<compile_context>
chip_gen: v7x
topology: tpu7x:2x2x1
jax: 0.10.0
libtpu: 0.0.40
codegen_flags: <defaults>
</compile_context>

<pallas_src>
import functools

import jax
import jax.numpy as jnp
from jax.experimental import pallas as pl
from jax.experimental.pallas import tpu as pltpu

LRELU_SLOPE = 0.2
BN_EPS = 1e-5
LANE = 128
KSIZE = 4


def _round_up(x, m):
    return ((x + m - 1) // m) * m


def _pad_axis(x, size, axis):
    extra = size - x.shape[axis]
    if extra == 0:
        return x
    cfg = [(0, 0)] * x.ndim
    cfg[axis] = (0, extra)
    return jnp.pad(x, cfg)


# ----------------------------- Pallas kernels ------------------------------ #

def _conv_fused_kernel(x_ref, w_ref, b_ref, o_ref, sum_ref, ssq_ref, *,
                       stride, h_out, w_out, act, use_bias):
    """Direct 4x4 convolution (one image per grid step) with fused epilogue.

    x_ref   : (1, Hp, stride, Wq, Cin_p)  spatially padded, W phase-split, bf16
    w_ref   : (16, Cin_p, Cout_p)         tap-major weights, bf16
    b_ref   : (1, Cout_p)                 f32 bias row (ignored if not use_bias)
    o_ref   : (1, h_out, w_out, Cout_p)   bf16 activations out
    sum_ref : (1, 1, Cout_p)  f32 per-channel sum of the raw conv output
    ssq_ref : (1, 1, Cout_p)  f32 per-channel sum of squares (for BatchNorm)
    """
    cout_p = w_ref.shape[-1]

    def row_body(ho, carry):
        s_acc, q_acc = carry
        acc = jnp.zeros((w_out, cout_p), jnp.float32)
        # Unrolled 4x4 tap loop: each tap is a contiguous (w_out, Cin_p) load
        # feeding one MXU matmul accumulated in f32.
        for ki in range(KSIZE):
            h_idx = ho * stride + ki
            for kj in range(KSIZE):
                pw = kj % stride          # W phase
                ws = kj // stride         # offset inside the phase
                xrow = x_ref[0, h_idx, pw, pl.ds(ws, w_out), :]
                acc = acc + jnp.dot(xrow, w_ref[ki * KSIZE + kj],
                                    preferred_element_type=jnp.float32)
        # Per-channel statistics of the raw conv output (used by BatchNorm).
        s_acc = s_acc + jnp.sum(acc, axis=0, keepdims=True)
        q_acc = q_acc + jnp.sum(acc * acc, axis=0, keepdims=True)
        # Fused epilogue.
        y = acc
        if use_bias:
            y = y + b_ref[...]
        if act == "leaky_relu":
            y = jnp.where(y >= 0, y, LRELU_SLOPE * y)
        elif act == "sigmoid":
            # Numerically stable sigmoid via tanh (EUP), avoids inf intermediates.
            y = 0.5 * (jnp.tanh(0.5 * y) + 1.0)
        o_ref[0, ho] = y.astype(o_ref.dtype)
        return s_acc, q_acc

    zeros = jnp.zeros((1, cout_p), jnp.float32)
    s_tot, q_tot = jax.lax.fori_loop(0, h_out, row_body, (zeros, zeros))
    sum_ref[...] = s_tot.reshape(1, 1, cout_p)
    ssq_ref[...] = q_tot.reshape(1, 1, cout_p)


def _bn_lrelu_kernel(x_ref, scale_ref, shift_ref, o_ref):
    # x: (1, H, W, Cp) bf16; scale/shift: (1, Cp) f32 (precomputed from batch
    # statistics).  Elementwise normalize + LeakyReLU(0.2), lane-dense.
    y = x_ref[...].astype(jnp.float32) * scale_ref[...] + shift_ref[...]
    o_ref[...] = jnp.where(y >= 0, y, LRELU_SLOPE * y).astype(o_ref.dtype)


# ------------------------------- wrappers ----------------------------------- #

def _pad_and_phase_split(x, pad, stride):
    """NHWC -> (N, Hp, stride, Wq, C): spatial zero-pad + W phase split.

    xph[n, h, p, wq, c] == x_padded[n, h, wq*stride + p, c].  For stride==1 this
    is just an expand_dims; for stride==2 it is one cheap slice+stack so that
    every in-kernel tap read is a contiguous (w_out, C) slab (no strided
    sublane loads, no im2col).
    """
    xp = jnp.pad(x, ((0, 0), (pad, pad), (pad, pad), (0, 0)))
    wp = xp.shape[2]
    wq = -(-wp // stride)
    if wq * stride != wp:
        xp = jnp.pad(xp, ((0, 0), (0, 0), (0, wq * stride - wp), (0, 0)))
    phases = [xp[:, :, p::stride, :] for p in range(stride)]
    return jnp.stack(phases, axis=2)          # (N, Hp, stride, Wq, C)


def conv_block(x_p, w_taps, bias_row, *, stride, pad, act, use_bias):
    # x_p: (N, H, W, Cin_p) bf16 NHWC with channels already padded to 128.
    n, h, w, cin_p = x_p.shape
    kk, _, cout_p = w_taps.shape
    h_out = (h + 2 * pad - KSIZE) // stride + 1
    w_out = (w + 2 * pad - KSIZE) // stride + 1
    xph = _pad_and_phase_split(x_p, pad, stride)
    _, hp, _, wq, _ = xph.shape

    # TODO(synk): for very large spatial sizes the per-image input block should
    # be split into H row-bands with manual halo DMA; at these sizes one image
    # per grid step comfortably fits VMEM and pipelines across the batch.
    kern = functools.partial(_conv_fused_kernel, stride=stride, h_out=h_out,
                             w_out=w_out, act=act, use_bias=use_bias)
    y, s, q = pl.pallas_call(
        kern,
        grid=(n,),
        in_specs=[
            pl.BlockSpec((1, hp, stride, wq, cin_p), lambda i: (i, 0, 0, 0, 0)),
            pl.BlockSpec((kk, cin_p, cout_p), lambda i: (0, 0, 0)),
            pl.BlockSpec((1, cout_p), lambda i: (0, 0)),
        ],
        out_specs=[
            pl.BlockSpec((1, h_out, w_out, cout_p), lambda i: (i, 0, 0, 0)),
            pl.BlockSpec((1, 1, cout_p), lambda i: (i, 0, 0)),
            pl.BlockSpec((1, 1, cout_p), lambda i: (i, 0, 0)),
        ],
        out_shape=[
            jax.ShapeDtypeStruct((n, h_out, w_out, cout_p), jnp.bfloat16),
            jax.ShapeDtypeStruct((n, 1, cout_p), jnp.float32),
            jax.ShapeDtypeStruct((n, 1, cout_p), jnp.float32),
        ],
        compiler_params=pltpu.CompilerParams(
            dimension_semantics=("parallel",)),
    )(xph, w_taps, bias_row)
    return y, s, q


def batchnorm_lrelu(y, sums, ssqs, gamma_row, beta_row):
    # Training-mode BatchNorm2d (batch stats, biased variance) + LeakyReLU(0.2).
    n, h, w, cp = y.shape
    m = n * h * w
    mean = jnp.sum(sums, axis=0) / m                              # (1, Cp)
    var = jnp.maximum(jnp.sum(ssqs, axis=0) / m - mean * mean, 0.0)
    scale = gamma_row * jax.lax.rsqrt(var + BN_EPS)               # (1, Cp)
    shift = beta_row - mean * scale
    return pl.pallas_call(
        _bn_lrelu_kernel,
        grid=(n,),
        in_specs=[
            pl.BlockSpec((1, h, w, cp), lambda i: (i, 0, 0, 0)),
            pl.BlockSpec((1, cp), lambda i: (0, 0)),
            pl.BlockSpec((1, cp), lambda i: (0, 0)),
        ],
        out_specs=pl.BlockSpec((1, h, w, cp), lambda i: (i, 0, 0, 0)),
        out_shape=jax.ShapeDtypeStruct((n, h, w, cp), jnp.bfloat16),
        compiler_params=pltpu.CompilerParams(
            dimension_semantics=("parallel",)),
    )(y, scale, shift)


# --------------------------- parameter packing ------------------------------ #

def _pack_conv(w, b):
    # torch layout (Cout, Cin, k, k) -> tap-major (k*k, Cin_p, Cout_p) bf16,
    # channels zero-padded to the 128-lane width; bias as a (1, Cout_p) f32 row.
    cout, cin, k, _ = w.shape
    cin_p = _round_up(cin, LANE)
    cout_p = _round_up(cout, LANE)
    wt = jnp.transpose(w, (2, 3, 1, 0)).reshape(k * k, cin, cout)
    wt = _pad_axis(_pad_axis(wt, cin_p, 1), cout_p, 2).astype(jnp.bfloat16)
    brow = _pad_axis(b.reshape(1, cout), cout_p, 1).astype(jnp.float32)
    return wt, brow


def _pack_row(v):
    c = v.shape[0]
    return _pad_axis(v.reshape(1, c), _round_up(c, LANE), 1).astype(jnp.float32)


def init_params(key, input_nc=3, ndf=8):
    ks = jax.random.split(key, 13)

    def conv_w(k_, cout, cin):
        return 0.05 * jax.random.normal(k_, (cout, cin, KSIZE, KSIZE), jnp.float32)

    p = {}
    p["w1"] = conv_w(ks[0], ndf, input_nc)
    p["b1"] = 0.05 * jax.random.normal(ks[1], (ndf,), jnp.float32)
    p["w2"] = conv_w(ks[2], ndf * 2, ndf)
    p["g2"] = 1.0 + 0.05 * jax.random.normal(ks[3], (ndf * 2,), jnp.float32)
    p["be2"] = 0.05 * jax.random.normal(ks[4], (ndf * 2,), jnp.float32)
    p["w3"] = conv_w(ks[5], ndf * 4, ndf * 2)
    p["g3"] = 1.0 + 0.05 * jax.random.normal(ks[6], (ndf * 4,), jnp.float32)
    p["be3"] = 0.05 * jax.random.normal(ks[7], (ndf * 4,), jnp.float32)
    p["w4"] = conv_w(ks[8], ndf * 2, ndf * 4)
    p["g4"] = 1.0 + 0.05 * jax.random.normal(ks[9], (ndf * 2,), jnp.float32)
    p["be4"] = 0.05 * jax.random.normal(ks[10], (ndf * 2,), jnp.float32)
    p["w5"] = conv_w(ks[11], 1, ndf * 2)
    p["b5"] = 0.05 * jax.random.normal(ks[12], (1,), jnp.float32)
    return p


def pack_params(p):
    packed = {}
    packed["w1"], packed["b1"] = _pack_conv(p["w1"], p["b1"])
    for i in (2, 3, 4):                       # bias=False (BatchNorm layers)
        zeros = jnp.zeros((p[f"w{i}"].shape[0],), jnp.float32)
        packed[f"w{i}"], packed[f"b{i}"] = _pack_conv(p[f"w{i}"], zeros)
        packed[f"g{i}"] = _pack_row(p[f"g{i}"])
        packed[f"be{i}"] = _pack_row(p[f"be{i}"])
    packed["w5"], packed["b5"] = _pack_conv(p["w5"], p["b5"])
    return packed


# ------------------------------ forward pass -------------------------------- #

def discriminator_forward(params, x_nchw, *, ndf):
    # NCHW -> NHWC once, channels zero-padded to the 128-lane width, bf16.
    x = jnp.transpose(x_nchw, (0, 2, 3, 1))
    x = _pad_axis(x, _round_up(x.shape[-1], LANE), 3).astype(jnp.bfloat16)

    # layer_1: Conv(s=2,p=2,bias=True) + LeakyReLU(0.2)  (fused epilogue)
    f1, _, _ = conv_block(x, params["w1"], params["b1"],
                          stride=2, pad=2, act="leaky_relu", use_bias=True)

    # layer_2: Conv(s=2,p=2,bias=False) -> BatchNorm + LeakyReLU
    y, s, q = conv_block(f1, params["w2"], params["b2"],
                         stride=2, pad=2, act="none", use_bias=False)
    f2 = batchnorm_lrelu(y, s, q, params["g2"], params["be2"])

    # layer_3
    y, s, q = conv_block(f2, params["w3"], params["b3"],
                         stride=2, pad=2, act="none", use_bias=False)
    f3 = batchnorm_lrelu(y, s, q, params["g3"], params["be3"])

    # layer_4: stride 1
    y, s, q = conv_block(f3, params["w4"], params["b4"],
                         stride=1, pad=2, act="none", use_bias=False)
    f4 = batchnorm_lrelu(y, s, q, params["g4"], params["be4"])

    # layer_5: Conv(s=1,p=2,bias=True) + Sigmoid  (fused epilogue)
    res, _, _ = conv_block(f4, params["w5"], params["b5"],
                           stride=1, pad=2, act="sigmoid", use_bias=True)

    # Only the three returned tensors are converted back to NCHW / f32.
    def to_nchw(t, c):
        return jnp.transpose(t[..., :c], (0, 3, 1, 2)).astype(jnp.float32)

    return to_nchw(f2, ndf * 2), to_nchw(f4, ndf * 2), to_nchw(res, 1)


if __name__ == "__main__":
    key = jax.random.PRNGKey(0)
    pkey, xkey = jax.random.split(key)

    ndf = 8          # small stand-in for the default ndf=64
    input_nc = 3
    params = pack_params(init_params(pkey, input_nc=input_nc, ndf=ndf))
    x = jax.random.normal(xkey, (2, input_nc, 16, 16), jnp.float32)

    fwd = jax.jit(functools.partial(discriminator_forward, ndf=ndf))
    feature_2, feature_4, result = fwd(params, x)
    jax.block_until_ready((feature_2, feature_4, result))

    # spatial sizes for H=16, k=4, p=2: 16 -> 9 -> 5 -> 3 -> 4 -> 5
    assert feature_2.shape == (2, ndf * 2, 5, 5)
    assert feature_4.shape == (2, ndf * 2, 4, 4)
    assert result.shape == (2, 1, 5, 5)
    assert bool(jnp.all((result >= 0.0) & (result <= 1.0)))

    print("KERNEL_OK")
</pallas_src>

<mosaic_0001>
module attributes {stable_mosaic.version = 11 : i64} {
  func.func @_conv_fused_kernel(%arg0: i32, %arg1: memref<1x20x2x10x128xbf16, #tpu.memory_space<vmem>>, %arg2: memref<16x128x128xbf16, #tpu.memory_space<vmem>>, %arg3: memref<1x128xf32, #tpu.memory_space<vmem>>, %arg4: memref<1x9x9x128xbf16, #tpu.memory_space<vmem>>, %arg5: memref<1x1x128xf32, #tpu.memory_space<vmem>>, %arg6: memref<1x1x128xf32, #tpu.memory_space<vmem>>) attributes {dimension_semantics = [#tpu.dimension_semantics<parallel>], iteration_bounds = array<i64: 2>, scalar_prefetch = 0 : i64, scratch_operands = 0 : i64, tpu.core_type = #tpu.core_type<tc>, window_params = [{transform_indices = @transform_0, window_bounds = array<i64: 1, 20, 2, 10, 128>}, {pipeline_mode = #tpu.pipeline_mode<synchronous>, transform_indices = @transform_1, window_bounds = array<i64: 16, 128, 128>}, {pipeline_mode = #tpu.pipeline_mode<synchronous>, transform_indices = @transform_2, window_bounds = array<i64: 1, 128>}, {transform_indices = @transform_3, window_bounds = array<i64: 1, 9, 9, 128>}, {transform_indices = @transform_4, window_bounds = array<i64: 1, 1, 128>}, {transform_indices = @transform_5, window_bounds = array<i64: 1, 1, 128>}]} {
    %cst = arith.constant 0.000000e+00 : f32
    %0 = vector.broadcast %cst : f32 to vector<1x128xf32>
    %c0_i32 = arith.constant 0 : i32
    %c9_i32 = arith.constant 9 : i32
    %1 = arith.addi %c0_i32, %c9_i32 : i32
    %c1_i32 = arith.constant 1 : i32
    %2:2 = scf.for %arg7 = %c0_i32 to %1 step %c1_i32 iter_args(%arg8 = %0, %arg9 = %0) -> (vector<1x128xf32>, vector<1x128xf32>)  : i32 {
      %cst_6 = arith.constant 0.000000e+00 : f32
      %7 = vector.broadcast %cst_6 : f32 to vector<9x128xf32>
      %c2_i32 = arith.constant 2 : i32
      %8 = arith.muli %arg7, %c2_i32 : i32
      %c0_i32_7 = arith.constant 0 : i32
      %9 = arith.addi %8, %c0_i32_7 : i32
      %c0_8 = arith.constant 0 : index
      %10 = arith.index_cast %9 : i32 to index
      %c0_9 = arith.constant 0 : index
      %c0_10 = arith.constant 0 : index
      %c0_11 = arith.constant 0 : index
      %11 = vector.load %arg1[%c0_8, %10, %c0_9, %c0_10, %c0_11] : memref<1x20x2x10x128xbf16, #tpu.memory_space<vmem>>, vector<1x1x1x9x128xbf16>
      %12 = vector.shape_cast %11 : vector<1x1x1x9x128xbf16> to vector<9x128xbf16>
      %c0_12 = arith.constant 0 : index
      %c0_13 = arith.constant 0 : index
      %c0_14 = arith.constant 0 : index
      %13 = vector.load %arg2[%c0_12, %c0_13, %c0_14] : memref<16x128x128xbf16, #tpu.memory_space<vmem>>, vector<1x128x128xbf16>
      %14 = vector.shape_cast %13 : vector<1x128x128xbf16> to vector<128x128xbf16>
      %cst_15 = arith.constant dense<0.000000e+00> : vector<9x128xf32>
      %15 = tpu.matmul %12, %14, %cst_15 {dimension_numbers = #tpu.dot_dimension_numbers<[1], [0], [0], [1], [0, 0, 1, 1], [], []>} : vector<9x128xbf16>, vector<128x128xbf16>, vector<9x128xf32> -> vector<9x128xf32>
      %16 = arith.addf %7, %15 : vector<9x128xf32>
      %c0_16 = arith.constant 0 : index
      %17 = arith.index_cast %9 : i32 to index
      %c1 = arith.constant 1 : index
      %c0_17 = arith.constant 0 : index
      %c0_18 = arith.constant 0 : index
      %18 = vector.load %arg1[%c0_16, %17, %c1, %c0_17, %c0_18] : memref<1x20x2x10x128xbf16, #tpu.memory_space<vmem>>, vector<1x1x1x9x128xbf16>
      %19 = vector.shape_cast %18 : vector<1x1x1x9x128xbf16> to vector<9x128xbf16>
      %c1_19 = arith.constant 1 : index
      %c0_20 = arith.constant 0 : index
      %c0_21 = arith.constant 0 : index
      %20 = vector.load %arg2[%c1_19, %c0_20, %c0_21] : memref<16x128x128xbf16, #tpu.memory_space<vmem>>, vector<1x128x128xbf16>
      %21 = vector.shape_cast %20 : vector<1x128x128xbf16> to vector<128x128xbf16>
      %cst_22 = arith.constant dense<0.000000e+00> : vector<9x128xf32>
      %22 = tpu.matmul %19, %21, %cst_22 {dimension_numbers = #tpu.dot_dimension_numbers<[1], [0], [0], [1], [0, 0, 1, 1], [], []>} : vector<9x128xbf16>, vector<128x128xbf16>, vector<9x128xf32> -> vector<9x128xf32>
      %23 = arith.addf %16, %22 : vector<9x128xf32>
      %c0_23 = arith.constant 0 : index
      %24 = arith.index_cast %9 : i32 to index
      %c0_24 = arith.constant 0 : index
      %c1_25 = arith.constant 1 : index
      %c0_26 = arith.constant 0 : index
      %25 = vector.load %arg1[%c0_23, %24, %c0_24, %c1_25, %c0_26] : memref<1x20x2x10x128xbf16, #tpu.memory_space<vmem>>, vector<1x1x1x9x128xbf16>
      %26 = vector.shape_cast %25 : vector<1x1x1x9x128xbf16> to vector<9x128xbf16>
      %c2 = arith.constant 2 : index
      %c0_27 = arith.constant 0 : index
      %c0_28 = arith.constant 0 : index
      %27 = vector.load %arg2[%c2, %c0_27, %c0_28] : memref<16x128x128xbf16, #tpu.memory_space<vmem>>, vector<1x128x128xbf16>
      %28 = vector.shape_cast %27 : vector<1x128x128xbf16> to vector<128x128xbf16>
      %cst_29 = arith.constant dense<0.000000e+00> : vector<9x128xf32>
      %29 = tpu.matmul %26, %28, %cst_29 {dimension_numbers = #tpu.dot_dimension_numbers<[1], [0], [0], [1], [0, 0, 1, 1], [], []>} : vector<9x128xbf16>, vector<128x128xbf16>, vector<9x128xf32> -> vector<9x128xf32>
      %30 = arith.addf %23, %29 : vector<9x128xf32>
      %c0_30 = arith.constant 0 : index
      %31 = arith.index_cast %9 : i32 to index
      %c1_31 = arith.constant 1 : index
      %c1_32 = arith.constant 1 : index
      %c0_33 = arith.constant 0 : index
      %32 = vector.load %arg1[%c0_30, %31, %c1_31, %c1_32, %c0_33] : memref<1x20x2x10x128xbf16, #tpu.memory_space<vmem>>, vector<1x1x1x9x128xbf16>
      %33 = vector.shape_cast %32 : vector<1x1x1x9x128xbf16> to vector<9x128xbf16>
      %c3 = arith.constant 3 : index
      %c0_34 = arith.constant 0 : index
      %c0_35 = arith.constant 0 : index
      %34 = vector.load %arg2[%c3, %c0_34, %c0_35] : memref<16x128x128xbf16, #tpu.memory_space<vmem>>, vector<1x128x128xbf16>
      %35 = vector.shape_cast %34 : vector<1x128x128xbf16> to vector<128x128xbf16>
      %cst_36 = arith.constant dense<0.000000e+00> : vector<9x128xf32>
      %36 = tpu.matmul %33, %35, %cst_36 {dimension_numbers = #tpu.dot_dimension_numbers<[1], [0], [0], [1], [0, 0, 1, 1], [], []>} : vector<9x128xbf16>, vector<128x128xbf16>, vector<9x128xf32> -> vector<9x128xf32>
      %37 = arith.addf %30, %36 : vector<9x128xf32>
      %c2_i32_37 = arith.constant 2 : i32
      %38 = arith.muli %arg7, %c2_i32_37 : i32
      %c1_i32_38 = arith.constant 1 : i32
      %39 = arith.addi %38, %c1_i32_38 : i32
      %c0_39 = arith.constant 0 : index
      %40 = arith.index_cast %39 : i32 to index
      %c0_40 = arith.constant 0 : index
      %c0_41 = arith.constant 0 : index
      %c0_42 = arith.constant 0 : index
      %41 = vector.load %arg1[%c0_39, %40, %c0_40, %c0_41, %c0_42] : memref<1x20x2x10x128xbf16, #tpu.memory_space<vmem>>, vector<1x1x1x9x128xbf16>
      %42 = vector.shape_cast %41 : vector<1x1x1x9x128xbf16> to vector<9x128xbf16>
      %c4 = arith.constant 4 : index
      %c0_43 = arith.constant 0 : index
      %c0_44 = arith.constant 0 : index
      %43 = vector.load %arg2[%c4, %c0_43, %c0_44] : memref<16x128x128xbf16, #tpu.memory_space<vmem>>, vector<1x128x128xbf16>
      %44 = vector.shape_cast %43 : vector<1x128x128xbf16> to vector<128x128xbf16>
      %cst_45 = arith.constant dense<0.000000e+00> : vector<9x128xf32>
      %45 = tpu.matmul %42, %44, %cst_45 {dimension_numbers = #tpu.dot_dimension_numbers<[1], [0], [0], [1], [0, 0, 1, 1], [], []>} : vector<9x128xbf16>, vector<128x128xbf16>, vector<9x128xf32> -> vector<9x128xf32>
      %46 = arith.addf %37, %45 : vector<9x128xf32>
      %c0_46 = arith.constant 0 : index
      %47 = arith.index_cast %39 : i32 to index
      %c1_47 = arith.constant 1 : index
      %c0_48 = arith.constant 0 : index
      %c0_49 = arith.constant 0 : index
      %48 = vector.load %arg1[%c0_46, %47, %c1_47, %c0_48, %c0_49] : memref<1x20x2x10x128xbf16, #tpu.memory_space<vmem>>, vector<1x1x1x9x128xbf16>
      %49 = vector.shape_cast %48 : vector<1x1x1x9x128xbf16> to vector<9x128xbf16>
      %c5 = arith.constant 5 : index
      %c0_50 = arith.constant 0 : index
      %c0_51 = arith.constant 0 : index
      %50 = vector.load %arg2[%c5, %c0_50, %c0_51] : memref<16x128x128xbf16, #tpu.memory_space<vmem>>, vector<1x128x128xbf16>
      %51 = vector.shape_cast %50 : vector<1x128x128xbf16> to vector<128x128xbf16>
      %cst_52 = arith.constant dense<0.000000e+00> : vector<9x128xf32>
      %52 = tpu.matmul %49, %51, %cst_52 {dimension_numbers = #tpu.dot_dimension_numbers<[1], [0], [0], [1], [0, 0, 1, 1], [], []>} : vector<9x128xbf16>, vector<128x128xbf16>, vector<9x128xf32> -> vector<9x128xf32>
      %53 = arith.addf %46, %52 : vector<9x128xf32>
      %c0_53 = arith.constant 0 : index
      %54 = arith.index_cast %39 : i32 to index
      %c0_54 = arith.constant 0 : index
      %c1_55 = arith.constant 1 : index
      %c0_56 = arith.constant 0 : index
      %55 = vector.load %arg1[%c0_53, %54, %c0_54, %c1_55, %c0_56] : memref<1x20x2x10x128xbf16, #tpu.memory_space<vmem>>, vector<1x1x1x9x128xbf16>
      %56 = vector.shape_cast %55 : vector<1x1x1x9x128xbf16> to vector<9x128xbf16>
      %c6 = arith.constant 6 : index
      %c0_57 = arith.constant 0 : index
      %c0_58 = arith.constant 0 : index
      %57 = vector.load %arg2[%c6, %c0_57, %c0_58] : memref<16x128x128xbf16, #tpu.memory_space<vmem>>, vector<1x128x128xbf16>
      %58 = vector.shape_cast %57 : vector<1x128x128xbf16> to vector<128x128xbf16>
      %cst_59 = arith.constant dense<0.000000e+00> : vector<9x128xf32>
      %59 = tpu.matmul %56, %58, %cst_59 {dimension_numbers = #tpu.dot_dimension_numbers<[1], [0], [0], [1], [0, 0, 1, 1], [], []>} : vector<9x128xbf16>, vector<128x128xbf16>, vector<9x128xf32> -> vector<9x128xf32>
      %60 = arith.addf %53, %59 : vector<9x128xf32>
      %c0_60 = arith.constant 0 : index
      %61 = arith.index_cast %39 : i32 to index
      %c1_61 = arith.constant 1 : index
      %c1_62 = arith.constant 1 : index
      %c0_63 = arith.constant 0 : index
      %62 = vector.load %arg1[%c0_60, %61, %c1_61, %c1_62, %c0_63] : memref<1x20x2x10x128xbf16, #tpu.memory_space<vmem>>, vector<1x1x1x9x128xbf16>
      %63 = vector.shape_cast %62 : vector<1x1x1x9x128xbf16> to vector<9x128xbf16>
      %c7 = arith.constant 7 : index
      %c0_64 = arith.constant 0 : index
      %c0_65 = arith.constant 0 : index
      %64 = vector.load %arg2[%c7, %c0_64, %c0_65] : memref<16x128x128xbf16, #tpu.memory_space<vmem>>, vector<1x128x128xbf16>
      %65 = vector.shape_cast %64 : vector<1x128x128xbf16> to vector<128x128xbf16>
      %cst_66 = arith.constant dense<0.000000e+00> : vector<9x128xf32>
      %66 = tpu.matmul %63, %65, %cst_66 {dimension_numbers = #tpu.dot_dimension_numbers<[1], [0], [0], [1], [0, 0, 1, 1], [], []>} : vector<9x128xbf16>, vector<128x128xbf16>, vector<9x128xf32> -> vector<9x128xf32>
      %67 = arith.addf %60, %66 : vector<9x128xf32>
      %c2_i32_67 = arith.constant 2 : i32
      %68 = arith.muli %arg7, %c2_i32_67 : i32
      %c2_i32_68 = arith.constant 2 : i32
      %69 = arith.addi %68, %c2_i32_68 : i32
      %c0_69 = arith.constant 0 : index
      %70 = arith.index_cast %69 : i32 to index
      %c0_70 = arith.constant 0 : index
      %c0_71 = arith.constant 0 : index
      %c0_72 = arith.constant 0 : index
      %71 = vector.load %arg1[%c0_69, %70, %c0_70, %c0_71, %c0_72] : memref<1x20x2x10x128xbf16, #tpu.memory_space<vmem>>, vector<1x1x1x9x128xbf16>
      %72 = vector.shape_cast %71 : vector<1x1x1x9x128xbf16> to vector<9x128xbf16>
      %c8 = arith.constant 8 : index
      %c0_73 = arith.constant 0 : index
      %c0_74 = arith.constant 0 : index
      %73 = vector.load %arg2[%c8, %c0_73, %c0_74] : memref<16x128x128xbf16, #tpu.memory_space<vmem>>, vector<1x128x128xbf16>
      %74 = vector.shape_cast %73 : vector<1x128x128xbf16> to vector<128x128xbf16>
      %cst_75 = arith.constant dense<0.000000e+00> : vector<9x128xf32>
      %75 = tpu.matmul %72, %74, %cst_75 {dimension_numbers = #tpu.dot_dimension_numbers<[1], [0], [0], [1], [0, 0, 1, 1], [], []>} : vector<9x128xbf16>, vector<128x128xbf16>, vector<9x128xf32> -> vector<9x128xf32>
      %76 = arith.addf %67, %75 : vector<9x128xf32>
      %c0_76 = arith.constant 0 : index
      %77 = arith.index_cast %69 : i32 to index
      %c1_77 = arith.constant 1 : index
      %c0_78 = arith.constant 0 : index
      %c0_79 = arith.constant 0 : index
      %78 = vector.load %arg1[%c0_76, %77, %c1_77, %c0_78, %c0_79] : memref<1x20x2x10x128xbf16, #tpu.memory_space<vmem>>, vector<1x1x1x9x128xbf16>
      %79 = vector.shape_cast %78 : vector<1x1x1x9x128xbf16> to vector<9x128xbf16>
      %c9 = arith.constant 9 : index
      %c0_80 = arith.constant 0 : index
      %c0_81 = arith.constant 0 : index
      %80 = vector.load %arg2[%c9, %c0_80, %c0_81] : memref<16x128x128xbf16, #tpu.memory_space<vmem>>, vector<1x128x128xbf16>
      %81 = vector.shape_cast %80 : vector<1x128x128xbf16> to vector<128x128xbf16>
      %cst_82 = arith.constant dense<0.000000e+00> : vector<9x128xf32>
      %82 = tpu.matmul %79, %81, %cst_82 {dimension_numbers = #tpu.dot_dimension_numbers<[1], [0], [0], [1], [0, 0, 1, 1], [], []>} : vector<9x128xbf16>, vector<128x128xbf16>, vector<9x128xf32> -> vector<9x128xf32>
      %83 = arith.addf %76, %82 : vector<9x128xf32>
      %c0_83 = arith.constant 0 : index
      %84 = arith.index_cast %69 : i32 to index
      %c0_84 = arith.constant 0 : index
      %c1_85 = arith.constant 1 : index
      %c0_86 = arith.constant 0 : index
      %85 = vector.load %arg1[%c0_83, %84, %c0_84, %c1_85, %c0_86] : memref<1x20x2x10x128xbf16, #tpu.memory_space<vmem>>, vector<1x1x1x9x128xbf16>
      %86 = vector.shape_cast %85 : vector<1x1x1x9x128xbf16> to vector<9x128xbf16>
      %c10 = arith.constant 10 : index
      %c0_87 = arith.constant 0 : index
      %c0_88 = arith.constant 0 : index
      %87 = vector.load %arg2[%c10, %c0_87, %c0_88] : memref<16x128x128xbf16, #tpu.memory_space<vmem>>, vector<1x128x128xbf16>
      %88 = vector.shape_cast %87 : vector<1x128x128xbf16> to vector<128x128xbf16>
      %cst_89 = arith.constant dense<0.000000e+00> : vector<9x128xf32>
      %89 = tpu.matmul %86, %88, %cst_89 {dimension_numbers = #tpu.dot_dimension_numbers<[1], [0], [0], [1], [0, 0, 1, 1], [], []>} : vector<9x128xbf16>, vector<128x128xbf16>, vector<9x128xf32> -> vector<9x128xf32>
      %90 = arith.addf %83, %89 : vector<9x128xf32>
      %c0_90 = arith.constant 0 : index
      %91 = arith.index_cast %69 : i32 to index
      %c1_91 = arith.constant 1 : index
      %c1_92 = arith.constant 1 : index
      %c0_93 = arith.constant 0 : index
      %92 = vector.load %arg1[%c0_90, %91, %c1_91, %c1_92, %c0_93] : memref<1x20x2x10x128xbf16, #tpu.memory_space<vmem>>, vector<1x1x1x9x128xbf16>
      %93 = vector.shape_cast %92 : vector<1x1x1x9x128xbf16> to vector<9x128xbf16>
      %c11 = arith.constant 11 : index
      %c0_94 = arith.constant 0 : index
      %c0_95 = arith.constant 0 : index
      %94 = vector.load %arg2[%c11, %c0_94, %c0_95] : memref<16x128x128xbf16, #tpu.memory_space<vmem>>, vector<1x128x128xbf16>
      %95 = vector.shape_cast %94 : vector<1x128x128xbf16> to vector<128x128xbf16>
      %cst_96 = arith.constant dense<0.000000e+00> : vector<9x128xf32>
      %96 = tpu.matmul %93, %95, %cst_96 {dimension_numbers = #tpu.dot_dimension_numbers<[1], [0], [0], [1], [0, 0, 1, 1], [], []>} : vector<9x128xbf16>, vector<128x128xbf16>, vector<9x128xf32> -> vector<9x128xf32>
      %97 = arith.addf %90, %96 : vector<9x128xf32>
      %c2_i32_97 = arith.constant 2 : i32
      %98 = arith.muli %arg7, %c2_i32_97 : i32
      %c3_i32 = arith.constant 3 : i32
      %99 = arith.addi %98, %c3_i32 : i32
      %c0_98 = arith.constant 0 : index
      %100 = arith.index_cast %99 : i32 to index
      %c0_99 = arith.constant 0 : index
      %c0_100 = arith.constant 0 : index
      %c0_101 = arith.constant 0 : index
      %101 = vector.load %arg1[%c0_98, %100, %c0_99, %c0_100, %c0_101] : memref<1x20x2x10x128xbf16, #tpu.memory_space<vmem>>, vector<1x1x1x9x128xbf16>
      %102 = vector.shape_cast %101 : vector<1x1x1x9x128xbf16> to vector<9x128xbf16>
      %c12 = arith.constant 12 : index
      %c0_102 = arith.constant 0 : index
      %c0_103 = arith.constant 0 : index
      %103 = vector.load %arg2[%c12, %c0_102, %c0_103] : memref<16x128x128xbf16, #tpu.memory_space<vmem>>, vector<1x128x128xbf16>
      %104 = vector.shape_cast %103 : vector<1x128x128xbf16> to vector<128x128xbf16>
      %cst_104 = arith.constant dense<0.000000e+00> : vector<9x128xf32>
      %105 = tpu.matmul %102, %104, %cst_104 {dimension_numbers = #tpu.dot_dimension_numbers<[1], [0], [0], [1], [0, 0, 1, 1], [], []>} : vector<9x128xbf16>, vector<128x128xbf16>, vector<9x128xf32> -> vector<9x128xf32>
      %106 = arith.addf %97, %105 : vector<9x128xf32>
      %c0_105 = arith.constant 0 : index
      %107 = arith.index_cast %99 : i32 to index
      %c1_106 = arith.constant 1 : index
      %c0_107 = arith.constant 0 : index
      %c0_108 = arith.constant 0 : index
      %108 = vector.load %arg1[%c0_105, %107, %c1_106, %c0_107, %c0_108] : memref<1x20x2x10x128xbf16, #tpu.memory_space<vmem>>, vector<1x1x1x9x128xbf16>
      %109 = vector.shape_cast %108 : vector<1x1x1x9x128xbf16> to vector<9x128xbf16>
      %c13 = arith.constant 13 : index
      %c0_109 = arith.constant 0 : index
      %c0_110 = arith.constant 0 : index
      %110 = vector.load %arg2[%c13, %c0_109, %c0_110] : memref<16x128x128xbf16, #tpu.memory_space<vmem>>, vector<1x128x128xbf16>
      %111 = vector.shape_cast %110 : vector<1x128x128xbf16> to vector<128x128xbf16>
      %cst_111 = arith.constant dense<0.000000e+00> : vector<9x128xf32>
      %112 = tpu.matmul %109, %111, %cst_111 {dimension_numbers = #tpu.dot_dimension_numbers<[1], [0], [0], [1], [0, 0, 1, 1], [], []>} : vector<9x128xbf16>, vector<128x128xbf16>, vector<9x128xf32> -> vector<9x128xf32>
      %113 = arith.addf %106, %112 : vector<9x128xf32>
      %c0_112 = arith.constant 0 : index
      %114 = arith.index_cast %99 : i32 to index
      %c0_113 = arith.constant 0 : index
      %c1_114 = arith.constant 1 : index
      %c0_115 = arith.constant 0 : index
      %115 = vector.load %arg1[%c0_112, %114, %c0_113, %c1_114, %c0_115] : memref<1x20x2x10x128xbf16, #tpu.memory_space<vmem>>, vector<1x1x1x9x128xbf16>
      %116 = vector.shape_cast %115 : vector<1x1x1x9x128xbf16> to vector<9x128xbf16>
      %c14 = arith.constant 14 : index
      %c0_116 = arith.constant 0 : index
      %c0_117 = arith.constant 0 : index
      %117 = vector.load %arg2[%c14, %c0_116, %c0_117] : memref<16x128x128xbf16, #tpu.memory_space<vmem>>, vector<1x128x128xbf16>
      %118 = vector.shape_cast %117 : vector<1x128x128xbf16> to vector<128x128xbf16>
      %cst_118 = arith.constant dense<0.000000e+00> : vector<9x128xf32>
      %119 = tpu.matmul %116, %118, %cst_118 {dimension_numbers = #tpu.dot_dimension_numbers<[1], [0], [0], [1], [0, 0, 1, 1], [], []>} : vector<9x128xbf16>, vector<128x128xbf16>, vector<9x128xf32> -> vector<9x128xf32>
      %120 = arith.addf %113, %119 : vector<9x128xf32>
      %c0_119 = arith.constant 0 : index
      %121 = arith.index_cast %99 : i32 to index
      %c1_120 = arith.constant 1 : index
      %c1_121 = arith.constant 1 : index
      %c0_122 = arith.constant 0 : index
      %122 = vector.load %arg1[%c0_119, %121, %c1_120, %c1_121, %c0_122] : memref<1x20x2x10x128xbf16, #tpu.memory_space<vmem>>, vector<1x1x1x9x128xbf16>
      %123 = vector.shape_cast %122 : vector<1x1x1x9x128xbf16> to vector<9x128xbf16>
      %c15 = arith.constant 15 : index
      %c0_123 = arith.constant 0 : index
      %c0_124 = arith.constant 0 : index
      %124 = vector.load %arg2[%c15, %c0_123, %c0_124] : memref<16x128x128xbf16, #tpu.memory_space<vmem>>, vector<1x128x128xbf16>
      %125 = vector.shape_cast %124 : vector<1x128x128xbf16> to vector<128x128xbf16>
      %cst_125 = arith.constant dense<0.000000e+00> : vector<9x128xf32>
      %126 = tpu.matmul %123, %125, %cst_125 {dimension_numbers = #tpu.dot_dimension_numbers<[1], [0], [0], [1], [0, 0, 1, 1], [], []>} : vector<9x128xbf16>, vector<128x128xbf16>, vector<9x128xf32> -> vector<9x128xf32>
      %127 = arith.addf %120, %126 : vector<9x128xf32>
      %cst_126 = arith.constant dense<0.000000e+00> : vector<128xf32>
      %128 = vector.multi_reduction <add>, %127, %cst_126 [0] : vector<9x128xf32> to vector<128xf32>
      %129 = vector.shape_cast %128 : vector<128xf32> to vector<1x128xf32>
      %130 = arith.addf %arg8, %129 : vector<1x128xf32>
      %131 = arith.mulf %127, %127 : vector<9x128xf32>
      %cst_127 = arith.constant dense<0.000000e+00> : vector<128xf32>
      %132 = vector.multi_reduction <add>, %131, %cst_127 [0] : vector<9x128xf32> to vector<128xf32>
      %133 = vector.shape_cast %132 : vector<128xf32> to vector<1x128xf32>
      %134 = arith.addf %arg9, %133 : vector<1x128xf32>
      %c0_128 = arith.constant 0 : index
      %c0_129 = arith.constant 0 : index
      %135 = vector.load %arg3[%c0_128, %c0_129] : memref<1x128xf32, #tpu.memory_space<vmem>>, vector<1x128xf32>
      %136 = vector.broadcast %135 : vector<1x128xf32> to vector<9x128xf32>
      %137 = arith.addf %127, %136 : vector<9x128xf32>
      %cst_130 = arith.constant 0.000000e+00 : f32
      %138 = vector.broadcast %cst_130 : f32 to vector<9x128xf32>
      %139 = arith.cmpf oge, %137, %138 : vector<9x128xf32>
      %cst_131 = arith.constant 2.000000e-01 : f32
      %140 = vector.broadcast %cst_131 : f32 to vector<9x128xf32>
      %141 = arith.mulf %140, %137 : vector<9x128xf32>
      %142 = arith.select %139, %137, %141 : vector<9x128xi1>, vector<9x128xf32>
      %143 = arith.truncf %142 : vector<9x128xf32> to vector<9x128xbf16>
      %c0_132 = arith.constant 0 : index
      %144 = arith.index_cast %arg7 : i32 to index
      %c0_133 = arith.constant 0 : index
      %c0_134 = arith.constant 0 : index
      %145 = vector.load %arg4[%c0_132, %144, %c0_133, %c0_134] : memref<1x9x9x128xbf16, #tpu.memory_space<vmem>>, vector<1x1x9x128xbf16>
      %146 = vector.shape_cast %145 : vector<1x1x9x128xbf16> to vector<9x128xbf16>
      %147 = vector.shape_cast %143 : vector<9x128xbf16> to vector<1x1x9x128xbf16>
      tpu.vector_store %arg4[%c0_132, %144, %c0_133, %c0_134], %147 {strides = array<i32>} : memref<1x9x9x128xbf16, #tpu.memory_space<vmem>>, vector<1x1x9x128xbf16>,
      scf.yield %130, %134 : vector<1x128xf32>, vector<1x128xf32>
    }
    %c9_i32_0 = arith.constant 9 : i32
    %3 = vector.shape_cast %2#0 : vector<1x128xf32> to vector<1x1x128xf32>
    %c0 = arith.constant 0 : index
    %c0_1 = arith.constant 0 : index
    %c0_2 = arith.constant 0 : index
    %4 = vector.load %arg5[%c0, %c0_1, %c0_2] : memref<1x1x128xf32, #tpu.memory_space<vmem>>, vector<1x1x128xf32>
    tpu.vector_store %arg5[%c0, %c0_1, %c0_2], %3 {strides = array<i32>} : memref<1x1x128xf32, #tpu.memory_space<vmem>>, vector<1x1x128xf32>,
    %5 = vector.shape_cast %2#1 : vector<1x128xf32> to vector<1x1x128xf32>
    %c0_3 = arith.constant 0 : index
    %c0_4 = arith.constant 0 : index
    %c0_5 = arith.constant 0 : index
    %6 = vector.load %arg6[%c0_3, %c0_4, %c0_5] : memref<1x1x128xf32, #tpu.memory_space<vmem>>, vector<1x1x128xf32>
    tpu.vector_store %arg6[%c0_3, %c0_4, %c0_5], %5 {strides = array<i32>} : memref<1x1x128xf32, #tpu.memory_space<vmem>>, vector<1x1x128xf32>,
    return
  }
  func.func @transform_0(%arg0: i32) -> (i32, i32, i32, i32, i32) {
    %c0_i32 = arith.constant 0 : i32
    %c0_i32_0 = arith.constant 0 : i32
    %c0_i32_1 = arith.constant 0 : i32
    %c0_i32_2 = arith.constant 0 : i32
    %c0_i32_3 = arith.constant 0 : i32
    return %arg0, %c0_i32, %c0_i32_0, %c0_i32_1, %c0_i32_2 : i32, i32, i32, i32, i32
  }
  func.func @transform_1(%arg0: i32) -> (i32, i32, i32) {
    %c0_i32 = arith.constant 0 : i32
    %c0_i32_0 = arith.constant 0 : i32
    %c0_i32_1 = arith.constant 0 : i32
    %c0_i32_2 = arith.constant 0 : i32
    return %c0_i32, %c0_i32_0, %c0_i32_1 : i32, i32, i32
  }
  func.func @transform_2(%arg0: i32) -> (i32, i32) {
    %c0_i32 = arith.constant 0 : i32
    %c0_i32_0 = arith.constant 0 : i32
    %c0_i32_1 = arith.constant 0 : i32
    return %c0_i32, %c0_i32_0 : i32, i32
  }
  func.func @transform_3(%arg0: i32) -> (i32, i32, i32, i32) {
    %c0_i32 = arith.constant 0 : i32
    %c0_i32_0 = arith.constant 0 : i32
    %c0_i32_1 = arith.constant 0 : i32
    %c0_i32_2 = arith.constant 0 : i32
    return %arg0, %c0_i32, %c0_i32_0, %c0_i32_1 : i32, i32, i32, i32
  }
  func.func @transform_4(%arg0: i32) -> (i32, i32, i32) {
    %c0_i32 = arith.constant 0 : i32
    %c0_i32_0 = arith.constant 0 : i32
    %c0_i32_1 = arith.constant 0 : i32
    return %arg0, %c0_i32, %c0_i32_0 : i32, i32, i32
  }
  func.func @transform_5(%arg0: i32) -> (i32, i32, i32) {
    %c0_i32 = arith.constant 0 : i32
    %c0_i32_0 = arith.constant 0 : i32
    %c0_i32_1 = arith.constant 0 : i32
    return %arg0, %c0_i32, %c0_i32_0 : i32, i32, i32
  }
}

module attributes {stable_mosaic.version = 11 : i64} {
  func.func @_conv_fused_kernel(%arg0: i32, %arg1: memref<1x13x2x7x128xbf16, #tpu.memory_space<vmem>>, %arg2: memref<16x128x128xbf16, #tpu.memory_space<vmem>>, %arg3: memref<1x128xf32, #tpu.memory_space<vmem>>, %arg4: memref<1x5x5x128xbf16, #tpu.memory_space<vmem>>, %arg5: memref<1x1x128xf32, #tpu.memory_space<vmem>>, %arg6: memref<1x1x128xf32, #tpu.memory_space<vmem>>) attributes {dimension_semantics = [#tpu.dimension_semantics<parallel>], iteration_bounds = array<i64: 2>, scalar_prefetch = 0 : i64, scratch_operands = 0 : i64, tpu.core_type = #tpu.core_type<tc>, window_params = [{transform_indices = @transform_0, window_bounds = array<i64: 1, 13, 2, 7, 128>}, {pipeline_mode = #tpu.pipeline_mode<synchronous>, transform_indices = @transform_1, window_bounds = array<i64: 16, 128, 128>}, {pipeline_mode = #tpu.pipeline_mode<synchronous>, transform_indices = @transform_2, window_bounds = array<i64: 1, 128>}, {transform_indices = @transform_3, window_bounds = array<i64: 1, 5, 5, 128>}, {transform_indices = @transform_4, window_bounds = array<i64: 1, 1, 128>}, {transform_indices = @transform_5, window_bounds = array<i64: 1, 1, 128>}]} {
    %cst = arith.constant 0.000000e+00 : f32
    %0 = vector.broadcast %cst : f32 to vector<1x128xf32>
    %c0_i32 = arith.constant 0 : i32
    %c5_i32 = arith.constant 5 : i32
    %1 = arith.addi %c0_i32, %c5_i32 : i32
    %c1_i32 = arith.constant 1 : i32
    %2:2 = scf.for %arg7 = %c0_i32 to %1 step %c1_i32 iter_args(%arg8 = %0, %arg9 = %0) -> (vector<1x128xf32>, vector<1x128xf32>)  : i32 {
      %cst_6 = arith.constant 0.000000e+00 : f32
      %7 = vector.broadcast %cst_6 : f32 to vector<5x128xf32>
      %c2_i32 = arith.constant 2 : i32
      %8 = arith.muli %arg7, %c2_i32 : i32
      %c0_i32_7 = arith.constant 0 : i32
      %9 = arith.addi %8, %c0_i32_7 : i32
      %c0_8 = arith.constant 0 : index
      %10 = arith.index_cast %9 : i32 to index
      %c0_9 = arith.constant 0 : index
      %c0_10 = arith.constant 0 : index
      %c0_11 = arith.constant 0 : index
      %11 = vector.load %arg1[%c0_8, %10, %c0_9, %c0_10, %c0_11] : memref<1x13x2x7x128xbf16, #tpu.memory_space<vmem>>, vector<1x1x1x5x128xbf16>
      %12 = vector.shape_cast %11 : vector<1x1x1x5x128xbf16> to vector<5x128xbf16>
      %c0_12 = arith.constant 0 : index
      %c0_13 = arith.constant 0 : index
      %c0_14 = arith.constant 0 : index
      %13 = vector.load %arg2[%c0_12, %c0_13, %c0_14] : memref<16x128x128xbf16, #tpu.memory_space<vmem>>, vector<1x128x128xbf16>
      %14 = vector.shape_cast %13 : vector<1x128x128xbf16> to vector<128x128xbf16>
      %cst_15 = arith.constant dense<0.000000e+00> : vector<5x128xf32>
      %15 = tpu.matmul %12, %14, %cst_15 {dimension_numbers = #tpu.dot_dimension_numbers<[1], [0], [0], [1], [0, 0, 1, 1], [], []>} : vector<5x128xbf16>, vector<128x128xbf16>, vector<5x128xf32> -> vector<5x128xf32>
      %16 = arith.addf %7, %15 : vector<5x128xf32>
      %c0_16 = arith.constant 0 : index
      %17 = arith.index_cast %9 : i32 to index
      %c1 = arith.constant 1 : index
      %c0_17 = arith.constant 0 : index
      %c0_18 = arith.constant 0 : index
      %18 = vector.load %arg1[%c0_16, %17, %c1, %c0_17, %c0_18] : memref<1x13x2x7x128xbf16, #tpu.memory_space<vmem>>, vector<1x1x1x5x128xbf16>
      %19 = vector.shape_cast %18 : vector<1x1x1x5x128xbf16> to vector<5x128xbf16>
      %c1_19 = arith.constant 1 : index
      %c0_20 = arith.constant 0 : index
      %c0_21 = arith.constant 0 : index
      %20 = vector.load %arg2[%c1_19, %c0_20, %c0_21] : memref<16x128x128xbf16, #tpu.memory_space<vmem>>, vector<1x128x128xbf16>
      %21 = vector.shape_cast %20 : vector<1x128x128xbf16> to vector<128x128xbf16>
      %cst_22 = arith.constant dense<0.000000e+00> : vector<5x128xf32>
      %22 = tpu.matmul %19, %21, %cst_22 {dimension_numbers = #tpu.dot_dimension_numbers<[1], [0], [0], [1], [0, 0, 1, 1], [], []>} : vector<5x128xbf16>, vector<128x128xbf16>, vector<5x128xf32> -> vector<5x128xf32>
      %23 = arith.addf %16, %22 : vector<5x128xf32>
      %c0_23 = arith.constant 0 : index
      %24 = arith.index_cast %9 : i32 to index
      %c0_24 = arith.constant 0 : index
      %c1_25 = arith.constant 1 : index
      %c0_26 = arith.constant 0 : index
      %25 = vector.load %arg1[%c0_23, %24, %c0_24, %c1_25, %c0_26] : memref<1x13x2x7x128xbf16, #tpu.memory_space<vmem>>, vector<1x1x1x5x128xbf16>
      %26 = vector.shape_cast %25 : vector<1x1x1x5x128xbf16> to vector<5x128xbf16>
      %c2 = arith.constant 2 : index
      %c0_27 = arith.constant 0 : index
      %c0_28 = arith.constant 0 : index
      %27 = vector.load %arg2[%c2, %c0_27, %c0_28] : memref<16x128x128xbf16, #tpu.memory_space<vmem>>, vector<1x128x128xbf16>
      %28 = vector.shape_cast %27 : vector<1x128x128xbf16> to vector<128x128xbf16>
      %cst_29 = arith.constant dense<0.000000e+00> : vector<5x128xf32>
      %29 = tpu.matmul %26, %28, %cst_29 {dimension_numbers = #tpu.dot_dimension_numbers<[1], [0], [0], [1], [0, 0, 1, 1], [], []>} : vector<5x128xbf16>, vector<128x128xbf16>, vector<5x128xf32> -> vector<5x128xf32>
      %30 = arith.addf %23, %29 : vector<5x128xf32>
      %c0_30 = arith.constant 0 : index
      %31 = arith.index_cast %9 : i32 to index
      %c1_31 = arith.constant 1 : index
      %c1_32 = arith.constant 1 : index
      %c0_33 = arith.constant 0 : index
      %32 = vector.load %arg1[%c0_30, %31, %c1_31, %c1_32, %c0_33] : memref<1x13x2x7x128xbf16, #tpu.memory_space<vmem>>, vector<1x1x1x5x128xbf16>
      %33 = vector.shape_cast %32 : vector<1x1x1x5x128xbf16> to vector<5x128xbf16>
      %c3 = arith.constant 3 : index
      %c0_34 = arith.constant 0 : index
      %c0_35 = arith.constant 0 : index
      %34 = vector.load %arg2[%c3, %c0_34, %c0_35] : memref<16x128x128xbf16, #tpu.memory_space<vmem>>, vector<1x128x128xbf16>
      %35 = vector.shape_cast %34 : vector<1x128x128xbf16> to vector<128x128xbf16>
      %cst_36 = arith.constant dense<0.000000e+00> : vector<5x128xf32>
      %36 = tpu.matmul %33, %35, %cst_36 {dimension_numbers = #tpu.dot_dimension_numbers<[1], [0], [0], [1], [0, 0, 1, 1], [], []>} : vector<5x128xbf16>, vector<128x128xbf16>, vector<5x128xf32> -> vector<5x128xf32>
      %37 = arith.addf %30, %36 : vector<5x128xf32>
      %c2_i32_37 = arith.constant 2 : i32
      %38 = arith.muli %arg7, %c2_i32_37 : i32
      %c1_i32_38 = arith.constant 1 : i32
      %39 = arith.addi %38, %c1_i32_38 : i32
      %c0_39 = arith.constant 0 : index
      %40 = arith.index_cast %39 : i32 to index
      %c0_40 = arith.constant 0 : index
      %c0_41 = arith.constant 0 : index
      %c0_42 = arith.constant 0 : index
      %41 = vector.load %arg1[%c0_39, %40, %c0_40, %c0_41, %c0_42] : memref<1x13x2x7x128xbf16, #tpu.memory_space<vmem>>, vector<1x1x1x5x128xbf16>
      %42 = vector.shape_cast %41 : vector<1x1x1x5x128xbf16> to vector<5x128xbf16>
      %c4 = arith.constant 4 : index
      %c0_43 = arith.constant 0 : index
      %c0_44 = arith.constant 0 : index
      %43 = vector.load %arg2[%c4, %c0_43, %c0_44] : memref<16x128x128xbf16, #tpu.memory_space<vmem>>, vector<1x128x128xbf16>
      %44 = vector.shape_cast %43 : vector<1x128x128xbf16> to vector<128x128xbf16>
      %cst_45 = arith.constant dense<0.000000e+00> : vector<5x128xf32>
      %45 = tpu.matmul %42, %44, %cst_45 {dimension_numbers = #tpu.dot_dimension_numbers<[1], [0], [0], [1], [0, 0, 1, 1], [], []>} : vector<5x128xbf16>, vector<128x128xbf16>, vector<5x128xf32> -> vector<5x128xf32>
      %46 = arith.addf %37, %45 : vector<5x128xf32>
      %c0_46 = arith.constant 0 : index
      %47 = arith.index_cast %39 : i32 to index
      %c1_47 = arith.constant 1 : index
      %c0_48 = arith.constant 0 : index
      %c0_49 = arith.constant 0 : index
      %48 = vector.load %arg1[%c0_46, %47, %c1_47, %c0_48, %c0_49] : memref<1x13x2x7x128xbf16, #tpu.memory_space<vmem>>, vector<1x1x1x5x128xbf16>
      %49 = vector.shape_cast %48 : vector<1x1x1x5x128xbf16> to vector<5x128xbf16>
      %c5 = arith.constant 5 : index
      %c0_50 = arith.constant 0 : index
      %c0_51 = arith.constant 0 : index
      %50 = vector.load %arg2[%c5, %c0_50, %c0_51] : memref<16x128x128xbf16, #tpu.memory_space<vmem>>, vector<1x128x128xbf16>
      %51 = vector.shape_cast %50 : vector<1x128x128xbf16> to vector<128x128xbf16>
      %cst_52 = arith.constant dense<0.000000e+00> : vector<5x128xf32>
      %52 = tpu.matmul %49, %51, %cst_52 {dimension_numbers = #tpu.dot_dimension_numbers<[1], [0], [0], [1], [0, 0, 1, 1], [], []>} : vector<5x128xbf16>, vector<128x128xbf16>, vector<5x128xf32> -> vector<5x128xf32>
      %53 = arith.addf %46, %52 : vector<5x128xf32>
      %c0_53 = arith.constant 0 : index
      %54 = arith.index_cast %39 : i32 to index
      %c0_54 = arith.constant 0 : index
      %c1_55 = arith.constant 1 : index
      %c0_56 = arith.constant 0 : index
      %55 = vector.load %arg1[%c0_53, %54, %c0_54, %c1_55, %c0_56] : memref<1x13x2x7x128xbf16, #tpu.memory_space<vmem>>, vector<1x1x1x5x128xbf16>
      %56 = vector.shape_cast %55 : vector<1x1x1x5x128xbf16> to vector<5x128xbf16>
      %c6 = arith.constant 6 : index
      %c0_57 = arith.constant 0 : index
      %c0_58 = arith.constant 0 : index
      %57 = vector.load %arg2[%c6, %c0_57, %c0_58] : memref<16x128x128xbf16, #tpu.memory_space<vmem>>, vector<1x128x128xbf16>
      %58 = vector.shape_cast %57 : vector<1x128x128xbf16> to vector<128x128xbf16>
      %cst_59 = arith.constant dense<0.000000e+00> : vector<5x128xf32>
      %59 = tpu.matmul %56, %58, %cst_59 {dimension_numbers = #tpu.dot_dimension_numbers<[1], [0], [0], [1], [0, 0, 1, 1], [], []>} : vector<5x128xbf16>, vector<128x128xbf16>, vector<5x128xf32> -> vector<5x128xf32>
      %60 = arith.addf %53, %59 : vector<5x128xf32>
      %c0_60 = arith.constant 0 : index
      %61 = arith.index_cast %39 : i32 to index
      %c1_61 = arith.constant 1 : index
      %c1_62 = arith.constant 1 : index
      %c0_63 = arith.constant 0 : index
      %62 = vector.load %arg1[%c0_60, %61, %c1_61, %c1_62, %c0_63] : memref<1x13x2x7x128xbf16, #tpu.memory_space<vmem>>, vector<1x1x1x5x128xbf16>
      %63 = vector.shape_cast %62 : vector<1x1x1x5x128xbf16> to vector<5x128xbf16>
      %c7 = arith.constant 7 : index
      %c0_64 = arith.constant 0 : index
      %c0_65 = arith.constant 0 : index
      %64 = vector.load %arg2[%c7, %c0_64, %c0_65] : memref<16x128x128xbf16, #tpu.memory_space<vmem>>, vector<1x128x128xbf16>
      %65 = vector.shape_cast %64 : vector<1x128x128xbf16> to vector<128x128xbf16>
      %cst_66 = arith.constant dense<0.000000e+00> : vector<5x128xf32>
      %66 = tpu.matmul %63, %65, %cst_66 {dimension_numbers = #tpu.dot_dimension_numbers<[1], [0], [0], [1], [0, 0, 1, 1], [], []>} : vector<5x128xbf16>, vector<128x128xbf16>, vector<5x128xf32> -> vector<5x128xf32>
      %67 = arith.addf %60, %66 : vector<5x128xf32>
      %c2_i32_67 = arith.constant 2 : i32
      %68 = arith.muli %arg7, %c2_i32_67 : i32
      %c2_i32_68 = arith.constant 2 : i32
      %69 = arith.addi %68, %c2_i32_68 : i32
      %c0_69 = arith.constant 0 : index
      %70 = arith.index_cast %69 : i32 to index
      %c0_70 = arith.constant 0 : index
      %c0_71 = arith.constant 0 : index
      %c0_72 = arith.constant 0 : index
      %71 = vector.load %arg1[%c0_69, %70, %c0_70, %c0_71, %c0_72] : memref<1x13x2x7x128xbf16, #tpu.memory_space<vmem>>, vector<1x1x1x5x128xbf16>
      %72 = vector.shape_cast %71 : vector<1x1x1x5x128xbf16> to vector<5x128xbf16>
      %c8 = arith.constant 8 : index
      %c0_73 = arith.constant 0 : index
      %c0_74 = arith.constant 0 : index
      %73 = vector.load %arg2[%c8, %c0_73, %c0_74] : memref<16x128x128xbf16, #tpu.memory_space<vmem>>, vector<1x128x128xbf16>
      %74 = vector.shape_cast %73 : vector<1x128x128xbf16> to vector<128x128xbf16>
      %cst_75 = arith.constant dense<0.000000e+00> : vector<5x128xf32>
      %75 = tpu.matmul %72, %74, %cst_75 {dimension_numbers = #tpu.dot_dimension_numbers<[1], [0], [0], [1], [0, 0, 1, 1], [], []>} : vector<5x128xbf16>, vector<128x128xbf16>, vector<5x128xf32> -> vector<5x128xf32>
      %76 = arith.addf %67, %75 : vector<5x128xf32>
      %c0_76 = arith.constant 0 : index
      %77 = arith.index_cast %69 : i32 to index
      %c1_77 = arith.constant 1 : index
      %c0_78 = arith.constant 0 : index
      %c0_79 = arith.constant 0 : index
      %78 = vector.load %arg1[%c0_76, %77, %c1_77, %c0_78, %c0_79] : memref<1x13x2x7x128xbf16, #tpu.memory_space<vmem>>, vector<1x1x1x5x128xbf16>
      %79 = vector.shape_cast %78 : vector<1x1x1x5x128xbf16> to vector<5x128xbf16>
      %c9 = arith.constant 9 : index
      %c0_80 = arith.constant 0 : index
      %c0_81 = arith.constant 0 : index
      %80 = vector.load %arg2[%c9, %c0_80, %c0_81] : memref<16x128x128xbf16, #tpu.memory_space<vmem>>, vector<1x128x128xbf16>
      %81 = vector.shape_cast %80 : vector<1x128x128xbf16> to vector<128x128xbf16>
      %cst_82 = arith.constant dense<0.000000e+00> : vector<5x128xf32>
      %82 = tpu.matmul %79, %81, %cst_82 {dimension_numbers = #tpu.dot_dimension_numbers<[1], [0], [0], [1], [0, 0, 1, 1], [], []>} : vector<5x128xbf16>, vector<128x128xbf16>, vector<5x128xf32> -> vector<5x128xf32>
      %83 = arith.addf %76, %82 : vector<5x128xf32>
      %c0_83 = arith.constant 0 : index
      %84 = arith.index_cast %69 : i32 to index
      %c0_84 = arith.constant 0 : index
      %c1_85 = arith.constant 1 : index
      %c0_86 = arith.constant 0 : index
      %85 = vector.load %arg1[%c0_83, %84, %c0_84, %c1_85, %c0_86] : memref<1x13x2x7x128xbf16, #tpu.memory_space<vmem>>, vector<1x1x1x5x128xbf16>
      %86 = vector.shape_cast %85 : vector<1x1x1x5x128xbf16> to vector<5x128xbf16>
      %c10 = arith.constant 10 : index
      %c0_87 = arith.constant 0 : index
      %c0_88 = arith.constant 0 : index
      %87 = vector.load %arg2[%c10, %c0_87, %c0_88] : memref<16x128x128xbf16, #tpu.memory_space<vmem>>, vector<1x128x128xbf16>
      %88 = vector.shape_cast %87 : vector<1x128x128xbf16> to vector<128x128xbf16>
      %cst_89 = arith.constant dense<0.000000e+00> : vector<5x128xf32>
      %89 = tpu.matmul %86, %88, %cst_89 {dimension_numbers = #tpu.dot_dimension_numbers<[1], [0], [0], [1], [0, 0, 1, 1], [], []>} : vector<5x128xbf16>, vector<128x128xbf16>, vector<5x128xf32> -> vector<5x128xf32>
      %90 = arith.addf %83, %89 : vector<5x128xf32>
      %c0_90 = arith.constant 0 : index
      %91 = arith.index_cast %69 : i32 to index
      %c1_91 = arith.constant 1 : index
      %c1_92 = arith.constant 1 : index
      %c0_93 = arith.constant 0 : index
      %92 = vector.load %arg1[%c0_90, %91, %c1_91, %c1_92, %c0_93] : memref<1x13x2x7x128xbf16, #tpu.memory_space<vmem>>, vector<1x1x1x5x128xbf16>
      %93 = vector.shape_cast %92 : vector<1x1x1x5x128xbf16> to vector<5x128xbf16>
      %c11 = arith.constant 11 : index
      %c0_94 = arith.constant 0 : index
      %c0_95 = arith.constant 0 : index
      %94 = vector.load %arg2[%c11, %c0_94, %c0_95] : memref<16x128x128xbf16, #tpu.memory_space<vmem>>, vector<1x128x128xbf16>
      %95 = vector.shape_cast %94 : vector<1x128x128xbf16> to vector<128x128xbf16>
      %cst_96 = arith.constant dense<0.000000e+00> : vector<5x128xf32>
      %96 = tpu.matmul %93, %95, %cst_96 {dimension_numbers = #tpu.dot_dimension_numbers<[1], [0], [0], [1], [0, 0, 1, 1], [], []>} : vector<5x128xbf16>, vector<128x128xbf16>, vector<5x128xf32> -> vector<5x128xf32>
      %97 = arith.addf %90, %96 : vector<5x128xf32>
      %c2_i32_97 = arith.constant 2 : i32
      %98 = arith.muli %arg7, %c2_i32_97 : i32
      %c3_i32 = arith.constant 3 : i32
      %99 = arith.addi %98, %c3_i32 : i32
      %c0_98 = arith.constant 0 : index
      %100 = arith.index_cast %99 : i32 to index
      %c0_99 = arith.constant 0 : index
      %c0_100 = arith.constant 0 : index
      %c0_101 = arith.constant 0 : index
      %101 = vector.load %arg1[%c0_98, %100, %c0_99, %c0_100, %c0_101] : memref<1x13x2x7x128xbf16, #tpu.memory_space<vmem>>, vector<1x1x1x5x128xbf16>
      %102 = vector.shape_cast %101 : vector<1x1x1x5x128xbf16> to vector<5x128xbf16>
      %c12 = arith.constant 12 : index
      %c0_102 = arith.constant 0 : index
      %c0_103 = arith.constant 0 : index
      %103 = vector.load %arg2[%c12, %c0_102, %c0_103] : memref<16x128x128xbf16, #tpu.memory_space<vmem>>, vector<1x128x128xbf16>
      %104 = vector.shape_cast %103 : vector<1x128x128xbf16> to vector<128x128xbf16>
      %cst_104 = arith.constant dense<0.000000e+00> : vector<5x128xf32>
      %105 = tpu.matmul %102, %104, %cst_104 {dimension_numbers = #tpu.dot_dimension_numbers<[1], [0], [0], [1], [0, 0, 1, 1], [], []>} : vector<5x128xbf16>, vector<128x128xbf16>, vector<5x128xf32> -> vector<5x128xf32>
      %106 = arith.addf %97, %105 : vector<5x128xf32>
      %c0_105 = arith.constant 0 : index
      %107 = arith.index_cast %99 : i32 to index
      %c1_106 = arith.constant 1 : index
      %c0_107 = arith.constant 0 : index
      %c0_108 = arith.constant 0 : index
      %108 = vector.load %arg1[%c0_105, %107, %c1_106, %c0_107, %c0_108] : memref<1x13x2x7x128xbf16, #tpu.memory_space<vmem>>, vector<1x1x1x5x128xbf16>
      %109 = vector.shape_cast %108 : vector<1x1x1x5x128xbf16> to vector<5x128xbf16>
      %c13 = arith.constant 13 : index
      %c0_109 = arith.constant 0 : index
      %c0_110 = arith.constant 0 : index
      %110 = vector.load %arg2[%c13, %c0_109, %c0_110] : memref<16x128x128xbf16, #tpu.memory_space<vmem>>, vector<1x128x128xbf16>
      %111 = vector.shape_cast %110 : vector<1x128x128xbf16> to vector<128x128xbf16>
      %cst_111 = arith.constant dense<0.000000e+00> : vector<5x128xf32>
      %112 = tpu.matmul %109, %111, %cst_111 {dimension_numbers = #tpu.dot_dimension_numbers<[1], [0], [0], [1], [0, 0, 1, 1], [], []>} : vector<5x128xbf16>, vector<128x128xbf16>, vector<5x128xf32> -> vector<5x128xf32>
      %113 = arith.addf %106, %112 : vector<5x128xf32>
      %c0_112 = arith.constant 0 : index
      %114 = arith.index_cast %99 : i32 to index
      %c0_113 = arith.constant 0 : index
      %c1_114 = arith.constant 1 : index
      %c0_115 = arith.constant 0 : index
      %115 = vector.load %arg1[%c0_112, %114, %c0_113, %c1_114, %c0_115] : memref<1x13x2x7x128xbf16, #tpu.memory_space<vmem>>, vector<1x1x1x5x128xbf16>
      %116 = vector.shape_cast %115 : vector<1x1x1x5x128xbf16> to vector<5x128xbf16>
      %c14 = arith.constant 14 : index
      %c0_116 = arith.constant 0 : index
      %c0_117 = arith.constant 0 : index
      %117 = vector.load %arg2[%c14, %c0_116, %c0_117] : memref<16x128x128xbf16, #tpu.memory_space<vmem>>, vector<1x128x128xbf16>
      %118 = vector.shape_cast %117 : vector<1x128x128xbf16> to vector<128x128xbf16>
      %cst_118 = arith.constant dense<0.000000e+00> : vector<5x128xf32>
      %119 = tpu.matmul %116, %118, %cst_118 {dimension_numbers = #tpu.dot_dimension_numbers<[1], [0], [0], [1], [0, 0, 1, 1], [], []>} : vector<5x128xbf16>, vector<128x128xbf16>, vector<5x128xf32> -> vector<5x128xf32>
      %120 = arith.addf %113, %119 : vector<5x128xf32>
      %c0_119 = arith.constant 0 : index
      %121 = arith.index_cast %99 : i32 to index
      %c1_120 = arith.constant 1 : index
      %c1_121 = arith.constant 1 : index
      %c0_122 = arith.constant 0 : index
      %122 = vector.load %arg1[%c0_119, %121, %c1_120, %c1_121, %c0_122] : memref<1x13x2x7x128xbf16, #tpu.memory_space<vmem>>, vector<1x1x1x5x128xbf16>
      %123 = vector.shape_cast %122 : vector<1x1x1x5x128xbf16> to vector<5x128xbf16>
      %c15 = arith.constant 15 : index
      %c0_123 = arith.constant 0 : index
      %c0_124 = arith.constant 0 : index
      %124 = vector.load %arg2[%c15, %c0_123, %c0_124] : memref<16x128x128xbf16, #tpu.memory_space<vmem>>, vector<1x128x128xbf16>
      %125 = vector.shape_cast %124 : vector<1x128x128xbf16> to vector<128x128xbf16>
      %cst_125 = arith.constant dense<0.000000e+00> : vector<5x128xf32>
      %126 = tpu.matmul %123, %125, %cst_125 {dimension_numbers = #tpu.dot_dimension_numbers<[1], [0], [0], [1], [0, 0, 1, 1], [], []>} : vector<5x128xbf16>, vector<128x128xbf16>, vector<5x128xf32> -> vector<5x128xf32>
      %127 = arith.addf %120, %126 : vector<5x128xf32>
      %cst_126 = arith.constant dense<0.000000e+00> : vector<128xf32>
      %128 = vector.multi_reduction <add>, %127, %cst_126 [0] : vector<5x128xf32> to vector<128xf32>
      %129 = vector.shape_cast %128 : vector<128xf32> to vector<1x128xf32>
      %130 = arith.addf %arg8, %129 : vector<1x128xf32>
      %131 = arith.mulf %127, %127 : vector<5x128xf32>
      %cst_127 = arith.constant dense<0.000000e+00> : vector<128xf32>
      %132 = vector.multi_reduction <add>, %131, %cst_127 [0] : vector<5x128xf32> to vector<128xf32>
      %133 = vector.shape_cast %132 : vector<128xf32> to vector<1x128xf32>
      %134 = arith.addf %arg9, %133 : vector<1x128xf32>
      %135 = arith.truncf %127 : vector<5x128xf32> to vector<5x128xbf16>
      %c0_128 = arith.constant 0 : index
      %136 = arith.index_cast %arg7 : i32 to index
      %c0_129 = arith.constant 0 : index
      %c0_130 = arith.constant 0 : index
      %137 = vector.load %arg4[%c0_128, %136, %c0_129, %c0_130] : memref<1x5x5x128xbf16, #tpu.memory_space<vmem>>, vector<1x1x5x128xbf16>
      %138 = vector.shape_cast %137 : vector<1x1x5x128xbf16> to vector<5x128xbf16>
      %139 = vector.shape_cast %135 : vector<5x128xbf16> to vector<1x1x5x128xbf16>
      tpu.vector_store %arg4[%c0_128, %136, %c0_129, %c0_130], %139 {strides = array<i32>} : memref<1x5x5x128xbf16, #tpu.memory_space<vmem>>, vector<1x1x5x128xbf16>,
      scf.yield %130, %134 : vector<1x128xf32>, vector<1x128xf32>
    }
    %c5_i32_0 = arith.constant 5 : i32
    %3 = vector.shape_cast %2#0 : vector<1x128xf32> to vector<1x1x128xf32>
    %c0 = arith.constant 0 : index
    %c0_1 = arith.constant 0 : index
    %c0_2 = arith.constant 0 : index
    %4 = vector.load %arg5[%c0, %c0_1, %c0_2] : memref<1x1x128xf32, #tpu.memory_space<vmem>>, vector<1x1x128xf32>
    tpu.vector_store %arg5[%c0, %c0_1, %c0_2], %3 {strides = array<i32>} : memref<1x1x128xf32, #tpu.memory_space<vmem>>, vector<1x1x128xf32>,
    %5 = vector.shape_cast %2#1 : vector<1x128xf32> to vector<1x1x128xf32>
    %c0_3 = arith.constant 0 : index
    %c0_4 = arith.constant 0 : index
    %c0_5 = arith.constant 0 : index
    %6 = vector.load %arg6[%c0_3, %c0_4, %c0_5] : memref<1x1x128xf32, #tpu.memory_space<vmem>>, vector<1x1x128xf32>
    tpu.vector_store %arg6[%c0_3, %c0_4, %c0_5], %5 {strides = array<i32>} : memref<1x1x128xf32, #tpu.memory_space<vmem>>, vector<1x1x128xf32>,
    return
  }
  func.func @transform_0(%arg0: i32) -> (i32, i32, i32, i32, i32) {
    %c0_i32 = arith.constant 0 : i32
    %c0_i32_0 = arith.constant 0 : i32
    %c0_i32_1 = arith.constant 0 : i32
    %c0_i32_2 = arith.constant 0 : i32
    %c0_i32_3 = arith.constant 0 : i32
    return %arg0, %c0_i32, %c0_i32_0, %c0_i32_1, %c0_i32_2 : i32, i32, i32, i32, i32
  }
  func.func @transform_1(%arg0: i32) -> (i32, i32, i32) {
    %c0_i32 = arith.constant 0 : i32
    %c0_i32_0 = arith.constant 0 : i32
    %c0_i32_1 = arith.constant 0 : i32
    %c0_i32_2 = arith.constant 0 : i32
    return %c0_i32, %c0_i32_0, %c0_i32_1 : i32, i32, i32
  }
  func.func @transform_2(%arg0: i32) -> (i32, i32) {
    %c0_i32 = arith.constant 0 : i32
    %c0_i32_0 = arith.constant 0 : i32
    %c0_i32_1 = arith.constant 0 : i32
    return %c0_i32, %c0_i32_0 : i32, i32
  }
  func.func @transform_3(%arg0: i32) -> (i32, i32, i32, i32) {
    %c0_i32 = arith.constant 0 : i32
    %c0_i32_0 = arith.constant 0 : i32
    %c0_i32_1 = arith.constant 0 : i32
    %c0_i32_2 = arith.constant 0 : i32
    return %arg0, %c0_i32, %c0_i32_0, %c0_i32_1 : i32, i32, i32, i32
  }
  func.func @transform_4(%arg0: i32) -> (i32, i32, i32) {
    %c0_i32 = arith.constant 0 : i32
    %c0_i32_0 = arith.constant 0 : i32
    %c0_i32_1 = arith.constant 0 : i32
    return %arg0, %c0_i32, %c0_i32_0 : i32, i32, i32
  }
  func.func @transform_5(%arg0: i32) -> (i32, i32, i32) {
    %c0_i32 = arith.constant 0 : i32
    %c0_i32_0 = arith.constant 0 : i32
    %c0_i32_1 = arith.constant 0 : i32
    return %arg0, %c0_i32, %c0_i32_0 : i32, i32, i32
  }
}

module attributes {stable_mosaic.version = 11 : i64} {
  func.func @_bn_lrelu_kernel(%arg0: i32, %arg1: memref<1x5x5x128xbf16, #tpu.memory_space<vmem>>, %arg2: memref<1x128xf32, #tpu.memory_space<vmem>>, %arg3: memref<1x128xf32, #tpu.memory_space<vmem>>, %arg4: memref<1x5x5x128xbf16, #tpu.memory_space<vmem>>) attributes {dimension_semantics = [#tpu.dimension_semantics<parallel>], iteration_bounds = array<i64: 2>, scalar_prefetch = 0 : i64, scratch_operands = 0 : i64, tpu.core_type = #tpu.core_type<tc>, window_params = [{transform_indices = @transform_0, window_bounds = array<i64: 1, 5, 5, 128>}, {pipeline_mode = #tpu.pipeline_mode<synchronous>, transform_indices = @transform_1, window_bounds = array<i64: 1, 128>}, {pipeline_mode = #tpu.pipeline_mode<synchronous>, transform_indices = @transform_2, window_bounds = array<i64: 1, 128>}, {transform_indices = @transform_3, window_bounds = array<i64: 1, 5, 5, 128>}]} {
    %c0 = arith.constant 0 : index
    %c0_0 = arith.constant 0 : index
    %c0_1 = arith.constant 0 : index
    %c0_2 = arith.constant 0 : index
    %0 = vector.load %arg1[%c0, %c0_0, %c0_1, %c0_2] : memref<1x5x5x128xbf16, #tpu.memory_space<vmem>>, vector<1x5x5x128xbf16>
    %1 = arith.extf %0 : vector<1x5x5x128xbf16> to vector<1x5x5x128xf32>
    %c0_3 = arith.constant 0 : index
    %c0_4 = arith.constant 0 : index
    %2 = vector.load %arg2[%c0_3, %c0_4] : memref<1x128xf32, #tpu.memory_space<vmem>>, vector<1x128xf32>
    %3 = vector.shape_cast %2 : vector<1x128xf32> to vector<1x1x1x128xf32>
    %4 = vector.broadcast %3 : vector<1x1x1x128xf32> to vector<1x5x5x128xf32>
    %5 = arith.mulf %1, %4 : vector<1x5x5x128xf32>
    %c0_5 = arith.constant 0 : index
    %c0_6 = arith.constant 0 : index
    %6 = vector.load %arg3[%c0_5, %c0_6] : memref<1x128xf32, #tpu.memory_space<vmem>>, vector<1x128xf32>
    %7 = vector.shape_cast %6 : vector<1x128xf32> to vector<1x1x1x128xf32>
    %8 = vector.broadcast %7 : vector<1x1x1x128xf32> to vector<1x5x5x128xf32>
    %9 = arith.addf %5, %8 : vector<1x5x5x128xf32>
    %cst = arith.constant 0.000000e+00 : f32
    %10 = vector.broadcast %cst : f32 to vector<1x5x5x128xf32>
    %11 = arith.cmpf oge, %9, %10 : vector<1x5x5x128xf32>
    %cst_7 = arith.constant 2.000000e-01 : f32
    %12 = vector.broadcast %cst_7 : f32 to vector<1x5x5x128xf32>
    %13 = arith.mulf %12, %9 : vector<1x5x5x128xf32>
    %14 = arith.select %11, %9, %13 : vector<1x5x5x128xi1>, vector<1x5x5x128xf32>
    %15 = arith.truncf %14 : vector<1x5x5x128xf32> to vector<1x5x5x128xbf16>
    %c0_8 = arith.constant 0 : index
    %c0_9 = arith.constant 0 : index
    %c0_10 = arith.constant 0 : index
    %c0_11 = arith.constant 0 : index
    %16 = vector.load %arg4[%c0_8, %c0_9, %c0_10, %c0_11] : memref<1x5x5x128xbf16, #tpu.memory_space<vmem>>, vector<1x5x5x128xbf16>
    tpu.vector_store %arg4[%c0_8, %c0_9, %c0_10, %c0_11], %15 {strides = array<i32>} : memref<1x5x5x128xbf16, #tpu.memory_space<vmem>>, vector<1x5x5x128xbf16>,
    return
  }
  func.func @transform_0(%arg0: i32) -> (i32, i32, i32, i32) {
    %c0_i32 = arith.constant 0 : i32
    %c0_i32_0 = arith.constant 0 : i32
    %c0_i32_1 = arith.constant 0 : i32
    %c0_i32_2 = arith.constant 0 : i32
    return %arg0, %c0_i32, %c0_i32_0, %c0_i32_1 : i32, i32, i32, i32
  }
  func.func @transform_1(%arg0: i32) -> (i32, i32) {
    %c0_i32 = arith.constant 0 : i32
    %c0_i32_0 = arith.constant 0 : i32
    %c0_i32_1 = arith.constant 0 : i32
    return %c0_i32, %c0_i32_0 : i32, i32
  }
  func.func @transform_2(%arg0: i32) -> (i32, i32) {
    %c0_i32 = arith.constant 0 : i32
    %c0_i32_0 = arith.constant 0 : i32
    %c0_i32_1 = arith.constant 0 : i32
    return %c0_i32, %c0_i32_0 : i32, i32
  }
  func.func @transform_3(%arg0: i32) -> (i32, i32, i32, i32) {
    %c0_i32 = arith.constant 0 : i32
    %c0_i32_0 = arith.constant 0 : i32
    %c0_i32_1 = arith.constant 0 : i32
    %c0_i32_2 = arith.constant 0 : i32
    return %arg0, %c0_i32, %c0_i32_0, %c0_i32_1 : i32, i32, i32, i32
  }
}

module attributes {stable_mosaic.version = 11 : i64} {
  func.func @_conv_fused_kernel(%arg0: i32, %arg1: memref<1x9x2x5x128xbf16, #tpu.memory_space<vmem>>, %arg2: memref<16x128x128xbf16, #tpu.memory_space<vmem>>, %arg3: memref<1x128xf32, #tpu.memory_space<vmem>>, %arg4: memref<1x3x3x128xbf16, #tpu.memory_space<vmem>>, %arg5: memref<1x1x128xf32, #tpu.memory_space<vmem>>, %arg6: memref<1x1x128xf32, #tpu.memory_space<vmem>>) attributes {dimension_semantics = [#tpu.dimension_semantics<parallel>], iteration_bounds = array<i64: 2>, scalar_prefetch = 0 : i64, scratch_operands = 0 : i64, tpu.core_type = #tpu.core_type<tc>, window_params = [{transform_indices = @transform_0, window_bounds = array<i64: 1, 9, 2, 5, 128>}, {pipeline_mode = #tpu.pipeline_mode<synchronous>, transform_indices = @transform_1, window_bounds = array<i64: 16, 128, 128>}, {pipeline_mode = #tpu.pipeline_mode<synchronous>, transform_indices = @transform_2, window_bounds = array<i64: 1, 128>}, {transform_indices = @transform_3, window_bounds = array<i64: 1, 3, 3, 128>}, {transform_indices = @transform_4, window_bounds = array<i64: 1, 1, 128>}, {transform_indices = @transform_5, window_bounds = array<i64: 1, 1, 128>}]} {
    %cst = arith.constant 0.000000e+00 : f32
    %0 = vector.broadcast %cst : f32 to vector<1x128xf32>
    %c0_i32 = arith.constant 0 : i32
    %c3_i32 = arith.constant 3 : i32
    %1 = arith.addi %c0_i32, %c3_i32 : i32
    %c1_i32 = arith.constant 1 : i32
    %2:2 = scf.for %arg7 = %c0_i32 to %1 step %c1_i32 iter_args(%arg8 = %0, %arg9 = %0) -> (vector<1x128xf32>, vector<1x128xf32>)  : i32 {
      %cst_6 = arith.constant 0.000000e+00 : f32
      %7 = vector.broadcast %cst_6 : f32 to vector<3x128xf32>
      %c2_i32 = arith.constant 2 : i32
      %8 = arith.muli %arg7, %c2_i32 : i32
      %c0_i32_7 = arith.constant 0 : i32
      %9 = arith.addi %8, %c0_i32_7 : i32
      %c0_8 = arith.constant 0 : index
      %10 = arith.index_cast %9 : i32 to index
      %c0_9 = arith.constant 0 : index
      %c0_10 = arith.constant 0 : index
      %c0_11 = arith.constant 0 : index
      %11 = vector.load %arg1[%c0_8, %10, %c0_9, %c0_10, %c0_11] : memref<1x9x2x5x128xbf16, #tpu.memory_space<vmem>>, vector<1x1x1x3x128xbf16>
      %12 = vector.shape_cast %11 : vector<1x1x1x3x128xbf16> to vector<3x128xbf16>
      %c0_12 = arith.constant 0 : index
      %c0_13 = arith.constant 0 : index
      %c0_14 = arith.constant 0 : index
      %13 = vector.load %arg2[%c0_12, %c0_13, %c0_14] : memref<16x128x128xbf16, #tpu.memory_space<vmem>>, vector<1x128x128xbf16>
      %14 = vector.shape_cast %13 : vector<1x128x128xbf16> to vector<128x128xbf16>
      %cst_15 = arith.constant dense<0.000000e+00> : vector<3x128xf32>
      %15 = tpu.matmul %12, %14, %cst_15 {dimension_numbers = #tpu.dot_dimension_numbers<[1], [0], [0], [1], [0, 0, 1, 1], [], []>} : vector<3x128xbf16>, vector<128x128xbf16>, vector<3x128xf32> -> vector<3x128xf32>
      %16 = arith.addf %7, %15 : vector<3x128xf32>
      %c0_16 = arith.constant 0 : index
      %17 = arith.index_cast %9 : i32 to index
      %c1 = arith.constant 1 : index
      %c0_17 = arith.constant 0 : index
      %c0_18 = arith.constant 0 : index
      %18 = vector.load %arg1[%c0_16, %17, %c1, %c0_17, %c0_18] : memref<1x9x2x5x128xbf16, #tpu.memory_space<vmem>>, vector<1x1x1x3x128xbf16>
      %19 = vector.shape_cast %18 : vector<1x1x1x3x128xbf16> to vector<3x128xbf16>
      %c1_19 = arith.constant 1 : index
      %c0_20 = arith.constant 0 : index
      %c0_21 = arith.constant 0 : index
      %20 = vector.load %arg2[%c1_19, %c0_20, %c0_21] : memref<16x128x128xbf16, #tpu.memory_space<vmem>>, vector<1x128x128xbf16>
      %21 = vector.shape_cast %20 : vector<1x128x128xbf16> to vector<128x128xbf16>
      %cst_22 = arith.constant dense<0.000000e+00> : vector<3x128xf32>
      %22 = tpu.matmul %19, %21, %cst_22 {dimension_numbers = #tpu.dot_dimension_numbers<[1], [0], [0], [1], [0, 0, 1, 1], [], []>} : vector<3x128xbf16>, vector<128x128xbf16>, vector<3x128xf32> -> vector<3x128xf32>
      %23 = arith.addf %16, %22 : vector<3x128xf32>
      %c0_23 = arith.constant 0 : index
      %24 = arith.index_cast %9 : i32 to index
      %c0_24 = arith.constant 0 : index
      %c1_25 = arith.constant 1 : index
      %c0_26 = arith.constant 0 : index
      %25 = vector.load %arg1[%c0_23, %24, %c0_24, %c1_25, %c0_26] : memref<1x9x2x5x128xbf16, #tpu.memory_space<vmem>>, vector<1x1x1x3x128xbf16>
      %26 = vector.shape_cast %25 : vector<1x1x1x3x128xbf16> to vector<3x128xbf16>
      %c2 = arith.constant 2 : index
      %c0_27 = arith.constant 0 : index
      %c0_28 = arith.constant 0 : index
      %27 = vector.load %arg2[%c2, %c0_27, %c0_28] : memref<16x128x128xbf16, #tpu.memory_space<vmem>>, vector<1x128x128xbf16>
      %28 = vector.shape_cast %27 : vector<1x128x128xbf16> to vector<128x128xbf16>
      %cst_29 = arith.constant dense<0.000000e+00> : vector<3x128xf32>
      %29 = tpu.matmul %26, %28, %cst_29 {dimension_numbers = #tpu.dot_dimension_numbers<[1], [0], [0], [1], [0, 0, 1, 1], [], []>} : vector<3x128xbf16>, vector<128x128xbf16>, vector<3x128xf32> -> vector<3x128xf32>
      %30 = arith.addf %23, %29 : vector<3x128xf32>
      %c0_30 = arith.constant 0 : index
      %31 = arith.index_cast %9 : i32 to index
      %c1_31 = arith.constant 1 : index
      %c1_32 = arith.constant 1 : index
      %c0_33 = arith.constant 0 : index
      %32 = vector.load %arg1[%c0_30, %31, %c1_31, %c1_32, %c0_33] : memref<1x9x2x5x128xbf16, #tpu.memory_space<vmem>>, vector<1x1x1x3x128xbf16>
      %33 = vector.shape_cast %32 : vector<1x1x1x3x128xbf16> to vector<3x128xbf16>
      %c3 = arith.constant 3 : index
      %c0_34 = arith.constant 0 : index
      %c0_35 = arith.constant 0 : index
      %34 = vector.load %arg2[%c3, %c0_34, %c0_35] : memref<16x128x128xbf16, #tpu.memory_space<vmem>>, vector<1x128x128xbf16>
      %35 = vector.shape_cast %34 : vector<1x128x128xbf16> to vector<128x128xbf16>
      %cst_36 = arith.constant dense<0.000000e+00> : vector<3x128xf32>
      %36 = tpu.matmul %33, %35, %cst_36 {dimension_numbers = #tpu.dot_dimension_numbers<[1], [0], [0], [1], [0, 0, 1, 1], [], []>} : vector<3x128xbf16>, vector<128x128xbf16>, vector<3x128xf32> -> vector<3x128xf32>
      %37 = arith.addf %30, %36 : vector<3x128xf32>
      %c2_i32_37 = arith.constant 2 : i32
      %38 = arith.muli %arg7, %c2_i32_37 : i32
      %c1_i32_38 = arith.constant 1 : i32
      %39 = arith.addi %38, %c1_i32_38 : i32
      %c0_39 = arith.constant 0 : index
      %40 = arith.index_cast %39 : i32 to index
      %c0_40 = arith.constant 0 : index
      %c0_41 = arith.constant 0 : index
      %c0_42 = arith.constant 0 : index
      %41 = vector.load %arg1[%c0_39, %40, %c0_40, %c0_41, %c0_42] : memref<1x9x2x5x128xbf16, #tpu.memory_space<vmem>>, vector<1x1x1x3x128xbf16>
      %42 = vector.shape_cast %41 : vector<1x1x1x3x128xbf16> to vector<3x128xbf16>
      %c4 = arith.constant 4 : index
      %c0_43 = arith.constant 0 : index
      %c0_44 = arith.constant 0 : index
      %43 = vector.load %arg2[%c4, %c0_43, %c0_44] : memref<16x128x128xbf16, #tpu.memory_space<vmem>>, vector<1x128x128xbf16>
      %44 = vector.shape_cast %43 : vector<1x128x128xbf16> to vector<128x128xbf16>
      %cst_45 = arith.constant dense<0.000000e+00> : vector<3x128xf32>
      %45 = tpu.matmul %42, %44, %cst_45 {dimension_numbers = #tpu.dot_dimension_numbers<[1], [0], [0], [1], [0, 0, 1, 1], [], []>} : vector<3x128xbf16>, vector<128x128xbf16>, vector<3x128xf32> -> vector<3x128xf32>
      %46 = arith.addf %37, %45 : vector<3x128xf32>
      %c0_46 = arith.constant 0 : index
      %47 = arith.index_cast %39 : i32 to index
      %c1_47 = arith.constant 1 : index
      %c0_48 = arith.constant 0 : index
      %c0_49 = arith.constant 0 : index
      %48 = vector.load %arg1[%c0_46, %47, %c1_47, %c0_48, %c0_49] : memref<1x9x2x5x128xbf16, #tpu.memory_space<vmem>>, vector<1x1x1x3x128xbf16>
      %49 = vector.shape_cast %48 : vector<1x1x1x3x128xbf16> to vector<3x128xbf16>
      %c5 = arith.constant 5 : index
      %c0_50 = arith.constant 0 : index
      %c0_51 = arith.constant 0 : index
      %50 = vector.load %arg2[%c5, %c0_50, %c0_51] : memref<16x128x128xbf16, #tpu.memory_space<vmem>>, vector<1x128x128xbf16>
      %51 = vector.shape_cast %50 : vector<1x128x128xbf16> to vector<128x128xbf16>
      %cst_52 = arith.constant dense<0.000000e+00> : vector<3x128xf32>
      %52 = tpu.matmul %49, %51, %cst_52 {dimension_numbers = #tpu.dot_dimension_numbers<[1], [0], [0], [1], [0, 0, 1, 1], [], []>} : vector<3x128xbf16>, vector<128x128xbf16>, vector<3x128xf32> -> vector<3x128xf32>
      %53 = arith.addf %46, %52 : vector<3x128xf32>
      %c0_53 = arith.constant 0 : index
      %54 = arith.index_cast %39 : i32 to index
      %c0_54 = arith.constant 0 : index
      %c1_55 = arith.constant 1 : index
      %c0_56 = arith.constant 0 : index
      %55 = vector.load %arg1[%c0_53, %54, %c0_54, %c1_55, %c0_56] : memref<1x9x2x5x128xbf16, #tpu.memory_space<vmem>>, vector<1x1x1x3x128xbf16>
      %56 = vector.shape_cast %55 : vector<1x1x1x3x128xbf16> to vector<3x128xbf16>
      %c6 = arith.constant 6 : index
      %c0_57 = arith.constant 0 : index
      %c0_58 = arith.constant 0 : index
      %57 = vector.load %arg2[%c6, %c0_57, %c0_58] : memref<16x128x128xbf16, #tpu.memory_space<vmem>>, vector<1x128x128xbf16>
      %58 = vector.shape_cast %57 : vector<1x128x128xbf16> to vector<128x128xbf16>
      %cst_59 = arith.constant dense<0.000000e+00> : vector<3x128xf32>
      %59 = tpu.matmul %56, %58, %cst_59 {dimension_numbers = #tpu.dot_dimension_numbers<[1], [0], [0], [1], [0, 0, 1, 1], [], []>} : vector<3x128xbf16>, vector<128x128xbf16>, vector<3x128xf32> -> vector<3x128xf32>
      %60 = arith.addf %53, %59 : vector<3x128xf32>
      %c0_60 = arith.constant 0 : index
      %61 = arith.index_cast %39 : i32 to index
      %c1_61 = arith.constant 1 : index
      %c1_62 = arith.constant 1 : index
      %c0_63 = arith.constant 0 : index
      %62 = vector.load %arg1[%c0_60, %61, %c1_61, %c1_62, %c0_63] : memref<1x9x2x5x128xbf16, #tpu.memory_space<vmem>>, vector<1x1x1x3x128xbf16>
      %63 = vector.shape_cast %62 : vector<1x1x1x3x128xbf16> to vector<3x128xbf16>
      %c7 = arith.constant 7 : index
      %c0_64 = arith.constant 0 : index
      %c0_65 = arith.constant 0 : index
      %64 = vector.load %arg2[%c7, %c0_64, %c0_65] : memref<16x128x128xbf16, #tpu.memory_space<vmem>>, vector<1x128x128xbf16>
      %65 = vector.shape_cast %64 : vector<1x128x128xbf16> to vector<128x128xbf16>
      %cst_66 = arith.constant dense<0.000000e+00> : vector<3x128xf32>
      %66 = tpu.matmul %63, %65, %cst_66 {dimension_numbers = #tpu.dot_dimension_numbers<[1], [0], [0], [1], [0, 0, 1, 1], [], []>} : vector<3x128xbf16>, vector<128x128xbf16>, vector<3x128xf32> -> vector<3x128xf32>
      %67 = arith.addf %60, %66 : vector<3x128xf32>
      %c2_i32_67 = arith.constant 2 : i32
      %68 = arith.muli %arg7, %c2_i32_67 : i32
      %c2_i32_68 = arith.constant 2 : i32
      %69 = arith.addi %68, %c2_i32_68 : i32
      %c0_69 = arith.constant 0 : index
      %70 = arith.index_cast %69 : i32 to index
      %c0_70 = arith.constant 0 : index
      %c0_71 = arith.constant 0 : index
      %c0_72 = arith.constant 0 : index
      %71 = vector.load %arg1[%c0_69, %70, %c0_70, %c0_71, %c0_72] : memref<1x9x2x5x128xbf16, #tpu.memory_space<vmem>>, vector<1x1x1x3x128xbf16>
      %72 = vector.shape_cast %71 : vector<1x1x1x3x128xbf16> to vector<3x128xbf16>
      %c8 = arith.constant 8 : index
      %c0_73 = arith.constant 0 : index
      %c0_74 = arith.constant 0 : index
      %73 = vector.load %arg2[%c8, %c0_73, %c0_74] : memref<16x128x128xbf16, #tpu.memory_space<vmem>>, vector<1x128x128xbf16>
      %74 = vector.shape_cast %73 : vector<1x128x128xbf16> to vector<128x128xbf16>
      %cst_75 = arith.constant dense<0.000000e+00> : vector<3x128xf32>
      %75 = tpu.matmul %72, %74, %cst_75 {dimension_numbers = #tpu.dot_dimension_numbers<[1], [0], [0], [1], [0, 0, 1, 1], [], []>} : vector<3x128xbf16>, vector<128x128xbf16>, vector<3x128xf32> -> vector<3x128xf32>
      %76 = arith.addf %67, %75 : vector<3x128xf32>
      %c0_76 = arith.constant 0 : index
      %77 = arith.index_cast %69 : i32 to index
      %c1_77 = arith.constant 1 : index
      %c0_78 = arith.constant 0 : index
      %c0_79 = arith.constant 0 : index
      %78 = vector.load %arg1[%c0_76, %77, %c1_77, %c0_78, %c0_79] : memref<1x9x2x5x128xbf16, #tpu.memory_space<vmem>>, vector<1x1x1x3x128xbf16>
      %79 = vector.shape_cast %78 : vector<1x1x1x3x128xbf16> to vector<3x128xbf16>
      %c9 = arith.constant 9 : index
      %c0_80 = arith.constant 0 : index
      %c0_81 = arith.constant 0 : index
      %80 = vector.load %arg2[%c9, %c0_80, %c0_81] : memref<16x128x128xbf16, #tpu.memory_space<vmem>>, vector<1x128x128xbf16>
      %81 = vector.shape_cast %80 : vector<1x128x128xbf16> to vector<128x128xbf16>
      %cst_82 = arith.constant dense<0.000000e+00> : vector<3x128xf32>
      %82 = tpu.matmul %79, %81, %cst_82 {dimension_numbers = #tpu.dot_dimension_numbers<[1], [0], [0], [1], [0, 0, 1, 1], [], []>} : vector<3x128xbf16>, vector<128x128xbf16>, vector<3x128xf32> -> vector<3x128xf32>
      %83 = arith.addf %76, %82 : vector<3x128xf32>
      %c0_83 = arith.constant 0 : index
      %84 = arith.index_cast %69 : i32 to index
      %c0_84 = arith.constant 0 : index
      %c1_85 = arith.constant 1 : index
      %c0_86 = arith.constant 0 : index
      %85 = vector.load %arg1[%c0_83, %84, %c0_84, %c1_85, %c0_86] : memref<1x9x2x5x128xbf16, #tpu.memory_space<vmem>>, vector<1x1x1x3x128xbf16>
      %86 = vector.shape_cast %85 : vector<1x1x1x3x128xbf16> to vector<3x128xbf16>
      %c10 = arith.constant 10 : index
      %c0_87 = arith.constant 0 : index
      %c0_88 = arith.constant 0 : index
      %87 = vector.load %arg2[%c10, %c0_87, %c0_88] : memref<16x128x128xbf16, #tpu.memory_space<vmem>>, vector<1x128x128xbf16>
      %88 = vector.shape_cast %87 : vector<1x128x128xbf16> to vector<128x128xbf16>
      %cst_89 = arith.constant dense<0.000000e+00> : vector<3x128xf32>
      %89 = tpu.matmul %86, %88, %cst_89 {dimension_numbers = #tpu.dot_dimension_numbers<[1], [0], [0], [1], [0, 0, 1, 1], [], []>} : vector<3x128xbf16>, vector<128x128xbf16>, vector<3x128xf32> -> vector<3x128xf32>
      %90 = arith.addf %83, %89 : vector<3x128xf32>
      %c0_90 = arith.constant 0 : index
      %91 = arith.index_cast %69 : i32 to index
      %c1_91 = arith.constant 1 : index
      %c1_92 = arith.constant 1 : index
      %c0_93 = arith.constant 0 : index
      %92 = vector.load %arg1[%c0_90, %91, %c1_91, %c1_92, %c0_93] : memref<1x9x2x5x128xbf16, #tpu.memory_space<vmem>>, vector<1x1x1x3x128xbf16>
      %93 = vector.shape_cast %92 : vector<1x1x1x3x128xbf16> to vector<3x128xbf16>
      %c11 = arith.constant 11 : index
      %c0_94 = arith.constant 0 : index
      %c0_95 = arith.constant 0 : index
      %94 = vector.load %arg2[%c11, %c0_94, %c0_95] : memref<16x128x128xbf16, #tpu.memory_space<vmem>>, vector<1x128x128xbf16>
      %95 = vector.shape_cast %94 : vector<1x128x128xbf16> to vector<128x128xbf16>
      %cst_96 = arith.constant dense<0.000000e+00> : vector<3x128xf32>
      %96 = tpu.matmul %93, %95, %cst_96 {dimension_numbers = #tpu.dot_dimension_numbers<[1], [0], [0], [1], [0, 0, 1, 1], [], []>} : vector<3x128xbf16>, vector<128x128xbf16>, vector<3x128xf32> -> vector<3x128xf32>
      %97 = arith.addf %90, %96 : vector<3x128xf32>
      %c2_i32_97 = arith.constant 2 : i32
      %98 = arith.muli %arg7, %c2_i32_97 : i32
      %c3_i32_98 = arith.constant 3 : i32
      %99 = arith.addi %98, %c3_i32_98 : i32
      %c0_99 = arith.constant 0 : index
      %100 = arith.index_cast %99 : i32 to index
      %c0_100 = arith.constant 0 : index
      %c0_101 = arith.constant 0 : index
      %c0_102 = arith.constant 0 : index
      %101 = vector.load %arg1[%c0_99, %100, %c0_100, %c0_101, %c0_102] : memref<1x9x2x5x128xbf16, #tpu.memory_space<vmem>>, vector<1x1x1x3x128xbf16>
      %102 = vector.shape_cast %101 : vector<1x1x1x3x128xbf16> to vector<3x128xbf16>
      %c12 = arith.constant 12 : index
      %c0_103 = arith.constant 0 : index
      %c0_104 = arith.constant 0 : index
      %103 = vector.load %arg2[%c12, %c0_103, %c0_104] : memref<16x128x128xbf16, #tpu.memory_space<vmem>>, vector<1x128x128xbf16>
      %104 = vector.shape_cast %103 : vector<1x128x128xbf16> to vector<128x128xbf16>
      %cst_105 = arith.constant dense<0.000000e+00> : vector<3x128xf32>
      %105 = tpu.matmul %102, %104, %cst_105 {dimension_numbers = #tpu.dot_dimension_numbers<[1], [0], [0], [1], [0, 0, 1, 1], [], []>} : vector<3x128xbf16>, vector<128x128xbf16>, vector<3x128xf32> -> vector<3x128xf32>
      %106 = arith.addf %97, %105 : vector<3x128xf32>
      %c0_106 = arith.constant 0 : index
      %107 = arith.index_cast %99 : i32 to index
      %c1_107 = arith.constant 1 : index
      %c0_108 = arith.constant 0 : index
      %c0_109 = arith.constant 0 : index
      %108 = vector.load %arg1[%c0_106, %107, %c1_107, %c0_108, %c0_109] : memref<1x9x2x5x128xbf16, #tpu.memory_space<vmem>>, vector<1x1x1x3x128xbf16>
      %109 = vector.shape_cast %108 : vector<1x1x1x3x128xbf16> to vector<3x128xbf16>
      %c13 = arith.constant 13 : index
      %c0_110 = arith.constant 0 : index
      %c0_111 = arith.constant 0 : index
      %110 = vector.load %arg2[%c13, %c0_110, %c0_111] : memref<16x128x128xbf16, #tpu.memory_space<vmem>>, vector<1x128x128xbf16>
      %111 = vector.shape_cast %110 : vector<1x128x128xbf16> to vector<128x128xbf16>
      %cst_112 = arith.constant dense<0.000000e+00> : vector<3x128xf32>
      %112 = tpu.matmul %109, %111, %cst_112 {dimension_numbers = #tpu.dot_dimension_numbers<[1], [0], [0], [1], [0, 0, 1, 1], [], []>} : vector<3x128xbf16>, vector<128x128xbf16>, vector<3x128xf32> -> vector<3x128xf32>
      %113 = arith.addf %106, %112 : vector<3x128xf32>
      %c0_113 = arith.constant 0 : index
      %114 = arith.index_cast %99 : i32 to index
      %c0_114 = arith.constant 0 : index
      %c1_115 = arith.constant 1 : index
      %c0_116 = arith.constant 0 : index
      %115 = vector.load %arg1[%c0_113, %114, %c0_114, %c1_115, %c0_116] : memref<1x9x2x5x128xbf16, #tpu.memory_space<vmem>>, vector<1x1x1x3x128xbf16>
      %116 = vector.shape_cast %115 : vector<1x1x1x3x128xbf16> to vector<3x128xbf16>
      %c14 = arith.constant 14 : index
      %c0_117 = arith.constant 0 : index
      %c0_118 = arith.constant 0 : index
      %117 = vector.load %arg2[%c14, %c0_117, %c0_118] : memref<16x128x128xbf16, #tpu.memory_space<vmem>>, vector<1x128x128xbf16>
      %118 = vector.shape_cast %117 : vector<1x128x128xbf16> to vector<128x128xbf16>
      %cst_119 = arith.constant dense<0.000000e+00> : vector<3x128xf32>
      %119 = tpu.matmul %116, %118, %cst_119 {dimension_numbers = #tpu.dot_dimension_numbers<[1], [0], [0], [1], [0, 0, 1, 1], [], []>} : vector<3x128xbf16>, vector<128x128xbf16>, vector<3x128xf32> -> vector<3x128xf32>
      %120 = arith.addf %113, %119 : vector<3x128xf32>
      %c0_120 = arith.constant 0 : index
      %121 = arith.index_cast %99 : i32 to index
      %c1_121 = arith.constant 1 : index
      %c1_122 = arith.constant 1 : index
      %c0_123 = arith.constant 0 : index
      %122 = vector.load %arg1[%c0_120, %121, %c1_121, %c1_122, %c0_123] : memref<1x9x2x5x128xbf16, #tpu.memory_space<vmem>>, vector<1x1x1x3x128xbf16>
      %123 = vector.shape_cast %122 : vector<1x1x1x3x128xbf16> to vector<3x128xbf16>
      %c15 = arith.constant 15 : index
      %c0_124 = arith.constant 0 : index
      %c0_125 = arith.constant 0 : index
      %124 = vector.load %arg2[%c15, %c0_124, %c0_125] : memref<16x128x128xbf16, #tpu.memory_space<vmem>>, vector<1x128x128xbf16>
      %125 = vector.shape_cast %124 : vector<1x128x128xbf16> to vector<128x128xbf16>
      %cst_126 = arith.constant dense<0.000000e+00> : vector<3x128xf32>
      %126 = tpu.matmul %123, %125, %cst_126 {dimension_numbers = #tpu.dot_dimension_numbers<[1], [0], [0], [1], [0, 0, 1, 1], [], []>} : vector<3x128xbf16>, vector<128x128xbf16>, vector<3x128xf32> -> vector<3x128xf32>
      %127 = arith.addf %120, %126 : vector<3x128xf32>
      %cst_127 = arith.constant dense<0.000000e+00> : vector<128xf32>
      %128 = vector.multi_reduction <add>, %127, %cst_127 [0] : vector<3x128xf32> to vector<128xf32>
      %129 = vector.shape_cast %128 : vector<128xf32> to vector<1x128xf32>
      %130 = arith.addf %arg8, %129 : vector<1x128xf32>
      %131 = arith.mulf %127, %127 : vector<3x128xf32>
      %cst_128 = arith.constant dense<0.000000e+00> : vector<128xf32>
      %132 = vector.multi_reduction <add>, %131, %cst_128 [0] : vector<3x128xf32> to vector<128xf32>
      %133 = vector.shape_cast %132 : vector<128xf32> to vector<1x128xf32>
      %134 = arith.addf %arg9, %133 : vector<1x128xf32>
      %135 = arith.truncf %127 : vector<3x128xf32> to vector<3x128xbf16>
      %c0_129 = arith.constant 0 : index
      %136 = arith.index_cast %arg7 : i32 to index
      %c0_130 = arith.constant 0 : index
      %c0_131 = arith.constant 0 : index
      %137 = vector.load %arg4[%c0_129, %136, %c0_130, %c0_131] : memref<1x3x3x128xbf16, #tpu.memory_space<vmem>>, vector<1x1x3x128xbf16>
      %138 = vector.shape_cast %137 : vector<1x1x3x128xbf16> to vector<3x128xbf16>
      %139 = vector.shape_cast %135 : vector<3x128xbf16> to vector<1x1x3x128xbf16>
      tpu.vector_store %arg4[%c0_129, %136, %c0_130, %c0_131], %139 {strides = array<i32>} : memref<1x3x3x128xbf16, #tpu.memory_space<vmem>>, vector<1x1x3x128xbf16>,
      scf.yield %130, %134 : vector<1x128xf32>, vector<1x128xf32>
    }
    %c3_i32_0 = arith.constant 3 : i32
    %3 = vector.shape_cast %2#0 : vector<1x128xf32> to vector<1x1x128xf32>
    %c0 = arith.constant 0 : index
    %c0_1 = arith.constant 0 : index
    %c0_2 = arith.constant 0 : index
    %4 = vector.load %arg5[%c0, %c0_1, %c0_2] : memref<1x1x128xf32, #tpu.memory_space<vmem>>, vector<1x1x128xf32>
    tpu.vector_store %arg5[%c0, %c0_1, %c0_2], %3 {strides = array<i32>} : memref<1x1x128xf32, #tpu.memory_space<vmem>>, vector<1x1x128xf32>,
    %5 = vector.shape_cast %2#1 : vector<1x128xf32> to vector<1x1x128xf32>
    %c0_3 = arith.constant 0 : index
    %c0_4 = arith.constant 0 : index
    %c0_5 = arith.constant 0 : index
    %6 = vector.load %arg6[%c0_3, %c0_4, %c0_5] : memref<1x1x128xf32, #tpu.memory_space<vmem>>, vector<1x1x128xf32>
    tpu.vector_store %arg6[%c0_3, %c0_4, %c0_5], %5 {strides = array<i32>} : memref<1x1x128xf32, #tpu.memory_space<vmem>>, vector<1x1x128xf32>,
    return
  }
  func.func @transform_0(%arg0: i32) -> (i32, i32, i32, i32, i32) {
    %c0_i32 = arith.constant 0 : i32
    %c0_i32_0 = arith.constant 0 : i32
    %c0_i32_1 = arith.constant 0 : i32
    %c0_i32_2 = arith.constant 0 : i32
    %c0_i32_3 = arith.constant 0 : i32
    return %arg0, %c0_i32, %c0_i32_0, %c0_i32_1, %c0_i32_2 : i32, i32, i32, i32, i32
  }
  func.func @transform_1(%arg0: i32) -> (i32, i32, i32) {
    %c0_i32 = arith.constant 0 : i32
    %c0_i32_0 = arith.constant 0 : i32
    %c0_i32_1 = arith.constant 0 : i32
    %c0_i32_2 = arith.constant 0 : i32
    return %c0_i32, %c0_i32_0, %c0_i32_1 : i32, i32, i32
  }
  func.func @transform_2(%arg0: i32) -> (i32, i32) {
    %c0_i32 = arith.constant 0 : i32
    %c0_i32_0 = arith.constant 0 : i32
    %c0_i32_1 = arith.constant 0 : i32
    return %c0_i32, %c0_i32_0 : i32, i32
  }
  func.func @transform_3(%arg0: i32) -> (i32, i32, i32, i32) {
    %c0_i32 = arith.constant 0 : i32
    %c0_i32_0 = arith.constant 0 : i32
    %c0_i32_1 = arith.constant 0 : i32
    %c0_i32_2 = arith.constant 0 : i32
    return %arg0, %c0_i32, %c0_i32_0, %c0_i32_1 : i32, i32, i32, i32
  }
  func.func @transform_4(%arg0: i32) -> (i32, i32, i32) {
    %c0_i32 = arith.constant 0 : i32
    %c0_i32_0 = arith.constant 0 : i32
    %c0_i32_1 = arith.constant 0 : i32
    return %arg0, %c0_i32, %c0_i32_0 : i32, i32, i32
  }
  func.func @transform_5(%arg0: i32) -> (i32, i32, i32) {
    %c0_i32 = arith.constant 0 : i32
    %c0_i32_0 = arith.constant 0 : i32
    %c0_i32_1 = arith.constant 0 : i32
    return %arg0, %c0_i32, %c0_i32_0 : i32, i32, i32
  }
}

module attributes {stable_mosaic.version = 11 : i64} {
  func.func @_bn_lrelu_kernel(%arg0: i32, %arg1: memref<1x3x3x128xbf16, #tpu.memory_space<vmem>>, %arg2: memref<1x128xf32, #tpu.memory_space<vmem>>, %arg3: memref<1x128xf32, #tpu.memory_space<vmem>>, %arg4: memref<1x3x3x128xbf16, #tpu.memory_space<vmem>>) attributes {dimension_semantics = [#tpu.dimension_semantics<parallel>], iteration_bounds = array<i64: 2>, scalar_prefetch = 0 : i64, scratch_operands = 0 : i64, tpu.core_type = #tpu.core_type<tc>, window_params = [{transform_indices = @transform_0, window_bounds = array<i64: 1, 3, 3, 128>}, {pipeline_mode = #tpu.pipeline_mode<synchronous>, transform_indices = @transform_1, window_bounds = array<i64: 1, 128>}, {pipeline_mode = #tpu.pipeline_mode<synchronous>, transform_indices = @transform_2, window_bounds = array<i64: 1, 128>}, {transform_indices = @transform_3, window_bounds = array<i64: 1, 3, 3, 128>}]} {
    %c0 = arith.constant 0 : index
    %c0_0 = arith.constant 0 : index
    %c0_1 = arith.constant 0 : index
    %c0_2 = arith.constant 0 : index
    %0 = vector.load %arg1[%c0, %c0_0, %c0_1, %c0_2] : memref<1x3x3x128xbf16, #tpu.memory_space<vmem>>, vector<1x3x3x128xbf16>
    %1 = arith.extf %0 : vector<1x3x3x128xbf16> to vector<1x3x3x128xf32>
    %c0_3 = arith.constant 0 : index
    %c0_4 = arith.constant 0 : index
    %2 = vector.load %arg2[%c0_3, %c0_4] : memref<1x128xf32, #tpu.memory_space<vmem>>, vector<1x128xf32>
    %3 = vector.shape_cast %2 : vector<1x128xf32> to vector<1x1x1x128xf32>
    %4 = vector.broadcast %3 : vector<1x1x1x128xf32> to vector<1x3x3x128xf32>
    %5 = arith.mulf %1, %4 : vector<1x3x3x128xf32>
    %c0_5 = arith.constant 0 : index
    %c0_6 = arith.constant 0 : index
    %6 = vector.load %arg3[%c0_5, %c0_6] : memref<1x128xf32, #tpu.memory_space<vmem>>, vector<1x128xf32>
    %7 = vector.shape_cast %6 : vector<1x128xf32> to vector<1x1x1x128xf32>
    %8 = vector.broadcast %7 : vector<1x1x1x128xf32> to vector<1x3x3x128xf32>
    %9 = arith.addf %5, %8 : vector<1x3x3x128xf32>
    %cst = arith.constant 0.000000e+00 : f32
    %10 = vector.broadcast %cst : f32 to vector<1x3x3x128xf32>
    %11 = arith.cmpf oge, %9, %10 : vector<1x3x3x128xf32>
    %cst_7 = arith.constant 2.000000e-01 : f32
    %12 = vector.broadcast %cst_7 : f32 to vector<1x3x3x128xf32>
    %13 = arith.mulf %12, %9 : vector<1x3x3x128xf32>
    %14 = arith.select %11, %9, %13 : vector<1x3x3x128xi1>, vector<1x3x3x128xf32>
    %15 = arith.truncf %14 : vector<1x3x3x128xf32> to vector<1x3x3x128xbf16>
    %c0_8 = arith.constant 0 : index
    %c0_9 = arith.constant 0 : index
    %c0_10 = arith.constant 0 : index
    %c0_11 = arith.constant 0 : index
    %16 = vector.load %arg4[%c0_8, %c0_9, %c0_10, %c0_11] : memref<1x3x3x128xbf16, #tpu.memory_space<vmem>>, vector<1x3x3x128xbf16>
    tpu.vector_store %arg4[%c0_8, %c0_9, %c0_10, %c0_11], %15 {strides = array<i32>} : memref<1x3x3x128xbf16, #tpu.memory_space<vmem>>, vector<1x3x3x128xbf16>,
    return
  }
  func.func @transform_0(%arg0: i32) -> (i32, i32, i32, i32) {
    %c0_i32 = arith.constant 0 : i32
    %c0_i32_0 = arith.constant 0 : i32
    %c0_i32_1 = arith.constant 0 : i32
    %c0_i32_2 = arith.constant 0 : i32
    return %arg0, %c0_i32, %c0_i32_0, %c0_i32_1 : i32, i32, i32, i32
  }
  func.func @transform_1(%arg0: i32) -> (i32, i32) {
    %c0_i32 = arith.constant 0 : i32
    %c0_i32_0 = arith.constant 0 : i32
    %c0_i32_1 = arith.constant 0 : i32
    return %c0_i32, %c0_i32_0 : i32, i32
  }
  func.func @transform_2(%arg0: i32) -> (i32, i32) {
    %c0_i32 = arith.constant 0 : i32
    %c0_i32_0 = arith.constant 0 : i32
    %c0_i32_1 = arith.constant 0 : i32
    return %c0_i32, %c0_i32_0 : i32, i32
  }
  func.func @transform_3(%arg0: i32) -> (i32, i32, i32, i32) {
    %c0_i32 = arith.constant 0 : i32
    %c0_i32_0 = arith.constant 0 : i32
    %c0_i32_1 = arith.constant 0 : i32
    %c0_i32_2 = arith.constant 0 : i32
    return %arg0, %c0_i32, %c0_i32_0, %c0_i32_1 : i32, i32, i32, i32
  }
}

module attributes {stable_mosaic.version = 11 : i64} {
  func.func @_bn_lrelu_kernel(%arg0: i32, %arg1: memref<1x4x4x128xbf16, #tpu.memory_space<vmem>>, %arg2: memref<1x128xf32, #tpu.memory_space<vmem>>, %arg3: memref<1x128xf32, #tpu.memory_space<vmem>>, %arg4: memref<1x4x4x128xbf16, #tpu.memory_space<vmem>>) attributes {dimension_semantics = [#tpu.dimension_semantics<parallel>], iteration_bounds = array<i64: 2>, scalar_prefetch = 0 : i64, scratch_operands = 0 : i64, tpu.core_type = #tpu.core_type<tc>, window_params = [{transform_indices = @transform_0, window_bounds = array<i64: 1, 4, 4, 128>}, {pipeline_mode = #tpu.pipeline_mode<synchronous>, transform_indices = @transform_1, window_bounds = array<i64: 1, 128>}, {pipeline_mode = #tpu.pipeline_mode<synchronous>, transform_indices = @transform_2, window_bounds = array<i64: 1, 128>}, {transform_indices = @transform_3, window_bounds = array<i64: 1, 4, 4, 128>}]} {
    %c0 = arith.constant 0 : index
    %c0_0 = arith.constant 0 : index
    %c0_1 = arith.constant 0 : index
    %c0_2 = arith.constant 0 : index
    %0 = vector.load %arg1[%c0, %c0_0, %c0_1, %c0_2] : memref<1x4x4x128xbf16, #tpu.memory_space<vmem>>, vector<1x4x4x128xbf16>
    %1 = arith.extf %0 : vector<1x4x4x128xbf16> to vector<1x4x4x128xf32>
    %c0_3 = arith.constant 0 : index
    %c0_4 = arith.constant 0 : index
    %2 = vector.load %arg2[%c0_3, %c0_4] : memref<1x128xf32, #tpu.memory_space<vmem>>, vector<1x128xf32>
    %3 = vector.shape_cast %2 : vector<1x128xf32> to vector<1x1x1x128xf32>
    %4 = vector.broadcast %3 : vector<1x1x1x128xf32> to vector<1x4x4x128xf32>
    %5 = arith.mulf %1, %4 : vector<1x4x4x128xf32>
    %c0_5 = arith.constant 0 : index
    %c0_6 = arith.constant 0 : index
    %6 = vector.load %arg3[%c0_5, %c0_6] : memref<1x128xf32, #tpu.memory_space<vmem>>, vector<1x128xf32>
    %7 = vector.shape_cast %6 : vector<1x128xf32> to vector<1x1x1x128xf32>
    %8 = vector.broadcast %7 : vector<1x1x1x128xf32> to vector<1x4x4x128xf32>
    %9 = arith.addf %5, %8 : vector<1x4x4x128xf32>
    %cst = arith.constant 0.000000e+00 : f32
    %10 = vector.broadcast %cst : f32 to vector<1x4x4x128xf32>
    %11 = arith.cmpf oge, %9, %10 : vector<1x4x4x128xf32>
    %cst_7 = arith.constant 2.000000e-01 : f32
    %12 = vector.broadcast %cst_7 : f32 to vector<1x4x4x128xf32>
    %13 = arith.mulf %12, %9 : vector<1x4x4x128xf32>
    %14 = arith.select %11, %9, %13 : vector<1x4x4x128xi1>, vector<1x4x4x128xf32>
    %15 = arith.truncf %14 : vector<1x4x4x128xf32> to vector<1x4x4x128xbf16>
    %c0_8 = arith.constant 0 : index
    %c0_9 = arith.constant 0 : index
    %c0_10 = arith.constant 0 : index
    %c0_11 = arith.constant 0 : index
    %16 = vector.load %arg4[%c0_8, %c0_9, %c0_10, %c0_11] : memref<1x4x4x128xbf16, #tpu.memory_space<vmem>>, vector<1x4x4x128xbf16>
    tpu.vector_store %arg4[%c0_8, %c0_9, %c0_10, %c0_11], %15 {strides = array<i32>} : memref<1x4x4x128xbf16, #tpu.memory_space<vmem>>, vector<1x4x4x128xbf16>,
    return
  }
  func.func @transform_0(%arg0: i32) -> (i32, i32, i32, i32) {
    %c0_i32 = arith.constant 0 : i32
    %c0_i32_0 = arith.constant 0 : i32
    %c0_i32_1 = arith.constant 0 : i32
    %c0_i32_2 = arith.constant 0 : i32
    return %arg0, %c0_i32, %c0_i32_0, %c0_i32_1 : i32, i32, i32, i32
  }
  func.func @transform_1(%arg0: i32) -> (i32, i32) {
    %c0_i32 = arith.constant 0 : i32
    %c0_i32_0 = arith.constant 0 : i32
    %c0_i32_1 = arith.constant 0 : i32
    return %c0_i32, %c0_i32_0 : i32, i32
  }
  func.func @transform_2(%arg0: i32) -> (i32, i32) {
    %c0_i32 = arith.constant 0 : i32
    %c0_i32_0 = arith.constant 0 : i32
    %c0_i32_1 = arith.constant 0 : i32
    return %c0_i32, %c0_i32_0 : i32, i32
  }
  func.func @transform_3(%arg0: i32) -> (i32, i32, i32, i32) {
    %c0_i32 = arith.constant 0 : i32
    %c0_i32_0 = arith.constant 0 : i32
    %c0_i32_1 = arith.constant 0 : i32
    %c0_i32_2 = arith.constant 0 : i32
    return %arg0, %c0_i32, %c0_i32_0, %c0_i32_1 : i32, i32, i32, i32
  }
}

module attributes {stable_mosaic.version = 11 : i64} {
  func.func @_conv_fused_kernel(%arg0: i32, %arg1: memref<1x7x1x7x128xbf16, #tpu.memory_space<vmem>>, %arg2: memref<16x128x128xbf16, #tpu.memory_space<vmem>>, %arg3: memref<1x128xf32, #tpu.memory_space<vmem>>, %arg4: memref<1x4x4x128xbf16, #tpu.memory_space<vmem>>, %arg5: memref<1x1x128xf32, #tpu.memory_space<vmem>>, %arg6: memref<1x1x128xf32, #tpu.memory_space<vmem>>) attributes {dimension_semantics = [#tpu.dimension_semantics<parallel>], iteration_bounds = array<i64: 2>, scalar_prefetch = 0 : i64, scratch_operands = 0 : i64, tpu.core_type = #tpu.core_type<tc>, window_params = [{transform_indices = @transform_0, window_bounds = array<i64: 1, 7, 1, 7, 128>}, {pipeline_mode = #tpu.pipeline_mode<synchronous>, transform_indices = @transform_1, window_bounds = array<i64: 16, 128, 128>}, {pipeline_mode = #tpu.pipeline_mode<synchronous>, transform_indices = @transform_2, window_bounds = array<i64: 1, 128>}, {transform_indices = @transform_3, window_bounds = array<i64: 1, 4, 4, 128>}, {transform_indices = @transform_4, window_bounds = array<i64: 1, 1, 128>}, {transform_indices = @transform_5, window_bounds = array<i64: 1, 1, 128>}]} {
    %cst = arith.constant 0.000000e+00 : f32
    %0 = vector.broadcast %cst : f32 to vector<1x128xf32>
    %c0_i32 = arith.constant 0 : i32
    %c4_i32 = arith.constant 4 : i32
    %1 = arith.addi %c0_i32, %c4_i32 : i32
    %c1_i32 = arith.constant 1 : i32
    %2:2 = scf.for %arg7 = %c0_i32 to %1 step %c1_i32 iter_args(%arg8 = %0, %arg9 = %0) -> (vector<1x128xf32>, vector<1x128xf32>)  : i32 {
      %cst_6 = arith.constant 0.000000e+00 : f32
      %7 = vector.broadcast %cst_6 : f32 to vector<4x128xf32>
      %c1_i32_7 = arith.constant 1 : i32
      %8 = arith.muli %arg7, %c1_i32_7 : i32
      %c0_i32_8 = arith.constant 0 : i32
      %9 = arith.addi %8, %c0_i32_8 : i32
      %c0_9 = arith.constant 0 : index
      %10 = arith.index_cast %9 : i32 to index
      %c0_10 = arith.constant 0 : index
      %c0_11 = arith.constant 0 : index
      %c0_12 = arith.constant 0 : index
      %11 = vector.load %arg1[%c0_9, %10, %c0_10, %c0_11, %c0_12] : memref<1x7x1x7x128xbf16, #tpu.memory_space<vmem>>, vector<1x1x1x4x128xbf16>
      %12 = vector.shape_cast %11 : vector<1x1x1x4x128xbf16> to vector<4x128xbf16>
      %c0_13 = arith.constant 0 : index
      %c0_14 = arith.constant 0 : index
      %c0_15 = arith.constant 0 : index
      %13 = vector.load %arg2[%c0_13, %c0_14, %c0_15] : memref<16x128x128xbf16, #tpu.memory_space<vmem>>, vector<1x128x128xbf16>
      %14 = vector.shape_cast %13 : vector<1x128x128xbf16> to vector<128x128xbf16>
      %cst_16 = arith.constant dense<0.000000e+00> : vector<4x128xf32>
      %15 = tpu.matmul %12, %14, %cst_16 {dimension_numbers = #tpu.dot_dimension_numbers<[1], [0], [0], [1], [0, 0, 1, 1], [], []>} : vector<4x128xbf16>, vector<128x128xbf16>, vector<4x128xf32> -> vector<4x128xf32>
      %16 = arith.addf %7, %15 : vector<4x128xf32>
      %c0_17 = arith.constant 0 : index
      %17 = arith.index_cast %9 : i32 to index
      %c0_18 = arith.constant 0 : index
      %c1 = arith.constant 1 : index
      %c0_19 = arith.constant 0 : index
      %18 = vector.load %arg1[%c0_17, %17, %c0_18, %c1, %c0_19] : memref<1x7x1x7x128xbf16, #tpu.memory_space<vmem>>, vector<1x1x1x4x128xbf16>
      %19 = vector.shape_cast %18 : vector<1x1x1x4x128xbf16> to vector<4x128xbf16>
      %c1_20 = arith.constant 1 : index
      %c0_21 = arith.constant 0 : index
      %c0_22 = arith.constant 0 : index
      %20 = vector.load %arg2[%c1_20, %c0_21, %c0_22] : memref<16x128x128xbf16, #tpu.memory_space<vmem>>, vector<1x128x128xbf16>
      %21 = vector.shape_cast %20 : vector<1x128x128xbf16> to vector<128x128xbf16>
      %cst_23 = arith.constant dense<0.000000e+00> : vector<4x128xf32>
      %22 = tpu.matmul %19, %21, %cst_23 {dimension_numbers = #tpu.dot_dimension_numbers<[1], [0], [0], [1], [0, 0, 1, 1], [], []>} : vector<4x128xbf16>, vector<128x128xbf16>, vector<4x128xf32> -> vector<4x128xf32>
      %23 = arith.addf %16, %22 : vector<4x128xf32>
      %c0_24 = arith.constant 0 : index
      %24 = arith.index_cast %9 : i32 to index
      %c0_25 = arith.constant 0 : index
      %c2 = arith.constant 2 : index
      %c0_26 = arith.constant 0 : index
      %25 = vector.load %arg1[%c0_24, %24, %c0_25, %c2, %c0_26] : memref<1x7x1x7x128xbf16, #tpu.memory_space<vmem>>, vector<1x1x1x4x128xbf16>
      %26 = vector.shape_cast %25 : vector<1x1x1x4x128xbf16> to vector<4x128xbf16>
      %c2_27 = arith.constant 2 : index
      %c0_28 = arith.constant 0 : index
      %c0_29 = arith.constant 0 : index
      %27 = vector.load %arg2[%c2_27, %c0_28, %c0_29] : memref<16x128x128xbf16, #tpu.memory_space<vmem>>, vector<1x128x128xbf16>
      %28 = vector.shape_cast %27 : vector<1x128x128xbf16> to vector<128x128xbf16>
      %cst_30 = arith.constant dense<0.000000e+00> : vector<4x128xf32>
      %29 = tpu.matmul %26, %28, %cst_30 {dimension_numbers = #tpu.dot_dimension_numbers<[1], [0], [0], [1], [0, 0, 1, 1], [], []>} : vector<4x128xbf16>, vector<128x128xbf16>, vector<4x128xf32> -> vector<4x128xf32>
      %30 = arith.addf %23, %29 : vector<4x128xf32>
      %c0_31 = arith.constant 0 : index
      %31 = arith.index_cast %9 : i32 to index
      %c0_32 = arith.constant 0 : index
      %c3 = arith.constant 3 : index
      %c0_33 = arith.constant 0 : index
      %32 = vector.load %arg1[%c0_31, %31, %c0_32, %c3, %c0_33] : memref<1x7x1x7x128xbf16, #tpu.memory_space<vmem>>, vector<1x1x1x4x128xbf16>
      %33 = vector.shape_cast %32 : vector<1x1x1x4x128xbf16> to vector<4x128xbf16>
      %c3_34 = arith.constant 3 : index
      %c0_35 = arith.constant 0 : index
      %c0_36 = arith.constant 0 : index
      %34 = vector.load %arg2[%c3_34, %c0_35, %c0_36] : memref<16x128x128xbf16, #tpu.memory_space<vmem>>, vector<1x128x128xbf16>
      %35 = vector.shape_cast %34 : vector<1x128x128xbf16> to vector<128x128xbf16>
      %cst_37 = arith.constant dense<0.000000e+00> : vector<4x128xf32>
      %36 = tpu.matmul %33, %35, %cst_37 {dimension_numbers = #tpu.dot_dimension_numbers<[1], [0], [0], [1], [0, 0, 1, 1], [], []>} : vector<4x128xbf16>, vector<128x128xbf16>, vector<4x128xf32> -> vector<4x128xf32>
      %37 = arith.addf %30, %36 : vector<4x128xf32>
      %c1_i32_38 = arith.constant 1 : i32
      %38 = arith.muli %arg7, %c1_i32_38 : i32
      %c1_i32_39 = arith.constant 1 : i32
      %39 = arith.addi %38, %c1_i32_39 : i32
      %c0_40 = arith.constant 0 : index
      %40 = arith.index_cast %39 : i32 to index
      %c0_41 = arith.constant 0 : index
      %c0_42 = arith.constant 0 : index
      %c0_43 = arith.constant 0 : index
      %41 = vector.load %arg1[%c0_40, %40, %c0_41, %c0_42, %c0_43] : memref<1x7x1x7x128xbf16, #tpu.memory_space<vmem>>, vector<1x1x1x4x128xbf16>
      %42 = vector.shape_cast %41 : vector<1x1x1x4x128xbf16> to vector<4x128xbf16>
      %c4 = arith.constant 4 : index
      %c0_44 = arith.constant 0 : index
      %c0_45 = arith.constant 0 : index
      %43 = vector.load %arg2[%c4, %c0_44, %c0_45] : memref<16x128x128xbf16, #tpu.memory_space<vmem>>, vector<1x128x128xbf16>
      %44 = vector.shape_cast %43 : vector<1x128x128xbf16> to vector<128x128xbf16>
      %cst_46 = arith.constant dense<0.000000e+00> : vector<4x128xf32>
      %45 = tpu.matmul %42, %44, %cst_46 {dimension_numbers = #tpu.dot_dimension_numbers<[1], [0], [0], [1], [0, 0, 1, 1], [], []>} : vector<4x128xbf16>, vector<128x128xbf16>, vector<4x128xf32> -> vector<4x128xf32>
      %46 = arith.addf %37, %45 : vector<4x128xf32>
      %c0_47 = arith.constant 0 : index
      %47 = arith.index_cast %39 : i32 to index
      %c0_48 = arith.constant 0 : index
      %c1_49 = arith.constant 1 : index
      %c0_50 = arith.constant 0 : index
      %48 = vector.load %arg1[%c0_47, %47, %c0_48, %c1_49, %c0_50] : memref<1x7x1x7x128xbf16, #tpu.memory_space<vmem>>, vector<1x1x1x4x128xbf16>
      %49 = vector.shape_cast %48 : vector<1x1x1x4x128xbf16> to vector<4x128xbf16>
      %c5 = arith.constant 5 : index
      %c0_51 = arith.constant 0 : index
      %c0_52 = arith.constant 0 : index
      %50 = vector.load %arg2[%c5, %c0_51, %c0_52] : memref<16x128x128xbf16, #tpu.memory_space<vmem>>, vector<1x128x128xbf16>
      %51 = vector.shape_cast %50 : vector<1x128x128xbf16> to vector<128x128xbf16>
      %cst_53 = arith.constant dense<0.000000e+00> : vector<4x128xf32>
      %52 = tpu.matmul %49, %51, %cst_53 {dimension_numbers = #tpu.dot_dimension_numbers<[1], [0], [0], [1], [0, 0, 1, 1], [], []>} : vector<4x128xbf16>, vector<128x128xbf16>, vector<4x128xf32> -> vector<4x128xf32>
      %53 = arith.addf %46, %52 : vector<4x128xf32>
      %c0_54 = arith.constant 0 : index
      %54 = arith.index_cast %39 : i32 to index
      %c0_55 = arith.constant 0 : index
      %c2_56 = arith.constant 2 : index
      %c0_57 = arith.constant 0 : index
      %55 = vector.load %arg1[%c0_54, %54, %c0_55, %c2_56, %c0_57] : memref<1x7x1x7x128xbf16, #tpu.memory_space<vmem>>, vector<1x1x1x4x128xbf16>
      %56 = vector.shape_cast %55 : vector<1x1x1x4x128xbf16> to vector<4x128xbf16>
      %c6 = arith.constant 6 : index
      %c0_58 = arith.constant 0 : index
      %c0_59 = arith.constant 0 : index
      %57 = vector.load %arg2[%c6, %c0_58, %c0_59] : memref<16x128x128xbf16, #tpu.memory_space<vmem>>, vector<1x128x128xbf16>
      %58 = vector.shape_cast %57 : vector<1x128x128xbf16> to vector<128x128xbf16>
      %cst_60 = arith.constant dense<0.000000e+00> : vector<4x128xf32>
      %59 = tpu.matmul %56, %58, %cst_60 {dimension_numbers = #tpu.dot_dimension_numbers<[1], [0], [0], [1], [0, 0, 1, 1], [], []>} : vector<4x128xbf16>, vector<128x128xbf16>, vector<4x128xf32> -> vector<4x128xf32>
      %60 = arith.addf %53, %59 : vector<4x128xf32>
      %c0_61 = arith.constant 0 : index
      %61 = arith.index_cast %39 : i32 to index
      %c0_62 = arith.constant 0 : index
      %c3_63 = arith.constant 3 : index
      %c0_64 = arith.constant 0 : index
      %62 = vector.load %arg1[%c0_61, %61, %c0_62, %c3_63, %c0_64] : memref<1x7x1x7x128xbf16, #tpu.memory_space<vmem>>, vector<1x1x1x4x128xbf16>
      %63 = vector.shape_cast %62 : vector<1x1x1x4x128xbf16> to vector<4x128xbf16>
      %c7 = arith.constant 7 : index
      %c0_65 = arith.constant 0 : index
      %c0_66 = arith.constant 0 : index
      %64 = vector.load %arg2[%c7, %c0_65, %c0_66] : memref<16x128x128xbf16, #tpu.memory_space<vmem>>, vector<1x128x128xbf16>
      %65 = vector.shape_cast %64 : vector<1x128x128xbf16> to vector<128x128xbf16>
      %cst_67 = arith.constant dense<0.000000e+00> : vector<4x128xf32>
      %66 = tpu.matmul %63, %65, %cst_67 {dimension_numbers = #tpu.dot_dimension_numbers<[1], [0], [0], [1], [0, 0, 1, 1], [], []>} : vector<4x128xbf16>, vector<128x128xbf16>, vector<4x128xf32> -> vector<4x128xf32>
      %67 = arith.addf %60, %66 : vector<4x128xf32>
      %c1_i32_68 = arith.constant 1 : i32
      %68 = arith.muli %arg7, %c1_i32_68 : i32
      %c2_i32 = arith.constant 2 : i32
      %69 = arith.addi %68, %c2_i32 : i32
      %c0_69 = arith.constant 0 : index
      %70 = arith.index_cast %69 : i32 to index
      %c0_70 = arith.constant 0 : index
      %c0_71 = arith.constant 0 : index
      %c0_72 = arith.constant 0 : index
      %71 = vector.load %arg1[%c0_69, %70, %c0_70, %c0_71, %c0_72] : memref<1x7x1x7x128xbf16, #tpu.memory_space<vmem>>, vector<1x1x1x4x128xbf16>
      %72 = vector.shape_cast %71 : vector<1x1x1x4x128xbf16> to vector<4x128xbf16>
      %c8 = arith.constant 8 : index
      %c0_73 = arith.constant 0 : index
      %c0_74 = arith.constant 0 : index
      %73 = vector.load %arg2[%c8, %c0_73, %c0_74] : memref<16x128x128xbf16, #tpu.memory_space<vmem>>, vector<1x128x128xbf16>
      %74 = vector.shape_cast %73 : vector<1x128x128xbf16> to vector<128x128xbf16>
      %cst_75 = arith.constant dense<0.000000e+00> : vector<4x128xf32>
      %75 = tpu.matmul %72, %74, %cst_75 {dimension_numbers = #tpu.dot_dimension_numbers<[1], [0], [0], [1], [0, 0, 1, 1], [], []>} : vector<4x128xbf16>, vector<128x128xbf16>, vector<4x128xf32> -> vector<4x128xf32>
      %76 = arith.addf %67, %75 : vector<4x128xf32>
      %c0_76 = arith.constant 0 : index
      %77 = arith.index_cast %69 : i32 to index
      %c0_77 = arith.constant 0 : index
      %c1_78 = arith.constant 1 : index
      %c0_79 = arith.constant 0 : index
      %78 = vector.load %arg1[%c0_76, %77, %c0_77, %c1_78, %c0_79] : memref<1x7x1x7x128xbf16, #tpu.memory_space<vmem>>, vector<1x1x1x4x128xbf16>
      %79 = vector.shape_cast %78 : vector<1x1x1x4x128xbf16> to vector<4x128xbf16>
      %c9 = arith.constant 9 : index
      %c0_80 = arith.constant 0 : index
      %c0_81 = arith.constant 0 : index
      %80 = vector.load %arg2[%c9, %c0_80, %c0_81] : memref<16x128x128xbf16, #tpu.memory_space<vmem>>, vector<1x128x128xbf16>
      %81 = vector.shape_cast %80 : vector<1x128x128xbf16> to vector<128x128xbf16>
      %cst_82 = arith.constant dense<0.000000e+00> : vector<4x128xf32>
      %82 = tpu.matmul %79, %81, %cst_82 {dimension_numbers = #tpu.dot_dimension_numbers<[1], [0], [0], [1], [0, 0, 1, 1], [], []>} : vector<4x128xbf16>, vector<128x128xbf16>, vector<4x128xf32> -> vector<4x128xf32>
      %83 = arith.addf %76, %82 : vector<4x128xf32>
      %c0_83 = arith.constant 0 : index
      %84 = arith.index_cast %69 : i32 to index
      %c0_84 = arith.constant 0 : index
      %c2_85 = arith.constant 2 : index
      %c0_86 = arith.constant 0 : index
      %85 = vector.load %arg1[%c0_83, %84, %c0_84, %c2_85, %c0_86] : memref<1x7x1x7x128xbf16, #tpu.memory_space<vmem>>, vector<1x1x1x4x128xbf16>
      %86 = vector.shape_cast %85 : vector<1x1x1x4x128xbf16> to vector<4x128xbf16>
      %c10 = arith.constant 10 : index
      %c0_87 = arith.constant 0 : index
      %c0_88 = arith.constant 0 : index
      %87 = vector.load %arg2[%c10, %c0_87, %c0_88] : memref<16x128x128xbf16, #tpu.memory_space<vmem>>, vector<1x128x128xbf16>
      %88 = vector.shape_cast %87 : vector<1x128x128xbf16> to vector<128x128xbf16>
      %cst_89 = arith.constant dense<0.000000e+00> : vector<4x128xf32>
      %89 = tpu.matmul %86, %88, %cst_89 {dimension_numbers = #tpu.dot_dimension_numbers<[1], [0], [0], [1], [0, 0, 1, 1], [], []>} : vector<4x128xbf16>, vector<128x128xbf16>, vector<4x128xf32> -> vector<4x128xf32>
      %90 = arith.addf %83, %89 : vector<4x128xf32>
      %c0_90 = arith.constant 0 : index
      %91 = arith.index_cast %69 : i32 to index
      %c0_91 = arith.constant 0 : index
      %c3_92 = arith.constant 3 : index
      %c0_93 = arith.constant 0 : index
      %92 = vector.load %arg1[%c0_90, %91, %c0_91, %c3_92, %c0_93] : memref<1x7x1x7x128xbf16, #tpu.memory_space<vmem>>, vector<1x1x1x4x128xbf16>
      %93 = vector.shape_cast %92 : vector<1x1x1x4x128xbf16> to vector<4x128xbf16>
      %c11 = arith.constant 11 : index
      %c0_94 = arith.constant 0 : index
      %c0_95 = arith.constant 0 : index
      %94 = vector.load %arg2[%c11, %c0_94, %c0_95] : memref<16x128x128xbf16, #tpu.memory_space<vmem>>, vector<1x128x128xbf16>
      %95 = vector.shape_cast %94 : vector<1x128x128xbf16> to vector<128x128xbf16>
      %cst_96 = arith.constant dense<0.000000e+00> : vector<4x128xf32>
      %96 = tpu.matmul %93, %95, %cst_96 {dimension_numbers = #tpu.dot_dimension_numbers<[1], [0], [0], [1], [0, 0, 1, 1], [], []>} : vector<4x128xbf16>, vector<128x128xbf16>, vector<4x128xf32> -> vector<4x128xf32>
      %97 = arith.addf %90, %96 : vector<4x128xf32>
      %c1_i32_97 = arith.constant 1 : i32
      %98 = arith.muli %arg7, %c1_i32_97 : i32
      %c3_i32 = arith.constant 3 : i32
      %99 = arith.addi %98, %c3_i32 : i32
      %c0_98 = arith.constant 0 : index
      %100 = arith.index_cast %99 : i32 to index
      %c0_99 = arith.constant 0 : index
      %c0_100 = arith.constant 0 : index
      %c0_101 = arith.constant 0 : index
      %101 = vector.load %arg1[%c0_98, %100, %c0_99, %c0_100, %c0_101] : memref<1x7x1x7x128xbf16, #tpu.memory_space<vmem>>, vector<1x1x1x4x128xbf16>
      %102 = vector.shape_cast %101 : vector<1x1x1x4x128xbf16> to vector<4x128xbf16>
      %c12 = arith.constant 12 : index
      %c0_102 = arith.constant 0 : index
      %c0_103 = arith.constant 0 : index
      %103 = vector.load %arg2[%c12, %c0_102, %c0_103] : memref<16x128x128xbf16, #tpu.memory_space<vmem>>, vector<1x128x128xbf16>
      %104 = vector.shape_cast %103 : vector<1x128x128xbf16> to vector<128x128xbf16>
      %cst_104 = arith.constant dense<0.000000e+00> : vector<4x128xf32>
      %105 = tpu.matmul %102, %104, %cst_104 {dimension_numbers = #tpu.dot_dimension_numbers<[1], [0], [0], [1], [0, 0, 1, 1], [], []>} : vector<4x128xbf16>, vector<128x128xbf16>, vector<4x128xf32> -> vector<4x128xf32>
      %106 = arith.addf %97, %105 : vector<4x128xf32>
      %c0_105 = arith.constant 0 : index
      %107 = arith.index_cast %99 : i32 to index
      %c0_106 = arith.constant 0 : index
      %c1_107 = arith.constant 1 : index
      %c0_108 = arith.constant 0 : index
      %108 = vector.load %arg1[%c0_105, %107, %c0_106, %c1_107, %c0_108] : memref<1x7x1x7x128xbf16, #tpu.memory_space<vmem>>, vector<1x1x1x4x128xbf16>
      %109 = vector.shape_cast %108 : vector<1x1x1x4x128xbf16> to vector<4x128xbf16>
      %c13 = arith.constant 13 : index
      %c0_109 = arith.constant 0 : index
      %c0_110 = arith.constant 0 : index
      %110 = vector.load %arg2[%c13, %c0_109, %c0_110] : memref<16x128x128xbf16, #tpu.memory_space<vmem>>, vector<1x128x128xbf16>
      %111 = vector.shape_cast %110 : vector<1x128x128xbf16> to vector<128x128xbf16>
      %cst_111 = arith.constant dense<0.000000e+00> : vector<4x128xf32>
      %112 = tpu.matmul %109, %111, %cst_111 {dimension_numbers = #tpu.dot_dimension_numbers<[1], [0], [0], [1], [0, 0, 1, 1], [], []>} : vector<4x128xbf16>, vector<128x128xbf16>, vector<4x128xf32> -> vector<4x128xf32>
      %113 = arith.addf %106, %112 : vector<4x128xf32>
      %c0_112 = arith.constant 0 : index
      %114 = arith.index_cast %99 : i32 to index
      %c0_113 = arith.constant 0 : index
      %c2_114 = arith.constant 2 : index
      %c0_115 = arith.constant 0 : index
      %115 = vector.load %arg1[%c0_112, %114, %c0_113, %c2_114, %c0_115] : memref<1x7x1x7x128xbf16, #tpu.memory_space<vmem>>, vector<1x1x1x4x128xbf16>
      %116 = vector.shape_cast %115 : vector<1x1x1x4x128xbf16> to vector<4x128xbf16>
      %c14 = arith.constant 14 : index
      %c0_116 = arith.constant 0 : index
      %c0_117 = arith.constant 0 : index
      %117 = vector.load %arg2[%c14, %c0_116, %c0_117] : memref<16x128x128xbf16, #tpu.memory_space<vmem>>, vector<1x128x128xbf16>
      %118 = vector.shape_cast %117 : vector<1x128x128xbf16> to vector<128x128xbf16>
      %cst_118 = arith.constant dense<0.000000e+00> : vector<4x128xf32>
      %119 = tpu.matmul %116, %118, %cst_118 {dimension_numbers = #tpu.dot_dimension_numbers<[1], [0], [0], [1], [0, 0, 1, 1], [], []>} : vector<4x128xbf16>, vector<128x128xbf16>, vector<4x128xf32> -> vector<4x128xf32>
      %120 = arith.addf %113, %119 : vector<4x128xf32>
      %c0_119 = arith.constant 0 : index
      %121 = arith.index_cast %99 : i32 to index
      %c0_120 = arith.constant 0 : index
      %c3_121 = arith.constant 3 : index
      %c0_122 = arith.constant 0 : index
      %122 = vector.load %arg1[%c0_119, %121, %c0_120, %c3_121, %c0_122] : memref<1x7x1x7x128xbf16, #tpu.memory_space<vmem>>, vector<1x1x1x4x128xbf16>
      %123 = vector.shape_cast %122 : vector<1x1x1x4x128xbf16> to vector<4x128xbf16>
      %c15 = arith.constant 15 : index
      %c0_123 = arith.constant 0 : index
      %c0_124 = arith.constant 0 : index
      %124 = vector.load %arg2[%c15, %c0_123, %c0_124] : memref<16x128x128xbf16, #tpu.memory_space<vmem>>, vector<1x128x128xbf16>
      %125 = vector.shape_cast %124 : vector<1x128x128xbf16> to vector<128x128xbf16>
      %cst_125 = arith.constant dense<0.000000e+00> : vector<4x128xf32>
      %126 = tpu.matmul %123, %125, %cst_125 {dimension_numbers = #tpu.dot_dimension_numbers<[1], [0], [0], [1], [0, 0, 1, 1], [], []>} : vector<4x128xbf16>, vector<128x128xbf16>, vector<4x128xf32> -> vector<4x128xf32>
      %127 = arith.addf %120, %126 : vector<4x128xf32>
      %cst_126 = arith.constant dense<0.000000e+00> : vector<128xf32>
      %128 = vector.multi_reduction <add>, %127, %cst_126 [0] : vector<4x128xf32> to vector<128xf32>
      %129 = vector.shape_cast %128 : vector<128xf32> to vector<1x128xf32>
      %130 = arith.addf %arg8, %129 : vector<1x128xf32>
      %131 = arith.mulf %127, %127 : vector<4x128xf32>
      %cst_127 = arith.constant dense<0.000000e+00> : vector<128xf32>
      %132 = vector.multi_reduction <add>, %131, %cst_127 [0] : vector<4x128xf32> to vector<128xf32>
      %133 = vector.shape_cast %132 : vector<128xf32> to vector<1x128xf32>
      %134 = arith.addf %arg9, %133 : vector<1x128xf32>
      %135 = arith.truncf %127 : vector<4x128xf32> to vector<4x128xbf16>
      %c0_128 = arith.constant 0 : index
      %136 = arith.index_cast %arg7 : i32 to index
      %c0_129 = arith.constant 0 : index
      %c0_130 = arith.constant 0 : index
      %137 = vector.load %arg4[%c0_128, %136, %c0_129, %c0_130] : memref<1x4x4x128xbf16, #tpu.memory_space<vmem>>, vector<1x1x4x128xbf16>
      %138 = vector.shape_cast %137 : vector<1x1x4x128xbf16> to vector<4x128xbf16>
      %139 = vector.shape_cast %135 : vector<4x128xbf16> to vector<1x1x4x128xbf16>
      tpu.vector_store %arg4[%c0_128, %136, %c0_129, %c0_130], %139 {strides = array<i32>} : memref<1x4x4x128xbf16, #tpu.memory_space<vmem>>, vector<1x1x4x128xbf16>,
      scf.yield %130, %134 : vector<1x128xf32>, vector<1x128xf32>
    }
    %c4_i32_0 = arith.constant 4 : i32
    %3 = vector.shape_cast %2#0 : vector<1x128xf32> to vector<1x1x128xf32>
    %c0 = arith.constant 0 : index
    %c0_1 = arith.constant 0 : index
    %c0_2 = arith.constant 0 : index
    %4 = vector.load %arg5[%c0, %c0_1, %c0_2] : memref<1x1x128xf32, #tpu.memory_space<vmem>>, vector<1x1x128xf32>
    tpu.vector_store %arg5[%c0, %c0_1, %c0_2], %3 {strides = array<i32>} : memref<1x1x128xf32, #tpu.memory_space<vmem>>, vector<1x1x128xf32>,
    %5 = vector.shape_cast %2#1 : vector<1x128xf32> to vector<1x1x128xf32>
    %c0_3 = arith.constant 0 : index
    %c0_4 = arith.constant 0 : index
    %c0_5 = arith.constant 0 : index
    %6 = vector.load %arg6[%c0_3, %c0_4, %c0_5] : memref<1x1x128xf32, #tpu.memory_space<vmem>>, vector<1x1x128xf32>
    tpu.vector_store %arg6[%c0_3, %c0_4, %c0_5], %5 {strides = array<i32>} : memref<1x1x128xf32, #tpu.memory_space<vmem>>, vector<1x1x128xf32>,
    return
  }
  func.func @transform_0(%arg0: i32) -> (i32, i32, i32, i32, i32) {
    %c0_i32 = arith.constant 0 : i32
    %c0_i32_0 = arith.constant 0 : i32
    %c0_i32_1 = arith.constant 0 : i32
    %c0_i32_2 = arith.constant 0 : i32
    %c0_i32_3 = arith.constant 0 : i32
    return %arg0, %c0_i32, %c0_i32_0, %c0_i32_1, %c0_i32_2 : i32, i32, i32, i32, i32
  }
  func.func @transform_1(%arg0: i32) -> (i32, i32, i32) {
    %c0_i32 = arith.constant 0 : i32
    %c0_i32_0 = arith.constant 0 : i32
    %c0_i32_1 = arith.constant 0 : i32
    %c0_i32_2 = arith.constant 0 : i32
    return %c0_i32, %c0_i32_0, %c0_i32_1 : i32, i32, i32
  }
  func.func @transform_2(%arg0: i32) -> (i32, i32) {
    %c0_i32 = arith.constant 0 : i32
    %c0_i32_0 = arith.constant 0 : i32
    %c0_i32_1 = arith.constant 0 : i32
    return %c0_i32, %c0_i32_0 : i32, i32
  }
  func.func @transform_3(%arg0: i32) -> (i32, i32, i32, i32) {
    %c0_i32 = arith.constant 0 : i32
    %c0_i32_0 = arith.constant 0 : i32
    %c0_i32_1 = arith.constant 0 : i32
    %c0_i32_2 = arith.constant 0 : i32
    return %arg0, %c0_i32, %c0_i32_0, %c0_i32_1 : i32, i32, i32, i32
  }
  func.func @transform_4(%arg0: i32) -> (i32, i32, i32) {
    %c0_i32 = arith.constant 0 : i32
    %c0_i32_0 = arith.constant 0 : i32
    %c0_i32_1 = arith.constant 0 : i32
    return %arg0, %c0_i32, %c0_i32_0 : i32, i32, i32
  }
  func.func @transform_5(%arg0: i32) -> (i32, i32, i32) {
    %c0_i32 = arith.constant 0 : i32
    %c0_i32_0 = arith.constant 0 : i32
    %c0_i32_1 = arith.constant 0 : i32
    return %arg0, %c0_i32, %c0_i32_0 : i32, i32, i32
  }
}

module attributes {stable_mosaic.version = 11 : i64} {
  func.func @_conv_fused_kernel(%arg0: i32, %arg1: memref<1x8x1x8x128xbf16, #tpu.memory_space<vmem>>, %arg2: memref<16x128x128xbf16, #tpu.memory_space<vmem>>, %arg3: memref<1x128xf32, #tpu.memory_space<vmem>>, %arg4: memref<1x5x5x128xbf16, #tpu.memory_space<vmem>>, %arg5: memref<1x1x128xf32, #tpu.memory_space<vmem>>, %arg6: memref<1x1x128xf32, #tpu.memory_space<vmem>>) attributes {dimension_semantics = [#tpu.dimension_semantics<parallel>], iteration_bounds = array<i64: 2>, scalar_prefetch = 0 : i64, scratch_operands = 0 : i64, tpu.core_type = #tpu.core_type<tc>, window_params = [{transform_indices = @transform_0, window_bounds = array<i64: 1, 8, 1, 8, 128>}, {pipeline_mode = #tpu.pipeline_mode<synchronous>, transform_indices = @transform_1, window_bounds = array<i64: 16, 128, 128>}, {pipeline_mode = #tpu.pipeline_mode<synchronous>, transform_indices = @transform_2, window_bounds = array<i64: 1, 128>}, {transform_indices = @transform_3, window_bounds = array<i64: 1, 5, 5, 128>}, {transform_indices = @transform_4, window_bounds = array<i64: 1, 1, 128>}, {transform_indices = @transform_5, window_bounds = array<i64: 1, 1, 128>}]} {
    %cst = arith.constant 0.000000e+00 : f32
    %0 = vector.broadcast %cst : f32 to vector<1x128xf32>
    %c0_i32 = arith.constant 0 : i32
    %c5_i32 = arith.constant 5 : i32
    %1 = arith.addi %c0_i32, %c5_i32 : i32
    %c1_i32 = arith.constant 1 : i32
    %2:2 = scf.for %arg7 = %c0_i32 to %1 step %c1_i32 iter_args(%arg8 = %0, %arg9 = %0) -> (vector<1x128xf32>, vector<1x128xf32>)  : i32 {
      %cst_6 = arith.constant 0.000000e+00 : f32
      %7 = vector.broadcast %cst_6 : f32 to vector<5x128xf32>
      %c1_i32_7 = arith.constant 1 : i32
      %8 = arith.muli %arg7, %c1_i32_7 : i32
      %c0_i32_8 = arith.constant 0 : i32
      %9 = arith.addi %8, %c0_i32_8 : i32
      %c0_9 = arith.constant 0 : index
      %10 = arith.index_cast %9 : i32 to index
      %c0_10 = arith.constant 0 : index
      %c0_11 = arith.constant 0 : index
      %c0_12 = arith.constant 0 : index
      %11 = vector.load %arg1[%c0_9, %10, %c0_10, %c0_11, %c0_12] : memref<1x8x1x8x128xbf16, #tpu.memory_space<vmem>>, vector<1x1x1x5x128xbf16>
      %12 = vector.shape_cast %11 : vector<1x1x1x5x128xbf16> to vector<5x128xbf16>
      %c0_13 = arith.constant 0 : index
      %c0_14 = arith.constant 0 : index
      %c0_15 = arith.constant 0 : index
      %13 = vector.load %arg2[%c0_13, %c0_14, %c0_15] : memref<16x128x128xbf16, #tpu.memory_space<vmem>>, vector<1x128x128xbf16>
      %14 = vector.shape_cast %13 : vector<1x128x128xbf16> to vector<128x128xbf16>
      %cst_16 = arith.constant dense<0.000000e+00> : vector<5x128xf32>
      %15 = tpu.matmul %12, %14, %cst_16 {dimension_numbers = #tpu.dot_dimension_numbers<[1], [0], [0], [1], [0, 0, 1, 1], [], []>} : vector<5x128xbf16>, vector<128x128xbf16>, vector<5x128xf32> -> vector<5x128xf32>
      %16 = arith.addf %7, %15 : vector<5x128xf32>
      %c0_17 = arith.constant 0 : index
      %17 = arith.index_cast %9 : i32 to index
      %c0_18 = arith.constant 0 : index
      %c1 = arith.constant 1 : index
      %c0_19 = arith.constant 0 : index
      %18 = vector.load %arg1[%c0_17, %17, %c0_18, %c1, %c0_19] : memref<1x8x1x8x128xbf16, #tpu.memory_space<vmem>>, vector<1x1x1x5x128xbf16>
      %19 = vector.shape_cast %18 : vector<1x1x1x5x128xbf16> to vector<5x128xbf16>
      %c1_20 = arith.constant 1 : index
      %c0_21 = arith.constant 0 : index
      %c0_22 = arith.constant 0 : index
      %20 = vector.load %arg2[%c1_20, %c0_21, %c0_22] : memref<16x128x128xbf16, #tpu.memory_space<vmem>>, vector<1x128x128xbf16>
      %21 = vector.shape_cast %20 : vector<1x128x128xbf16> to vector<128x128xbf16>
      %cst_23 = arith.constant dense<0.000000e+00> : vector<5x128xf32>
      %22 = tpu.matmul %19, %21, %cst_23 {dimension_numbers = #tpu.dot_dimension_numbers<[1], [0], [0], [1], [0, 0, 1, 1], [], []>} : vector<5x128xbf16>, vector<128x128xbf16>, vector<5x128xf32> -> vector<5x128xf32>
      %23 = arith.addf %16, %22 : vector<5x128xf32>
      %c0_24 = arith.constant 0 : index
      %24 = arith.index_cast %9 : i32 to index
      %c0_25 = arith.constant 0 : index
      %c2 = arith.constant 2 : index
      %c0_26 = arith.constant 0 : index
      %25 = vector.load %arg1[%c0_24, %24, %c0_25, %c2, %c0_26] : memref<1x8x1x8x128xbf16, #tpu.memory_space<vmem>>, vector<1x1x1x5x128xbf16>
      %26 = vector.shape_cast %25 : vector<1x1x1x5x128xbf16> to vector<5x128xbf16>
      %c2_27 = arith.constant 2 : index
      %c0_28 = arith.constant 0 : index
      %c0_29 = arith.constant 0 : index
      %27 = vector.load %arg2[%c2_27, %c0_28, %c0_29] : memref<16x128x128xbf16, #tpu.memory_space<vmem>>, vector<1x128x128xbf16>
      %28 = vector.shape_cast %27 : vector<1x128x128xbf16> to vector<128x128xbf16>
      %cst_30 = arith.constant dense<0.000000e+00> : vector<5x128xf32>
      %29 = tpu.matmul %26, %28, %cst_30 {dimension_numbers = #tpu.dot_dimension_numbers<[1], [0], [0], [1], [0, 0, 1, 1], [], []>} : vector<5x128xbf16>, vector<128x128xbf16>, vector<5x128xf32> -> vector<5x128xf32>
      %30 = arith.addf %23, %29 : vector<5x128xf32>
      %c0_31 = arith.constant 0 : index
      %31 = arith.index_cast %9 : i32 to index
      %c0_32 = arith.constant 0 : index
      %c3 = arith.constant 3 : index
      %c0_33 = arith.constant 0 : index
      %32 = vector.load %arg1[%c0_31, %31, %c0_32, %c3, %c0_33] : memref<1x8x1x8x128xbf16, #tpu.memory_space<vmem>>, vector<1x1x1x5x128xbf16>
      %33 = vector.shape_cast %32 : vector<1x1x1x5x128xbf16> to vector<5x128xbf16>
      %c3_34 = arith.constant 3 : index
      %c0_35 = arith.constant 0 : index
      %c0_36 = arith.constant 0 : index
      %34 = vector.load %arg2[%c3_34, %c0_35, %c0_36] : memref<16x128x128xbf16, #tpu.memory_space<vmem>>, vector<1x128x128xbf16>
      %35 = vector.shape_cast %34 : vector<1x128x128xbf16> to vector<128x128xbf16>
      %cst_37 = arith.constant dense<0.000000e+00> : vector<5x128xf32>
      %36 = tpu.matmul %33, %35, %cst_37 {dimension_numbers = #tpu.dot_dimension_numbers<[1], [0], [0], [1], [0, 0, 1, 1], [], []>} : vector<5x128xbf16>, vector<128x128xbf16>, vector<5x128xf32> -> vector<5x128xf32>
      %37 = arith.addf %30, %36 : vector<5x128xf32>
      %c1_i32_38 = arith.constant 1 : i32
      %38 = arith.muli %arg7, %c1_i32_38 : i32
      %c1_i32_39 = arith.constant 1 : i32
      %39 = arith.addi %38, %c1_i32_39 : i32
      %c0_40 = arith.constant 0 : index
      %40 = arith.index_cast %39 : i32 to index
      %c0_41 = arith.constant 0 : index
      %c0_42 = arith.constant 0 : index
      %c0_43 = arith.constant 0 : index
      %41 = vector.load %arg1[%c0_40, %40, %c0_41, %c0_42, %c0_43] : memref<1x8x1x8x128xbf16, #tpu.memory_space<vmem>>, vector<1x1x1x5x128xbf16>
      %42 = vector.shape_cast %41 : vector<1x1x1x5x128xbf16> to vector<5x128xbf16>
      %c4 = arith.constant 4 : index
      %c0_44 = arith.constant 0 : index
      %c0_45 = arith.constant 0 : index
      %43 = vector.load %arg2[%c4, %c0_44, %c0_45] : memref<16x128x128xbf16, #tpu.memory_space<vmem>>, vector<1x128x128xbf16>
      %44 = vector.shape_cast %43 : vector<1x128x128xbf16> to vector<128x128xbf16>
      %cst_46 = arith.constant dense<0.000000e+00> : vector<5x128xf32>
      %45 = tpu.matmul %42, %44, %cst_46 {dimension_numbers = #tpu.dot_dimension_numbers<[1], [0], [0], [1], [0, 0, 1, 1], [], []>} : vector<5x128xbf16>, vector<128x128xbf16>, vector<5x128xf32> -> vector<5x128xf32>
      %46 = arith.addf %37, %45 : vector<5x128xf32>
      %c0_47 = arith.constant 0 : index
      %47 = arith.index_cast %39 : i32 to index
      %c0_48 = arith.constant 0 : index
      %c1_49 = arith.constant 1 : index
      %c0_50 = arith.constant 0 : index
      %48 = vector.load %arg1[%c0_47, %47, %c0_48, %c1_49, %c0_50] : memref<1x8x1x8x128xbf16, #tpu.memory_space<vmem>>, vector<1x1x1x5x128xbf16>
      %49 = vector.shape_cast %48 : vector<1x1x1x5x128xbf16> to vector<5x128xbf16>
      %c5 = arith.constant 5 : index
      %c0_51 = arith.constant 0 : index
      %c0_52 = arith.constant 0 : index
      %50 = vector.load %arg2[%c5, %c0_51, %c0_52] : memref<16x128x128xbf16, #tpu.memory_space<vmem>>, vector<1x128x128xbf16>
      %51 = vector.shape_cast %50 : vector<1x128x128xbf16> to vector<128x128xbf16>
      %cst_53 = arith.constant dense<0.000000e+00> : vector<5x128xf32>
      %52 = tpu.matmul %49, %51, %cst_53 {dimension_numbers = #tpu.dot_dimension_numbers<[1], [0], [0], [1], [0, 0, 1, 1], [], []>} : vector<5x128xbf16>, vector<128x128xbf16>, vector<5x128xf32> -> vector<5x128xf32>
      %53 = arith.addf %46, %52 : vector<5x128xf32>
      %c0_54 = arith.constant 0 : index
      %54 = arith.index_cast %39 : i32 to index
      %c0_55 = arith.constant 0 : index
      %c2_56 = arith.constant 2 : index
      %c0_57 = arith.constant 0 : index
      %55 = vector.load %arg1[%c0_54, %54, %c0_55, %c2_56, %c0_57] : memref<1x8x1x8x128xbf16, #tpu.memory_space<vmem>>, vector<1x1x1x5x128xbf16>
      %56 = vector.shape_cast %55 : vector<1x1x1x5x128xbf16> to vector<5x128xbf16>
      %c6 = arith.constant 6 : index
      %c0_58 = arith.constant 0 : index
      %c0_59 = arith.constant 0 : index
      %57 = vector.load %arg2[%c6, %c0_58, %c0_59] : memref<16x128x128xbf16, #tpu.memory_space<vmem>>, vector<1x128x128xbf16>
      %58 = vector.shape_cast %57 : vector<1x128x128xbf16> to vector<128x128xbf16>
      %cst_60 = arith.constant dense<0.000000e+00> : vector<5x128xf32>
      %59 = tpu.matmul %56, %58, %cst_60 {dimension_numbers = #tpu.dot_dimension_numbers<[1], [0], [0], [1], [0, 0, 1, 1], [], []>} : vector<5x128xbf16>, vector<128x128xbf16>, vector<5x128xf32> -> vector<5x128xf32>
      %60 = arith.addf %53, %59 : vector<5x128xf32>
      %c0_61 = arith.constant 0 : index
      %61 = arith.index_cast %39 : i32 to index
      %c0_62 = arith.constant 0 : index
      %c3_63 = arith.constant 3 : index
      %c0_64 = arith.constant 0 : index
      %62 = vector.load %arg1[%c0_61, %61, %c0_62, %c3_63, %c0_64] : memref<1x8x1x8x128xbf16, #tpu.memory_space<vmem>>, vector<1x1x1x5x128xbf16>
      %63 = vector.shape_cast %62 : vector<1x1x1x5x128xbf16> to vector<5x128xbf16>
      %c7 = arith.constant 7 : index
      %c0_65 = arith.constant 0 : index
      %c0_66 = arith.constant 0 : index
      %64 = vector.load %arg2[%c7, %c0_65, %c0_66] : memref<16x128x128xbf16, #tpu.memory_space<vmem>>, vector<1x128x128xbf16>
      %65 = vector.shape_cast %64 : vector<1x128x128xbf16> to vector<128x128xbf16>
      %cst_67 = arith.constant dense<0.000000e+00> : vector<5x128xf32>
      %66 = tpu.matmul %63, %65, %cst_67 {dimension_numbers = #tpu.dot_dimension_numbers<[1], [0], [0], [1], [0, 0, 1, 1], [], []>} : vector<5x128xbf16>, vector<128x128xbf16>, vector<5x128xf32> -> vector<5x128xf32>
      %67 = arith.addf %60, %66 : vector<5x128xf32>
      %c1_i32_68 = arith.constant 1 : i32
      %68 = arith.muli %arg7, %c1_i32_68 : i32
      %c2_i32 = arith.constant 2 : i32
      %69 = arith.addi %68, %c2_i32 : i32
      %c0_69 = arith.constant 0 : index
      %70 = arith.index_cast %69 : i32 to index
      %c0_70 = arith.constant 0 : index
      %c0_71 = arith.constant 0 : index
      %c0_72 = arith.constant 0 : index
      %71 = vector.load %arg1[%c0_69, %70, %c0_70, %c0_71, %c0_72] : memref<1x8x1x8x128xbf16, #tpu.memory_space<vmem>>, vector<1x1x1x5x128xbf16>
      %72 = vector.shape_cast %71 : vector<1x1x1x5x128xbf16> to vector<5x128xbf16>
      %c8 = arith.constant 8 : index
      %c0_73 = arith.constant 0 : index
      %c0_74 = arith.constant 0 : index
      %73 = vector.load %arg2[%c8, %c0_73, %c0_74] : memref<16x128x128xbf16, #tpu.memory_space<vmem>>, vector<1x128x128xbf16>
      %74 = vector.shape_cast %73 : vector<1x128x128xbf16> to vector<128x128xbf16>
      %cst_75 = arith.constant dense<0.000000e+00> : vector<5x128xf32>
      %75 = tpu.matmul %72, %74, %cst_75 {dimension_numbers = #tpu.dot_dimension_numbers<[1], [0], [0], [1], [0, 0, 1, 1], [], []>} : vector<5x128xbf16>, vector<128x128xbf16>, vector<5x128xf32> -> vector<5x128xf32>
      %76 = arith.addf %67, %75 : vector<5x128xf32>
      %c0_76 = arith.constant 0 : index
      %77 = arith.index_cast %69 : i32 to index
      %c0_77 = arith.constant 0 : index
      %c1_78 = arith.constant 1 : index
      %c0_79 = arith.constant 0 : index
      %78 = vector.load %arg1[%c0_76, %77, %c0_77, %c1_78, %c0_79] : memref<1x8x1x8x128xbf16, #tpu.memory_space<vmem>>, vector<1x1x1x5x128xbf16>
      %79 = vector.shape_cast %78 : vector<1x1x1x5x128xbf16> to vector<5x128xbf16>
      %c9 = arith.constant 9 : index
      %c0_80 = arith.constant 0 : index
      %c0_81 = arith.constant 0 : index
      %80 = vector.load %arg2[%c9, %c0_80, %c0_81] : memref<16x128x128xbf16, #tpu.memory_space<vmem>>, vector<1x128x128xbf16>
      %81 = vector.shape_cast %80 : vector<1x128x128xbf16> to vector<128x128xbf16>
      %cst_82 = arith.constant dense<0.000000e+00> : vector<5x128xf32>
      %82 = tpu.matmul %79, %81, %cst_82 {dimension_numbers = #tpu.dot_dimension_numbers<[1], [0], [0], [1], [0, 0, 1, 1], [], []>} : vector<5x128xbf16>, vector<128x128xbf16>, vector<5x128xf32> -> vector<5x128xf32>
      %83 = arith.addf %76, %82 : vector<5x128xf32>
      %c0_83 = arith.constant 0 : index
      %84 = arith.index_cast %69 : i32 to index
      %c0_84 = arith.constant 0 : index
      %c2_85 = arith.constant 2 : index
      %c0_86 = arith.constant 0 : index
      %85 = vector.load %arg1[%c0_83, %84, %c0_84, %c2_85, %c0_86] : memref<1x8x1x8x128xbf16, #tpu.memory_space<vmem>>, vector<1x1x1x5x128xbf16>
      %86 = vector.shape_cast %85 : vector<1x1x1x5x128xbf16> to vector<5x128xbf16>
      %c10 = arith.constant 10 : index
      %c0_87 = arith.constant 0 : index
      %c0_88 = arith.constant 0 : index
      %87 = vector.load %arg2[%c10, %c0_87, %c0_88] : memref<16x128x128xbf16, #tpu.memory_space<vmem>>, vector<1x128x128xbf16>
      %88 = vector.shape_cast %87 : vector<1x128x128xbf16> to vector<128x128xbf16>
      %cst_89 = arith.constant dense<0.000000e+00> : vector<5x128xf32>
      %89 = tpu.matmul %86, %88, %cst_89 {dimension_numbers = #tpu.dot_dimension_numbers<[1], [0], [0], [1], [0, 0, 1, 1], [], []>} : vector<5x128xbf16>, vector<128x128xbf16>, vector<5x128xf32> -> vector<5x128xf32>
      %90 = arith.addf %83, %89 : vector<5x128xf32>
      %c0_90 = arith.constant 0 : index
      %91 = arith.index_cast %69 : i32 to index
      %c0_91 = arith.constant 0 : index
      %c3_92 = arith.constant 3 : index
      %c0_93 = arith.constant 0 : index
      %92 = vector.load %arg1[%c0_90, %91, %c0_91, %c3_92, %c0_93] : memref<1x8x1x8x128xbf16, #tpu.memory_space<vmem>>, vector<1x1x1x5x128xbf16>
      %93 = vector.shape_cast %92 : vector<1x1x1x5x128xbf16> to vector<5x128xbf16>
      %c11 = arith.constant 11 : index
      %c0_94 = arith.constant 0 : index
      %c0_95 = arith.constant 0 : index
      %94 = vector.load %arg2[%c11, %c0_94, %c0_95] : memref<16x128x128xbf16, #tpu.memory_space<vmem>>, vector<1x128x128xbf16>
      %95 = vector.shape_cast %94 : vector<1x128x128xbf16> to vector<128x128xbf16>
      %cst_96 = arith.constant dense<0.000000e+00> : vector<5x128xf32>
      %96 = tpu.matmul %93, %95, %cst_96 {dimension_numbers = #tpu.dot_dimension_numbers<[1], [0], [0], [1], [0, 0, 1, 1], [], []>} : vector<5x128xbf16>, vector<128x128xbf16>, vector<5x128xf32> -> vector<5x128xf32>
      %97 = arith.addf %90, %96 : vector<5x128xf32>
      %c1_i32_97 = arith.constant 1 : i32
      %98 = arith.muli %arg7, %c1_i32_97 : i32
      %c3_i32 = arith.constant 3 : i32
      %99 = arith.addi %98, %c3_i32 : i32
      %c0_98 = arith.constant 0 : index
      %100 = arith.index_cast %99 : i32 to index
      %c0_99 = arith.constant 0 : index
      %c0_100 = arith.constant 0 : index
      %c0_101 = arith.constant 0 : index
      %101 = vector.load %arg1[%c0_98, %100, %c0_99, %c0_100, %c0_101] : memref<1x8x1x8x128xbf16, #tpu.memory_space<vmem>>, vector<1x1x1x5x128xbf16>
      %102 = vector.shape_cast %101 : vector<1x1x1x5x128xbf16> to vector<5x128xbf16>
      %c12 = arith.constant 12 : index
      %c0_102 = arith.constant 0 : index
      %c0_103 = arith.constant 0 : index
      %103 = vector.load %arg2[%c12, %c0_102, %c0_103] : memref<16x128x128xbf16, #tpu.memory_space<vmem>>, vector<1x128x128xbf16>
      %104 = vector.shape_cast %103 : vector<1x128x128xbf16> to vector<128x128xbf16>
      %cst_104 = arith.constant dense<0.000000e+00> : vector<5x128xf32>
      %105 = tpu.matmul %102, %104, %cst_104 {dimension_numbers = #tpu.dot_dimension_numbers<[1], [0], [0], [1], [0, 0, 1, 1], [], []>} : vector<5x128xbf16>, vector<128x128xbf16>, vector<5x128xf32> -> vector<5x128xf32>
      %106 = arith.addf %97, %105 : vector<5x128xf32>
      %c0_105 = arith.constant 0 : index
      %107 = arith.index_cast %99 : i32 to index
      %c0_106 = arith.constant 0 : index
      %c1_107 = arith.constant 1 : index
      %c0_108 = arith.constant 0 : index
      %108 = vector.load %arg1[%c0_105, %107, %c0_106, %c1_107, %c0_108] : memref<1x8x1x8x128xbf16, #tpu.memory_space<vmem>>, vector<1x1x1x5x128xbf16>
      %109 = vector.shape_cast %108 : vector<1x1x1x5x128xbf16> to vector<5x128xbf16>
      %c13 = arith.constant 13 : index
      %c0_109 = arith.constant 0 : index
      %c0_110 = arith.constant 0 : index
      %110 = vector.load %arg2[%c13, %c0_109, %c0_110] : memref<16x128x128xbf16, #tpu.memory_space<vmem>>, vector<1x128x128xbf16>
      %111 = vector.shape_cast %110 : vector<1x128x128xbf16> to vector<128x128xbf16>
      %cst_111 = arith.constant dense<0.000000e+00> : vector<5x128xf32>
      %112 = tpu.matmul %109, %111, %cst_111 {dimension_numbers = #tpu.dot_dimension_numbers<[1], [0], [0], [1], [0, 0, 1, 1], [], []>} : vector<5x128xbf16>, vector<128x128xbf16>, vector<5x128xf32> -> vector<5x128xf32>
      %113 = arith.addf %106, %112 : vector<5x128xf32>
      %c0_112 = arith.constant 0 : index
      %114 = arith.index_cast %99 : i32 to index
      %c0_113 = arith.constant 0 : index
      %c2_114 = arith.constant 2 : index
      %c0_115 = arith.constant 0 : index
      %115 = vector.load %arg1[%c0_112, %114, %c0_113, %c2_114, %c0_115] : memref<1x8x1x8x128xbf16, #tpu.memory_space<vmem>>, vector<1x1x1x5x128xbf16>
      %116 = vector.shape_cast %115 : vector<1x1x1x5x128xbf16> to vector<5x128xbf16>
      %c14 = arith.constant 14 : index
      %c0_116 = arith.constant 0 : index
      %c0_117 = arith.constant 0 : index
      %117 = vector.load %arg2[%c14, %c0_116, %c0_117] : memref<16x128x128xbf16, #tpu.memory_space<vmem>>, vector<1x128x128xbf16>
      %118 = vector.shape_cast %117 : vector<1x128x128xbf16> to vector<128x128xbf16>
      %cst_118 = arith.constant dense<0.000000e+00> : vector<5x128xf32>
      %119 = tpu.matmul %116, %118, %cst_118 {dimension_numbers = #tpu.dot_dimension_numbers<[1], [0], [0], [1], [0, 0, 1, 1], [], []>} : vector<5x128xbf16>, vector<128x128xbf16>, vector<5x128xf32> -> vector<5x128xf32>
      %120 = arith.addf %113, %119 : vector<5x128xf32>
      %c0_119 = arith.constant 0 : index
      %121 = arith.index_cast %99 : i32 to index
      %c0_120 = arith.constant 0 : index
      %c3_121 = arith.constant 3 : index
      %c0_122 = arith.constant 0 : index
      %122 = vector.load %arg1[%c0_119, %121, %c0_120, %c3_121, %c0_122] : memref<1x8x1x8x128xbf16, #tpu.memory_space<vmem>>, vector<1x1x1x5x128xbf16>
      %123 = vector.shape_cast %122 : vector<1x1x1x5x128xbf16> to vector<5x128xbf16>
      %c15 = arith.constant 15 : index
      %c0_123 = arith.constant 0 : index
      %c0_124 = arith.constant 0 : index
      %124 = vector.load %arg2[%c15, %c0_123, %c0_124] : memref<16x128x128xbf16, #tpu.memory_space<vmem>>, vector<1x128x128xbf16>
      %125 = vector.shape_cast %124 : vector<1x128x128xbf16> to vector<128x128xbf16>
      %cst_125 = arith.constant dense<0.000000e+00> : vector<5x128xf32>
      %126 = tpu.matmul %123, %125, %cst_125 {dimension_numbers = #tpu.dot_dimension_numbers<[1], [0], [0], [1], [0, 0, 1, 1], [], []>} : vector<5x128xbf16>, vector<128x128xbf16>, vector<5x128xf32> -> vector<5x128xf32>
      %127 = arith.addf %120, %126 : vector<5x128xf32>
      %cst_126 = arith.constant dense<0.000000e+00> : vector<128xf32>
      %128 = vector.multi_reduction <add>, %127, %cst_126 [0] : vector<5x128xf32> to vector<128xf32>
      %129 = vector.shape_cast %128 : vector<128xf32> to vector<1x128xf32>
      %130 = arith.addf %arg8, %129 : vector<1x128xf32>
      %131 = arith.mulf %127, %127 : vector<5x128xf32>
      %cst_127 = arith.constant dense<0.000000e+00> : vector<128xf32>
      %132 = vector.multi_reduction <add>, %131, %cst_127 [0] : vector<5x128xf32> to vector<128xf32>
      %133 = vector.shape_cast %132 : vector<128xf32> to vector<1x128xf32>
      %134 = arith.addf %arg9, %133 : vector<1x128xf32>
      %c0_128 = arith.constant 0 : index
      %c0_129 = arith.constant 0 : index
      %135 = vector.load %arg3[%c0_128, %c0_129] : memref<1x128xf32, #tpu.memory_space<vmem>>, vector<1x128xf32>
      %136 = vector.broadcast %135 : vector<1x128xf32> to vector<5x128xf32>
      %137 = arith.addf %127, %136 : vector<5x128xf32>
      %cst_130 = arith.constant 5.000000e-01 : f32
      %138 = vector.broadcast %cst_130 : f32 to vector<5x128xf32>
      %139 = arith.mulf %138, %137 : vector<5x128xf32>
      %140 = math.tanh %139 : vector<5x128xf32>
      %cst_131 = arith.constant 1.000000e+00 : f32
      %141 = vector.broadcast %cst_131 : f32 to vector<5x128xf32>
      %142 = arith.addf %140, %141 : vector<5x128xf32>
      %cst_132 = arith.constant 5.000000e-01 : f32
      %143 = vector.broadcast %cst_132 : f32 to vector<5x128xf32>
      %144 = arith.mulf %143, %142 : vector<5x128xf32>
      %145 = arith.truncf %144 : vector<5x128xf32> to vector<5x128xbf16>
      %c0_133 = arith.constant 0 : index
      %146 = arith.index_cast %arg7 : i32 to index
      %c0_134 = arith.constant 0 : index
      %c0_135 = arith.constant 0 : index
      %147 = vector.load %arg4[%c0_133, %146, %c0_134, %c0_135] : memref<1x5x5x128xbf16, #tpu.memory_space<vmem>>, vector<1x1x5x128xbf16>
      %148 = vector.shape_cast %147 : vector<1x1x5x128xbf16> to vector<5x128xbf16>
      %149 = vector.shape_cast %145 : vector<5x128xbf16> to vector<1x1x5x128xbf16>
      tpu.vector_store %arg4[%c0_133, %146, %c0_134, %c0_135], %149 {strides = array<i32>} : memref<1x5x5x128xbf16, #tpu.memory_space<vmem>>, vector<1x1x5x128xbf16>,
      scf.yield %130, %134 : vector<1x128xf32>, vector<1x128xf32>
    }
    %c5_i32_0 = arith.constant 5 : i32
    %3 = vector.shape_cast %2#0 : vector<1x128xf32> to vector<1x1x128xf32>
    %c0 = arith.constant 0 : index
    %c0_1 = arith.constant 0 : index
    %c0_2 = arith.constant 0 : index
    %4 = vector.load %arg5[%c0, %c0_1, %c0_2] : memref<1x1x128xf32, #tpu.memory_space<vmem>>, vector<1x1x128xf32>
    tpu.vector_store %arg5[%c0, %c0_1, %c0_2], %3 {strides = array<i32>} : memref<1x1x128xf32, #tpu.memory_space<vmem>>, vector<1x1x128xf32>,
    %5 = vector.shape_cast %2#1 : vector<1x128xf32> to vector<1x1x128xf32>
    %c0_3 = arith.constant 0 : index
    %c0_4 = arith.constant 0 : index
    %c0_5 = arith.constant 0 : index
    %6 = vector.load %arg6[%c0_3, %c0_4, %c0_5] : memref<1x1x128xf32, #tpu.memory_space<vmem>>, vector<1x1x128xf32>
    tpu.vector_store %arg6[%c0_3, %c0_4, %c0_5], %5 {strides = array<i32>} : memref<1x1x128xf32, #tpu.memory_space<vmem>>, vector<1x1x128xf32>,
    return
  }
  func.func @transform_0(%arg0: i32) -> (i32, i32, i32, i32, i32) {
    %c0_i32 = arith.constant 0 : i32
    %c0_i32_0 = arith.constant 0 : i32
    %c0_i32_1 = arith.constant 0 : i32
    %c0_i32_2 = arith.constant 0 : i32
    %c0_i32_3 = arith.constant 0 : i32
    return %arg0, %c0_i32, %c0_i32_0, %c0_i32_1, %c0_i32_2 : i32, i32, i32, i32, i32
  }
  func.func @transform_1(%arg0: i32) -> (i32, i32, i32) {
    %c0_i32 = arith.constant 0 : i32
    %c0_i32_0 = arith.constant 0 : i32
    %c0_i32_1 = arith.constant 0 : i32
    %c0_i32_2 = arith.constant 0 : i32
    return %c0_i32, %c0_i32_0, %c0_i32_1 : i32, i32, i32
  }
  func.func @transform_2(%arg0: i32) -> (i32, i32) {
    %c0_i32 = arith.constant 0 : i32
    %c0_i32_0 = arith.constant 0 : i32
    %c0_i32_1 = arith.constant 0 : i32
    return %c0_i32, %c0_i32_0 : i32, i32
  }
  func.func @transform_3(%arg0: i32) -> (i32, i32, i32, i32) {
    %c0_i32 = arith.constant 0 : i32
    %c0_i32_0 = arith.constant 0 : i32
    %c0_i32_1 = arith.constant 0 : i32
    %c0_i32_2 = arith.constant 0 : i32
    return %arg0, %c0_i32, %c0_i32_0, %c0_i32_1 : i32, i32, i32, i32
  }
  func.func @transform_4(%arg0: i32) -> (i32, i32, i32) {
    %c0_i32 = arith.constant 0 : i32
    %c0_i32_0 = arith.constant 0 : i32
    %c0_i32_1 = arith.constant 0 : i32
    return %arg0, %c0_i32, %c0_i32_0 : i32, i32, i32
  }
  func.func @transform_5(%arg0: i32) -> (i32, i32, i32) {
    %c0_i32 = arith.constant 0 : i32
    %c0_i32_0 = arith.constant 0 : i32
    %c0_i32_1 = arith.constant 0 : i32
    return %arg0, %c0_i32, %c0_i32_0 : i32, i32, i32
  }
}

</mosaic_0001>

<bundles_post_ra>
// kernel: discriminator_forward.10
= control target key start
LH: loop header
LB: loop body
LE: loop exit
PB: predicated region body
PF: predicated region fallthrough
CT: control target
= control target key end

     0   :  { %s346_s12 = smov 0   ;;  %s395_s0 = inlined_call_operand.vmem [shape: bf16[2,5,5,128], index: 0, kind: input, shape index: {}]   ;;  %s396_s1 = inlined_call_operand.vmem [shape: f32[1,128], index: 1, kind: input, shape index: {}]   ;;  %s397_s2 = inlined_call_operand.vmem [shape: f32[1,128], index: 2, kind: input, shape index: {}]   ;;  %s398_s3 = inlined_call_operand.vmem [shape: bf16[2,5,5,128], index: 3, kind: output, shape index: {}]  }
   0x1 LB: > { %s298_s13 = sadd.s32 4294967295, %s324_s12   ;;  %p302_p0 = scmp.ge.s32.totalorder %s324_s12, 1  ;;  %s324_s12 = sphi %s346_s12, %s13_s12  }
   0x2   : > { %p137_p1 = scmp.lt.s32.totalorder %s324_s12, 3 }
   0x4   : > { %p138_p2 = pnand %p302_p0, %p137_p1 }
   0x5   : > { %p161_p3 = scmp.lt.s32.totalorder (!%p138_p2), %s298_s13, 1  ;;  %v305_v1 = vld [vmem:[%s396_s1] ss:$0 sm:$0xff] (!%p138_p2)  ;;  %vm225_vm0 = vcmask (!%p138_p2), 1042432   ;;  %vm226_vm1 = vsmask.f32 (!%p138_p2), 2304 }
   0x6   : > { %141 = sbr.rel (%p138_p2) target bundleno = 33 (0x21), region = 32  ;;  %v306_v6 = vld [vmem:[%s397_s2] ss:$0 sm:$0xff] (!%p138_p2)  ;;  %vm368_vm5 = vmand (!%p138_p2), %vm225_vm0, %vm226_vm1 }
   0xd   : > { %s402_s13 = smov (!%p161_p3, %s298_s13), 1 }
   0xe   : > { %s309_s14 = smul.u32 20, %s402_s13 }
  0x10   : > { %s165_s17 = scalar_lea.vmem %s395_s0, %s309_s14  ;;  %s366_s24 = scalar_lea.vmem %s398_s3, %s309_s14 }
  0x11   : > { %v171_v0 = vld [vmem:[%s165_s17] sm:$0x7]  ;;  %v172_v2 = vld [vmem:[%s165_s17 + $0x4] sm:$0x7]  ;;  %v173_v5 = vld [vmem:[%s165_s17 + $0x8] sm:$0x7] }
  0x12   : > { %v176_v3 = vunpack.c.l.bf16 %v171_v0  ;;  %v177_v4 = vunpack.c.l.bf16 %v172_v2  ;;  %v178_v7 = vunpack.c.l.bf16 %v173_v5  ;;  %v174_v8 = vld [vmem:[%s165_s17 + $0xc] sm:$0x7]  ;;  %v175_v9 = vld [vmem:[%s165_s17 + $0x10] sm:$0x7]  ;;  %v228_v27 = vld [vmem:[%s366_s24] sm:$0x7] }
  0x13   : > { %v179_v12 = vunpack.c.l.bf16 %v174_v8  ;;  %v180_v13 = vunpack.c.l.bf16 %v175_v9  ;;  %v231_v29 = vld [vmem:[%s366_s24 + $0x4] sm:$0x7]  ;;  %v234_v33 = vld [vmem:[%s366_s24 + $0x8] sm:$0x7]  ;;  %v237_v41 = vld [vmem:[%s366_s24 + $0xc] sm:$0x7] }
  0x14   : > { %v188_v10 = vmul.f32 %v305_v1, %v176_v3  ;;  %v189_v11 = vmul.f32 %v305_v1, %v177_v4  ;;  %v190_v14 = vmul.f32 %v305_v1, %v178_v7  ;;  %v240_v43 = vld [vmem:[%s366_s24 + $0x10] sm:$0x7] }
  0x15   : > { %v191_v17 = vmul.f32 %v305_v1, %v179_v12  ;;  %v192_v18 = vmul.f32 %v305_v1, %v180_v13 }
  0x16   : > { %v200_v15 = vadd.f32 %v306_v6, %v188_v10  ;;  %v201_v16 = vadd.f32 %v306_v6, %v189_v11  ;;  %v202_v19 = vadd.f32 %v306_v6, %v190_v14 }
  0x17   : > { %v203_v23 = vadd.f32 %v306_v6, %v191_v17  ;;  %v204_v24 = vadd.f32 %v306_v6, %v192_v18 }
  0x18   : > { %vm205_vm2 = vcmp.ge.f32.partialorder %v200_v15, 0.0  ;;  %v210_v20 = vmul.f32 0.2, %v200_v15  ;;  %vm206_vm3 = vcmp.ge.f32.partialorder %v201_v16, 0.0  ;;  %v211_v21 = vmul.f32 0.2, %v201_v16 }
  0x19   : > { %vm207_vm4 = vcmp.ge.f32.partialorder %v202_v19, 0.0  ;;  %v212_v22 = vmul.f32 0.2, %v202_v19  ;;  %vm208_vm6 = vcmp.ge.f32.partialorder %v203_v23, 0.0  ;;  %v213_v35 = vmul.f32 0.2, %v203_v23 }
  0x1a   : > { %v215_v25 = vsel %vm205_vm2, %v200_v15, %v210_v20  ;;  %v216_v28 = vsel %vm206_vm3, %v201_v16, %v211_v21  ;;  %vm209_vm7 = vcmp.ge.f32.partialorder %v204_v24, 0.0  ;;  %v214_v36 = vmul.f32 0.2, %v204_v24 }
  0x1b   : > { %v220_v30 = vpack.c.bf16 %v215_v25, %v215_v25  ;;  %v221_v31 = vpack.c.bf16 %v216_v28, %v216_v28  ;;  %v217_v32 = vsel %vm207_vm4, %v202_v19, %v212_v22  ;;  %v218_v40 = vsel %vm208_vm6, %v203_v23, %v213_v35 }
  0x1c   : > { %v222_v34 = vpack.c.bf16 %v217_v32, %v217_v32  ;;  %v219_v42 = vsel %vm209_vm7, %v204_v24, %v214_v36  ;;  %v223_v44 = vpack.c.bf16 %v218_v40, %v218_v40 }
  0x1d   : > { %v229_v37 = vsel %vm368_vm5, %v220_v30, %v228_v27  ;;  %v232_v38 = vsel %vm368_vm5, %v221_v31, %v231_v29  ;;  %v224_v45 = vpack.c.bf16 %v219_v42, %v219_v42 }
  0x1e   : > { %230 = vst [vmem:[%s366_s24] sm:$0x7] %v229_v37  ;;  %233 = vst [vmem:[%s366_s24 + $0x4] sm:$0x7] %v232_v38  ;;  %v235_v39 = vsel %vm368_vm5, %v222_v34, %v234_v33  ;;  %v238_v46 = vsel %vm368_vm5, %v223_v44, %v237_v41 }
  0x1f   : > { %236 = vst [vmem:[%s366_s24 + $0x8] sm:$0x7] %v235_v39  ;;  %v241_v47 = vsel %vm368_vm5, %v224_v45, %v240_v43  ;;  %239 = vst [vmem:[%s366_s24 + $0xc] sm:$0x7] %v238_v46 }
  0x20   : > { %242 = vst [vmem:[%s366_s24 + $0x10] sm:$0x7] %v241_v47 }
  0x21 PF: > { %s13_s12 = sadd.s32 1, %s324_s12  }
  0x22   : > { %p10_p4 = scmp.ge.s32.totalorder %s13_s12, 4  }
  0x24   :  { %12 = sbr.rel (!%p10_p4) target bundleno = 1 (0x1), region = 62 }

// kernel: discriminator_forward.8
= control target key start
LH: loop header
LB: loop body
LE: loop exit
PB: predicated region body
PF: predicated region fallthrough
CT: control target
= control target key end

     0   :  { %11 = vsyncpa [#allocation3], 0  ;;  %s4466_s0 = inlined_call_operand.vmem [shape: bf16[2,20,2,10,128], index: 0, kind: input, shape index: {}]   ;;  %s4467_s1 = inlined_call_operand.vmem [shape: bf16[16,128,128], index: 1, kind: input, shape index: {}]   ;;  %s4468_s2 = inlined_call_operand.vmem [shape: f32[1,128], index: 2, kind: input, shape index: {}]   ;;  %s4469_s3 = inlined_call_operand.vmem [shape: bf16[2,9,9,128], index: 3, kind: output, shape index: {0}]   ;;  %s4470_s4 = inlined_call_operand.hbm [shape: f32[2,1,128], index: 4, kind: output, shape index: {1}]   ;;  %s4471_s5 = inlined_call_operand.hbm [shape: f32[2,1,128], index: 5, kind: output, shape index: {2}]  }
   0x1   :  { %13 = vsyncpa [#allocation3 + $0x1], 0 }
   0x2   :  { %14 = vsyncpa [#allocation5], 0 }
   0x3   :  { %16 = vsyncpa [#allocation5 + $0x1], 0  ;;  %s3702_s18 = smov 0   ;;  %s3704_s19 = smov 0  }
   0x4   :  { %s3706_s20 = smov 0   ;;  %s3708_s21 = smov 0  }
   0x5 LB: > { %s3723_s22 = sadd.s32 4294967295, %s3654_s21   ;;  %s2379_s23 = sadd.s32 4294967294, %s3654_s21   ;;  %s3654_s21 = sphi %s3708_s21, %s4479_s21   ;;  %s3650_s20 = sphi %s3706_s20, %s4478_s20   ;;  %s3646_s19 = sphi %s3704_s19, %s4477_s19   ;;  %s3642_s18 = sphi %s3702_s18, %s4476_s18  }
   0x6   : > { %s3727_s24 = sadd.s32 1, %s3654_s21   ;;  %s123_s25 = sadd.s32 1, %s3650_s20 }
   0x7   : > { %s120_s26 = ssub.s32 %s3654_s21, %s3727_s24  ;;  %p133_p0 = scmp.ne.s32.totalorder %s3650_s20, %s3646_s19 }
   0x8   : > { %p121_p1 = scmp.eq.s32.totalorder %s120_s26, 0  ;;  %p134_p2 = scmp.eq.s32.totalorder %s3723_s22, 1 }
   0x9   : > { %p139_p3 = scmp.ne.s32.totalorder %s3646_s19, %s3642_s18  ;;  %p140_p4 = scmp.eq.s32.totalorder %s2379_s23, 1 }
   0xa   : > { %s3738_s27 = scalar_select %p121_p1, %s3650_s20, %s123_s25  }
   0xb   : > { %p3740_p5 = por %p134_p2, %p133_p0  ;;  %p3744_p6 = por %p140_p4, %p139_p3 }
   0xc   : > { %p2382_p7 = scmp.ge.s32.totalorder %s3654_s21, 1  ;;  %p198_p8 = scmp.lt.s32.totalorder %s3654_s21, 3 }
   0xe   : > { %p199_p9 = pnand %p2382_p7, %p198_p8 }
   0xf   : > { %s3751_s30 = sand.u32 (!%p199_p9), 1, %s3646_s19   ;;  %p234_p10 = scmp.lt.s32.totalorder (!%p199_p9), %s3723_s22, 1  ;;  %v3767_v0 = vmov (!%p199_p9), 0.0   ;;  %v3769_v1 = vmov (!%p199_p9), 0.0  }
  0x10   : > { %202 = sbr.rel (%p199_p9) target bundleno = 560 (0x230), region = 32  ;;  %s227_s15 = scalar_lea.vmem (!%p199_p9), [#allocation2], %s3751_s30 }
  0x11   : > { %s233_s16 = scalar_lea.vmem (!%p199_p9), [#allocation4], %s3751_s30  ;;  %s3771_s17 = smov (!%p199_p9), 0  }
  0x17   : > { %s235_s6 = scalar_select %p234_p10, %s3723_s22, 1 }
  0x19   : > { %s3340_s7 = smul.u32 320, %s235_s6 }
  0x1a   : > { %s3341_s8 = smul.u32 72, %s235_s6 }
  0x1b   : > { %s3758_s11 = scalar_lea.vmem %s4466_s0, %s3340_s7 }
  0x1c   : > { %s3763_s14 = scalar_lea.vmem %s4469_s3, %s3341_s8 }
  0x1d LB: >> { %v3412_v2 = vld [vmem:[%s4467_s1 + $0x40] sm:$0xff]   ;;  %v3668_v3 = vmov 0.0   ;;  %v3414_v5 = vld [vmem:[%s4467_s1 + $0x48] sm:$0xff]   ;;  %vm3669_vm0 = vmmov 0   ;;  %v3416_v7 = vld [vmem:[%s4467_s1 + $0x50] sm:$0xff]   ;;  %s2804_s9 = sshll.u32 %s3666_s17, 5  ;;  %s3666_s17 = sphi %s3771_s17, %s250_s17   ;;  %v3662_v1 = vphi %v3769_v1, %v4475_v1   ;;  %v3658_v0 = vphi %v3767_v0, %v4474_v0  }
  0x1e   : >> { %2962 = vmatprep.subr.bf16.mxu1 %v3668_v3  ;;  %3122 = vmatprep.subr.bf16.mxu0 %v3668_v3  ;;  %v3413_v4 = vld [vmem:[%s4467_s1 + $0x200] sm:$0xff]   ;;  %v3415_v6 = vld [vmem:[%s4467_s1 + $0x208] sm:$0xff]   ;;  %v3417_v8 = vld [vmem:[%s4467_s1 + $0x210] sm:$0xff]   ;;  %s3827_s25 = scalar_lea.vmem %s3758_s11, %s2804_s9  ;;  %vm2132_vm1 = vcmask 1040384   ;;  %vm2180_vm3 = vsmask.f32 256 }
  0x1f   : >> { %2963 = vmatpush3.bf16.msra.mxu1 %v3412_v2  ;;  %2978 = vmatprep.mubr.msk.bf16.mxu1 %vm3669_vm0, %v3668_v3  ;;  %v3418_v9 = vld [vmem:[%s4467_s1 + $0x58] sm:$0xff]   ;;  %v3420_v11 = vld [vmem:[%s4467_s1 + $0x60] sm:$0xff]   ;;  %v3422_v13 = vld [vmem:[%s4467_s1 + $0x68] sm:$0xff]  }
  0x20   : >> { %3123 = vmatpush3.bf16.msra.mxu0 %v3413_v4  ;;  %2964 = vmatprep.subr.bf16.mxu1 %v3668_v3  ;;  %v3419_v10 = vld [vmem:[%s4467_s1 + $0x218] sm:$0xff]   ;;  %v3421_v12 = vld [vmem:[%s4467_s1 + $0x220] sm:$0xff]   ;;  %v3423_v14 = vld [vmem:[%s4467_s1 + $0x228] sm:$0xff]  }
  0x21   : >> { %3124 = vmatprep.subr.bf16.mxu0 %v3668_v3  ;;  %3138 = vmatprep.mubr.msk.bf16.mxu0 %vm3669_vm0, %v3668_v3  ;;  %v3424_v15 = vld [vmem:[%s4467_s1 + $0x70] sm:$0xff]   ;;  %v3426_v17 = vld [vmem:[%s4467_s1 + $0x78] sm:$0xff]   ;;  %v3855_v19 = vld [vmem:[%s3827_s25 + $0x8] sm:$0x1f]  }
  0x22   : >> { %v3425_v16 = vld [vmem:[%s4467_s1 + $0x230] sm:$0xff]   ;;  %v3427_v18 = vld [vmem:[%s4467_s1 + $0x238] sm:$0xff]   ;;  %v3429_v20 = vld [vmem:[%s4467_s1] sm:$0xff]  }
  0x23   : >> { %2965 = vmatpush3.bf16.msra.mxu1 %v3414_v5  ;;  %v3861_v21 = vld [vmem:[%s3827_s25 + $0x20] sm:$0x1f]   ;;  %v3432_v23 = vld [vmem:[%s4467_s1 + $0x8] sm:$0xff]   ;;  %v3434_v25 = vld [vmem:[%s4467_s1 + $0x10] sm:$0xff]  }
  0x24   : >> { %3125 = vmatpush3.bf16.msra.mxu0 %v3415_v6  ;;  %2966 = vmatprep.subr.bf16.mxu1 %v3668_v3  ;;  %v3431_v22 = vld [vmem:[%s4467_s1 + $0x240] sm:$0xff]   ;;  %v3433_v24 = vld [vmem:[%s4467_s1 + $0x248] sm:$0xff]   ;;  %v3435_v26 = vld [vmem:[%s4467_s1 + $0x250] sm:$0xff]   ;;  %v1449_v52 = vshll.u32 %v3861_v21, 16  ;;  %v1447_v55 = vshrl.u32 %v3861_v21, 16 }
  0x25   : >> { %3126 = vmatprep.subr.bf16.mxu0 %v3668_v3  ;;  %v3436_v27 = vld [vmem:[%s4467_s1 + $0x18] sm:$0xff]   ;;  %v3438_v29 = vld [vmem:[%s4467_s1 + $0x20] sm:$0xff]   ;;  %v3440_v31 = vld [vmem:[%s4467_s1 + $0x28] sm:$0xff]  }
  0x26   : >> { %v3437_v28 = vld [vmem:[%s4467_s1 + $0x258] sm:$0xff]   ;;  %v3439_v30 = vld [vmem:[%s4467_s1 + $0x260] sm:$0xff]   ;;  %v3441_v32 = vld [vmem:[%s4467_s1 + $0x268] sm:$0xff]   ;;  %v1451_v58 = vrot.slane %v1449_v52, 1 }
  0x27   : >> { %2967 = vmatpush3.bf16.msra.mxu1 %v3416_v7  ;;  %v3442_v33 = vld [vmem:[%s4467_s1 + $0x30] sm:$0xff]   ;;  %v3444_v35 = vld [vmem:[%s4467_s1 + $0x38] sm:$0xff]   ;;  %v3446_v37 = vld [vmem:[%s3827_s25] sm:$0x1f]  }
  0x28   : >> { %3127 = vmatpush3.bf16.msra.mxu0 %v3417_v8  ;;  %2968 = vmatprep.subr.bf16.mxu1 %v3668_v3  ;;  %v3443_v34 = vld [vmem:[%s4467_s1 + $0x270] sm:$0xff]   ;;  %v3445_v36 = vld [vmem:[%s4467_s1 + $0x278] sm:$0xff]   ;;  %v3447_v38 = vld [vmem:[%s4467_s1 + $0x80] sm:$0xff]   ;;  %v507_v51 = vshll.u32 %v3446_v37, 16  ;;  %v505_v56 = vshrl.u32 %v3446_v37, 16  ;;  %v1452_v63 = vor.u32 %v1451_v58, %v1447_v55 }
  0x29   : >> { %3128 = vmatprep.subr.bf16.mxu0 %v3668_v3  ;;  %v3935_v39 = vld [vmem:[%s3827_s25 + $0x28] sm:$0x1f]   ;;  %v3449_v40 = vld [vmem:[%s4467_s1 + $0x280] sm:$0xff]   ;;  %v3452_v43 = vld [vmem:[%s4467_s1 + $0x90] sm:$0xff]  }
  0x2a   : >> { %v3450_v41 = vld [vmem:[%s4467_s1 + $0x88] sm:$0xff]   ;;  %v3453_v44 = vld [vmem:[%s4467_s1 + $0x290] sm:$0xff]   ;;  %v3454_v45 = vld [vmem:[%s4467_s1 + $0x98] sm:$0xff]   ;;  %v509_v57 = vrot.slane %v507_v51, 1 }
  0x2b   : >> { %2969 = vmatpush3.bf16.msra.mxu1 %v3418_v9  ;;  %v3451_v42 = vld [vmem:[%s4467_s1 + $0x288] sm:$0xff]   ;;  %v3455_v46 = vld [vmem:[%s4467_s1 + $0x298] sm:$0xff]   ;;  %v3456_v47 = vld [vmem:[%s4467_s1 + $0xa0] sm:$0xff]  }
  0x2c   : >> { %3129 = vmatpush3.bf16.msra.mxu0 %v3419_v10  ;;  %2970 = vmatprep.subr.bf16.mxu1 %v3668_v3  ;;  %v3457_v48 = vld [vmem:[%s4467_s1 + $0x2a0] sm:$0xff]   ;;  %v3458_v49 = vld [vmem:[%s4467_s1 + $0xa8] sm:$0xff]   ;;  %v3460_v53 = vld [vmem:[%s4467_s1 + $0xb0] sm:$0xff]   ;;  %v510_v61 = vor.u32 %v509_v57, %v505_v56 }
  0x2d   : >> { %3130 = vmatprep.subr.bf16.mxu0 %v3668_v3  ;;  %v3459_v50 = vld [vmem:[%s4467_s1 + $0x2a8] sm:$0xff]   ;;  %v3461_v54 = vld [vmem:[%s4467_s1 + $0x2b0] sm:$0xff]   ;;  %v3462_v59 = vld [vmem:[%s4467_s1 + $0xb8] sm:$0xff]  }
  0x2e   : >> { %v3463_v60 = vld [vmem:[%s4467_s1 + $0x2b8] sm:$0xff]   ;;  %v3464_v62 = vld [vmem:[%s4467_s1 + $0xc0] sm:$0xff]   ;;  %v3466_v4 = vld [vmem:[%s4467_s1 + $0xc8] sm:$0xff]  }
  0x2f   : >> { %2971 = vmatpush3.bf16.msra.mxu1 %v3420_v11  ;;  %v3465_v2 = vld [vmem:[%s4467_s1 + $0x2c0] sm:$0xff]   ;;  %v3467_v5 = vld [vmem:[%s4467_s1 + $0x2c8] sm:$0xff]   ;;  %v3468_v6 = vld [vmem:[%s4467_s1 + $0xd0] sm:$0xff]  }
  0x30   : >> { %3131 = vmatpush3.bf16.msra.mxu0 %v3421_v12  ;;  %2972 = vmatprep.subr.bf16.mxu1 %v3668_v3  ;;  %v3469_v7 = vld [vmem:[%s4467_s1 + $0x2d0] sm:$0xff]   ;;  %v3470_v8 = vld [vmem:[%s4467_s1 + $0xd8] sm:$0xff]   ;;  %v3472_v10 = vld [vmem:[%s4467_s1 + $0xe0] sm:$0xff]  }
  0x31   : >> { %3132 = vmatprep.subr.bf16.mxu0 %v3668_v3  ;;  %v3471_v9 = vld [vmem:[%s4467_s1 + $0x2d8] sm:$0xff]   ;;  %v3473_v11 = vld [vmem:[%s4467_s1 + $0x2e0] sm:$0xff]   ;;  %v3474_v12 = vld [vmem:[%s4467_s1 + $0xe8] sm:$0xff]  }
  0x32   : >> { %v3505_v51 = vld [vmem:[%s4467_s1 + $0x358] sm:$0xff]   ;;  %v3506_v52 = vld [vmem:[%s4467_s1 + $0x160] sm:$0xff]   ;;  %v3509_v55 = vld [vmem:[%s4467_s1 + $0x368] sm:$0xff]  }
  0x33   : >> { %2973 = vmatpush3.bf16.msra.mxu1 %v3422_v13  ;;  %v3475_v13 = vld [vmem:[%s4467_s1 + $0x2e8] sm:$0xff]   ;;  %v3510_v56 = vld [vmem:[%s4467_s1 + $0x170] sm:$0xff]   ;;  %v3512_v58 = vld [vmem:[%s4467_s1 + $0x178] sm:$0xff]  }
  0x34   : >> { %3133 = vmatpush3.bf16.msra.mxu0 %v3423_v14  ;;  %2974 = vmatprep.subr.bf16.mxu1 %v3668_v3  ;;  %v623_v14 = vshll.u32 %v3855_v19, 16  ;;  %v3511_v57 = vld [vmem:[%s4467_s1 + $0x370] sm:$0xff]   ;;  %vm2181_vm5 = vmand %vm2132_vm1, %vm2180_vm3 }
  0x35   : >> { %3134 = vmatprep.subr.bf16.mxu0 %v3668_v3 }
  0x37   : >> { %2975 = vmatpush3.bf16.msra.mxu1 %v3424_v15  ;;  %v3476_v15 = vld [vmem:[%s4467_s1 + $0xf0] sm:$0xff]  }
  0x38   : >> { %3135 = vmatpush3.bf16.msra.mxu0 %v3425_v16  ;;  %2976 = vmatprep.subr.bf16.mxu1 %v3668_v3  ;;  %v1565_v16 = vshll.u32 %v3935_v39, 16 }
  0x39   : >> { %3136 = vmatprep.subr.bf16.mxu0 %v3668_v3 }
  0x3b   : >> { %2977 = vmatpush3.bf16.msra.mxu1 %v3426_v17  ;;  %v3477_v17 = vld [vmem:[%s4467_s1 + $0x2f0] sm:$0xff]  }
  0x3c   : >> { %3137 = vmatpush3.bf16.msra.mxu0 %v3427_v18  ;;  %2982 = vmatprep.subr.bf16.mxu1 %v3668_v3  ;;  %v621_v18 = vshrl.u32 %v3855_v19, 16 }
  0x3d   : >> { %3142 = vmatprep.subr.bf16.mxu0 %v3668_v3 }
  0x3e   : >> { %2979 = vmatmul.mubr.bf16.vlgmr.msra.gmra.mrb[0].mxu1 %v3855_v19 }
  0x3f   : >> { %2983 = vmatpush3.bf16.msra.mxu1 %v3429_v20  ;;  %3139 = vmatmul.mubr.bf16.vlgmr.msra.gmra.mrb[0].mxu0 %v3861_v21  ;;  %v625_v20 = vrot.slane %v623_v14, 1  ;;  %v1563_v21 = vshrl.u32 %v3935_v39, 16  ;;  %v3528_v14 = vld [vmem:[%s4467_s1 + $0x1b0] sm:$0xff]  }
  0x40   : >> { %3143 = vmatpush3.bf16.msra.mxu0 %v3431_v22  ;;  %2984 = vmatprep.subr.bf16.mxu1 %v3668_v3  ;;  %v3478_v22 = vld [vmem:[%s4467_s1 + $0xf8] sm:$0xff]  }
  0x41   : >> { %3144 = vmatprep.subr.bf16.mxu0 %v3668_v3  ;;  %2998 = vmatprep.mubr.msk.bf16.mxu1 %vm3669_vm0, %v3668_v3  ;;  %v626_v19 = vor.u32 %v625_v20, %v621_v18  ;;  %v3530_v20 = vld [vmem:[%s4467_s1 + $0x1b8] sm:$0xff]  }
  0x42   : >> { %3158 = vmatprep.mubr.msk.bf16.mxu0 %vm3669_vm0, %v3668_v3 }
  0x43   : >> { %2985 = vmatpush3.bf16.msra.mxu1 %v3432_v23  ;;  %v1567_v23 = vrot.slane %v1565_v16, 1  ;;  %v3529_v16 = vld [vmem:[%s4467_s1 + $0x3b0] sm:$0xff]  }
  0x44   : >> { %3145 = vmatpush3.bf16.msra.mxu0 %v3433_v24  ;;  %2986 = vmatprep.subr.bf16.mxu1 %v3668_v3  ;;  %v3479_v24 = vld [vmem:[%s4467_s1 + $0x2f8] sm:$0xff]  }
  0x45   : >> { %3146 = vmatprep.subr.bf16.mxu0 %v3668_v3 }
  0x47   : >> { %2987 = vmatpush3.bf16.msra.mxu1 %v3434_v25  ;;  %v3480_v25 = vld [vmem:[%s4467_s1 + $0x100] sm:$0xff]  }
  0x48   : >> { %3147 = vmatpush3.bf16.msra.mxu0 %v3435_v26  ;;  %2988 = vmatprep.subr.bf16.mxu1 %v3668_v3  ;;  %v1568_v26 = vor.u32 %v1567_v23, %v1563_v21  ;;  %v3531_v23 = vld [vmem:[%s4467_s1 + $0x3b8] sm:$0xff]  }
  0x49   : >> { %3148 = vmatprep.subr.bf16.mxu0 %v3668_v3 }
  0x4b   : >> { %2989 = vmatpush3.bf16.msra.mxu1 %v3436_v27  ;;  %v3481_v27 = vld [vmem:[%s4467_s1 + $0x300] sm:$0xff]  }
  0x4c   : >> { %3149 = vmatpush3.bf16.msra.mxu0 %v3437_v28  ;;  %2990 = vmatprep.subr.bf16.mxu1 %v3668_v3  ;;  %v3482_v28 = vld [vmem:[%s4467_s1 + $0x108] sm:$0xff]  }
  0x4d   : >> { %3150 = vmatprep.subr.bf16.mxu0 %v3668_v3 }
  0x4f   : >> { %2991 = vmatpush3.bf16.msra.mxu1 %v3438_v29  ;;  %v3483_v29 = vld [vmem:[%s4467_s1 + $0x308] sm:$0xff]  }
  0x50   : >> { %3151 = vmatpush3.bf16.msra.mxu0 %v3439_v30  ;;  %2992 = vmatprep.subr.bf16.mxu1 %v3668_v3  ;;  %v3484_v30 = vld [vmem:[%s4467_s1 + $0x110] sm:$0xff]  }
  0x51   : >> { %3152 = vmatprep.subr.bf16.mxu0 %v3668_v3 }
  0x53   : >> { %2993 = vmatpush3.bf16.msra.mxu1 %v3440_v31  ;;  %v3485_v31 = vld [vmem:[%s4467_s1 + $0x310] sm:$0xff]  }
  0x54   : >> { %3153 = vmatpush3.bf16.msra.mxu0 %v3441_v32  ;;  %2994 = vmatprep.subr.bf16.mxu1 %v3668_v3  ;;  %v3486_v32 = vld [vmem:[%s4467_s1 + $0x118] sm:$0xff]  }
  0x55   : >> { %3154 = vmatprep.subr.bf16.mxu0 %v3668_v3 }
  0x57   : >> { %2995 = vmatpush3.bf16.msra.mxu1 %v3442_v33  ;;  %v3487_v33 = vld [vmem:[%s4467_s1 + $0x318] sm:$0xff]  }
  0x58   : >> { %3155 = vmatpush3.bf16.msra.mxu0 %v3443_v34  ;;  %2996 = vmatprep.subr.bf16.mxu1 %v3668_v3  ;;  %v3488_v34 = vld [vmem:[%s4467_s1 + $0x120] sm:$0xff]  }
  0x59   : >> { %3156 = vmatprep.subr.bf16.mxu0 %v3668_v3 }
  0x5b   : >> { %2997 = vmatpush3.bf16.msra.mxu1 %v3444_v35  ;;  %v3489_v35 = vld [vmem:[%s4467_s1 + $0x320] sm:$0xff]  }
  0x5c   : >> { %3157 = vmatpush3.bf16.msra.mxu0 %v3445_v36  ;;  %3002 = vmatprep.subr.bf16.mxu1 %v3668_v3  ;;  %v3490_v36 = vld [vmem:[%s4467_s1 + $0x128] sm:$0xff]  }
  0x5d   : >> { %3162 = vmatprep.subr.bf16.mxu0 %v3668_v3 }
  0x5e   : >> { %2999 = vmatmul.mubr.bf16.vlgmr.msra.gmra.mrb[0].mxu1 %v3446_v37  ;;  %v3491_v37 = vld [vmem:[%s4467_s1 + $0x328] sm:$0xff]  }
  0x5f   : >> { %3003 = vmatpush3.bf16.msra.mxu1 %v3447_v38  ;;  %3159 = vmatmul.mubr.bf16.vlgmr.msra.gmra.mrb[0].mxu0 %v3935_v39  ;;  %v3492_v38 = vld [vmem:[%s4467_s1 + $0x130] sm:$0xff]  }
  0x60   : >> { %3163 = vmatpush3.bf16.msra.mxu0 %v3449_v40  ;;  %3004 = vmatprep.subr.bf16.mxu1 %v3668_v3  ;;  %v3493_v39 = vld [vmem:[%s4467_s1 + $0x330] sm:$0xff]   ;;  %v3494_v40 = vld [vmem:[%s4467_s1 + $0x138] sm:$0xff]  }
  0x61   : >> { %3164 = vmatprep.subr.bf16.mxu0 %v3668_v3  ;;  %3018 = vmatprep.mubr.msk.bf16.mxu1 %vm3669_vm0, %v3668_v3 }
  0x62   : >> { %3178 = vmatprep.mubr.msk.bf16.mxu0 %vm3669_vm0, %v3668_v3 }
  0x63   : >> { %3005 = vmatpush3.bf16.msra.mxu1 %v3450_v41  ;;  %v3495_v41 = vld [vmem:[%s4467_s1 + $0x338] sm:$0xff]  }
  0x64   : >> { %3165 = vmatpush3.bf16.msra.mxu0 %v3451_v42  ;;  %3006 = vmatprep.subr.bf16.mxu1 %v3668_v3  ;;  %v4146_v42 = vld [vmem:[%s3827_s25 + $0x10] sm:$0x1f]  }
  0x65   : >> { %3166 = vmatprep.subr.bf16.mxu0 %v3668_v3 }
  0x67   : >> { %3007 = vmatpush3.bf16.msra.mxu1 %v3452_v43  ;;  %v3497_v43 = vld [vmem:[%s4467_s1 + $0x140] sm:$0xff]  }
  0x68   : >> { %3167 = vmatpush3.bf16.msra.mxu0 %v3453_v44  ;;  %3008 = vmatprep.subr.bf16.mxu1 %v3668_v3  ;;  %v4152_v44 = vld [vmem:[%s3827_s25 + $0x30] sm:$0x1f]  }
  0x69   : >> { %3168 = vmatprep.subr.bf16.mxu0 %v3668_v3  ;;  %v1918_v21 = vshrl.u32 %v4152_v44, 16 }
  0x6b   : >> { %3009 = vmatpush3.bf16.msra.mxu1 %v3454_v45  ;;  %v3499_v45 = vld [vmem:[%s4467_s1 + $0x340] sm:$0xff]  }
  0x6c   : >> { %3169 = vmatpush3.bf16.msra.mxu0 %v3455_v46  ;;  %3010 = vmatprep.subr.bf16.mxu1 %v3668_v3  ;;  %v3500_v46 = vld [vmem:[%s4467_s1 + $0x148] sm:$0xff]  }
  0x6d   : >> { %3170 = vmatprep.subr.bf16.mxu0 %v3668_v3 }
  0x6f   : >> { %3011 = vmatpush3.bf16.msra.mxu1 %v3456_v47  ;;  %v3501_v47 = vld [vmem:[%s4467_s1 + $0x348] sm:$0xff]  }
  0x70   : >> { %3171 = vmatpush3.bf16.msra.mxu0 %v3457_v48  ;;  %3012 = vmatprep.subr.bf16.mxu1 %v3668_v3  ;;  %v3502_v48 = vld [vmem:[%s4467_s1 + $0x150] sm:$0xff]  }
  0x71   : >> { %3172 = vmatprep.subr.bf16.mxu0 %v3668_v3 }
  0x73   : >> { %3013 = vmatpush3.bf16.msra.mxu1 %v3458_v49  ;;  %v3503_v49 = vld [vmem:[%s4467_s1 + $0x350] sm:$0xff]  }
  0x74   : >> { %3173 = vmatpush3.bf16.msra.mxu0 %v3459_v50  ;;  %3014 = vmatprep.subr.bf16.mxu1 %v3668_v3  ;;  %v3504_v50 = vld [vmem:[%s4467_s1 + $0x158] sm:$0xff]  }
  0x75   : >> { %3174 = vmatprep.subr.bf16.mxu0 %v3668_v3 }
  0x77   : >> { %3015 = vmatpush3.bf16.msra.mxu1 %v3460_v53  ;;  %v3507_v53 = vld [vmem:[%s4467_s1 + $0x360] sm:$0xff]  }
  0x78   : >> { %3175 = vmatpush3.bf16.msra.mxu0 %v3461_v54  ;;  %3016 = vmatprep.subr.bf16.mxu1 %v3668_v3  ;;  %v3508_v54 = vld [vmem:[%s4467_s1 + $0x168] sm:$0xff]  }
  0x79   : >> { %3176 = vmatprep.subr.bf16.mxu0 %v3668_v3 }
  0x7b   : >> { %3017 = vmatpush3.bf16.msra.mxu1 %v3462_v59  ;;  %v3513_v59 = vld [vmem:[%s4467_s1 + $0x378] sm:$0xff]  }
  0x7c   : >> { %3177 = vmatpush3.bf16.msra.mxu0 %v3463_v60  ;;  %3022 = vmatprep.subr.bf16.mxu1 %v3668_v3  ;;  %v4222_v60 = vld [vmem:[%s3827_s25 + $0x18] sm:$0x1f]  }
  0x7d   : >> { %3182 = vmatprep.subr.bf16.mxu0 %v3668_v3 }
  0x7e   : >> { %3019 = vmatmul.mubr.bf16.vlgmr.msra.gmra.mrb[0].mxu1 %v510_v61  ;;  %v3515_v61 = vld [vmem:[%s4467_s1 + $0x180] sm:$0xff]  }
  0x7f   : >> { %3023 = vmatpush3.bf16.msra.mxu1 %v3464_v62  ;;  %3179 = vmatmul.mubr.bf16.vlgmr.msra.gmra.mrb[0].mxu0 %v1452_v63  ;;  %v4228_v62 = vld [vmem:[%s3827_s25 + $0x38] sm:$0x1f]   ;;  %v3517_v63 = vld [vmem:[%s4467_s1 + $0x380] sm:$0xff]   ;;  %s2817_s25 = sshll.u32 %s3666_s17, 3  ;;  %s250_s17 = sadd.s32 1, %s3666_s17  }
  0x80   : >> { %3183 = vmatpush3.bf16.msra.mxu0 %v3465_v2  ;;  %3024 = vmatprep.subr.bf16.mxu1 %v3668_v3  ;;  %v3518_v2 = vld [vmem:[%s4467_s1 + $0x188] sm:$0xff]   ;;  %s2177_s13 = scalar_lea.vmem %s3763_s14, %s2817_s25  ;;  %p247_p11 = scmp.ge.s32.totalorder %s250_s17, 9  }
  0x81   : >> { %3184 = vmatprep.subr.bf16.mxu0 %v3668_v3  ;;  %3038 = vmatprep.mubr.msk.bf16.mxu1 %vm3669_vm0, %v3668_v3  ;;  %s2799_s23 = sshll.u32 (%p247_p11), %s3723_s22, 4  ;;  %s2212_s17 = sshll.u32 (%p247_p11), %s227_s15, 4  ;;  %s2213_s17 = int_to_ptr.vmem [resolvable:$true] %s2212_s17 }
  0x82   : >> { %3198 = vmatprep.mubr.msk.bf16.mxu0 %vm3669_vm0, %v3668_v3  ;;  %s4400_s7 = scalar_lea.hbm (%p247_p11), %s4470_s4, %s2799_s23  ;;  %s2193_s11 = scalar_lea.sflag (%p247_p11), [#allocation3], %s3751_s30 }
  0x83   : >> { %3025 = vmatpush3.bf16.msra.mxu1 %v3466_v4  ;;  %v3519_v4 = vld [vmem:[%s4467_s1 + $0x388] sm:$0xff]   ;;  %s3548_s14 = scalar_lea.vmem (%p247_p11), %s2213_s17, 16  ;;  %s3670_s8 = smov (%p247_p11), [#allocation2]  }
  0x84   : >> { %3185 = vmatpush3.bf16.msra.mxu0 %v3467_v5  ;;  %3026 = vmatprep.subr.bf16.mxu1 %v3668_v3  ;;  %v3520_v5 = vld [vmem:[%s4467_s1 + $0x190] sm:$0xff]   ;;  %p3549_p12 = scmp.ne.s32.totalorder (%p247_p11), %s2213_s17, %s3548_s14  ;;  %s3552_s10 = sshll.u32 (%p247_p11), %s3670_s8, 4  ;;  %s3553_s10 = int_to_ptr.vmem [resolvable:$false] %s3552_s10 }
  0x85   : >> { %3186 = vmatprep.subr.bf16.mxu0 %v3668_v3  ;;  %s3554_s9 = scalar_lea.vmem (%p247_p11), %s3553_s10, 32  ;;  %p3555_p1 = scmp.lt.s32.totalorder (%p247_p11), %s2213_s17, %s3553_s10 }
  0x86   : > { %p3550_p13 = pnand (%p247_p11), %p3549_p12, %p3740_p5  ;;  %p3556_p2 = scmp.lt.s32.totalorder (%p247_p11), %s3554_s9, %s3548_s14 }
  0x87   : >> { %3027 = vmatpush3.bf16.msra.mxu1 %v3468_v6  ;;  %v3521_v6 = vld [vmem:[%s4467_s1 + $0x390] sm:$0xff]  }
  0x88   : >> { %3187 = vmatpush3.bf16.msra.mxu0 %v3469_v7  ;;  %3028 = vmatprep.subr.bf16.mxu1 %v3668_v3  ;;  %v3522_v7 = vld [vmem:[%s4467_s1 + $0x198] sm:$0xff]   ;;  %p3551_p0 = pneg (%p247_p11), %p3550_p13  ;;  %p3557_p3 = por (%p247_p11), %p3556_p2, %p3555_p1 }
  0x89   : >> { %3188 = vmatprep.subr.bf16.mxu0 %v3668_v3 }
  0x8a   : > { %p3558_p4 = pnand (%p247_p11), %p3557_p3, %p3551_p0 }
  0x8b   : >> { %3029 = vmatpush3.bf16.msra.mxu1 %v3470_v8  ;;  %v3523_v8 = vld [vmem:[%s4467_s1 + $0x398] sm:$0xff]  }
  0x8c   : >> { %3189 = vmatpush3.bf16.msra.mxu0 %v3471_v9  ;;  %3030 = vmatprep.subr.bf16.mxu1 %v3668_v3  ;;  %v3524_v9 = vld [vmem:[%s4467_s1 + $0x1a0] sm:$0xff]  }
  0x8d   : >> { %3190 = vmatprep.subr.bf16.mxu0 %v3668_v3 }
  0x8f   : >> { %3031 = vmatpush3.bf16.msra.mxu1 %v3472_v10  ;;  %v3525_v10 = vld [vmem:[%s4467_s1 + $0x3a0] sm:$0xff]  }
  0x90   : >> { %3191 = vmatpush3.bf16.msra.mxu0 %v3473_v11  ;;  %3032 = vmatprep.subr.bf16.mxu1 %v3668_v3  ;;  %v3526_v11 = vld [vmem:[%s4467_s1 + $0x1a8] sm:$0xff]  }
  0x91   : >> { %3192 = vmatprep.subr.bf16.mxu0 %v3668_v3 }
  0x93   : >> { %3033 = vmatpush3.bf16.msra.mxu1 %v3474_v12  ;;  %v3527_v12 = vld [vmem:[%s4467_s1 + $0x3a8] sm:$0xff]  }
  0x94   : >> { %3193 = vmatpush3.bf16.msra.mxu0 %v3475_v13  ;;  %3034 = vmatprep.subr.bf16.mxu1 %v3668_v3  ;;  %v978_v13 = vshll.u32 %v4146_v42, 16 }
  0x95   : >> { %3194 = vmatprep.subr.bf16.mxu0 %v3668_v3 }
  0x96   : >> { %v980_v18 = vrot.slane %v978_v13, 1 }
  0x97   : >> { %3035 = vmatpush3.bf16.msra.mxu1 %v3476_v15  ;;  %v1920_v15 = vshll.u32 %v4152_v44, 16 }
  0x98   : >> { %3195 = vmatpush3.bf16.msra.mxu0 %v3477_v17  ;;  %3036 = vmatprep.subr.bf16.mxu1 %v3668_v3  ;;  %v976_v17 = vshrl.u32 %v4146_v42, 16 }
  0x99   : >> { %3196 = vmatprep.subr.bf16.mxu0 %v3668_v3 }
  0x9b   : >> { %3037 = vmatpush3.bf16.msra.mxu1 %v3478_v22  ;;  %v1922_v22 = vrot.slane %v1920_v15, 1 }
  0x9c   : >> { %3197 = vmatpush3.bf16.msra.mxu0 %v3479_v24  ;;  %3042 = vmatprep.subr.bf16.mxu1 %v3668_v3  ;;  %v981_v24 = vor.u32 %v980_v18, %v976_v17 }
  0x9d   : >> { %3202 = vmatprep.subr.bf16.mxu0 %v3668_v3 }
  0x9e   : >> { %3039 = vmatmul.mubr.bf16.vlgmr.msra.gmra.mrb[0].mxu1 %v626_v19  ;;  %v3532_v19 = vld [vmem:[%s4467_s1 + $0x1c0] sm:$0xff]  }
  0x9f   : >> { %3043 = vmatpush3.bf16.msra.mxu1 %v3480_v25  ;;  %3199 = vmatmul.mubr.bf16.vlgmr.msra.gmra.mrb[0].mxu0 %v1568_v26  ;;  %v1923_v25 = vor.u32 %v1922_v22, %v1918_v21  ;;  %v3533_v26 = vld [vmem:[%s4467_s1 + $0x3c0] sm:$0xff]  }
  0xa0   : >> { %3203 = vmatpush3.bf16.msra.mxu0 %v3481_v27  ;;  %3044 = vmatprep.subr.bf16.mxu1 %v3668_v3  ;;  %v3534_v27 = vld [vmem:[%s4467_s1 + $0x1c8] sm:$0xff]  }
  0xa1   : >> { %3204 = vmatprep.subr.bf16.mxu0 %v3668_v3  ;;  %3058 = vmatprep.mubr.msk.bf16.mxu1 %vm3669_vm0, %v3668_v3 }
  0xa2   : >> { %3218 = vmatprep.mubr.msk.bf16.mxu0 %vm3669_vm0, %v3668_v3 }
  0xa3   : >> { %3045 = vmatpush3.bf16.msra.mxu1 %v3482_v28  ;;  %v3535_v28 = vld [vmem:[%s4467_s1 + $0x3c8] sm:$0xff]  }
  0xa4   : >> { %3205 = vmatpush3.bf16.msra.mxu0 %v3483_v29  ;;  %3046 = vmatprep.subr.bf16.mxu1 %v3668_v3  ;;  %v3536_v29 = vld [vmem:[%s4467_s1 + $0x1d0] sm:$0xff]  }
  0xa5   : >> { %3206 = vmatprep.subr.bf16.mxu0 %v3668_v3 }
  0xa7   : >> { %3047 = vmatpush3.bf16.msra.mxu1 %v3484_v30  ;;  %v3537_v30 = vld [vmem:[%s4467_s1 + $0x3d0] sm:$0xff]  }
  0xa8   : >> { %3207 = vmatpush3.bf16.msra.mxu0 %v3485_v31  ;;  %3048 = vmatprep.subr.bf16.mxu1 %v3668_v3  ;;  %v3538_v31 = vld [vmem:[%s4467_s1 + $0x1d8] sm:$0xff]  }
  0xa9   : >> { %3208 = vmatprep.subr.bf16.mxu0 %v3668_v3 }
  0xab   : >> { %3049 = vmatpush3.bf16.msra.mxu1 %v3486_v32  ;;  %v3539_v32 = vld [vmem:[%s4467_s1 + $0x3d8] sm:$0xff]  }
  0xac   : >> { %3209 = vmatpush3.bf16.msra.mxu0 %v3487_v33  ;;  %3050 = vmatprep.subr.bf16.mxu1 %v3668_v3  ;;  %v3540_v33 = vld [vmem:[%s4467_s1 + $0x1e0] sm:$0xff]  }
  0xad   : >> { %3210 = vmatprep.subr.bf16.mxu0 %v3668_v3 }
  0xaf   : >> { %3051 = vmatpush3.bf16.msra.mxu1 %v3488_v34  ;;  %v3541_v34 = vld [vmem:[%s4467_s1 + $0x3e0] sm:$0xff]  }
  0xb0   : >> { %3211 = vmatpush3.bf16.msra.mxu0 %v3489_v35  ;;  %3052 = vmatprep.subr.bf16.mxu1 %v3668_v3  ;;  %v3542_v35 = vld [vmem:[%s4467_s1 + $0x1e8] sm:$0xff]  }
  0xb1   : >> { %3212 = vmatprep.subr.bf16.mxu0 %v3668_v3 }
  0xb3   : >> { %3053 = vmatpush3.bf16.msra.mxu1 %v3490_v36  ;;  %v3543_v36 = vld [vmem:[%s4467_s1 + $0x3e8] sm:$0xff]  }
  0xb4   : >> { %3213 = vmatpush3.bf16.msra.mxu0 %v3491_v37  ;;  %3054 = vmatprep.subr.bf16.mxu1 %v3668_v3  ;;  %v1094_v37 = vshll.u32 %v4222_v60, 16 }
  0xb5   : >> { %3214 = vmatprep.subr.bf16.mxu0 %v3668_v3 }
  0xb7   : >> { %3055 = vmatpush3.bf16.msra.mxu1 %v3492_v38  ;;  %v3544_v38 = vld [vmem:[%s4467_s1 + $0x1f0] sm:$0xff]  }
  0xb8   : >> { %3215 = vmatpush3.bf16.msra.mxu0 %v3493_v39  ;;  %3056 = vmatprep.subr.bf16.mxu1 %v3668_v3  ;;  %v2036_v39 = vshll.u32 %v4228_v62, 16 }
  0xb9   : >> { %3216 = vmatprep.subr.bf16.mxu0 %v3668_v3 }
  0xbb   : >> { %3057 = vmatpush3.bf16.msra.mxu1 %v3494_v40  ;;  %v3545_v40 = vld [vmem:[%s4467_s1 + $0x3f0] sm:$0xff]  }
  0xbc   : >> { %3217 = vmatpush3.bf16.msra.mxu0 %v3495_v41  ;;  %3062 = vmatprep.subr.bf16.mxu1 %v3668_v3  ;;  %v1092_v41 = vshrl.u32 %v4222_v60, 16 }
  0xbd   : >> { %3222 = vmatprep.subr.bf16.mxu0 %v3668_v3 }
  0xbe   : >> { %3059 = vmatmul.mubr.bf16.vlgmr.msra.gmra.mrb[0].mxu1 %v4146_v42  ;;  %v1096_v42 = vrot.slane %v1094_v37, 1 }
  0xbf   : >> { %3063 = vmatpush3.bf16.msra.mxu1 %v3497_v43  ;;  %3219 = vmatmul.mubr.bf16.vlgmr.msra.gmra.mrb[0].mxu0 %v4152_v44  ;;  %v3546_v43 = vld [vmem:[%s4467_s1 + $0x1f8] sm:$0xff]   ;;  %v2034_v44 = vshrl.u32 %v4228_v62, 16 }
  0xc0   : >> { %3223 = vmatpush3.bf16.msra.mxu0 %v3499_v45  ;;  %3064 = vmatprep.subr.bf16.mxu1 %v3668_v3  ;;  %v2038_v45 = vrot.slane %v2036_v39, 1 }
  0xc1   : >> { %3224 = vmatprep.subr.bf16.mxu0 %v3668_v3  ;;  %3078 = vmatprep.mubr.msk.bf16.mxu1 %vm3669_vm0, %v3668_v3 }
  0xc2   : >> { %3238 = vmatprep.mubr.msk.bf16.mxu0 %vm3669_vm0, %v3668_v3 }
  0xc3   : >> { %3065 = vmatpush3.bf16.msra.mxu1 %v3500_v46  ;;  %v3547_v46 = vld [vmem:[%s4467_s1 + $0x3f8] sm:$0xff]  }
  0xc4   : >> { %3225 = vmatpush3.bf16.msra.mxu0 %v3501_v47  ;;  %3066 = vmatprep.subr.bf16.mxu1 %v3668_v3  ;;  %v1097_v47 = vor.u32 %v1096_v42, %v1092_v41 }
  0xc5   : >> { %3226 = vmatprep.subr.bf16.mxu0 %v3668_v3 }
  0xc7   : >> { %3067 = vmatpush3.bf16.msra.mxu1 %v3502_v48  ;;  %v2039_v48 = vor.u32 %v2038_v45, %v2034_v44 }
  0xc8   : >> { %3227 = vmatpush3.bf16.msra.mxu0 %v3503_v49  ;;  %3068 = vmatprep.subr.bf16.mxu1 %v3668_v3 }
  0xc9   : >> { %3228 = vmatprep.subr.bf16.mxu0 %v3668_v3 }
  0xcb   : >> { %3069 = vmatpush3.bf16.msra.mxu1 %v3504_v50 }
  0xcc   : >> { %3229 = vmatpush3.bf16.msra.mxu0 %v3505_v51  ;;  %3070 = vmatprep.subr.bf16.mxu1 %v3668_v3  ;;  %v2795_v51 = vld [vmem:[%s4468_s2] ss:$0 sm:$0xff] }
  0xcd   : >> { %3230 = vmatprep.subr.bf16.mxu0 %v3668_v3 }
  0xcf   : >> { %3071 = vmatpush3.bf16.msra.mxu1 %v3506_v52 }
  0xd0   : >> { %3231 = vmatpush3.bf16.msra.mxu0 %v3507_v53  ;;  %3072 = vmatprep.subr.bf16.mxu1 %v3668_v3 }
  0xd1   : >> { %3232 = vmatprep.subr.bf16.mxu0 %v3668_v3 }
  0xd3   : >> { %3073 = vmatpush3.bf16.msra.mxu1 %v3508_v54 }
  0xd4   : >> { %3233 = vmatpush3.bf16.msra.mxu0 %v3509_v55  ;;  %3074 = vmatprep.subr.bf16.mxu1 %v3668_v3 }
  0xd5   : >> { %3234 = vmatprep.subr.bf16.mxu0 %v3668_v3 }
  0xd7   : >> { %3075 = vmatpush3.bf16.msra.mxu1 %v3510_v56 }
  0xd8   : >> { %3235 = vmatpush3.bf16.msra.mxu0 %v3511_v57  ;;  %3076 = vmatprep.subr.bf16.mxu1 %v3668_v3 }
  0xd9   : >> { %3236 = vmatprep.subr.bf16.mxu0 %v3668_v3 }
  0xdb   : >> { %3077 = vmatpush3.bf16.msra.mxu1 %v3512_v58 }
  0xdc   : >> { %3237 = vmatpush3.bf16.msra.mxu0 %v3513_v59  ;;  %3082 = vmatprep.subr.bf16.mxu1 %v3668_v3 }
  0xdd   : >> { %3242 = vmatprep.subr.bf16.mxu0 %v3668_v3 }
  0xde   : >> { %3079 = vmatmul.mubr.bf16.vlgmr.msra.gmra.mrb[0].mxu1 %v4222_v60 }
  0xdf   : >> { %3083 = vmatpush3.bf16.msra.mxu1 %v3515_v61  ;;  %3239 = vmatmul.mubr.bf16.vlgmr.msra.gmra.mrb[0].mxu0 %v4228_v62 }
  0xe0   : >> { %3243 = vmatpush3.bf16.msra.mxu0 %v3517_v63  ;;  %3084 = vmatprep.subr.bf16.mxu1 %v3668_v3 }
  0xe1   : >> { %3244 = vmatprep.subr.bf16.mxu0 %v3668_v3  ;;  %3098 = vmatprep.mubr.msk.bf16.mxu1 %vm3669_vm0, %v3668_v3 }
  0xe2   : >> { %3258 = vmatprep.mubr.msk.bf16.mxu0 %vm3669_vm0, %v3668_v3 }
  0xe3   : >> { %3085 = vmatpush3.bf16.msra.mxu1 %v3518_v2 }
  0xe4   : >> { %3245 = vmatpush3.bf16.msra.mxu0 %v3519_v4  ;;  %3086 = vmatprep.subr.bf16.mxu1 %v3668_v3 }
  0xe5   : >> { %3246 = vmatprep.subr.bf16.mxu0 %v3668_v3 }
  0xe7   : >> { %3087 = vmatpush3.bf16.msra.mxu1 %v3520_v5 }
  0xe8   : >> { %3247 = vmatpush3.bf16.msra.mxu0 %v3521_v6  ;;  %3088 = vmatprep.subr.bf16.mxu1 %v3668_v3 }
  0xe9   : >> { %3248 = vmatprep.subr.bf16.mxu0 %v3668_v3 }
  0xeb   : >> { %3089 = vmatpush3.bf16.msra.mxu1 %v3522_v7 }
  0xec   : >> { %3249 = vmatpush3.bf16.msra.mxu0 %v3523_v8  ;;  %3090 = vmatprep.subr.bf16.mxu1 %v3668_v3 }
  0xed   : >> { %3250 = vmatprep.subr.bf16.mxu0 %v3668_v3 }
  0xef   : >> { %3091 = vmatpush3.bf16.msra.mxu1 %v3524_v9 }
  0xf0   : >> { %3251 = vmatpush3.bf16.msra.mxu0 %v3525_v10  ;;  %3092 = vmatprep.subr.bf16.mxu1 %v3668_v3 }
  0xf1   : >> { %3252 = vmatprep.subr.bf16.mxu0 %v3668_v3 }
  0xf3   : >> { %3093 = vmatpush3.bf16.msra.mxu1 %v3526_v11 }
  0xf4   : >> { %3253 = vmatpush3.bf16.msra.mxu0 %v3527_v12  ;;  %3094 = vmatprep.subr.bf16.mxu1 %v3668_v3 }
  0xf5   : >> { %3254 = vmatprep.subr.bf16.mxu0 %v3668_v3 }
  0xf7   : >> { %3095 = vmatpush3.bf16.msra.mxu1 %v3528_v14  ;;  %v2182_v14 = vld [vmem:[%s2177_s13 + $0x4] sm:$0x1] }
  0xf8   : >> { %3255 = vmatpush3.bf16.msra.mxu0 %v3529_v16  ;;  %3096 = vmatprep.subr.bf16.mxu1 %v3668_v3 }
  0xf9   : >> { %3256 = vmatprep.subr.bf16.mxu0 %v3668_v3 }
  0xfb   : >> { %3097 = vmatpush3.bf16.msra.mxu1 %v3530_v20 }
  0xfc   : >> { %3257 = vmatpush3.bf16.msra.mxu0 %v3531_v23  ;;  %3102 = vmatprep.subr.bf16.mxu1 %v3668_v3 }
  0xfd   : >> { %3262 = vmatprep.subr.bf16.mxu0 %v3668_v3 }
  0xfe   : >> { %3099 = vmatmul.mubr.bf16.vlgmr.msra.gmra.mrb[0].mxu1 %v981_v24 }
  0xff   : >> { %3103 = vmatpush3.bf16.msra.mxu1 %v3532_v19  ;;  %3259 = vmatmul.mubr.bf16.vlgmr.msra.gmra.mrb[0].mxu0 %v1923_v25 }
 0x100   : >> { %3263 = vmatpush3.bf16.msra.mxu0 %v3533_v26  ;;  %3104 = vmatprep.subr.bf16.mxu1 %v3668_v3 }
 0x101   : >> { %3264 = vmatprep.subr.bf16.mxu0 %v3668_v3  ;;  %3118 = vmatprep.mubr.msk.bf16.mxu1 %vm3669_vm0, %v3668_v3 }
 0x102   : >> { %3278 = vmatprep.mubr.msk.bf16.mxu0 %vm3669_vm0, %v3668_v3 }
 0x103   : >> { %3105 = vmatpush3.bf16.msra.mxu1 %v3534_v27 }
 0x104   : >> { %3265 = vmatpush3.bf16.msra.mxu0 %v3535_v28  ;;  %3106 = vmatprep.subr.bf16.mxu1 %v3668_v3 }
 0x105   : >> { %3266 = vmatprep.subr.bf16.mxu0 %v3668_v3 }
 0x107   : >> { %3107 = vmatpush3.bf16.msra.mxu1 %v3536_v29 }
 0x108   : >> { %3267 = vmatpush3.bf16.msra.mxu0 %v3537_v30  ;;  %3108 = vmatprep.subr.bf16.mxu1 %v3668_v3 }
 0x109   : >> { %3268 = vmatprep.subr.bf16.mxu0 %v3668_v3 }
 0x10b   : >> { %3109 = vmatpush3.bf16.msra.mxu1 %v3538_v31 }
 0x10c   : >> { %3269 = vmatpush3.bf16.msra.mxu0 %v3539_v32  ;;  %3110 = vmatprep.subr.bf16.mxu1 %v3668_v3 }
 0x10d   : >> { %3270 = vmatprep.subr.bf16.mxu0 %v3668_v3 }
 0x10f   : >> { %3111 = vmatpush3.bf16.msra.mxu1 %v3540_v33 }
 0x110   : >> { %3271 = vmatpush3.bf16.msra.mxu0 %v3541_v34  ;;  %3112 = vmatprep.subr.bf16.mxu1 %v3668_v3 }
 0x111   : >> { %3272 = vmatprep.subr.bf16.mxu0 %v3668_v3 }
 0x113   : >> { %3113 = vmatpush3.bf16.msra.mxu1 %v3542_v35 }
 0x114   : >> { %3273 = vmatpush3.bf16.msra.mxu0 %v3543_v36  ;;  %3114 = vmatprep.subr.bf16.mxu1 %v3668_v3 }
 0x115   : >> { %3274 = vmatprep.subr.bf16.mxu0 %v3668_v3 }
 0x117   : >> { %3115 = vmatpush3.bf16.msra.mxu1 %v3544_v38 }
 0x118   : >> { %3275 = vmatpush3.bf16.msra.mxu0 %v3545_v40  ;;  %3116 = vmatprep.subr.bf16.mxu1 %v3668_v3 }
 0x119   : >> { %3276 = vmatprep.subr.bf16.mxu0 %v3668_v3 }
 0x11b   : >> { %3117 = vmatpush3.bf16.msra.mxu1 %v3546_v43 }
 0x11c   : >> { %3277 = vmatpush3.bf16.msra.mxu0 %v3547_v46 }
 0x11e   : >> { %3119 = vmatmul.mubr.bf16.vlgmr.msra.gmra.mrb[0].mxu1 %v1097_v47 }
 0x11f   : >> { %3279 = vmatmul.mubr.bf16.vlgmr.msra.gmra.mrb[0].mxu0 %v2039_v48 }
 0x1f1   : >> { %v1181_v49 = vpop.f32.mrb[0].mxu1 }
 0x1f2   : >> { %v2123_v50 = vpop.f32.mrb[0].mxu0  ;;  %v3120_v52 = vpop.f32.mrb[1].mxu1 }
 0x1f3   : >> { %v3282_v53 = vadd.f32 %v2123_v50, %v1181_v49  ;;  %v3280_v54 = vpop.f32.mrb[1].mxu0  ;;  %v1184_v55 = vpop.f32.mrb[2].mxu1 }
 0x1f4   : >> { %v2126_v56 = vpop.f32.mrb[2].mxu0  ;;  %v3121_v3 = vpop.f32.mrb[3].mxu1 }
 0x1f5   : >> { %v2160_v57 = vadd.f32 %v3282_v53, %v2795_v51  ;;  %v3283_v58 = vadd.f32 %v2126_v56, %v1184_v55  ;;  %v3281_v59 = vpop.f32.mrb[3].mxu0  ;;  %v2142_v63 = vmul.f32 %v3282_v53, %v3282_v53 }
 0x1f7   : >> { %vm2162_vm2 = vcmp.ge.f32.partialorder %v2160_v57, 0.0  ;;  %v2164_v60 = vmul.f32 0.2, %v2160_v57  ;;  %v2133_v61 = vsel %vm2132_vm1, %v3283_v58, 0.0  ;;  %v2143_v62 = vmul.f32 %v3283_v58, %v3283_v58 }
 0x1f8   : >> { %v2134_v2 = vadd.f32 %v3282_v53, %v2133_v61  ;;  %v2161_v4 = vadd.f32 %v3283_v58, %v2795_v51 }
 0x1f9   : >> { %v2166_v5 = vsel %vm2162_vm2, %v2160_v57, %v2164_v60  ;;  %v2144_v6 = vsel %vm2132_vm1, %v2143_v62, 0.0 }
 0x1fa   : >> { %v2815_v7 = vpack.c.bf16 %v2166_v5, %v2166_v5  ;;  %v2135_v8 = vrot.slane %v2134_v2, 4  ;;  %v2145_v9 = vadd.f32 %v2144_v6, %v2142_v63  ;;  %vm2163_vm4 = vcmp.ge.f32.partialorder %v2161_v4, 0.0 }
 0x1fb   : >> { %v2165_v10 = vmul.f32 0.2, %v2161_v4 }
 0x1fc   : >> { %2178 = vst [vmem:[%s2177_s13] sm:$0xf] %v2815_v7  ;;  %v2136_v11 = vadd.f32 %v2135_v8, %v2134_v2  ;;  %v2146_v12 = vrot.slane %v2145_v9, 4 }
 0x1fd   : >> { %v2167_v13 = vsel %vm2163_vm4, %v2161_v4, %v2165_v10 }
 0x1fe   : >> { %v2137_v15 = vrot.slane %v2136_v11, 2  ;;  %v2147_v16 = vadd.f32 %v2146_v12, %v2145_v9  ;;  %v2816_v17 = vpack.c.bf16 %v2167_v13, %v2167_v13 }
 0x200   : >> { %v2138_v18 = vadd.f32 %v2137_v15, %v2136_v11  ;;  %v2148_v20 = vrot.slane %v2147_v16, 2  ;;  %v2183_v21 = vsel %vm2181_vm5, %v2816_v17, %v2182_v14 }
 0x201   : >> { %2184 = vst [vmem:[%s2177_s13 + $0x4] sm:$0x1] %v2183_v21 }
 0x202   : >> { %v2139_v22 = vrot.slane %v2138_v18, 1  ;;  %v2149_v23 = vadd.f32 %v2148_v20, %v2147_v16 }
 0x204   : >> { %v2140_v24 = vadd.f32 %v2139_v22, %v2138_v18  ;;  %v2150_v19 = vrot.slane %v2149_v23, 1  ;;  %249 = sbr.rel (!%p247_p11) target bundleno = 29 (0x1d), region = 127 }
 0x206   : >> { %v2141_v25 = vadd.f32 %v3662_v1, %v2140_v24   ;;  %v2151_v26 = vadd.f32 %v2150_v19, %v2149_v23 }
 0x208   : >> { %v2152_v27 = vadd.f32 %v3658_v0, %v2151_v26   ;;  %v4475_v1 = vmov %v2141_v25  ;;  %2185 = vst [vmem:[%s227_s15] sm:$0x1] (%p247_p11), %v2141_v25 }
 0x20a   : >> { %v4474_v0 = vmov %v2152_v27  ;;  %2186 = vst [vmem:[%s233_s16] sm:$0x1] (%p247_p11), %v2152_v27 }
 0x20b   : > { %3561 = shalt.err (!%p3558_p4)
}
 0x20c   : > { %s3562_s15 = scalar_lea.hbm %s4400_s7, 16  ;;  %s3566_s13 = scalar_lea.hbm %s4470_s4, 32 }
 0x20d   : > { %p3563_p7 = scmp.ne.s32.totalorder %s4400_s7, %s3562_s15  ;;  %p3567_p10 = scmp.lt.u32.totalorder %s4400_s7, %s4470_s4 }
 0x20e   : > { %p3568_p11 = scmp.lt.u32.totalorder %s3566_s13, %s3562_s15  ;;  %p3570_p13 = scmp.lt.u32.totalorder %s3562_s15, %s4400_s7 }
 0x20f   : > { %p3564_p8 = pnand %p3563_p7, %p3740_p5 }
 0x210   : > { %p3569_p12 = por %p3568_p11, %p3567_p10 }
 0x211   : > { %p3565_p9 = pneg %p3564_p8 }
 0x212   : > { %p3571_p0 = por %p3570_p13, %p3569_p12 }
 0x214   : > { %p3572_p1 = pnand %p3571_p0, %p3565_p9 }
 0x216   : > { %3575 = shalt.err (!%p3572_p1)
}
 0x217   : > { %3342 = dma.vmem_to_hbm [thread:$0]  (%p3740_p5), %s2213_s17, 16, %s4400_s7, %s2193_s11  }
 0x218   : > { %s4427_s10 = scalar_lea.hbm %s4471_s5, %s2799_s23  ;;  %s2225_s9 = sshll.u32 %s233_s16, 4  ;;  %s2226_s9 = int_to_ptr.vmem [resolvable:$true] %s2225_s9 }
 0x219   : > { %s2197_s15 = scalar_lea.sflag [#allocation5], %s3751_s30  ;;  %s3576_s12 = scalar_lea.vmem %s2226_s9, 16 }
 0x21a   : > { %p3577_p2 = scmp.ne.s32.totalorder %s2226_s9, %s3576_s12  ;;  %s3671_s25 = smov [#allocation4]  }
 0x21b   : > { %s3580_s13 = sshll.u32 %s3671_s25, 4  ;;  %s3581_s13 = int_to_ptr.vmem [resolvable:$false] %s3580_s13 }
 0x21c   : > { %p3578_p3 = pnand %p3577_p2, %p3740_p5  ;;  %s3582_s26 = scalar_lea.vmem %s3581_s13, 32 }
 0x21d   : > { %p3583_p7 = scmp.lt.s32.totalorder %s2226_s9, %s3581_s13  ;;  %p3584_p8 = scmp.lt.s32.totalorder %s3582_s26, %s3576_s12 }
 0x21e   : > { %p3579_p4 = pneg %p3578_p3 }
 0x21f   : > { %p3585_p9 = por %p3584_p8, %p3583_p7 }
 0x221   : > { %p3586_p10 = pnand %p3585_p9, %p3579_p4 }
 0x223   : > { %3589 = shalt.err (!%p3586_p10)
}
 0x224   : > { %s3590_s22 = scalar_lea.hbm %s4427_s10, 16  ;;  %s3594_s23 = scalar_lea.hbm %s4471_s5, 32 }
 0x225   : > { %p3591_p11 = scmp.ne.s32.totalorder %s4427_s10, %s3590_s22  ;;  %p3595_p0 = scmp.lt.u32.totalorder %s4427_s10, %s4471_s5 }
 0x226   : > { %p3596_p1 = scmp.lt.u32.totalorder %s3594_s23, %s3590_s22  ;;  %p3598_p3 = scmp.lt.u32.totalorder %s3590_s22, %s4427_s10 }
 0x227   : > { %p3592_p12 = pnand %p3591_p11, %p3740_p5 }
 0x228   : > { %p3597_p2 = por %p3596_p1, %p3595_p0 }
 0x229   : > { %p3593_p13 = pneg %p3592_p12 }
 0x22a   : > { %p3599_p4 = por %p3598_p3, %p3597_p2 }
 0x22c   : > { %p3600_p7 = pnand %p3599_p4, %p3593_p13 }
 0x22e   : > { %3603 = shalt.err (!%p3600_p7)
}
 0x22f   : > { %3343 = dma.vmem_to_hbm [thread:$0]  (%p3740_p5), %s2226_s9, 16, %s4427_s10, %s2197_s15  }
 0x230 PF: > { %p3353_p8 = scmp.ge.s32.totalorder %s3654_s21, 2  ;;  %s2245_s11 = sand.u32 1, %s3642_s18  }
 0x231   : > { %s2246_s6 = scalar_lea.sflag [#allocation3], %s2245_s11 }
 0x232   : > { %p3347_p9 = pnand %p3353_p8, %p3744_p6 }
 0x234   : > { %3633 = dma.done.wait (!%p3347_p9), %s2246_s6, 16  }
 0x235   : > { %3635 = vsyncadd (!%p3347_p9), %s2246_s6, 4294967280  ;;  %s2254_s14 = scalar_lea.sflag [#allocation5], %s2245_s11 }
 0x236   : > { %3637 = dma.done.wait (!%p3347_p9), %s2254_s14, 16  }
 0x237   : > { %3639 = vsyncadd (!%p3347_p9), %s2254_s14, 4294967280  ;;  %p19_p5 = scmp.ge.s32.totalorder %s3727_s24, 4   ;;  %s4476_s18 = smov %s3646_s19 }
 0x238   : > { %s4477_s19 = smov %s3650_s20  ;;  %s4478_s20 = smov %s3738_s27 }
 0x239   : > { %s4479_s21 = smov %s3727_s24  ;;  %21 = sbr.rel (!%p19_p5) target bundleno = 5 (0x5), region = 138 }
 0x240   :  { %2258 = vsyncpa [#allocation3], 1 }
 0x241   :  { %2260 = vsyncpa [#allocation3 + $0x1], 1 }
 0x242   :  { %2261 = vsyncpa [#allocation5], 1 }
 0x243   :  { %2263 = vsyncpa [#allocation5 + $0x1], 1 }

// kernel: discriminator_forward.9
= control target key start
LH: loop header
LB: loop body
LE: loop exit
PB: predicated region body
PF: predicated region fallthrough
CT: control target
= control target key end

     0   :  { %s3430_s18 = smov 0   ;;  %s4090_s0 = inlined_call_operand.vmem [shape: bf16[2,13,2,7,128], index: 0, kind: input, shape index: {}]   ;;  %s4091_s1 = inlined_call_operand.vmem [shape: bf16[16,128,128], index: 1, kind: input, shape index: {}]   ;;  %s4092_s2 = inlined_call_operand.vmem [shape: f32[1,128], index: 2, kind: input, shape index: {}]   ;;  %s4093_s3 = inlined_call_operand.vmem [shape: bf16[2,5,5,128], index: 3, kind: output, shape index: {0}]   ;;  %s4094_s4 = inlined_call_operand.vmem [shape: f32[2,1,128], index: 4, kind: output, shape index: {1}]   ;;  %s4095_s5 = inlined_call_operand.vmem [shape: f32[2,1,128], index: 5, kind: output, shape index: {2}]  }
   0x1 LB: > { %s2248_s2 = sadd.s32 4294967295, %s3384_s18   ;;  %p2252_p0 = scmp.ge.s32.totalorder %s3384_s18, 1  ;;  %s3384_s18 = sphi %s3430_s18, %s16_s18  }
   0x2   : > { %p192_p1 = scmp.lt.s32.totalorder %s3384_s18, 3 }
   0x4   : > { %p193_p2 = pnand %p2252_p0, %p192_p1 }
   0x5   : > { %p226_p3 = scmp.lt.s32.totalorder (!%p193_p2), %s2248_s2, 1  ;;  %v3460_v0 = vmov (!%p193_p2), 0.0   ;;  %v3462_v1 = vmov (!%p193_p2), 0.0   ;;  %s3464_s8 = smov (!%p193_p2), 0  }
   0x6   : > { %196 = sbr.rel (%p193_p2) target bundleno = 508 (0x1fc), region = 32 }
   0xd   : > { %s4099_s2 = smov (!%p226_p3, %s2248_s2), 1 }
   0xe   : > { %s3194_s19 = smul.u32 104, %s4099_s2  ;;  %s238_s22 = scalar_lea.vmem %s4094_s4, %s4099_s2 }
   0xf   : > { %s3195_s23 = smul.u32 20, %s4099_s2  ;;  %s241_s26 = scalar_lea.vmem %s4095_s5, %s4099_s2 }
  0x10   : > { %s3453_s29 = scalar_lea.vmem %s4090_s0, %s3194_s19 }
  0x11   : > { %s3458_s7 = scalar_lea.vmem %s4093_s3, %s3195_s23 }
  0x12 LB: >> { %v3230_v2 = vld [vmem:[%s4091_s1 + $0x40] sm:$0xff]   ;;  %v3398_v3 = vmov 0.0   ;;  %v3232_v5 = vld [vmem:[%s4091_s1 + $0x48] sm:$0xff]   ;;  %vm3399_vm0 = vmmov 0   ;;  %v3234_v7 = vld [vmem:[%s4091_s1 + $0x50] sm:$0xff]   ;;  %s2662_s16 = sshll.u32 %s3396_s8, 4  ;;  %s3396_s8 = sphi %s3464_s8, %s248_s8   ;;  %v3392_v1 = vphi %v3462_v1, %v4097_v1   ;;  %v3388_v0 = vphi %v3460_v0, %v4096_v0  }
  0x13   : >> { %2817 = vmatprep.subr.bf16.mxu1 %v3398_v3  ;;  %2977 = vmatprep.subr.bf16.mxu0 %v3398_v3  ;;  %v3231_v4 = vld [vmem:[%s4091_s1 + $0x200] sm:$0xff]   ;;  %v3233_v6 = vld [vmem:[%s4091_s1 + $0x208] sm:$0xff]   ;;  %v3235_v8 = vld [vmem:[%s4091_s1 + $0x210] sm:$0xff]   ;;  %s3537_s20 = scalar_lea.vmem %s3453_s29, %s2662_s16  ;;  %s2658_s9 = sshll.u32 %s3396_s8, 2  ;;  %vm2089_vm1 = vcmask 1042432   ;;  %vm2068_vm3 = vcmask 1044480  }
  0x14   : >> { %2818 = vmatpush3.bf16.msra.mxu1 %v3230_v2  ;;  %2833 = vmatprep.mubr.msk.bf16.mxu1 %vm3399_vm0, %v3398_v3  ;;  %v3236_v9 = vld [vmem:[%s4091_s1 + $0x58] sm:$0xff]   ;;  %v3238_v11 = vld [vmem:[%s4091_s1 + $0x60] sm:$0xff]   ;;  %v3240_v13 = vld [vmem:[%s4091_s1 + $0x68] sm:$0xff]   ;;  %s2088_s10 = scalar_lea.vmem %s3458_s7, %s2658_s9  ;;  %vm2090_vm2 = vsmask.f32 2304  ;;  %s248_s8 = sadd.s32 1, %s3396_s8  }
  0x15   : >> { %2978 = vmatpush3.bf16.msra.mxu0 %v3231_v4  ;;  %2819 = vmatprep.subr.bf16.mxu1 %v3398_v3  ;;  %v3237_v10 = vld [vmem:[%s4091_s1 + $0x218] sm:$0xff]   ;;  %v3239_v12 = vld [vmem:[%s4091_s1 + $0x220] sm:$0xff]   ;;  %v3241_v14 = vld [vmem:[%s4091_s1 + $0x228] sm:$0xff]   ;;  %p245_p4 = scmp.ge.s32.totalorder %s248_s8, 5  }
  0x16   : >> { %2979 = vmatprep.subr.bf16.mxu0 %v3398_v3  ;;  %2993 = vmatprep.mubr.msk.bf16.mxu0 %vm3399_vm0, %v3398_v3  ;;  %v3242_v15 = vld [vmem:[%s4091_s1 + $0x70] sm:$0xff]   ;;  %v3244_v17 = vld [vmem:[%s4091_s1 + $0x78] sm:$0xff]   ;;  %v3548_v19 = vld [vmem:[%s3537_s20 + $0x4] sm:$0x7] }
  0x17   : >> { %v3243_v16 = vld [vmem:[%s4091_s1 + $0x230] sm:$0xff]   ;;  %v3245_v18 = vld [vmem:[%s4091_s1 + $0x238] sm:$0xff]   ;;  %v3247_v20 = vld [vmem:[%s4091_s1] sm:$0xff]  }
  0x18   : >> { %2820 = vmatpush3.bf16.msra.mxu1 %v3232_v5  ;;  %v3554_v21 = vld [vmem:[%s3537_s20 + $0x10] sm:$0x7]  ;;  %v3249_v22 = vld [vmem:[%s4091_s1 + $0x240] sm:$0xff]   ;;  %v3250_v23 = vld [vmem:[%s4091_s1 + $0x8] sm:$0xff]  }
  0x19   : >> { %2980 = vmatpush3.bf16.msra.mxu0 %v3233_v6  ;;  %2821 = vmatprep.subr.bf16.mxu1 %v3398_v3  ;;  %v3251_v24 = vld [vmem:[%s4091_s1 + $0x248] sm:$0xff]   ;;  %v3252_v25 = vld [vmem:[%s4091_s1 + $0x10] sm:$0xff]   ;;  %v3254_v27 = vld [vmem:[%s4091_s1 + $0x18] sm:$0xff]   ;;  %v2519_v50 = vcombine.low %v3554_v21, %v3554_v21 }
  0x1a   : >> { %2981 = vmatprep.subr.bf16.mxu0 %v3398_v3  ;;  %v3253_v26 = vld [vmem:[%s4091_s1 + $0x250] sm:$0xff]   ;;  %v3255_v28 = vld [vmem:[%s4091_s1 + $0x258] sm:$0xff]   ;;  %v3256_v29 = vld [vmem:[%s4091_s1 + $0x20] sm:$0xff]  }
  0x1b   : >> { %v3257_v30 = vld [vmem:[%s4091_s1 + $0x260] sm:$0xff]   ;;  %v3258_v31 = vld [vmem:[%s4091_s1 + $0x28] sm:$0xff]   ;;  %v3260_v33 = vld [vmem:[%s4091_s1 + $0x30] sm:$0xff]   ;;  %v1402_v54 = vshll.u32 %v2519_v50, 16  ;;  %v1400_v57 = vshrl.u32 %v2519_v50, 16 }
  0x1c   : >> { %2822 = vmatpush3.bf16.msra.mxu1 %v3234_v7  ;;  %v3259_v32 = vld [vmem:[%s4091_s1 + $0x268] sm:$0xff]   ;;  %v3261_v34 = vld [vmem:[%s4091_s1 + $0x270] sm:$0xff]   ;;  %v3262_v35 = vld [vmem:[%s4091_s1 + $0x38] sm:$0xff]  }
  0x1d   : >> { %2982 = vmatpush3.bf16.msra.mxu0 %v3235_v8  ;;  %2823 = vmatprep.subr.bf16.mxu1 %v3398_v3  ;;  %v3263_v36 = vld [vmem:[%s4091_s1 + $0x278] sm:$0xff]   ;;  %v255_v37 = vld [vmem:[%s3537_s20] sm:$0x7]  ;;  %v3628_v39 = vld [vmem:[%s3537_s20 + $0x14] sm:$0x7]  ;;  %v1404_v60 = vrot.slane %v1402_v54, 1 }
  0x1e   : >> { %2983 = vmatprep.subr.bf16.mxu0 %v3398_v3  ;;  %v3265_v38 = vld [vmem:[%s4091_s1 + $0x80] sm:$0xff]   ;;  %v3268_v41 = vld [vmem:[%s4091_s1 + $0x88] sm:$0xff]   ;;  %v3270_v43 = vld [vmem:[%s4091_s1 + $0x90] sm:$0xff]   ;;  %v2309_v49 = vcombine.low %v255_v37, %v255_v37 }
  0x1f   : >> { %v3267_v40 = vld [vmem:[%s4091_s1 + $0x280] sm:$0xff]   ;;  %v3269_v42 = vld [vmem:[%s4091_s1 + $0x288] sm:$0xff]   ;;  %v3271_v44 = vld [vmem:[%s4091_s1 + $0x290] sm:$0xff]   ;;  %v1405_v2 = vor.u32 %v1404_v60, %v1400_v57 }
  0x20   : >> { %2824 = vmatpush3.bf16.msra.mxu1 %v3236_v9  ;;  %v3272_v45 = vld [vmem:[%s4091_s1 + $0x98] sm:$0xff]   ;;  %v3274_v47 = vld [vmem:[%s4091_s1 + $0xa0] sm:$0xff]   ;;  %v3276_v51 = vld [vmem:[%s4091_s1 + $0xa8] sm:$0xff]   ;;  %v492_v53 = vshll.u32 %v2309_v49, 16  ;;  %v490_v58 = vshrl.u32 %v2309_v49, 16 }
  0x21   : >> { %2984 = vmatpush3.bf16.msra.mxu0 %v3237_v10  ;;  %2825 = vmatprep.subr.bf16.mxu1 %v3398_v3  ;;  %v3273_v46 = vld [vmem:[%s4091_s1 + $0x298] sm:$0xff]   ;;  %v3275_v48 = vld [vmem:[%s4091_s1 + $0x2a0] sm:$0xff]   ;;  %v3277_v52 = vld [vmem:[%s4091_s1 + $0x2a8] sm:$0xff]  }
  0x22   : >> { %2985 = vmatprep.subr.bf16.mxu0 %v3398_v3  ;;  %v3278_v55 = vld [vmem:[%s4091_s1 + $0xb0] sm:$0xff]   ;;  %v494_v59 = vrot.slane %v492_v53, 1  ;;  %v3280_v61 = vld [vmem:[%s4091_s1 + $0xb8] sm:$0xff]   ;;  %v3282_v4 = vld [vmem:[%s4091_s1 + $0xc0] sm:$0xff]  }
  0x23   : >> { %v3279_v56 = vld [vmem:[%s4091_s1 + $0x2b0] sm:$0xff]   ;;  %v3281_v62 = vld [vmem:[%s4091_s1 + $0x2b8] sm:$0xff]   ;;  %v3283_v5 = vld [vmem:[%s4091_s1 + $0x2c0] sm:$0xff]  }
  0x24   : >> { %2826 = vmatpush3.bf16.msra.mxu1 %v3238_v11  ;;  %v495_v63 = vor.u32 %v494_v59, %v490_v58  ;;  %v3284_v6 = vld [vmem:[%s4091_s1 + $0xc8] sm:$0xff]   ;;  %v3286_v8 = vld [vmem:[%s4091_s1 + $0xd0] sm:$0xff]   ;;  %v3288_v10 = vld [vmem:[%s4091_s1 + $0xd8] sm:$0xff]  }
  0x25   : >> { %2986 = vmatpush3.bf16.msra.mxu0 %v3239_v12  ;;  %2827 = vmatprep.subr.bf16.mxu1 %v3398_v3  ;;  %v3285_v7 = vld [vmem:[%s4091_s1 + $0x2c8] sm:$0xff]   ;;  %v3287_v9 = vld [vmem:[%s4091_s1 + $0x2d0] sm:$0xff]   ;;  %v3289_v11 = vld [vmem:[%s4091_s1 + $0x2d8] sm:$0xff]  }
  0x26   : >> { %2987 = vmatprep.subr.bf16.mxu0 %v3398_v3  ;;  %v3290_v12 = vld [vmem:[%s4091_s1 + $0xe0] sm:$0xff]   ;;  %v3318_v50 = vld [vmem:[%s4091_s1 + $0x148] sm:$0xff]   ;;  %v3321_v53 = vld [vmem:[%s4091_s1 + $0x350] sm:$0xff]  }
  0x27   : >> { %v3317_v49 = vld [vmem:[%s4091_s1 + $0x340] sm:$0xff]   ;;  %v3322_v54 = vld [vmem:[%s4091_s1 + $0x158] sm:$0xff]   ;;  %v3326_v58 = vld [vmem:[%s4091_s1 + $0x168] sm:$0xff]  }
  0x28   : >> { %2828 = vmatpush3.bf16.msra.mxu1 %v3240_v13  ;;  %v3291_v13 = vld [vmem:[%s4091_s1 + $0x2e0] sm:$0xff]   ;;  %v3327_v59 = vld [vmem:[%s4091_s1 + $0x368] sm:$0xff]   ;;  %v3328_v60 = vld [vmem:[%s4091_s1 + $0x170] sm:$0xff]  }
  0x29   : >> { %2988 = vmatpush3.bf16.msra.mxu0 %v3241_v14  ;;  %2829 = vmatprep.subr.bf16.mxu1 %v3398_v3  ;;  %v2334_v14 = vcombine.low %v3548_v19, %v3548_v19  ;;  %v3325_v57 = vld [vmem:[%s4091_s1 + $0x360] sm:$0xff]   ;;  %vm2091_vm4 = vmand %vm2089_vm1, %vm2090_vm2 }
  0x2a   : >> { %2989 = vmatprep.subr.bf16.mxu0 %v3398_v3 }
  0x2c   : >> { %2830 = vmatpush3.bf16.msra.mxu1 %v3242_v15  ;;  %v2544_v15 = vcombine.low %v3628_v39, %v3628_v39 }
  0x2d   : >> { %2990 = vmatpush3.bf16.msra.mxu0 %v3243_v16  ;;  %2831 = vmatprep.subr.bf16.mxu1 %v3398_v3  ;;  %v3292_v16 = vld [vmem:[%s4091_s1 + $0xe8] sm:$0xff]  }
  0x2e   : >> { %2991 = vmatprep.subr.bf16.mxu0 %v3398_v3 }
  0x30   : >> { %2832 = vmatpush3.bf16.msra.mxu1 %v3244_v17  ;;  %v3293_v17 = vld [vmem:[%s4091_s1 + $0x2e8] sm:$0xff]  }
  0x31   : >> { %2992 = vmatpush3.bf16.msra.mxu0 %v3245_v18  ;;  %2837 = vmatprep.subr.bf16.mxu1 %v3398_v3  ;;  %v609_v18 = vshll.u32 %v2334_v14, 16 }
  0x32   : >> { %2997 = vmatprep.subr.bf16.mxu0 %v3398_v3 }
  0x33   : >> { %2834 = vmatmul.mubr.bf16.vlgmr.msra.gmra.mrb[0].mxu1 %v3548_v19  ;;  %v3294_v19 = vld [vmem:[%s4091_s1 + $0xf0] sm:$0xff]  }
  0x34   : >> { %2838 = vmatpush3.bf16.msra.mxu1 %v3247_v20  ;;  %2994 = vmatmul.mubr.bf16.vlgmr.msra.gmra.mrb[0].mxu0 %v3554_v21  ;;  %v1519_v20 = vshll.u32 %v2544_v15, 16  ;;  %v3295_v21 = vld [vmem:[%s4091_s1 + $0x2f0] sm:$0xff]  }
  0x35   : >> { %2998 = vmatpush3.bf16.msra.mxu0 %v3249_v22  ;;  %2839 = vmatprep.subr.bf16.mxu1 %v3398_v3  ;;  %v607_v22 = vshrl.u32 %v2334_v14, 16  ;;  %v3343_v14 = vld [vmem:[%s4091_s1 + $0x3a0] sm:$0xff]  }
  0x36   : >> { %2999 = vmatprep.subr.bf16.mxu0 %v3398_v3  ;;  %2853 = vmatprep.mubr.msk.bf16.mxu1 %vm3399_vm0, %v3398_v3 }
  0x37   : >> { %3013 = vmatprep.mubr.msk.bf16.mxu0 %vm3399_vm0, %v3398_v3 }
  0x38   : >> { %2840 = vmatpush3.bf16.msra.mxu1 %v3250_v23  ;;  %v611_v23 = vrot.slane %v609_v18, 1  ;;  %v3345_v18 = vld [vmem:[%s4091_s1 + $0x3a8] sm:$0xff]  }
  0x39   : >> { %3000 = vmatpush3.bf16.msra.mxu0 %v3251_v24  ;;  %2841 = vmatprep.subr.bf16.mxu1 %v3398_v3  ;;  %v1517_v24 = vshrl.u32 %v2544_v15, 16 }
  0x3a   : >> { %3001 = vmatprep.subr.bf16.mxu0 %v3398_v3 }
  0x3c   : >> { %2842 = vmatpush3.bf16.msra.mxu1 %v3252_v25  ;;  %v1521_v25 = vrot.slane %v1519_v20, 1 }
  0x3d   : >> { %3002 = vmatpush3.bf16.msra.mxu0 %v3253_v26  ;;  %2843 = vmatprep.subr.bf16.mxu1 %v3398_v3  ;;  %v3296_v26 = vld [vmem:[%s4091_s1 + $0xf8] sm:$0xff]  }
  0x3e   : >> { %3003 = vmatprep.subr.bf16.mxu0 %v3398_v3 }
  0x40   : >> { %2844 = vmatpush3.bf16.msra.mxu1 %v3254_v27  ;;  %v3297_v27 = vld [vmem:[%s4091_s1 + $0x2f8] sm:$0xff]  }
  0x41   : >> { %3004 = vmatpush3.bf16.msra.mxu0 %v3255_v28  ;;  %2845 = vmatprep.subr.bf16.mxu1 %v3398_v3  ;;  %v612_v28 = vor.u32 %v611_v23, %v607_v22  ;;  %v3347_v22 = vld [vmem:[%s4091_s1 + $0x3b0] sm:$0xff]  }
  0x42   : >> { %3005 = vmatprep.subr.bf16.mxu0 %v3398_v3 }
  0x44   : >> { %2846 = vmatpush3.bf16.msra.mxu1 %v3256_v29  ;;  %v3298_v29 = vld [vmem:[%s4091_s1 + $0x100] sm:$0xff]  }
  0x45   : >> { %3006 = vmatpush3.bf16.msra.mxu0 %v3257_v30  ;;  %2847 = vmatprep.subr.bf16.mxu1 %v3398_v3  ;;  %v1522_v30 = vor.u32 %v1521_v25, %v1517_v24 }
  0x46   : >> { %3007 = vmatprep.subr.bf16.mxu0 %v3398_v3 }
  0x48   : >> { %2848 = vmatpush3.bf16.msra.mxu1 %v3258_v31  ;;  %v3299_v31 = vld [vmem:[%s4091_s1 + $0x300] sm:$0xff]  }
  0x49   : >> { %3008 = vmatpush3.bf16.msra.mxu0 %v3259_v32  ;;  %2849 = vmatprep.subr.bf16.mxu1 %v3398_v3  ;;  %v3300_v32 = vld [vmem:[%s4091_s1 + $0x108] sm:$0xff]  }
  0x4a   : >> { %3009 = vmatprep.subr.bf16.mxu0 %v3398_v3 }
  0x4c   : >> { %2850 = vmatpush3.bf16.msra.mxu1 %v3260_v33  ;;  %v3301_v33 = vld [vmem:[%s4091_s1 + $0x308] sm:$0xff]  }
  0x4d   : >> { %3010 = vmatpush3.bf16.msra.mxu0 %v3261_v34  ;;  %2851 = vmatprep.subr.bf16.mxu1 %v3398_v3  ;;  %v3302_v34 = vld [vmem:[%s4091_s1 + $0x110] sm:$0xff]  }
  0x4e   : >> { %3011 = vmatprep.subr.bf16.mxu0 %v3398_v3 }
  0x50   : >> { %2852 = vmatpush3.bf16.msra.mxu1 %v3262_v35  ;;  %v3303_v35 = vld [vmem:[%s4091_s1 + $0x310] sm:$0xff]  }
  0x51   : >> { %3012 = vmatpush3.bf16.msra.mxu0 %v3263_v36  ;;  %2857 = vmatprep.subr.bf16.mxu1 %v3398_v3  ;;  %v3304_v36 = vld [vmem:[%s4091_s1 + $0x118] sm:$0xff]  }
  0x52   : >> { %3017 = vmatprep.subr.bf16.mxu0 %v3398_v3 }
  0x53   : >> { %2854 = vmatmul.mubr.bf16.vlgmr.msra.gmra.mrb[0].mxu1 %v255_v37  ;;  %v3305_v37 = vld [vmem:[%s4091_s1 + $0x318] sm:$0xff]  }
  0x54   : >> { %2858 = vmatpush3.bf16.msra.mxu1 %v3265_v38  ;;  %3014 = vmatmul.mubr.bf16.vlgmr.msra.gmra.mrb[0].mxu0 %v3628_v39  ;;  %v3306_v38 = vld [vmem:[%s4091_s1 + $0x120] sm:$0xff]  }
  0x55   : >> { %3018 = vmatpush3.bf16.msra.mxu0 %v3267_v40  ;;  %2859 = vmatprep.subr.bf16.mxu1 %v3398_v3  ;;  %v3307_v39 = vld [vmem:[%s4091_s1 + $0x320] sm:$0xff]   ;;  %v3308_v40 = vld [vmem:[%s4091_s1 + $0x128] sm:$0xff]  }
  0x56   : >> { %3019 = vmatprep.subr.bf16.mxu0 %v3398_v3  ;;  %2873 = vmatprep.mubr.msk.bf16.mxu1 %vm3399_vm0, %v3398_v3 }
  0x57   : >> { %3033 = vmatprep.mubr.msk.bf16.mxu0 %vm3399_vm0, %v3398_v3 }
  0x58   : >> { %2860 = vmatpush3.bf16.msra.mxu1 %v3268_v41  ;;  %v3309_v41 = vld [vmem:[%s4091_s1 + $0x328] sm:$0xff]  }
  0x59   : >> { %3020 = vmatpush3.bf16.msra.mxu0 %v3269_v42  ;;  %2861 = vmatprep.subr.bf16.mxu1 %v3398_v3  ;;  %v3310_v42 = vld [vmem:[%s4091_s1 + $0x130] sm:$0xff]  }
  0x5a   : >> { %3021 = vmatprep.subr.bf16.mxu0 %v3398_v3 }
  0x5c   : >> { %2862 = vmatpush3.bf16.msra.mxu1 %v3270_v43  ;;  %v3311_v43 = vld [vmem:[%s4091_s1 + $0x330] sm:$0xff]  }
  0x5d   : >> { %3022 = vmatpush3.bf16.msra.mxu0 %v3271_v44  ;;  %2863 = vmatprep.subr.bf16.mxu1 %v3398_v3  ;;  %v3312_v44 = vld [vmem:[%s4091_s1 + $0x138] sm:$0xff]  }
  0x5e   : >> { %3023 = vmatprep.subr.bf16.mxu0 %v3398_v3 }
  0x60   : >> { %2864 = vmatpush3.bf16.msra.mxu1 %v3272_v45  ;;  %v3313_v45 = vld [vmem:[%s4091_s1 + $0x338] sm:$0xff]  }
  0x61   : >> { %3024 = vmatpush3.bf16.msra.mxu0 %v3273_v46  ;;  %2865 = vmatprep.subr.bf16.mxu1 %v3398_v3  ;;  %v3839_v46 = vld [vmem:[%s3537_s20 + $0x8] sm:$0x7] }
  0x62   : >> { %3025 = vmatprep.subr.bf16.mxu0 %v3398_v3  ;;  %v2414_v15 = vcombine.low %v3839_v46, %v3839_v46 }
  0x64   : >> { %2866 = vmatpush3.bf16.msra.mxu1 %v3274_v47  ;;  %v3315_v47 = vld [vmem:[%s4091_s1 + $0x140] sm:$0xff]   ;;  %v947_v20 = vshll.u32 %v2414_v15, 16  ;;  %v945_v23 = vshrl.u32 %v2414_v15, 16 }
  0x65   : >> { %3026 = vmatpush3.bf16.msra.mxu0 %v3275_v48  ;;  %2867 = vmatprep.subr.bf16.mxu1 %v3398_v3  ;;  %v3846_v48 = vld [vmem:[%s3537_s20 + $0x18] sm:$0x7] }
  0x66   : >> { %3027 = vmatprep.subr.bf16.mxu0 %v3398_v3  ;;  %v949_v24 = vrot.slane %v947_v20, 1 }
  0x68   : >> { %2868 = vmatpush3.bf16.msra.mxu1 %v3276_v51  ;;  %v3319_v51 = vld [vmem:[%s4091_s1 + $0x348] sm:$0xff]  }
  0x69   : >> { %3028 = vmatpush3.bf16.msra.mxu0 %v3277_v52  ;;  %2869 = vmatprep.subr.bf16.mxu1 %v3398_v3  ;;  %v3320_v52 = vld [vmem:[%s4091_s1 + $0x150] sm:$0xff]  }
  0x6a   : >> { %3029 = vmatprep.subr.bf16.mxu0 %v3398_v3 }
  0x6c   : >> { %2870 = vmatpush3.bf16.msra.mxu1 %v3278_v55  ;;  %v3323_v55 = vld [vmem:[%s4091_s1 + $0x358] sm:$0xff]  }
  0x6d   : >> { %3030 = vmatpush3.bf16.msra.mxu0 %v3279_v56  ;;  %2871 = vmatprep.subr.bf16.mxu1 %v3398_v3  ;;  %v3324_v56 = vld [vmem:[%s4091_s1 + $0x160] sm:$0xff]  }
  0x6e   : >> { %3031 = vmatprep.subr.bf16.mxu0 %v3398_v3 }
  0x70   : >> { %2872 = vmatpush3.bf16.msra.mxu1 %v3280_v61  ;;  %v3329_v61 = vld [vmem:[%s4091_s1 + $0x370] sm:$0xff]  }
  0x71   : >> { %3032 = vmatpush3.bf16.msra.mxu0 %v3281_v62  ;;  %2877 = vmatprep.subr.bf16.mxu1 %v3398_v3  ;;  %v3330_v62 = vld [vmem:[%s4091_s1 + $0x178] sm:$0xff]  }
  0x72   : >> { %3037 = vmatprep.subr.bf16.mxu0 %v3398_v3 }
  0x73   : >> { %2874 = vmatmul.mubr.bf16.vlgmr.msra.gmra.mrb[0].mxu1 %v495_v63  ;;  %v3331_v63 = vld [vmem:[%s4091_s1 + $0x378] sm:$0xff]  }
  0x74   : >> { %2878 = vmatpush3.bf16.msra.mxu1 %v3282_v4  ;;  %3034 = vmatmul.mubr.bf16.vlgmr.msra.gmra.mrb[0].mxu0 %v1405_v2  ;;  %v3915_v2 = vld [vmem:[%s3537_s20 + $0xc] sm:$0x7]  ;;  %v3333_v4 = vld [vmem:[%s4091_s1 + $0x180] sm:$0xff]  }
  0x75   : >> { %3038 = vmatpush3.bf16.msra.mxu0 %v3283_v5  ;;  %2879 = vmatprep.subr.bf16.mxu1 %v3398_v3  ;;  %v3922_v5 = vld [vmem:[%s3537_s20 + $0x1c] sm:$0x7] }
  0x76   : >> { %3039 = vmatprep.subr.bf16.mxu0 %v3398_v3  ;;  %2893 = vmatprep.mubr.msk.bf16.mxu1 %vm3399_vm0, %v3398_v3 }
  0x77   : >> { %3053 = vmatprep.mubr.msk.bf16.mxu0 %vm3399_vm0, %v3398_v3 }
  0x78   : >> { %2880 = vmatpush3.bf16.msra.mxu1 %v3284_v6  ;;  %v3335_v6 = vld [vmem:[%s4091_s1 + $0x380] sm:$0xff]  }
  0x79   : >> { %3040 = vmatpush3.bf16.msra.mxu0 %v3285_v7  ;;  %2881 = vmatprep.subr.bf16.mxu1 %v3398_v3  ;;  %v3336_v7 = vld [vmem:[%s4091_s1 + $0x188] sm:$0xff]  }
  0x7a   : >> { %3041 = vmatprep.subr.bf16.mxu0 %v3398_v3 }
  0x7c   : >> { %2882 = vmatpush3.bf16.msra.mxu1 %v3286_v8  ;;  %v3337_v8 = vld [vmem:[%s4091_s1 + $0x388] sm:$0xff]  }
  0x7d   : >> { %3042 = vmatpush3.bf16.msra.mxu0 %v3287_v9  ;;  %2883 = vmatprep.subr.bf16.mxu1 %v3398_v3  ;;  %v3338_v9 = vld [vmem:[%s4091_s1 + $0x190] sm:$0xff]  }
  0x7e   : >> { %3043 = vmatprep.subr.bf16.mxu0 %v3398_v3 }
  0x80   : >> { %2884 = vmatpush3.bf16.msra.mxu1 %v3288_v10  ;;  %v3339_v10 = vld [vmem:[%s4091_s1 + $0x390] sm:$0xff]  }
  0x81   : >> { %3044 = vmatpush3.bf16.msra.mxu0 %v3289_v11  ;;  %2885 = vmatprep.subr.bf16.mxu1 %v3398_v3  ;;  %v3340_v11 = vld [vmem:[%s4091_s1 + $0x198] sm:$0xff]  }
  0x82   : >> { %3045 = vmatprep.subr.bf16.mxu0 %v3398_v3 }
  0x84   : >> { %2886 = vmatpush3.bf16.msra.mxu1 %v3290_v12  ;;  %v3341_v12 = vld [vmem:[%s4091_s1 + $0x398] sm:$0xff]  }
  0x85   : >> { %3046 = vmatpush3.bf16.msra.mxu0 %v3291_v13  ;;  %2887 = vmatprep.subr.bf16.mxu1 %v3398_v3  ;;  %v3342_v13 = vld [vmem:[%s4091_s1 + $0x1a0] sm:$0xff]  }
  0x86   : >> { %3047 = vmatprep.subr.bf16.mxu0 %v3398_v3 }
  0x88   : >> { %2888 = vmatpush3.bf16.msra.mxu1 %v3292_v16  ;;  %v2624_v16 = vcombine.low %v3846_v48, %v3846_v48 }
  0x89   : >> { %3048 = vmatpush3.bf16.msra.mxu0 %v3293_v17  ;;  %2889 = vmatprep.subr.bf16.mxu1 %v3398_v3  ;;  %v3344_v17 = vld [vmem:[%s4091_s1 + $0x1a8] sm:$0xff]  }
  0x8a   : >> { %3049 = vmatprep.subr.bf16.mxu0 %v3398_v3  ;;  %v1855_v25 = vshrl.u32 %v2624_v16, 16 }
  0x8c   : >> { %2890 = vmatpush3.bf16.msra.mxu1 %v3294_v19  ;;  %v1857_v19 = vshll.u32 %v2624_v16, 16 }
  0x8d   : >> { %3050 = vmatpush3.bf16.msra.mxu0 %v3295_v21  ;;  %2891 = vmatprep.subr.bf16.mxu1 %v3398_v3  ;;  %v3346_v21 = vld [vmem:[%s4091_s1 + $0x1b0] sm:$0xff]  }
  0x8e   : >> { %3051 = vmatprep.subr.bf16.mxu0 %v3398_v3 }
  0x90   : >> { %2892 = vmatpush3.bf16.msra.mxu1 %v3296_v26  ;;  %v1859_v26 = vrot.slane %v1857_v19, 1 }
  0x91   : >> { %3052 = vmatpush3.bf16.msra.mxu0 %v3297_v27  ;;  %2897 = vmatprep.subr.bf16.mxu1 %v3398_v3  ;;  %v3348_v27 = vld [vmem:[%s4091_s1 + $0x1b8] sm:$0xff]  }
  0x92   : >> { %3057 = vmatprep.subr.bf16.mxu0 %v3398_v3 }
  0x93   : >> { %2894 = vmatmul.mubr.bf16.vlgmr.msra.gmra.mrb[0].mxu1 %v612_v28  ;;  %v3349_v28 = vld [vmem:[%s4091_s1 + $0x3b8] sm:$0xff]  }
  0x94   : >> { %2898 = vmatpush3.bf16.msra.mxu1 %v3298_v29  ;;  %3054 = vmatmul.mubr.bf16.vlgmr.msra.gmra.mrb[0].mxu0 %v1522_v30  ;;  %v950_v29 = vor.u32 %v949_v24, %v945_v23  ;;  %v3350_v30 = vld [vmem:[%s4091_s1 + $0x1c0] sm:$0xff]  }
  0x95   : >> { %3058 = vmatpush3.bf16.msra.mxu0 %v3299_v31  ;;  %2899 = vmatprep.subr.bf16.mxu1 %v3398_v3  ;;  %v1860_v31 = vor.u32 %v1859_v26, %v1855_v25 }
  0x96   : >> { %3059 = vmatprep.subr.bf16.mxu0 %v3398_v3  ;;  %2913 = vmatprep.mubr.msk.bf16.mxu1 %vm3399_vm0, %v3398_v3 }
  0x97   : >> { %3073 = vmatprep.mubr.msk.bf16.mxu0 %vm3399_vm0, %v3398_v3 }
  0x98   : >> { %2900 = vmatpush3.bf16.msra.mxu1 %v3300_v32  ;;  %v3351_v32 = vld [vmem:[%s4091_s1 + $0x3c0] sm:$0xff]  }
  0x99   : >> { %3060 = vmatpush3.bf16.msra.mxu0 %v3301_v33  ;;  %2901 = vmatprep.subr.bf16.mxu1 %v3398_v3  ;;  %v3352_v33 = vld [vmem:[%s4091_s1 + $0x1c8] sm:$0xff]  }
  0x9a   : >> { %3061 = vmatprep.subr.bf16.mxu0 %v3398_v3 }
  0x9c   : >> { %2902 = vmatpush3.bf16.msra.mxu1 %v3302_v34  ;;  %v3353_v34 = vld [vmem:[%s4091_s1 + $0x3c8] sm:$0xff]  }
  0x9d   : >> { %3062 = vmatpush3.bf16.msra.mxu0 %v3303_v35  ;;  %2903 = vmatprep.subr.bf16.mxu1 %v3398_v3  ;;  %v3354_v35 = vld [vmem:[%s4091_s1 + $0x1d0] sm:$0xff]  }
  0x9e   : >> { %3063 = vmatprep.subr.bf16.mxu0 %v3398_v3 }
  0xa0   : >> { %2904 = vmatpush3.bf16.msra.mxu1 %v3304_v36  ;;  %v3355_v36 = vld [vmem:[%s4091_s1 + $0x3d0] sm:$0xff]  }
  0xa1   : >> { %3064 = vmatpush3.bf16.msra.mxu0 %v3305_v37  ;;  %2905 = vmatprep.subr.bf16.mxu1 %v3398_v3  ;;  %v3356_v37 = vld [vmem:[%s4091_s1 + $0x1d8] sm:$0xff]  }
  0xa2   : >> { %3065 = vmatprep.subr.bf16.mxu0 %v3398_v3 }
  0xa4   : >> { %2906 = vmatpush3.bf16.msra.mxu1 %v3306_v38  ;;  %v3357_v38 = vld [vmem:[%s4091_s1 + $0x3d8] sm:$0xff]  }
  0xa5   : >> { %3066 = vmatpush3.bf16.msra.mxu0 %v3307_v39  ;;  %2907 = vmatprep.subr.bf16.mxu1 %v3398_v3  ;;  %v3358_v39 = vld [vmem:[%s4091_s1 + $0x1e0] sm:$0xff]  }
  0xa6   : >> { %3067 = vmatprep.subr.bf16.mxu0 %v3398_v3 }
  0xa8   : >> { %2908 = vmatpush3.bf16.msra.mxu1 %v3308_v40  ;;  %v3359_v40 = vld [vmem:[%s4091_s1 + $0x3e0] sm:$0xff]  }
  0xa9   : >> { %3068 = vmatpush3.bf16.msra.mxu0 %v3309_v41  ;;  %2909 = vmatprep.subr.bf16.mxu1 %v3398_v3  ;;  %v2439_v41 = vcombine.low %v3915_v2, %v3915_v2 }
  0xaa   : >> { %3069 = vmatprep.subr.bf16.mxu0 %v3398_v3 }
  0xac   : >> { %2910 = vmatpush3.bf16.msra.mxu1 %v3310_v42  ;;  %v2649_v42 = vcombine.low %v3922_v5, %v3922_v5 }
  0xad   : >> { %3070 = vmatpush3.bf16.msra.mxu0 %v3311_v43  ;;  %2911 = vmatprep.subr.bf16.mxu1 %v3398_v3  ;;  %v3360_v43 = vld [vmem:[%s4091_s1 + $0x1e8] sm:$0xff]  }
  0xae   : >> { %3071 = vmatprep.subr.bf16.mxu0 %v3398_v3 }
  0xb0   : >> { %2912 = vmatpush3.bf16.msra.mxu1 %v3312_v44  ;;  %v3361_v44 = vld [vmem:[%s4091_s1 + $0x3e8] sm:$0xff]  }
  0xb1   : >> { %3072 = vmatpush3.bf16.msra.mxu0 %v3313_v45  ;;  %2917 = vmatprep.subr.bf16.mxu1 %v3398_v3  ;;  %v1064_v45 = vshll.u32 %v2439_v41, 16 }
  0xb2   : >> { %3077 = vmatprep.subr.bf16.mxu0 %v3398_v3 }
  0xb3   : >> { %2914 = vmatmul.mubr.bf16.vlgmr.msra.gmra.mrb[0].mxu1 %v3839_v46  ;;  %v1974_v46 = vshll.u32 %v2649_v42, 16 }
  0xb4   : >> { %2918 = vmatpush3.bf16.msra.mxu1 %v3315_v47  ;;  %3074 = vmatmul.mubr.bf16.vlgmr.msra.gmra.mrb[0].mxu0 %v3846_v48  ;;  %v3362_v47 = vld [vmem:[%s4091_s1 + $0x1f0] sm:$0xff]  }
  0xb5   : >> { %3078 = vmatpush3.bf16.msra.mxu0 %v3317_v49  ;;  %2919 = vmatprep.subr.bf16.mxu1 %v3398_v3  ;;  %v3363_v48 = vld [vmem:[%s4091_s1 + $0x3f0] sm:$0xff]   ;;  %v1062_v49 = vshrl.u32 %v2439_v41, 16 }
  0xb6   : >> { %3079 = vmatprep.subr.bf16.mxu0 %v3398_v3  ;;  %2933 = vmatprep.mubr.msk.bf16.mxu1 %vm3399_vm0, %v3398_v3 }
  0xb7   : >> { %3093 = vmatprep.mubr.msk.bf16.mxu0 %vm3399_vm0, %v3398_v3 }
  0xb8   : >> { %2920 = vmatpush3.bf16.msra.mxu1 %v3318_v50  ;;  %v1066_v50 = vrot.slane %v1064_v45, 1 }
  0xb9   : >> { %3080 = vmatpush3.bf16.msra.mxu0 %v3319_v51  ;;  %2921 = vmatprep.subr.bf16.mxu1 %v3398_v3  ;;  %v1972_v51 = vshrl.u32 %v2649_v42, 16 }
  0xba   : >> { %3081 = vmatprep.subr.bf16.mxu0 %v3398_v3 }
  0xbc   : >> { %2922 = vmatpush3.bf16.msra.mxu1 %v3320_v52  ;;  %v1976_v52 = vrot.slane %v1974_v46, 1 }
  0xbd   : >> { %3082 = vmatpush3.bf16.msra.mxu0 %v3321_v53  ;;  %2923 = vmatprep.subr.bf16.mxu1 %v3398_v3  ;;  %v3364_v53 = vld [vmem:[%s4091_s1 + $0x1f8] sm:$0xff]  }
  0xbe   : >> { %3083 = vmatprep.subr.bf16.mxu0 %v3398_v3 }
  0xc0   : >> { %2924 = vmatpush3.bf16.msra.mxu1 %v3322_v54  ;;  %v3365_v54 = vld [vmem:[%s4091_s1 + $0x3f8] sm:$0xff]  }
  0xc1   : >> { %3084 = vmatpush3.bf16.msra.mxu0 %v3323_v55  ;;  %2925 = vmatprep.subr.bf16.mxu1 %v3398_v3  ;;  %v1067_v55 = vor.u32 %v1066_v50, %v1062_v49 }
  0xc2   : >> { %3085 = vmatprep.subr.bf16.mxu0 %v3398_v3 }
  0xc4   : >> { %2926 = vmatpush3.bf16.msra.mxu1 %v3324_v56  ;;  %v1977_v56 = vor.u32 %v1976_v52, %v1972_v51 }
  0xc5   : >> { %3086 = vmatpush3.bf16.msra.mxu0 %v3325_v57  ;;  %2927 = vmatprep.subr.bf16.mxu1 %v3398_v3 }
  0xc6   : >> { %3087 = vmatprep.subr.bf16.mxu0 %v3398_v3 }
  0xc8   : >> { %2928 = vmatpush3.bf16.msra.mxu1 %v3326_v58 }
  0xc9   : >> { %3088 = vmatpush3.bf16.msra.mxu0 %v3327_v59  ;;  %2929 = vmatprep.subr.bf16.mxu1 %v3398_v3 }
  0xca   : >> { %3089 = vmatprep.subr.bf16.mxu0 %v3398_v3 }
  0xcc   : >> { %2930 = vmatpush3.bf16.msra.mxu1 %v3328_v60 }
  0xcd   : >> { %3090 = vmatpush3.bf16.msra.mxu0 %v3329_v61  ;;  %2931 = vmatprep.subr.bf16.mxu1 %v3398_v3 }
  0xce   : >> { %3091 = vmatprep.subr.bf16.mxu0 %v3398_v3 }
  0xd0   : >> { %2932 = vmatpush3.bf16.msra.mxu1 %v3330_v62 }
  0xd1   : >> { %3092 = vmatpush3.bf16.msra.mxu0 %v3331_v63  ;;  %2937 = vmatprep.subr.bf16.mxu1 %v3398_v3  ;;  %v2092_v63 = vld [vmem:[%s2088_s10] sm:$0x7] }
  0xd2   : >> { %3097 = vmatprep.subr.bf16.mxu0 %v3398_v3 }
  0xd3   : >> { %2934 = vmatmul.mubr.bf16.vlgmr.msra.gmra.mrb[0].mxu1 %v3915_v2 }
  0xd4   : >> { %2938 = vmatpush3.bf16.msra.mxu1 %v3333_v4  ;;  %3094 = vmatmul.mubr.bf16.vlgmr.msra.gmra.mrb[0].mxu0 %v3922_v5 }
  0xd5   : >> { %3098 = vmatpush3.bf16.msra.mxu0 %v3335_v6  ;;  %2939 = vmatprep.subr.bf16.mxu1 %v3398_v3 }
  0xd6   : >> { %3099 = vmatprep.subr.bf16.mxu0 %v3398_v3  ;;  %2953 = vmatprep.mubr.msk.bf16.mxu1 %vm3399_vm0, %v3398_v3 }
  0xd7   : >> { %3113 = vmatprep.mubr.msk.bf16.mxu0 %vm3399_vm0, %v3398_v3 }
  0xd8   : >> { %2940 = vmatpush3.bf16.msra.mxu1 %v3336_v7 }
  0xd9   : >> { %3100 = vmatpush3.bf16.msra.mxu0 %v3337_v8  ;;  %2941 = vmatprep.subr.bf16.mxu1 %v3398_v3 }
  0xda   : >> { %3101 = vmatprep.subr.bf16.mxu0 %v3398_v3 }
  0xdc   : >> { %2942 = vmatpush3.bf16.msra.mxu1 %v3338_v9 }
  0xdd   : >> { %3102 = vmatpush3.bf16.msra.mxu0 %v3339_v10  ;;  %2943 = vmatprep.subr.bf16.mxu1 %v3398_v3 }
  0xde   : >> { %3103 = vmatprep.subr.bf16.mxu0 %v3398_v3 }
  0xe0   : >> { %2944 = vmatpush3.bf16.msra.mxu1 %v3340_v11 }
  0xe1   : >> { %3104 = vmatpush3.bf16.msra.mxu0 %v3341_v12  ;;  %2945 = vmatprep.subr.bf16.mxu1 %v3398_v3 }
  0xe2   : >> { %3105 = vmatprep.subr.bf16.mxu0 %v3398_v3 }
  0xe4   : >> { %2946 = vmatpush3.bf16.msra.mxu1 %v3342_v13 }
  0xe5   : >> { %3106 = vmatpush3.bf16.msra.mxu0 %v3343_v14  ;;  %2947 = vmatprep.subr.bf16.mxu1 %v3398_v3 }
  0xe6   : >> { %3107 = vmatprep.subr.bf16.mxu0 %v3398_v3 }
  0xe8   : >> { %2948 = vmatpush3.bf16.msra.mxu1 %v3344_v17 }
  0xe9   : >> { %3108 = vmatpush3.bf16.msra.mxu0 %v3345_v18  ;;  %2949 = vmatprep.subr.bf16.mxu1 %v3398_v3 }
  0xea   : >> { %3109 = vmatprep.subr.bf16.mxu0 %v3398_v3 }
  0xec   : >> { %2950 = vmatpush3.bf16.msra.mxu1 %v3346_v21 }
  0xed   : >> { %3110 = vmatpush3.bf16.msra.mxu0 %v3347_v22  ;;  %2951 = vmatprep.subr.bf16.mxu1 %v3398_v3 }
  0xee   : >> { %3111 = vmatprep.subr.bf16.mxu0 %v3398_v3 }
  0xf0   : >> { %2952 = vmatpush3.bf16.msra.mxu1 %v3348_v27 }
  0xf1   : >> { %3112 = vmatpush3.bf16.msra.mxu0 %v3349_v28  ;;  %2957 = vmatprep.subr.bf16.mxu1 %v3398_v3 }
  0xf2   : >> { %3117 = vmatprep.subr.bf16.mxu0 %v3398_v3 }
  0xf3   : >> { %2954 = vmatmul.mubr.bf16.vlgmr.msra.gmra.mrb[0].mxu1 %v950_v29 }
  0xf4   : >> { %2958 = vmatpush3.bf16.msra.mxu1 %v3350_v30  ;;  %3114 = vmatmul.mubr.bf16.vlgmr.msra.gmra.mrb[0].mxu0 %v1860_v31 }
  0xf5   : >> { %3118 = vmatpush3.bf16.msra.mxu0 %v3351_v32  ;;  %2959 = vmatprep.subr.bf16.mxu1 %v3398_v3 }
  0xf6   : >> { %3119 = vmatprep.subr.bf16.mxu0 %v3398_v3  ;;  %2973 = vmatprep.mubr.msk.bf16.mxu1 %vm3399_vm0, %v3398_v3 }
  0xf7   : >> { %3133 = vmatprep.mubr.msk.bf16.mxu0 %vm3399_vm0, %v3398_v3 }
  0xf8   : >> { %2960 = vmatpush3.bf16.msra.mxu1 %v3352_v33 }
  0xf9   : >> { %3120 = vmatpush3.bf16.msra.mxu0 %v3353_v34  ;;  %2961 = vmatprep.subr.bf16.mxu1 %v3398_v3 }
  0xfa   : >> { %3121 = vmatprep.subr.bf16.mxu0 %v3398_v3 }
  0xfc   : >> { %2962 = vmatpush3.bf16.msra.mxu1 %v3354_v35 }
  0xfd   : >> { %3122 = vmatpush3.bf16.msra.mxu0 %v3355_v36  ;;  %2963 = vmatprep.subr.bf16.mxu1 %v3398_v3 }
  0xfe   : >> { %3123 = vmatprep.subr.bf16.mxu0 %v3398_v3 }
 0x100   : >> { %2964 = vmatpush3.bf16.msra.mxu1 %v3356_v37 }
 0x101   : >> { %3124 = vmatpush3.bf16.msra.mxu0 %v3357_v38  ;;  %2965 = vmatprep.subr.bf16.mxu1 %v3398_v3 }
 0x102   : >> { %3125 = vmatprep.subr.bf16.mxu0 %v3398_v3 }
 0x104   : >> { %2966 = vmatpush3.bf16.msra.mxu1 %v3358_v39 }
 0x105   : >> { %3126 = vmatpush3.bf16.msra.mxu0 %v3359_v40  ;;  %2967 = vmatprep.subr.bf16.mxu1 %v3398_v3 }
 0x106   : >> { %3127 = vmatprep.subr.bf16.mxu0 %v3398_v3 }
 0x108   : >> { %2968 = vmatpush3.bf16.msra.mxu1 %v3360_v43 }
 0x109   : >> { %3128 = vmatpush3.bf16.msra.mxu0 %v3361_v44  ;;  %2969 = vmatprep.subr.bf16.mxu1 %v3398_v3 }
 0x10a   : >> { %3129 = vmatprep.subr.bf16.mxu0 %v3398_v3 }
 0x10c   : >> { %2970 = vmatpush3.bf16.msra.mxu1 %v3362_v47 }
 0x10d   : >> { %3130 = vmatpush3.bf16.msra.mxu0 %v3363_v48  ;;  %2971 = vmatprep.subr.bf16.mxu1 %v3398_v3 }
 0x10e   : >> { %3131 = vmatprep.subr.bf16.mxu0 %v3398_v3 }
 0x110   : >> { %2972 = vmatpush3.bf16.msra.mxu1 %v3364_v53 }
 0x111   : >> { %3132 = vmatpush3.bf16.msra.mxu0 %v3365_v54 }
 0x113   : >> { %2974 = vmatmul.mubr.bf16.vlgmr.msra.gmra.mrb[0].mxu1 %v1067_v55 }
 0x114   : >> { %3134 = vmatmul.mubr.bf16.vlgmr.msra.gmra.mrb[0].mxu0 %v1977_v56 }
 0x1e6   : >> { %v1151_v57 = vpop.f32.mrb[0].mxu1 }
 0x1e7   : >> { %v2061_v58 = vpop.f32.mrb[0].mxu0  ;;  %v2975_v59 = vpop.f32.mrb[1].mxu1 }
 0x1e8   : >> { %v3137_v60 = vadd.f32 %v2061_v58, %v1151_v57  ;;  %v3135_v61 = vpop.f32.mrb[1].mxu0  ;;  %v1154_v62 = vpop.f32.mrb[2].mxu1 }
 0x1e9   : >> { %v2064_v3 = vpop.f32.mrb[2].mxu0  ;;  %v2976_v2 = vpop.f32.mrb[3].mxu1 }
 0x1ea   : >> { %v2069_v4 = vsel %vm2068_vm3, %v3137_v60, 0.0  ;;  %v2077_v5 = vmul.f32 %v3137_v60, %v3137_v60  ;;  %v2086_v6 = vpack.c.bf16 %v3137_v60, %v3137_v60  ;;  %v3136_v7 = vpop.f32.mrb[3].mxu0 }
 0x1eb   : >> { %v2070_v8 = vrot.slane %v2069_v4, 4 }
 0x1ec   : >> { %v2078_v9 = vsel %vm2068_vm3, %v2077_v5, 0.0  ;;  %v2093_v10 = vsel %vm2091_vm4, %v2086_v6, %v2092_v63 }
 0x1ed   : >> { %v2071_v11 = vadd.f32 %v2070_v8, %v2069_v4  ;;  %v2079_v12 = vrot.slane %v2078_v9, 4  ;;  %2094 = vst [vmem:[%s2088_s10] sm:$0x7] %v2093_v10 }
 0x1ef   : >> { %v2072_v13 = vrot.slane %v2071_v11, 2  ;;  %v2080_v14 = vadd.f32 %v2079_v12, %v2078_v9 }
 0x1f1   : >> { %v2073_v15 = vadd.f32 %v2072_v13, %v2071_v11  ;;  %v2081_v16 = vrot.slane %v2080_v14, 2 }
 0x1f3   : >> { %v2074_v17 = vrot.slane %v2073_v15, 1  ;;  %v2082_v18 = vadd.f32 %v2081_v16, %v2080_v14 }
 0x1f5   : >> { %v2075_v20 = vadd.f32 %v2074_v17, %v2073_v15  ;;  %v2083_v19 = vrot.slane %v2082_v18, 1  ;;  %247 = sbr.rel (!%p245_p4) target bundleno = 18 (0x12), region = 117 }
 0x1f7   : >> { %v2076_v21 = vadd.f32 %v3392_v1, %v2075_v20   ;;  %v2084_v22 = vadd.f32 %v2083_v19, %v2082_v18 }
 0x1f9   : >> { %v2085_v23 = vadd.f32 %v3388_v0, %v2084_v22   ;;  %v4097_v1 = vmov %v2076_v21  ;;  %2095 = vst [vmem:[%s238_s22] sm:$0x1] (%p245_p4), %v2076_v21 }
 0x1fb   : >> { %v4096_v0 = vmov %v2085_v23  ;;  %2096 = vst [vmem:[%s241_s26] sm:$0x1] (%p245_p4), %v2085_v23 }
 0x1fc PF: > { %s16_s18 = sadd.s32 1, %s3384_s18  }
 0x1fd   : > { %p13_p5 = scmp.ge.s32.totalorder %s16_s18, 4  }
 0x1ff   :  { %15 = sbr.rel (!%p13_p5) target bundleno = 1 (0x1), region = 128 }

// kernel: discriminator_forward.12
= control target key start
LH: loop header
LB: loop body
LE: loop exit
PB: predicated region body
PF: predicated region fallthrough
CT: control target
= control target key end

     0   :  { %s324_s12 = smov 0   ;;  %s347_s0 = inlined_call_operand.vmem [shape: bf16[2,3,3,128], index: 0, kind: input, shape index: {}]   ;;  %s348_s1 = inlined_call_operand.vmem [shape: f32[1,128], index: 1, kind: input, shape index: {}]   ;;  %s349_s2 = inlined_call_operand.vmem [shape: f32[1,128], index: 2, kind: input, shape index: {}]   ;;  %s350_s3 = inlined_call_operand.vmem [shape: bf16[2,3,3,128], index: 3, kind: output, shape index: {}]  }
   0x1 LB: > { %s276_s13 = sadd.s32 4294967295, %s302_s12   ;;  %p280_p0 = scmp.ge.s32.totalorder %s302_s12, 1  ;;  %s302_s12 = sphi %s324_s12, %s13_s12  }
   0x2   : > { %p137_p1 = scmp.lt.s32.totalorder %s302_s12, 3 }
   0x4   : > { %p138_p2 = pnand %p280_p0, %p137_p1 }
   0x5   : > { %p161_p3 = scmp.lt.s32.totalorder (!%p138_p2), %s276_s13, 1  ;;  %v283_v0 = vld [vmem:[%s348_s1] ss:$0 sm:$0xff] (!%p138_p2)  ;;  %vm209_vm0 = vcmask (!%p138_p2), 1041408   ;;  %vm210_vm1 = vsmask.f32 (!%p138_p2), 1280 }
   0x6   : > { %141 = sbr.rel (%p138_p2) target bundleno = 32 (0x20), region = 32  ;;  %v284_v7 = vld [vmem:[%s349_s2] ss:$0 sm:$0xff] (!%p138_p2)  ;;  %vm211_vm5 = vmand (!%p138_p2), %vm209_vm0, %vm210_vm1 }
   0xd   : > { %s352_s13 = smov (!%p161_p3, %s276_s13), 1 }
   0xe   : > { %s287_s14 = smul.u32 6, %s352_s13 }
  0x10   : > { %s165_s17 = scalar_lea.vmem %s347_s0, %s287_s14  ;;  %s170_s24 = scalar_lea.vmem %s350_s3, %s287_s14 }
  0x11   : > { %v171_v1 = vld [vmem:[%s165_s17] sm:$0x3]  ;;  %v172_v2 = vld [vmem:[%s165_s17 + $0x2] sm:$0x3]  ;;  %v173_v3 = vld [vmem:[%s165_s17 + $0x4] sm:$0x3] }
  0x12   : > { %v174_v4 = vunpack.c.l.bf16 %v171_v1  ;;  %v175_v5 = vunpack.c.l.bf16 %v172_v2  ;;  %v176_v6 = vunpack.c.l.bf16 %v173_v3  ;;  %v212_v18 = vld [vmem:[%s170_s24] sm:$0x3]  ;;  %v215_v20 = vld [vmem:[%s170_s24 + $0x2] sm:$0x3]  ;;  %v218_v24 = vld [vmem:[%s170_s24 + $0x4] sm:$0x3] }
  0x14   : > { %v184_v8 = vmul.f32 %v283_v0, %v174_v4  ;;  %v185_v9 = vmul.f32 %v283_v0, %v175_v5  ;;  %v186_v10 = vmul.f32 %v283_v0, %v176_v6 }
  0x16   : > { %v194_v11 = vadd.f32 %v284_v7, %v184_v8  ;;  %v195_v12 = vadd.f32 %v284_v7, %v185_v9  ;;  %v196_v13 = vadd.f32 %v284_v7, %v186_v10 }
  0x18   : > { %vm197_vm2 = vcmp.ge.f32.partialorder %v194_v11, 0.0  ;;  %v200_v14 = vmul.f32 0.2, %v194_v11  ;;  %vm198_vm3 = vcmp.ge.f32.partialorder %v195_v12, 0.0  ;;  %v201_v15 = vmul.f32 0.2, %v195_v12 }
  0x19   : > { %vm199_vm4 = vcmp.ge.f32.partialorder %v196_v13, 0.0  ;;  %v202_v16 = vmul.f32 0.2, %v196_v13 }
  0x1a   : > { %v203_v17 = vsel %vm197_vm2, %v194_v11, %v200_v14  ;;  %v204_v19 = vsel %vm198_vm3, %v195_v12, %v201_v15 }
  0x1b   : > { %v206_v21 = vpack.c.bf16 %v203_v17, %v203_v17  ;;  %v207_v22 = vpack.c.bf16 %v204_v19, %v204_v19  ;;  %v205_v23 = vsel %vm199_vm4, %v196_v13, %v202_v16 }
  0x1c   : > { %v208_v25 = vpack.c.bf16 %v205_v23, %v205_v23 }
  0x1d   : > { %v213_v26 = vsel %vm211_vm5, %v206_v21, %v212_v18  ;;  %v216_v27 = vsel %vm211_vm5, %v207_v22, %v215_v20 }
  0x1e   : > { %214 = vst [vmem:[%s170_s24] sm:$0x3] %v213_v26  ;;  %217 = vst [vmem:[%s170_s24 + $0x2] sm:$0x3] %v216_v27  ;;  %v219_v28 = vsel %vm211_vm5, %v208_v25, %v218_v24 }
  0x1f   : > { %220 = vst [vmem:[%s170_s24 + $0x4] sm:$0x3] %v219_v28 }
  0x20 PF: > { %s13_s12 = sadd.s32 1, %s302_s12  }
  0x21   : > { %p10_p4 = scmp.ge.s32.totalorder %s13_s12, 4  }
  0x23   :  { %12 = sbr.rel (!%p10_p4) target bundleno = 1 (0x1), region = 62 }

// kernel: discriminator_forward.14
= control target key start
LH: loop header
LB: loop body
LE: loop exit
PB: predicated region body
PF: predicated region fallthrough
CT: control target
= control target key end

     0   :  { %s327_s12 = smov 0   ;;  %s353_s0 = inlined_call_operand.vmem [shape: bf16[2,4,4,128], index: 0, kind: input, shape index: {}]   ;;  %s354_s1 = inlined_call_operand.vmem [shape: f32[1,128], index: 1, kind: input, shape index: {}]   ;;  %s355_s2 = inlined_call_operand.vmem [shape: f32[1,128], index: 2, kind: input, shape index: {}]   ;;  %s356_s3 = inlined_call_operand.vmem [shape: bf16[2,4,4,128], index: 3, kind: output, shape index: {}]  }
   0x1 LB: > { %s276_s13 = sadd.s32 4294967295, %s305_s12   ;;  %p280_p0 = scmp.ge.s32.totalorder %s305_s12, 1  ;;  %s305_s12 = sphi %s327_s12, %s13_s12  }
   0x2   : > { %p137_p1 = scmp.lt.s32.totalorder %s305_s12, 3 }
   0x4   : > { %p138_p2 = pnand %p280_p0, %p137_p1 }
   0x5   : > { %p161_p3 = scmp.lt.s32.totalorder (!%p138_p2), %s276_s13, 1  ;;  %v285_v0 = vld [vmem:[%s354_s1] ss:$0 sm:$0xff] (!%p138_p2) }
   0x6   : > { %141 = sbr.rel (%p138_p2) target bundleno = 30 (0x1e), region = 32  ;;  %v286_v9 = vld [vmem:[%s355_s2] ss:$0 sm:$0xff] (!%p138_p2) }
   0xd   : > { %s358_s13 = smov (!%p161_p3, %s276_s13), 1 }
   0xe   : > { %s289_s14 = sshll.u32 %s358_s13, 3 }
   0xf   : > { %s165_s17 = scalar_lea.vmem %s353_s0, %s289_s14  ;;  %s170_s24 = scalar_lea.vmem %s356_s3, %s289_s14 }
  0x10   : > { %v171_v1 = vld [vmem:[%s165_s17] sm:$0x3]  ;;  %v172_v2 = vld [vmem:[%s165_s17 + $0x2] sm:$0x3]  ;;  %v173_v3 = vld [vmem:[%s165_s17 + $0x4] sm:$0x3] }
  0x11   : > { %v174_v4 = vld [vmem:[%s165_s17 + $0x6] sm:$0x3]  ;;  %v175_v5 = vunpack.c.l.bf16 %v171_v1  ;;  %v176_v6 = vunpack.c.l.bf16 %v172_v2  ;;  %v177_v7 = vunpack.c.l.bf16 %v173_v3 }
  0x12   : > { %v178_v8 = vunpack.c.l.bf16 %v174_v4 }
  0x13   : > { %v186_v10 = vmul.f32 %v285_v0, %v175_v5  ;;  %v187_v11 = vmul.f32 %v285_v0, %v176_v6  ;;  %v188_v12 = vmul.f32 %v285_v0, %v177_v7 }
  0x14   : > { %v189_v13 = vmul.f32 %v285_v0, %v178_v8 }
  0x15   : > { %v197_v14 = vadd.f32 %v286_v9, %v186_v10  ;;  %v198_v15 = vadd.f32 %v286_v9, %v187_v11  ;;  %v199_v16 = vadd.f32 %v286_v9, %v188_v12 }
  0x16   : > { %v200_v17 = vadd.f32 %v286_v9, %v189_v13 }
  0x17   : > { %vm201_vm0 = vcmp.ge.f32.partialorder %v197_v14, 0.0  ;;  %v205_v18 = vmul.f32 0.2, %v197_v14  ;;  %vm202_vm1 = vcmp.ge.f32.partialorder %v198_v15, 0.0  ;;  %v206_v19 = vmul.f32 0.2, %v198_v15 }
  0x18   : > { %vm203_vm2 = vcmp.ge.f32.partialorder %v199_v16, 0.0  ;;  %v207_v20 = vmul.f32 0.2, %v199_v16  ;;  %vm204_vm3 = vcmp.ge.f32.partialorder %v200_v17, 0.0  ;;  %v208_v21 = vmul.f32 0.2, %v200_v17 }
  0x19   : > { %v209_v22 = vsel %vm201_vm0, %v197_v14, %v205_v18  ;;  %v210_v23 = vsel %vm202_vm1, %v198_v15, %v206_v19 }
  0x1a   : > { %v213_v24 = vpack.c.bf16 %v209_v22, %v209_v22  ;;  %v214_v25 = vpack.c.bf16 %v210_v23, %v210_v23  ;;  %v211_v26 = vsel %vm203_vm2, %v199_v16, %v207_v20  ;;  %v212_v27 = vsel %vm204_vm3, %v200_v17, %v208_v21 }
  0x1b   : > { %v215_v28 = vpack.c.bf16 %v211_v26, %v211_v26  ;;  %v216_v29 = vpack.c.bf16 %v212_v27, %v212_v27 }
  0x1c   : > { %217 = vst [vmem:[%s170_s24] sm:$0x3] %v213_v24  ;;  %218 = vst [vmem:[%s170_s24 + $0x2] sm:$0x3] %v214_v25 }
  0x1d   : > { %219 = vst [vmem:[%s170_s24 + $0x4] sm:$0x3] %v215_v28  ;;  %220 = vst [vmem:[%s170_s24 + $0x6] sm:$0x3] %v216_v29 }
  0x1e PF: > { %s13_s12 = sadd.s32 1, %s305_s12  }
  0x1f   : > { %p10_p4 = scmp.ge.s32.totalorder %s13_s12, 4  }
  0x21   :  { %12 = sbr.rel (!%p10_p4) target bundleno = 1 (0x1), region = 62 }

// kernel: discriminator_forward.11
= control target key start
LH: loop header
LB: loop body
LE: loop exit
PB: predicated region body
PF: predicated region fallthrough
CT: control target
= control target key end

     0   :  { %s3430_s18 = smov 0   ;;  %s4090_s0 = inlined_call_operand.vmem [shape: bf16[2,9,2,5,128], index: 0, kind: input, shape index: {}]   ;;  %s4091_s1 = inlined_call_operand.vmem [shape: bf16[16,128,128], index: 1, kind: input, shape index: {}]   ;;  %s4092_s2 = inlined_call_operand.vmem [shape: f32[1,128], index: 2, kind: input, shape index: {}]   ;;  %s4093_s3 = inlined_call_operand.vmem [shape: bf16[2,3,3,128], index: 3, kind: output, shape index: {0}]   ;;  %s4094_s4 = inlined_call_operand.vmem [shape: f32[2,1,128], index: 4, kind: output, shape index: {1}]   ;;  %s4095_s5 = inlined_call_operand.vmem [shape: f32[2,1,128], index: 5, kind: output, shape index: {2}]  }
   0x1 LB: > { %s2248_s2 = sadd.s32 4294967295, %s3384_s18   ;;  %p2252_p0 = scmp.ge.s32.totalorder %s3384_s18, 1  ;;  %s3384_s18 = sphi %s3430_s18, %s16_s18  }
   0x2   : > { %p192_p1 = scmp.lt.s32.totalorder %s3384_s18, 3 }
   0x4   : > { %p193_p2 = pnand %p2252_p0, %p192_p1 }
   0x5   : > { %p226_p3 = scmp.lt.s32.totalorder (!%p193_p2), %s2248_s2, 1  ;;  %v3460_v0 = vmov (!%p193_p2), 0.0   ;;  %v3462_v1 = vmov (!%p193_p2), 0.0   ;;  %s3464_s8 = smov (!%p193_p2), 0  }
   0x6   : > { %196 = sbr.rel (%p193_p2) target bundleno = 508 (0x1fc), region = 32 }
   0xd   : > { %s4099_s2 = smov (!%p226_p3, %s2248_s2), 1 }
   0xe   : > { %s3194_s19 = smul.u32 72, %s4099_s2  ;;  %s238_s22 = scalar_lea.vmem %s4094_s4, %s4099_s2 }
   0xf   : > { %s3195_s23 = smul.u32 6, %s4099_s2  ;;  %s241_s26 = scalar_lea.vmem %s4095_s5, %s4099_s2 }
  0x10   : > { %s3453_s29 = scalar_lea.vmem %s4090_s0, %s3194_s19 }
  0x11   : > { %s3458_s7 = scalar_lea.vmem %s4093_s3, %s3195_s23 }
  0x12 LB: >> { %v3230_v2 = vld [vmem:[%s4091_s1 + $0x40] sm:$0xff]   ;;  %v3398_v3 = vmov 0.0   ;;  %v3232_v5 = vld [vmem:[%s4091_s1 + $0x48] sm:$0xff]   ;;  %vm3399_vm0 = vmmov 0   ;;  %v3234_v7 = vld [vmem:[%s4091_s1 + $0x50] sm:$0xff]   ;;  %s2662_s16 = sshll.u32 %s3396_s8, 4  ;;  %s3396_s8 = sphi %s3464_s8, %s248_s8   ;;  %v3392_v1 = vphi %v3462_v1, %v4097_v1   ;;  %v3388_v0 = vphi %v3460_v0, %v4096_v0  }
  0x13   : >> { %2817 = vmatprep.subr.bf16.mxu1 %v3398_v3  ;;  %2977 = vmatprep.subr.bf16.mxu0 %v3398_v3  ;;  %v3231_v4 = vld [vmem:[%s4091_s1 + $0x200] sm:$0xff]   ;;  %v3233_v6 = vld [vmem:[%s4091_s1 + $0x208] sm:$0xff]   ;;  %v3235_v8 = vld [vmem:[%s4091_s1 + $0x210] sm:$0xff]   ;;  %s3537_s20 = scalar_lea.vmem %s3453_s29, %s2662_s16  ;;  %s2658_s9 = sshll.u32 %s3396_s8, 1  ;;  %vm2089_vm1 = vcmask 1041408   ;;  %vm2068_vm3 = vcmask 1042432  }
  0x14   : >> { %2818 = vmatpush3.bf16.msra.mxu1 %v3230_v2  ;;  %2833 = vmatprep.mubr.msk.bf16.mxu1 %vm3399_vm0, %v3398_v3  ;;  %v3236_v9 = vld [vmem:[%s4091_s1 + $0x58] sm:$0xff]   ;;  %v3238_v11 = vld [vmem:[%s4091_s1 + $0x60] sm:$0xff]   ;;  %v3240_v13 = vld [vmem:[%s4091_s1 + $0x68] sm:$0xff]   ;;  %s2088_s10 = scalar_lea.vmem %s3458_s7, %s2658_s9  ;;  %vm2090_vm2 = vsmask.f32 1280  ;;  %s248_s8 = sadd.s32 1, %s3396_s8  }
  0x15   : >> { %2978 = vmatpush3.bf16.msra.mxu0 %v3231_v4  ;;  %2819 = vmatprep.subr.bf16.mxu1 %v3398_v3  ;;  %v3237_v10 = vld [vmem:[%s4091_s1 + $0x218] sm:$0xff]   ;;  %v3239_v12 = vld [vmem:[%s4091_s1 + $0x220] sm:$0xff]   ;;  %v3241_v14 = vld [vmem:[%s4091_s1 + $0x228] sm:$0xff]   ;;  %p245_p4 = scmp.ge.s32.totalorder %s248_s8, 3  }
  0x16   : >> { %2979 = vmatprep.subr.bf16.mxu0 %v3398_v3  ;;  %2993 = vmatprep.mubr.msk.bf16.mxu0 %vm3399_vm0, %v3398_v3  ;;  %v3242_v15 = vld [vmem:[%s4091_s1 + $0x70] sm:$0xff]   ;;  %v3244_v17 = vld [vmem:[%s4091_s1 + $0x78] sm:$0xff]   ;;  %v3548_v19 = vld [vmem:[%s3537_s20 + $0x4] sm:$0x3] }
  0x17   : >> { %v3243_v16 = vld [vmem:[%s4091_s1 + $0x230] sm:$0xff]   ;;  %v3245_v18 = vld [vmem:[%s4091_s1 + $0x238] sm:$0xff]   ;;  %v3247_v20 = vld [vmem:[%s4091_s1] sm:$0xff]  }
  0x18   : >> { %2820 = vmatpush3.bf16.msra.mxu1 %v3232_v5  ;;  %v3554_v21 = vld [vmem:[%s3537_s20 + $0x10] sm:$0x3]  ;;  %v3249_v22 = vld [vmem:[%s4091_s1 + $0x240] sm:$0xff]   ;;  %v3250_v23 = vld [vmem:[%s4091_s1 + $0x8] sm:$0xff]  }
  0x19   : >> { %2980 = vmatpush3.bf16.msra.mxu0 %v3233_v6  ;;  %2821 = vmatprep.subr.bf16.mxu1 %v3398_v3  ;;  %v3251_v24 = vld [vmem:[%s4091_s1 + $0x248] sm:$0xff]   ;;  %v3252_v25 = vld [vmem:[%s4091_s1 + $0x10] sm:$0xff]   ;;  %v3254_v27 = vld [vmem:[%s4091_s1 + $0x18] sm:$0xff]   ;;  %v2519_v50 = vcombine.low %v3554_v21, %v3554_v21 }
  0x1a   : >> { %2981 = vmatprep.subr.bf16.mxu0 %v3398_v3  ;;  %v3253_v26 = vld [vmem:[%s4091_s1 + $0x250] sm:$0xff]   ;;  %v3255_v28 = vld [vmem:[%s4091_s1 + $0x258] sm:$0xff]   ;;  %v3256_v29 = vld [vmem:[%s4091_s1 + $0x20] sm:$0xff]  }
  0x1b   : >> { %v3257_v30 = vld [vmem:[%s4091_s1 + $0x260] sm:$0xff]   ;;  %v3258_v31 = vld [vmem:[%s4091_s1 + $0x28] sm:$0xff]   ;;  %v3260_v33 = vld [vmem:[%s4091_s1 + $0x30] sm:$0xff]   ;;  %v1402_v54 = vshll.u32 %v2519_v50, 16  ;;  %v1400_v57 = vshrl.u32 %v2519_v50, 16 }
  0x1c   : >> { %2822 = vmatpush3.bf16.msra.mxu1 %v3234_v7  ;;  %v3259_v32 = vld [vmem:[%s4091_s1 + $0x268] sm:$0xff]   ;;  %v3261_v34 = vld [vmem:[%s4091_s1 + $0x270] sm:$0xff]   ;;  %v3262_v35 = vld [vmem:[%s4091_s1 + $0x38] sm:$0xff]  }
  0x1d   : >> { %2982 = vmatpush3.bf16.msra.mxu0 %v3235_v8  ;;  %2823 = vmatprep.subr.bf16.mxu1 %v3398_v3  ;;  %v3263_v36 = vld [vmem:[%s4091_s1 + $0x278] sm:$0xff]   ;;  %v255_v37 = vld [vmem:[%s3537_s20] sm:$0x3]  ;;  %v3628_v39 = vld [vmem:[%s3537_s20 + $0x14] sm:$0x3]  ;;  %v1404_v60 = vrot.slane %v1402_v54, 1 }
  0x1e   : >> { %2983 = vmatprep.subr.bf16.mxu0 %v3398_v3  ;;  %v3265_v38 = vld [vmem:[%s4091_s1 + $0x80] sm:$0xff]   ;;  %v3268_v41 = vld [vmem:[%s4091_s1 + $0x88] sm:$0xff]   ;;  %v3270_v43 = vld [vmem:[%s4091_s1 + $0x90] sm:$0xff]   ;;  %v2309_v49 = vcombine.low %v255_v37, %v255_v37 }
  0x1f   : >> { %v3267_v40 = vld [vmem:[%s4091_s1 + $0x280] sm:$0xff]   ;;  %v3269_v42 = vld [vmem:[%s4091_s1 + $0x288] sm:$0xff]   ;;  %v3271_v44 = vld [vmem:[%s4091_s1 + $0x290] sm:$0xff]   ;;  %v1405_v2 = vor.u32 %v1404_v60, %v1400_v57 }
  0x20   : >> { %2824 = vmatpush3.bf16.msra.mxu1 %v3236_v9  ;;  %v3272_v45 = vld [vmem:[%s4091_s1 + $0x98] sm:$0xff]   ;;  %v3274_v47 = vld [vmem:[%s4091_s1 + $0xa0] sm:$0xff]   ;;  %v3276_v51 = vld [vmem:[%s4091_s1 + $0xa8] sm:$0xff]   ;;  %v492_v53 = vshll.u32 %v2309_v49, 16  ;;  %v490_v58 = vshrl.u32 %v2309_v49, 16 }
  0x21   : >> { %2984 = vmatpush3.bf16.msra.mxu0 %v3237_v10  ;;  %2825 = vmatprep.subr.bf16.mxu1 %v3398_v3  ;;  %v3273_v46 = vld [vmem:[%s4091_s1 + $0x298] sm:$0xff]   ;;  %v3275_v48 = vld [vmem:[%s4091_s1 + $0x2a0] sm:$0xff]   ;;  %v3277_v52 = vld [vmem:[%s4091_s1 + $0x2a8] sm:$0xff]  }
  0x22   : >> { %2985 = vmatprep.subr.bf16.mxu0 %v3398_v3  ;;  %v3278_v55 = vld [vmem:[%s4091_s1 + $0xb0] sm:$0xff]   ;;  %v494_v59 = vrot.slane %v492_v53, 1  ;;  %v3280_v61 = vld [vmem:[%s4091_s1 + $0xb8] sm:$0xff]   ;;  %v3282_v4 = vld [vmem:[%s4091_s1 + $0xc0] sm:$0xff]  }
  0x23   : >> { %v3279_v56 = vld [vmem:[%s4091_s1 + $0x2b0] sm:$0xff]   ;;  %v3281_v62 = vld [vmem:[%s4091_s1 + $0x2b8] sm:$0xff]   ;;  %v3283_v5 = vld [vmem:[%s4091_s1 + $0x2c0] sm:$0xff]  }
  0x24   : >> { %2826 = vmatpush3.bf16.msra.mxu1 %v3238_v11  ;;  %v495_v63 = vor.u32 %v494_v59, %v490_v58  ;;  %v3284_v6 = vld [vmem:[%s4091_s1 + $0xc8] sm:$0xff]   ;;  %v3286_v8 = vld [vmem:[%s4091_s1 + $0xd0] sm:$0xff]   ;;  %v3288_v10 = vld [vmem:[%s4091_s1 + $0xd8] sm:$0xff]  }
  0x25   : >> { %2986 = vmatpush3.bf16.msra.mxu0 %v3239_v12  ;;  %2827 = vmatprep.subr.bf16.mxu1 %v3398_v3  ;;  %v3285_v7 = vld [vmem:[%s4091_s1 + $0x2c8] sm:$0xff]   ;;  %v3287_v9 = vld [vmem:[%s4091_s1 + $0x2d0] sm:$0xff]   ;;  %v3289_v11 = vld [vmem:[%s4091_s1 + $0x2d8] sm:$0xff]  }
  0x26   : >> { %2987 = vmatprep.subr.bf16.mxu0 %v3398_v3  ;;  %v3290_v12 = vld [vmem:[%s4091_s1 + $0xe0] sm:$0xff]   ;;  %v3318_v50 = vld [vmem:[%s4091_s1 + $0x148] sm:$0xff]   ;;  %v3321_v53 = vld [vmem:[%s4091_s1 + $0x350] sm:$0xff]  }
  0x27   : >> { %v3317_v49 = vld [vmem:[%s4091_s1 + $0x340] sm:$0xff]   ;;  %v3322_v54 = vld [vmem:[%s4091_s1 + $0x158] sm:$0xff]   ;;  %v3326_v58 = vld [vmem:[%s4091_s1 + $0x168] sm:$0xff]  }
  0x28   : >> { %2828 = vmatpush3.bf16.msra.mxu1 %v3240_v13  ;;  %v3291_v13 = vld [vmem:[%s4091_s1 + $0x2e0] sm:$0xff]   ;;  %v3327_v59 = vld [vmem:[%s4091_s1 + $0x368] sm:$0xff]   ;;  %v3328_v60 = vld [vmem:[%s4091_s1 + $0x170] sm:$0xff]  }
  0x29   : >> { %2988 = vmatpush3.bf16.msra.mxu0 %v3241_v14  ;;  %2829 = vmatprep.subr.bf16.mxu1 %v3398_v3  ;;  %v2334_v14 = vcombine.low %v3548_v19, %v3548_v19  ;;  %v3325_v57 = vld [vmem:[%s4091_s1 + $0x360] sm:$0xff]   ;;  %vm2091_vm4 = vmand %vm2089_vm1, %vm2090_vm2 }
  0x2a   : >> { %2989 = vmatprep.subr.bf16.mxu0 %v3398_v3 }
  0x2c   : >> { %2830 = vmatpush3.bf16.msra.mxu1 %v3242_v15  ;;  %v2544_v15 = vcombine.low %v3628_v39, %v3628_v39 }
  0x2d   : >> { %2990 = vmatpush3.bf16.msra.mxu0 %v3243_v16  ;;  %2831 = vmatprep.subr.bf16.mxu1 %v3398_v3  ;;  %v3292_v16 = vld [vmem:[%s4091_s1 + $0xe8] sm:$0xff]  }
  0x2e   : >> { %2991 = vmatprep.subr.bf16.mxu0 %v3398_v3 }
  0x30   : >> { %2832 = vmatpush3.bf16.msra.mxu1 %v3244_v17  ;;  %v3293_v17 = vld [vmem:[%s4091_s1 + $0x2e8] sm:$0xff]  }
  0x31   : >> { %2992 = vmatpush3.bf16.msra.mxu0 %v3245_v18  ;;  %2837 = vmatprep.subr.bf16.mxu1 %v3398_v3  ;;  %v609_v18 = vshll.u32 %v2334_v14, 16 }
  0x32   : >> { %2997 = vmatprep.subr.bf16.mxu0 %v3398_v3 }
  0x33   : >> { %2834 = vmatmul.mubr.bf16.vlgmr.msra.gmra.mrb[0].mxu1 %v3548_v19  ;;  %v3294_v19 = vld [vmem:[%s4091_s1 + $0xf0] sm:$0xff]  }
  0x34   : >> { %2838 = vmatpush3.bf16.msra.mxu1 %v3247_v20  ;;  %2994 = vmatmul.mubr.bf16.vlgmr.msra.gmra.mrb[0].mxu0 %v3554_v21  ;;  %v1519_v20 = vshll.u32 %v2544_v15, 16  ;;  %v3295_v21 = vld [vmem:[%s4091_s1 + $0x2f0] sm:$0xff]  }
  0x35   : >> { %2998 = vmatpush3.bf16.msra.mxu0 %v3249_v22  ;;  %2839 = vmatprep.subr.bf16.mxu1 %v3398_v3  ;;  %v607_v22 = vshrl.u32 %v2334_v14, 16  ;;  %v3343_v14 = vld [vmem:[%s4091_s1 + $0x3a0] sm:$0xff]  }
  0x36   : >> { %2999 = vmatprep.subr.bf16.mxu0 %v3398_v3  ;;  %2853 = vmatprep.mubr.msk.bf16.mxu1 %vm3399_vm0, %v3398_v3 }
  0x37   : >> { %3013 = vmatprep.mubr.msk.bf16.mxu0 %vm3399_vm0, %v3398_v3 }
  0x38   : >> { %2840 = vmatpush3.bf16.msra.mxu1 %v3250_v23  ;;  %v611_v23 = vrot.slane %v609_v18, 1  ;;  %v3345_v18 = vld [vmem:[%s4091_s1 + $0x3a8] sm:$0xff]  }
  0x39   : >> { %3000 = vmatpush3.bf16.msra.mxu0 %v3251_v24  ;;  %2841 = vmatprep.subr.bf16.mxu1 %v3398_v3  ;;  %v1517_v24 = vshrl.u32 %v2544_v15, 16 }
  0x3a   : >> { %3001 = vmatprep.subr.bf16.mxu0 %v3398_v3 }
  0x3c   : >> { %2842 = vmatpush3.bf16.msra.mxu1 %v3252_v25  ;;  %v1521_v25 = vrot.slane %v1519_v20, 1 }
  0x3d   : >> { %3002 = vmatpush3.bf16.msra.mxu0 %v3253_v26  ;;  %2843 = vmatprep.subr.bf16.mxu1 %v3398_v3  ;;  %v3296_v26 = vld [vmem:[%s4091_s1 + $0xf8] sm:$0xff]  }
  0x3e   : >> { %3003 = vmatprep.subr.bf16.mxu0 %v3398_v3 }
  0x40   : >> { %2844 = vmatpush3.bf16.msra.mxu1 %v3254_v27  ;;  %v3297_v27 = vld [vmem:[%s4091_s1 + $0x2f8] sm:$0xff]  }
  0x41   : >> { %3004 = vmatpush3.bf16.msra.mxu0 %v3255_v28  ;;  %2845 = vmatprep.subr.bf16.mxu1 %v3398_v3  ;;  %v612_v28 = vor.u32 %v611_v23, %v607_v22  ;;  %v3347_v22 = vld [vmem:[%s4091_s1 + $0x3b0] sm:$0xff]  }
  0x42   : >> { %3005 = vmatprep.subr.bf16.mxu0 %v3398_v3 }
  0x44   : >> { %2846 = vmatpush3.bf16.msra.mxu1 %v3256_v29  ;;  %v3298_v29 = vld [vmem:[%s4091_s1 + $0x100] sm:$0xff]  }
  0x45   : >> { %3006 = vmatpush3.bf16.msra.mxu0 %v3257_v30  ;;  %2847 = vmatprep.subr.bf16.mxu1 %v3398_v3  ;;  %v1522_v30 = vor.u32 %v1521_v25, %v1517_v24 }
  0x46   : >> { %3007 = vmatprep.subr.bf16.mxu0 %v3398_v3 }
  0x48   : >> { %2848 = vmatpush3.bf16.msra.mxu1 %v3258_v31  ;;  %v3299_v31 = vld [vmem:[%s4091_s1 + $0x300] sm:$0xff]  }
  0x49   : >> { %3008 = vmatpush3.bf16.msra.mxu0 %v3259_v32  ;;  %2849 = vmatprep.subr.bf16.mxu1 %v3398_v3  ;;  %v3300_v32 = vld [vmem:[%s4091_s1 + $0x108] sm:$0xff]  }
  0x4a   : >> { %3009 = vmatprep.subr.bf16.mxu0 %v3398_v3 }
  0x4c   : >> { %2850 = vmatpush3.bf16.msra.mxu1 %v3260_v33  ;;  %v3301_v33 = vld [vmem:[%s4091_s1 + $0x308] sm:$0xff]  }
  0x4d   : >> { %3010 = vmatpush3.bf16.msra.mxu0 %v3261_v34  ;;  %2851 = vmatprep.subr.bf16.mxu1 %v3398_v3  ;;  %v3302_v34 = vld [vmem:[%s4091_s1 + $0x110] sm:$0xff]  }
  0x4e   : >> { %3011 = vmatprep.subr.bf16.mxu0 %v3398_v3 }
  0x50   : >> { %2852 = vmatpush3.bf16.msra.mxu1 %v3262_v35  ;;  %v3303_v35 = vld [vmem:[%s4091_s1 + $0x310] sm:$0xff]  }
  0x51   : >> { %3012 = vmatpush3.bf16.msra.mxu0 %v3263_v36  ;;  %2857 = vmatprep.subr.bf16.mxu1 %v3398_v3  ;;  %v3304_v36 = vld [vmem:[%s4091_s1 + $0x118] sm:$0xff]  }
  0x52   : >> { %3017 = vmatprep.subr.bf16.mxu0 %v3398_v3 }
  0x53   : >> { %2854 = vmatmul.mubr.bf16.vlgmr.msra.gmra.mrb[0].mxu1 %v255_v37  ;;  %v3305_v37 = vld [vmem:[%s4091_s1 + $0x318] sm:$0xff]  }
  0x54   : >> { %2858 = vmatpush3.bf16.msra.mxu1 %v3265_v38  ;;  %3014 = vmatmul.mubr.bf16.vlgmr.msra.gmra.mrb[0].mxu0 %v3628_v39  ;;  %v3306_v38 = vld [vmem:[%s4091_s1 + $0x120] sm:$0xff]  }
  0x55   : >> { %3018 = vmatpush3.bf16.msra.mxu0 %v3267_v40  ;;  %2859 = vmatprep.subr.bf16.mxu1 %v3398_v3  ;;  %v3307_v39 = vld [vmem:[%s4091_s1 + $0x320] sm:$0xff]   ;;  %v3308_v40 = vld [vmem:[%s4091_s1 + $0x128] sm:$0xff]  }
  0x56   : >> { %3019 = vmatprep.subr.bf16.mxu0 %v3398_v3  ;;  %2873 = vmatprep.mubr.msk.bf16.mxu1 %vm3399_vm0, %v3398_v3 }
  0x57   : >> { %3033 = vmatprep.mubr.msk.bf16.mxu0 %vm3399_vm0, %v3398_v3 }
  0x58   : >> { %2860 = vmatpush3.bf16.msra.mxu1 %v3268_v41  ;;  %v3309_v41 = vld [vmem:[%s4091_s1 + $0x328] sm:$0xff]  }
  0x59   : >> { %3020 = vmatpush3.bf16.msra.mxu0 %v3269_v42  ;;  %2861 = vmatprep.subr.bf16.mxu1 %v3398_v3  ;;  %v3310_v42 = vld [vmem:[%s4091_s1 + $0x130] sm:$0xff]  }
  0x5a   : >> { %3021 = vmatprep.subr.bf16.mxu0 %v3398_v3 }
  0x5c   : >> { %2862 = vmatpush3.bf16.msra.mxu1 %v3270_v43  ;;  %v3311_v43 = vld [vmem:[%s4091_s1 + $0x330] sm:$0xff]  }
  0x5d   : >> { %3022 = vmatpush3.bf16.msra.mxu0 %v3271_v44  ;;  %2863 = vmatprep.subr.bf16.mxu1 %v3398_v3  ;;  %v3312_v44 = vld [vmem:[%s4091_s1 + $0x138] sm:$0xff]  }
  0x5e   : >> { %3023 = vmatprep.subr.bf16.mxu0 %v3398_v3 }
  0x60   : >> { %2864 = vmatpush3.bf16.msra.mxu1 %v3272_v45  ;;  %v3313_v45 = vld [vmem:[%s4091_s1 + $0x338] sm:$0xff]  }
  0x61   : >> { %3024 = vmatpush3.bf16.msra.mxu0 %v3273_v46  ;;  %2865 = vmatprep.subr.bf16.mxu1 %v3398_v3  ;;  %v3839_v46 = vld [vmem:[%s3537_s20 + $0x8] sm:$0x3] }
  0x62   : >> { %3025 = vmatprep.subr.bf16.mxu0 %v3398_v3  ;;  %v2414_v15 = vcombine.low %v3839_v46, %v3839_v46 }
  0x64   : >> { %2866 = vmatpush3.bf16.msra.mxu1 %v3274_v47  ;;  %v3315_v47 = vld [vmem:[%s4091_s1 + $0x140] sm:$0xff]   ;;  %v947_v20 = vshll.u32 %v2414_v15, 16  ;;  %v945_v23 = vshrl.u32 %v2414_v15, 16 }
  0x65   : >> { %3026 = vmatpush3.bf16.msra.mxu0 %v3275_v48  ;;  %2867 = vmatprep.subr.bf16.mxu1 %v3398_v3  ;;  %v3846_v48 = vld [vmem:[%s3537_s20 + $0x18] sm:$0x3] }
  0x66   : >> { %3027 = vmatprep.subr.bf16.mxu0 %v3398_v3  ;;  %v949_v24 = vrot.slane %v947_v20, 1 }
  0x68   : >> { %2868 = vmatpush3.bf16.msra.mxu1 %v3276_v51  ;;  %v3319_v51 = vld [vmem:[%s4091_s1 + $0x348] sm:$0xff]  }
  0x69   : >> { %3028 = vmatpush3.bf16.msra.mxu0 %v3277_v52  ;;  %2869 = vmatprep.subr.bf16.mxu1 %v3398_v3  ;;  %v3320_v52 = vld [vmem:[%s4091_s1 + $0x150] sm:$0xff]  }
  0x6a   : >> { %3029 = vmatprep.subr.bf16.mxu0 %v3398_v3 }
  0x6c   : >> { %2870 = vmatpush3.bf16.msra.mxu1 %v3278_v55  ;;  %v3323_v55 = vld [vmem:[%s4091_s1 + $0x358] sm:$0xff]  }
  0x6d   : >> { %3030 = vmatpush3.bf16.msra.mxu0 %v3279_v56  ;;  %2871 = vmatprep.subr.bf16.mxu1 %v3398_v3  ;;  %v3324_v56 = vld [vmem:[%s4091_s1 + $0x160] sm:$0xff]  }
  0x6e   : >> { %3031 = vmatprep.subr.bf16.mxu0 %v3398_v3 }
  0x70   : >> { %2872 = vmatpush3.bf16.msra.mxu1 %v3280_v61  ;;  %v3329_v61 = vld [vmem:[%s4091_s1 + $0x370] sm:$0xff]  }
  0x71   : >> { %3032 = vmatpush3.bf16.msra.mxu0 %v3281_v62  ;;  %2877 = vmatprep.subr.bf16.mxu1 %v3398_v3  ;;  %v3330_v62 = vld [vmem:[%s4091_s1 + $0x178] sm:$0xff]  }
  0x72   : >> { %3037 = vmatprep.subr.bf16.mxu0 %v3398_v3 }
  0x73   : >> { %2874 = vmatmul.mubr.bf16.vlgmr.msra.gmra.mrb[0].mxu1 %v495_v63  ;;  %v3331_v63 = vld [vmem:[%s4091_s1 + $0x378] sm:$0xff]  }
  0x74   : >> { %2878 = vmatpush3.bf16.msra.mxu1 %v3282_v4  ;;  %3034 = vmatmul.mubr.bf16.vlgmr.msra.gmra.mrb[0].mxu0 %v1405_v2  ;;  %v3915_v2 = vld [vmem:[%s3537_s20 + $0xc] sm:$0x3]  ;;  %v3333_v4 = vld [vmem:[%s4091_s1 + $0x180] sm:$0xff]  }
  0x75   : >> { %3038 = vmatpush3.bf16.msra.mxu0 %v3283_v5  ;;  %2879 = vmatprep.subr.bf16.mxu1 %v3398_v3  ;;  %v3922_v5 = vld [vmem:[%s3537_s20 + $0x1c] sm:$0x3] }
  0x76   : >> { %3039 = vmatprep.subr.bf16.mxu0 %v3398_v3  ;;  %2893 = vmatprep.mubr.msk.bf16.mxu1 %vm3399_vm0, %v3398_v3 }
  0x77   : >> { %3053 = vmatprep.mubr.msk.bf16.mxu0 %vm3399_vm0, %v3398_v3 }
  0x78   : >> { %2880 = vmatpush3.bf16.msra.mxu1 %v3284_v6  ;;  %v3335_v6 = vld [vmem:[%s4091_s1 + $0x380] sm:$0xff]  }
  0x79   : >> { %3040 = vmatpush3.bf16.msra.mxu0 %v3285_v7  ;;  %2881 = vmatprep.subr.bf16.mxu1 %v3398_v3  ;;  %v3336_v7 = vld [vmem:[%s4091_s1 + $0x188] sm:$0xff]  }
  0x7a   : >> { %3041 = vmatprep.subr.bf16.mxu0 %v3398_v3 }
  0x7c   : >> { %2882 = vmatpush3.bf16.msra.mxu1 %v3286_v8  ;;  %v3337_v8 = vld [vmem:[%s4091_s1 + $0x388] sm:$0xff]  }
  0x7d   : >> { %3042 = vmatpush3.bf16.msra.mxu0 %v3287_v9  ;;  %2883 = vmatprep.subr.bf16.mxu1 %v3398_v3  ;;  %v3338_v9 = vld [vmem:[%s4091_s1 + $0x190] sm:$0xff]  }
  0x7e   : >> { %3043 = vmatprep.subr.bf16.mxu0 %v3398_v3 }
  0x80   : >> { %2884 = vmatpush3.bf16.msra.mxu1 %v3288_v10  ;;  %v3339_v10 = vld [vmem:[%s4091_s1 + $0x390] sm:$0xff]  }
  0x81   : >> { %3044 = vmatpush3.bf16.msra.mxu0 %v3289_v11  ;;  %2885 = vmatprep.subr.bf16.mxu1 %v3398_v3  ;;  %v3340_v11 = vld [vmem:[%s4091_s1 + $0x198] sm:$0xff]  }
  0x82   : >> { %3045 = vmatprep.subr.bf16.mxu0 %v3398_v3 }
  0x84   : >> { %2886 = vmatpush3.bf16.msra.mxu1 %v3290_v12  ;;  %v3341_v12 = vld [vmem:[%s4091_s1 + $0x398] sm:$0xff]  }
  0x85   : >> { %3046 = vmatpush3.bf16.msra.mxu0 %v3291_v13  ;;  %2887 = vmatprep.subr.bf16.mxu1 %v3398_v3  ;;  %v3342_v13 = vld [vmem:[%s4091_s1 + $0x1a0] sm:$0xff]  }
  0x86   : >> { %3047 = vmatprep.subr.bf16.mxu0 %v3398_v3 }
  0x88   : >> { %2888 = vmatpush3.bf16.msra.mxu1 %v3292_v16  ;;  %v2624_v16 = vcombine.low %v3846_v48, %v3846_v48 }
  0x89   : >> { %3048 = vmatpush3.bf16.msra.mxu0 %v3293_v17  ;;  %2889 = vmatprep.subr.bf16.mxu1 %v3398_v3  ;;  %v3344_v17 = vld [vmem:[%s4091_s1 + $0x1a8] sm:$0xff]  }
  0x8a   : >> { %3049 = vmatprep.subr.bf16.mxu0 %v3398_v3  ;;  %v1855_v25 = vshrl.u32 %v2624_v16, 16 }
  0x8c   : >> { %2890 = vmatpush3.bf16.msra.mxu1 %v3294_v19  ;;  %v1857_v19 = vshll.u32 %v2624_v16, 16 }
  0x8d   : >> { %3050 = vmatpush3.bf16.msra.mxu0 %v3295_v21  ;;  %2891 = vmatprep.subr.bf16.mxu1 %v3398_v3  ;;  %v3346_v21 = vld [vmem:[%s4091_s1 + $0x1b0] sm:$0xff]  }
  0x8e   : >> { %3051 = vmatprep.subr.bf16.mxu0 %v3398_v3 }
  0x90   : >> { %2892 = vmatpush3.bf16.msra.mxu1 %v3296_v26  ;;  %v1859_v26 = vrot.slane %v1857_v19, 1 }
  0x91   : >> { %3052 = vmatpush3.bf16.msra.mxu0 %v3297_v27  ;;  %2897 = vmatprep.subr.bf16.mxu1 %v3398_v3  ;;  %v3348_v27 = vld [vmem:[%s4091_s1 + $0x1b8] sm:$0xff]  }
  0x92   : >> { %3057 = vmatprep.subr.bf16.mxu0 %v3398_v3 }
  0x93   : >> { %2894 = vmatmul.mubr.bf16.vlgmr.msra.gmra.mrb[0].mxu1 %v612_v28  ;;  %v3349_v28 = vld [vmem:[%s4091_s1 + $0x3b8] sm:$0xff]  }
  0x94   : >> { %2898 = vmatpush3.bf16.msra.mxu1 %v3298_v29  ;;  %3054 = vmatmul.mubr.bf16.vlgmr.msra.gmra.mrb[0].mxu0 %v1522_v30  ;;  %v950_v29 = vor.u32 %v949_v24, %v945_v23  ;;  %v3350_v30 = vld [vmem:[%s4091_s1 + $0x1c0] sm:$0xff]  }
  0x95   : >> { %3058 = vmatpush3.bf16.msra.mxu0 %v3299_v31  ;;  %2899 = vmatprep.subr.bf16.mxu1 %v3398_v3  ;;  %v1860_v31 = vor.u32 %v1859_v26, %v1855_v25 }
  0x96   : >> { %3059 = vmatprep.subr.bf16.mxu0 %v3398_v3  ;;  %2913 = vmatprep.mubr.msk.bf16.mxu1 %vm3399_vm0, %v3398_v3 }
  0x97   : >> { %3073 = vmatprep.mubr.msk.bf16.mxu0 %vm3399_vm0, %v3398_v3 }
  0x98   : >> { %2900 = vmatpush3.bf16.msra.mxu1 %v3300_v32  ;;  %v3351_v32 = vld [vmem:[%s4091_s1 + $0x3c0] sm:$0xff]  }
  0x99   : >> { %3060 = vmatpush3.bf16.msra.mxu0 %v3301_v33  ;;  %2901 = vmatprep.subr.bf16.mxu1 %v3398_v3  ;;  %v3352_v33 = vld [vmem:[%s4091_s1 + $0x1c8] sm:$0xff]  }
  0x9a   : >> { %3061 = vmatprep.subr.bf16.mxu0 %v3398_v3 }
  0x9c   : >> { %2902 = vmatpush3.bf16.msra.mxu1 %v3302_v34  ;;  %v3353_v34 = vld [vmem:[%s4091_s1 + $0x3c8] sm:$0xff]  }
  0x9d   : >> { %3062 = vmatpush3.bf16.msra.mxu0 %v3303_v35  ;;  %2903 = vmatprep.subr.bf16.mxu1 %v3398_v3  ;;  %v3354_v35 = vld [vmem:[%s4091_s1 + $0x1d0] sm:$0xff]  }
  0x9e   : >> { %3063 = vmatprep.subr.bf16.mxu0 %v3398_v3 }
  0xa0   : >> { %2904 = vmatpush3.bf16.msra.mxu1 %v3304_v36  ;;  %v3355_v36 = vld [vmem:[%s4091_s1 + $0x3d0] sm:$0xff]  }
  0xa1   : >> { %3064 = vmatpush3.bf16.msra.mxu0 %v3305_v37  ;;  %2905 = vmatprep.subr.bf16.mxu1 %v3398_v3  ;;  %v3356_v37 = vld [vmem:[%s4091_s1 + $0x1d8] sm:$0xff]  }
  0xa2   : >> { %3065 = vmatprep.subr.bf16.mxu0 %v3398_v3 }
  0xa4   : >> { %2906 = vmatpush3.bf16.msra.mxu1 %v3306_v38  ;;  %v3357_v38 = vld [vmem:[%s4091_s1 + $0x3d8] sm:$0xff]  }
  0xa5   : >> { %3066 = vmatpush3.bf16.msra.mxu0 %v3307_v39  ;;  %2907 = vmatprep.subr.bf16.mxu1 %v3398_v3  ;;  %v3358_v39 = vld [vmem:[%s4091_s1 + $0x1e0] sm:$0xff]  }
  0xa6   : >> { %3067 = vmatprep.subr.bf16.mxu0 %v3398_v3 }
  0xa8   : >> { %2908 = vmatpush3.bf16.msra.mxu1 %v3308_v40  ;;  %v3359_v40 = vld [vmem:[%s4091_s1 + $0x3e0] sm:$0xff]  }
  0xa9   : >> { %3068 = vmatpush3.bf16.msra.mxu0 %v3309_v41  ;;  %2909 = vmatprep.subr.bf16.mxu1 %v3398_v3  ;;  %v2439_v41 = vcombine.low %v3915_v2, %v3915_v2 }
  0xaa   : >> { %3069 = vmatprep.subr.bf16.mxu0 %v3398_v3 }
  0xac   : >> { %2910 = vmatpush3.bf16.msra.mxu1 %v3310_v42  ;;  %v2649_v42 = vcombine.low %v3922_v5, %v3922_v5 }
  0xad   : >> { %3070 = vmatpush3.bf16.msra.mxu0 %v3311_v43  ;;  %2911 = vmatprep.subr.bf16.mxu1 %v3398_v3  ;;  %v3360_v43 = vld [vmem:[%s4091_s1 + $0x1e8] sm:$0xff]  }
  0xae   : >> { %3071 = vmatprep.subr.bf16.mxu0 %v3398_v3 }
  0xb0   : >> { %2912 = vmatpush3.bf16.msra.mxu1 %v3312_v44  ;;  %v3361_v44 = vld [vmem:[%s4091_s1 + $0x3e8] sm:$0xff]  }
  0xb1   : >> { %3072 = vmatpush3.bf16.msra.mxu0 %v3313_v45  ;;  %2917 = vmatprep.subr.bf16.mxu1 %v3398_v3  ;;  %v1064_v45 = vshll.u32 %v2439_v41, 16 }
  0xb2   : >> { %3077 = vmatprep.subr.bf16.mxu0 %v3398_v3 }
  0xb3   : >> { %2914 = vmatmul.mubr.bf16.vlgmr.msra.gmra.mrb[0].mxu1 %v3839_v46  ;;  %v1974_v46 = vshll.u32 %v2649_v42, 16 }
  0xb4   : >> { %2918 = vmatpush3.bf16.msra.mxu1 %v3315_v47  ;;  %3074 = vmatmul.mubr.bf16.vlgmr.msra.gmra.mrb[0].mxu0 %v3846_v48  ;;  %v3362_v47 = vld [vmem:[%s4091_s1 + $0x1f0] sm:$0xff]  }
  0xb5   : >> { %3078 = vmatpush3.bf16.msra.mxu0 %v3317_v49  ;;  %2919 = vmatprep.subr.bf16.mxu1 %v3398_v3  ;;  %v3363_v48 = vld [vmem:[%s4091_s1 + $0x3f0] sm:$0xff]   ;;  %v1062_v49 = vshrl.u32 %v2439_v41, 16 }
  0xb6   : >> { %3079 = vmatprep.subr.bf16.mxu0 %v3398_v3  ;;  %2933 = vmatprep.mubr.msk.bf16.mxu1 %vm3399_vm0, %v3398_v3 }
  0xb7   : >> { %3093 = vmatprep.mubr.msk.bf16.mxu0 %vm3399_vm0, %v3398_v3 }
  0xb8   : >> { %2920 = vmatpush3.bf16.msra.mxu1 %v3318_v50  ;;  %v1066_v50 = vrot.slane %v1064_v45, 1 }
  0xb9   : >> { %3080 = vmatpush3.bf16.msra.mxu0 %v3319_v51  ;;  %2921 = vmatprep.subr.bf16.mxu1 %v3398_v3  ;;  %v1972_v51 = vshrl.u32 %v2649_v42, 16 }
  0xba   : >> { %3081 = vmatprep.subr.bf16.mxu0 %v3398_v3 }
  0xbc   : >> { %2922 = vmatpush3.bf16.msra.mxu1 %v3320_v52  ;;  %v1976_v52 = vrot.slane %v1974_v46, 1 }
  0xbd   : >> { %3082 = vmatpush3.bf16.msra.mxu0 %v3321_v53  ;;  %2923 = vmatprep.subr.bf16.mxu1 %v3398_v3  ;;  %v3364_v53 = vld [vmem:[%s4091_s1 + $0x1f8] sm:$0xff]  }
  0xbe   : >> { %3083 = vmatprep.subr.bf16.mxu0 %v3398_v3 }
  0xc0   : >> { %2924 = vmatpush3.bf16.msra.mxu1 %v3322_v54  ;;  %v3365_v54 = vld [vmem:[%s4091_s1 + $0x3f8] sm:$0xff]  }
  0xc1   : >> { %3084 = vmatpush3.bf16.msra.mxu0 %v3323_v55  ;;  %2925 = vmatprep.subr.bf16.mxu1 %v3398_v3  ;;  %v1067_v55 = vor.u32 %v1066_v50, %v1062_v49 }
  0xc2   : >> { %3085 = vmatprep.subr.bf16.mxu0 %v3398_v3 }
  0xc4   : >> { %2926 = vmatpush3.bf16.msra.mxu1 %v3324_v56  ;;  %v1977_v56 = vor.u32 %v1976_v52, %v1972_v51 }
  0xc5   : >> { %3086 = vmatpush3.bf16.msra.mxu0 %v3325_v57  ;;  %2927 = vmatprep.subr.bf16.mxu1 %v3398_v3 }
  0xc6   : >> { %3087 = vmatprep.subr.bf16.mxu0 %v3398_v3 }
  0xc8   : >> { %2928 = vmatpush3.bf16.msra.mxu1 %v3326_v58 }
  0xc9   : >> { %3088 = vmatpush3.bf16.msra.mxu0 %v3327_v59  ;;  %2929 = vmatprep.subr.bf16.mxu1 %v3398_v3 }
  0xca   : >> { %3089 = vmatprep.subr.bf16.mxu0 %v3398_v3 }
  0xcc   : >> { %2930 = vmatpush3.bf16.msra.mxu1 %v3328_v60 }
  0xcd   : >> { %3090 = vmatpush3.bf16.msra.mxu0 %v3329_v61  ;;  %2931 = vmatprep.subr.bf16.mxu1 %v3398_v3 }
  0xce   : >> { %3091 = vmatprep.subr.bf16.mxu0 %v3398_v3 }
  0xd0   : >> { %2932 = vmatpush3.bf16.msra.mxu1 %v3330_v62 }
  0xd1   : >> { %3092 = vmatpush3.bf16.msra.mxu0 %v3331_v63  ;;  %2937 = vmatprep.subr.bf16.mxu1 %v3398_v3  ;;  %v2092_v63 = vld [vmem:[%s2088_s10] sm:$0x3] }
  0xd2   : >> { %3097 = vmatprep.subr.bf16.mxu0 %v3398_v3 }
  0xd3   : >> { %2934 = vmatmul.mubr.bf16.vlgmr.msra.gmra.mrb[0].mxu1 %v3915_v2 }
  0xd4   : >> { %2938 = vmatpush3.bf16.msra.mxu1 %v3333_v4  ;;  %3094 = vmatmul.mubr.bf16.vlgmr.msra.gmra.mrb[0].mxu0 %v3922_v5 }
  0xd5   : >> { %3098 = vmatpush3.bf16.msra.mxu0 %v3335_v6  ;;  %2939 = vmatprep.subr.bf16.mxu1 %v3398_v3 }
  0xd6   : >> { %3099 = vmatprep.subr.bf16.mxu0 %v3398_v3  ;;  %2953 = vmatprep.mubr.msk.bf16.mxu1 %vm3399_vm0, %v3398_v3 }
  0xd7   : >> { %3113 = vmatprep.mubr.msk.bf16.mxu0 %vm3399_vm0, %v3398_v3 }
  0xd8   : >> { %2940 = vmatpush3.bf16.msra.mxu1 %v3336_v7 }
  0xd9   : >> { %3100 = vmatpush3.bf16.msra.mxu0 %v3337_v8  ;;  %2941 = vmatprep.subr.bf16.mxu1 %v3398_v3 }
  0xda   : >> { %3101 = vmatprep.subr.bf16.mxu0 %v3398_v3 }
  0xdc   : >> { %2942 = vmatpush3.bf16.msra.mxu1 %v3338_v9 }
  0xdd   : >> { %3102 = vmatpush3.bf16.msra.mxu0 %v3339_v10  ;;  %2943 = vmatprep.subr.bf16.mxu1 %v3398_v3 }
  0xde   : >> { %3103 = vmatprep.subr.bf16.mxu0 %v3398_v3 }
  0xe0   : >> { %2944 = vmatpush3.bf16.msra.mxu1 %v3340_v11 }
  0xe1   : >> { %3104 = vmatpush3.bf16.msra.mxu0 %v3341_v12  ;;  %2945 = vmatprep.subr.bf16.mxu1 %v3398_v3 }
  0xe2   : >> { %3105 = vmatprep.subr.bf16.mxu0 %v3398_v3 }
  0xe4   : >> { %2946 = vmatpush3.bf16.msra.mxu1 %v3342_v13 }
  0xe5   : >> { %3106 = vmatpush3.bf16.msra.mxu0 %v3343_v14  ;;  %2947 = vmatprep.subr.bf16.mxu1 %v3398_v3 }
  0xe6   : >> { %3107 = vmatprep.subr.bf16.mxu0 %v3398_v3 }
  0xe8   : >> { %2948 = vmatpush3.bf16.msra.mxu1 %v3344_v17 }
  0xe9   : >> { %3108 = vmatpush3.bf16.msra.mxu0 %v3345_v18  ;;  %2949 = vmatprep.subr.bf16.mxu1 %v3398_v3 }
  0xea   : >> { %3109 = vmatprep.subr.bf16.mxu0 %v3398_v3 }
  0xec   : >> { %2950 = vmatpush3.bf16.msra.mxu1 %v3346_v21 }
  0xed   : >> { %3110 = vmatpush3.bf16.msra.mxu0 %v3347_v22  ;;  %2951 = vmatprep.subr.bf16.mxu1 %v3398_v3 }
  0xee   : >> { %3111 = vmatprep.subr.bf16.mxu0 %v3398_v3 }
  0xf0   : >> { %2952 = vmatpush3.bf16.msra.mxu1 %v3348_v27 }
  0xf1   : >> { %3112 = vmatpush3.bf16.msra.mxu0 %v3349_v28  ;;  %2957 = vmatprep.subr.bf16.mxu1 %v3398_v3 }
  0xf2   : >> { %3117 = vmatprep.subr.bf16.mxu0 %v3398_v3 }
  0xf3   : >> { %2954 = vmatmul.mubr.bf16.vlgmr.msra.gmra.mrb[0].mxu1 %v950_v29 }
  0xf4   : >> { %2958 = vmatpush3.bf16.msra.mxu1 %v3350_v30  ;;  %3114 = vmatmul.mubr.bf16.vlgmr.msra.gmra.mrb[0].mxu0 %v1860_v31 }
  0xf5   : >> { %3118 = vmatpush3.bf16.msra.mxu0 %v3351_v32  ;;  %2959 = vmatprep.subr.bf16.mxu1 %v3398_v3 }
  0xf6   : >> { %3119 = vmatprep.subr.bf16.mxu0 %v3398_v3  ;;  %2973 = vmatprep.mubr.msk.bf16.mxu1 %vm3399_vm0, %v3398_v3 }
  0xf7   : >> { %3133 = vmatprep.mubr.msk.bf16.mxu0 %vm3399_vm0, %v3398_v3 }
  0xf8   : >> { %2960 = vmatpush3.bf16.msra.mxu1 %v3352_v33 }
  0xf9   : >> { %3120 = vmatpush3.bf16.msra.mxu0 %v3353_v34  ;;  %2961 = vmatprep.subr.bf16.mxu1 %v3398_v3 }
  0xfa   : >> { %3121 = vmatprep.subr.bf16.mxu0 %v3398_v3 }
  0xfc   : >> { %2962 = vmatpush3.bf16.msra.mxu1 %v3354_v35 }
  0xfd   : >> { %3122 = vmatpush3.bf16.msra.mxu0 %v3355_v36  ;;  %2963 = vmatprep.subr.bf16.mxu1 %v3398_v3 }
  0xfe   : >> { %3123 = vmatprep.subr.bf16.mxu0 %v3398_v3 }
 0x100   : >> { %2964 = vmatpush3.bf16.msra.mxu1 %v3356_v37 }
 0x101   : >> { %3124 = vmatpush3.bf16.msra.mxu0 %v3357_v38  ;;  %2965 = vmatprep.subr.bf16.mxu1 %v3398_v3 }
 0x102   : >> { %3125 = vmatprep.subr.bf16.mxu0 %v3398_v3 }
 0x104   : >> { %2966 = vmatpush3.bf16.msra.mxu1 %v3358_v39 }
 0x105   : >> { %3126 = vmatpush3.bf16.msra.mxu0 %v3359_v40  ;;  %2967 = vmatprep.subr.bf16.mxu1 %v3398_v3 }
 0x106   : >> { %3127 = vmatprep.subr.bf16.mxu0 %v3398_v3 }
 0x108   : >> { %2968 = vmatpush3.bf16.msra.mxu1 %v3360_v43 }
 0x109   : >> { %3128 = vmatpush3.bf16.msra.mxu0 %v3361_v44  ;;  %2969 = vmatprep.subr.bf16.mxu1 %v3398_v3 }
 0x10a   : >> { %3129 = vmatprep.subr.bf16.mxu0 %v3398_v3 }
 0x10c   : >> { %2970 = vmatpush3.bf16.msra.mxu1 %v3362_v47 }
 0x10d   : >> { %3130 = vmatpush3.bf16.msra.mxu0 %v3363_v48  ;;  %2971 = vmatprep.subr.bf16.mxu1 %v3398_v3 }
 0x10e   : >> { %3131 = vmatprep.subr.bf16.mxu0 %v3398_v3 }
 0x110   : >> { %2972 = vmatpush3.bf16.msra.mxu1 %v3364_v53 }
 0x111   : >> { %3132 = vmatpush3.bf16.msra.mxu0 %v3365_v54 }
 0x113   : >> { %2974 = vmatmul.mubr.bf16.vlgmr.msra.gmra.mrb[0].mxu1 %v1067_v55 }
 0x114   : >> { %3134 = vmatmul.mubr.bf16.vlgmr.msra.gmra.mrb[0].mxu0 %v1977_v56 }
 0x1e6   : >> { %v1151_v57 = vpop.f32.mrb[0].mxu1 }
 0x1e7   : >> { %v2061_v58 = vpop.f32.mrb[0].mxu0  ;;  %v2975_v59 = vpop.f32.mrb[1].mxu1 }
 0x1e8   : >> { %v3137_v60 = vadd.f32 %v2061_v58, %v1151_v57  ;;  %v3135_v61 = vpop.f32.mrb[1].mxu0  ;;  %v1154_v62 = vpop.f32.mrb[2].mxu1 }
 0x1e9   : >> { %v2064_v3 = vpop.f32.mrb[2].mxu0  ;;  %v2976_v2 = vpop.f32.mrb[3].mxu1 }
 0x1ea   : >> { %v2069_v4 = vsel %vm2068_vm3, %v3137_v60, 0.0  ;;  %v2077_v5 = vmul.f32 %v3137_v60, %v3137_v60  ;;  %v2086_v6 = vpack.c.bf16 %v3137_v60, %v3137_v60  ;;  %v3136_v7 = vpop.f32.mrb[3].mxu0 }
 0x1eb   : >> { %v2070_v8 = vrot.slane %v2069_v4, 4 }
 0x1ec   : >> { %v2078_v9 = vsel %vm2068_vm3, %v2077_v5, 0.0  ;;  %v2093_v10 = vsel %vm2091_vm4, %v2086_v6, %v2092_v63 }
 0x1ed   : >> { %v2071_v11 = vadd.f32 %v2070_v8, %v2069_v4  ;;  %v2079_v12 = vrot.slane %v2078_v9, 4  ;;  %2094 = vst [vmem:[%s2088_s10] sm:$0x3] %v2093_v10 }
 0x1ef   : >> { %v2072_v13 = vrot.slane %v2071_v11, 2  ;;  %v2080_v14 = vadd.f32 %v2079_v12, %v2078_v9 }
 0x1f1   : >> { %v2073_v15 = vadd.f32 %v2072_v13, %v2071_v11  ;;  %v2081_v16 = vrot.slane %v2080_v14, 2 }
 0x1f3   : >> { %v2074_v17 = vrot.slane %v2073_v15, 1  ;;  %v2082_v18 = vadd.f32 %v2081_v16, %v2080_v14 }
 0x1f5   : >> { %v2075_v20 = vadd.f32 %v2074_v17, %v2073_v15  ;;  %v2083_v19 = vrot.slane %v2082_v18, 1  ;;  %247 = sbr.rel (!%p245_p4) target bundleno = 18 (0x12), region = 117 }
 0x1f7   : >> { %v2076_v21 = vadd.f32 %v3392_v1, %v2075_v20   ;;  %v2084_v22 = vadd.f32 %v2083_v19, %v2082_v18 }
 0x1f9   : >> { %v2085_v23 = vadd.f32 %v3388_v0, %v2084_v22   ;;  %v4097_v1 = vmov %v2076_v21  ;;  %2095 = vst [vmem:[%s238_s22] sm:$0x1] (%p245_p4), %v2076_v21 }
 0x1fb   : >> { %v4096_v0 = vmov %v2085_v23  ;;  %2096 = vst [vmem:[%s241_s26] sm:$0x1] (%p245_p4), %v2085_v23 }
 0x1fc PF: > { %s16_s18 = sadd.s32 1, %s3384_s18  }
 0x1fd   : > { %p13_p5 = scmp.ge.s32.totalorder %s16_s18, 4  }
 0x1ff   :  { %15 = sbr.rel (!%p13_p5) target bundleno = 1 (0x1), region = 128 }

// kernel: discriminator_forward.13
= control target key start
LH: loop header
LB: loop body
LE: loop exit
PB: predicated region body
PF: predicated region fallthrough
CT: control target
= control target key end

     0   :  { %s3404_s18 = smov 0   ;;  %s4037_s0 = inlined_call_operand.vmem [shape: bf16[2,7,1,7,128], index: 0, kind: input, shape index: {}]   ;;  %s4038_s1 = inlined_call_operand.vmem [shape: bf16[16,128,128], index: 1, kind: input, shape index: {}]   ;;  %s4039_s2 = inlined_call_operand.vmem [shape: f32[1,128], index: 2, kind: input, shape index: {}]   ;;  %s4040_s3 = inlined_call_operand.vmem [shape: bf16[2,4,4,128], index: 3, kind: output, shape index: {0}]   ;;  %s4041_s4 = inlined_call_operand.vmem [shape: f32[2,1,128], index: 4, kind: output, shape index: {1}]   ;;  %s4042_s5 = inlined_call_operand.vmem [shape: f32[2,1,128], index: 5, kind: output, shape index: {2}]  }
   0x1 LB: > { %s2236_s2 = sadd.s32 4294967295, %s3358_s18   ;;  %p2240_p0 = scmp.ge.s32.totalorder %s3358_s18, 1  ;;  %s3358_s18 = sphi %s3404_s18, %s16_s18  }
   0x2   : > { %p192_p1 = scmp.lt.s32.totalorder %s3358_s18, 3 }
   0x4   : > { %p193_p2 = pnand %p2240_p0, %p192_p1 }
   0x5   : > { %p226_p3 = scmp.lt.s32.totalorder (!%p193_p2), %s2236_s2, 1  ;;  %v3434_v0 = vmov (!%p193_p2), 0.0   ;;  %v3436_v1 = vmov (!%p193_p2), 0.0   ;;  %s3438_s8 = smov (!%p193_p2), 0  }
   0x6   : > { %196 = sbr.rel (%p193_p2) target bundleno = 507 (0x1fb), region = 32 }
   0xd   : > { %s4046_s2 = smov (!%p226_p3, %s2236_s2), 1 }
   0xe   : > { %s3165_s19 = smul.u32 28, %s4046_s2  ;;  %s2643_s20 = sshll.u32 %s4046_s2, 3 }
   0xf   : > { %s3419_s23 = scalar_lea.vmem %s4040_s3, %s2643_s20  ;;  %s238_s26 = scalar_lea.vmem %s4041_s4, %s4046_s2 }
  0x10   : > { %s3428_s29 = scalar_lea.vmem %s4037_s0, %s3165_s19  ;;  %s241_s7 = scalar_lea.vmem %s4042_s5, %s4046_s2 }
  0x11 LB: >> { %v3200_v2 = vld [vmem:[%s4038_s1 + $0x40] sm:$0xff]   ;;  %v3372_v3 = vmov 0.0   ;;  %v3202_v5 = vld [vmem:[%s4038_s1 + $0x48] sm:$0xff]   ;;  %vm3373_vm0 = vmmov 0   ;;  %v3204_v7 = vld [vmem:[%s4038_s1 + $0x50] sm:$0xff]   ;;  %s2244_s25 = sshll.u32 %s3370_s8, 2  ;;  %s3370_s8 = sphi %s3438_s8, %s248_s8   ;;  %v3366_v1 = vphi %v3436_v1, %v4044_v1   ;;  %v3362_v0 = vphi %v3434_v0, %v4043_v0  }
  0x12   : >> { %2788 = vmatprep.subr.bf16.mxu1 %v3372_v3  ;;  %2948 = vmatprep.subr.bf16.mxu0 %v3372_v3  ;;  %v3201_v4 = vld [vmem:[%s4038_s1 + $0x200] sm:$0xff]   ;;  %v3203_v6 = vld [vmem:[%s4038_s1 + $0x208] sm:$0xff]   ;;  %v3205_v8 = vld [vmem:[%s4038_s1 + $0x210] sm:$0xff]   ;;  %s3487_s30 = scalar_lea.vmem %s3428_s29, %s2244_s25  ;;  %s2640_s13 = sshll.u32 %s3370_s8, 1  ;;  %vm2083_vm1 = vcmask 1043456  }
  0x13   : >> { %2789 = vmatpush3.bf16.msra.mxu1 %v3200_v2  ;;  %2804 = vmatprep.mubr.msk.bf16.mxu1 %vm3373_vm0, %v3372_v3  ;;  %v3206_v9 = vld [vmem:[%s4038_s1 + $0x58] sm:$0xff]   ;;  %v3208_v11 = vld [vmem:[%s4038_s1 + $0x60] sm:$0xff]   ;;  %v3210_v14 = vld [vmem:[%s4038_s1 + $0x68] sm:$0xff]   ;;  %s2103_s14 = scalar_lea.vmem %s3419_s23, %s2640_s13  ;;  %s248_s8 = sadd.s32 1, %s3370_s8  }
  0x14   : >> { %2949 = vmatpush3.bf16.msra.mxu0 %v3201_v4  ;;  %2790 = vmatprep.subr.bf16.mxu1 %v3372_v3  ;;  %v3207_v10 = vld [vmem:[%s4038_s1 + $0x218] sm:$0xff]   ;;  %v3209_v12 = vld [vmem:[%s4038_s1 + $0x220] sm:$0xff]   ;;  %v3211_v15 = vld [vmem:[%s4038_s1 + $0x228] sm:$0xff]   ;;  %p245_p4 = scmp.ge.s32.totalorder %s248_s8, 4  }
  0x15   : >> { %2950 = vmatprep.subr.bf16.mxu0 %v3372_v3  ;;  %2964 = vmatprep.mubr.msk.bf16.mxu0 %vm3373_vm0, %v3372_v3  ;;  %v3216_v13 = vld [vmem:[%s3487_s30] ss:$0 sps:$4 sm:$0x77]   ;;  %v3212_v17 = vld [vmem:[%s4038_s1 + $0x70] sm:$0xff]   ;;  %v3214_v21 = vld [vmem:[%s4038_s1 + $0x78] sm:$0xff]  }
  0x16   : >> { %v294_v16 = vshll.u32 %v3216_v13, 16  ;;  %v3213_v18 = vld [vmem:[%s4038_s1 + $0x230] sm:$0xff]   ;;  %v292_v19 = vshrl.u32 %v3216_v13, 16  ;;  %v3215_v22 = vld [vmem:[%s4038_s1 + $0x238] sm:$0xff]   ;;  %v3217_v24 = vld [vmem:[%s4038_s1] sm:$0xff]  }
  0x17   : >> { %2791 = vmatpush3.bf16.msra.mxu1 %v3202_v5  ;;  %v2433_v25 = vld [vmem:[%s3487_s30 + $0x8] sm:$0x3]  ;;  %v3218_v26 = vld [vmem:[%s4038_s1 + $0x240] sm:$0xff]   ;;  %v3221_v29 = vld [vmem:[%s4038_s1 + $0x10] sm:$0xff]  }
  0x18   : >> { %2951 = vmatpush3.bf16.msra.mxu0 %v3203_v6  ;;  %2792 = vmatprep.subr.bf16.mxu1 %v3372_v3  ;;  %v296_v20 = vrot.slane %v294_v16, 1  ;;  %v3219_v27 = vld [vmem:[%s4038_s1 + $0x8] sm:$0xff]   ;;  %v3222_v30 = vld [vmem:[%s4038_s1 + $0x250] sm:$0xff]   ;;  %v3223_v31 = vld [vmem:[%s4038_s1 + $0x18] sm:$0xff]  }
  0x19   : >> { %2952 = vmatprep.subr.bf16.mxu0 %v3372_v3  ;;  %v3220_v28 = vld [vmem:[%s4038_s1 + $0x248] sm:$0xff]   ;;  %v3224_v32 = vld [vmem:[%s4038_s1 + $0x258] sm:$0xff]   ;;  %v3225_v33 = vld [vmem:[%s4038_s1 + $0x20] sm:$0xff]  }
  0x1a   : >> { %v297_v23 = vor.u32 %v296_v20, %v292_v19  ;;  %v3226_v34 = vld [vmem:[%s4038_s1 + $0x260] sm:$0xff]   ;;  %v3227_v35 = vld [vmem:[%s4038_s1 + $0x28] sm:$0xff]   ;;  %v3229_v38 = vld [vmem:[%s4038_s1 + $0x30] sm:$0xff]  }
  0x1b   : >> { %2793 = vmatpush3.bf16.msra.mxu1 %v3204_v7  ;;  %v3234_v36 = vld [vmem:[%s3487_s30 + $0x8] ss:$0 sps:$4 sm:$0x77]   ;;  %v3230_v40 = vld [vmem:[%s4038_s1 + $0x270] sm:$0xff]   ;;  %v3231_v41 = vld [vmem:[%s4038_s1 + $0x38] sm:$0xff]  }
  0x1c   : >> { %2953 = vmatpush3.bf16.msra.mxu0 %v3205_v8  ;;  %2794 = vmatprep.subr.bf16.mxu1 %v3372_v3  ;;  %v3228_v37 = vld [vmem:[%s4038_s1 + $0x268] sm:$0xff]   ;;  %v1299_v39 = vshll.u32 %v3234_v36, 16  ;;  %v1297_v42 = vshrl.u32 %v3234_v36, 16  ;;  %v3232_v44 = vld [vmem:[%s4038_s1 + $0x278] sm:$0xff]   ;;  %v253_v45 = vld [vmem:[%s3487_s30] sm:$0x3] }
  0x1d   : >> { %2954 = vmatprep.subr.bf16.mxu0 %v3372_v3  ;;  %v3233_v46 = vld [vmem:[%s4038_s1 + $0x80] sm:$0xff]   ;;  %v3236_v49 = vld [vmem:[%s4038_s1 + $0x88] sm:$0xff]   ;;  %v3238_v51 = vld [vmem:[%s4038_s1 + $0x90] sm:$0xff]  }
  0x1e   : >> { %v1301_v43 = vrot.slane %v1299_v39, 1  ;;  %v3235_v48 = vld [vmem:[%s4038_s1 + $0x280] sm:$0xff]   ;;  %v3237_v50 = vld [vmem:[%s4038_s1 + $0x288] sm:$0xff]   ;;  %v3239_v52 = vld [vmem:[%s4038_s1 + $0x290] sm:$0xff]  }
  0x1f   : >> { %2795 = vmatpush3.bf16.msra.mxu1 %v3206_v9  ;;  %v3240_v53 = vld [vmem:[%s4038_s1 + $0x98] sm:$0xff]   ;;  %v3242_v55 = vld [vmem:[%s4038_s1 + $0xa0] sm:$0xff]   ;;  %v3244_v57 = vld [vmem:[%s4038_s1 + $0xa8] sm:$0xff]  }
  0x20   : >> { %2955 = vmatpush3.bf16.msra.mxu0 %v3207_v10  ;;  %2796 = vmatprep.subr.bf16.mxu1 %v3372_v3  ;;  %v1302_v47 = vor.u32 %v1301_v43, %v1297_v42  ;;  %v3241_v54 = vld [vmem:[%s4038_s1 + $0x298] sm:$0xff]   ;;  %v3243_v56 = vld [vmem:[%s4038_s1 + $0x2a0] sm:$0xff]   ;;  %v3245_v58 = vld [vmem:[%s4038_s1 + $0x2a8] sm:$0xff]  }
  0x21   : >> { %2956 = vmatprep.subr.bf16.mxu0 %v3372_v3  ;;  %v3246_v59 = vld [vmem:[%s4038_s1 + $0xb0] sm:$0xff]   ;;  %v3250_v61 = vld [vmem:[%s3487_s30] ss:$0 sps:$4 sm:$0x66]   ;;  %v3248_v63 = vld [vmem:[%s4038_s1 + $0xb8] sm:$0xff]  }
  0x22   : >> { %v3247_v60 = vld [vmem:[%s4038_s1 + $0x2b0] sm:$0xff]   ;;  %v3252_v62 = vld [vmem:[%s3487_s30 + $0x8] ss:$0 sps:$4 sm:$0x66]   ;;  %v3249_v2 = vld [vmem:[%s4038_s1 + $0x2b8] sm:$0xff]   ;;  %v496_v4 = vrot.slane %v3250_v61, 1 }
  0x23   : >> { %2797 = vmatpush3.bf16.msra.mxu1 %v3208_v11  ;;  %v3251_v5 = vld [vmem:[%s4038_s1 + $0xc0] sm:$0xff]   ;;  %v1414_v6 = vrot.slane %v3252_v62, 1  ;;  %v3254_v8 = vld [vmem:[%s4038_s1 + $0xc8] sm:$0xff]   ;;  %v3256_v10 = vld [vmem:[%s4038_s1 + $0xd0] sm:$0xff]  }
  0x24   : >> { %2957 = vmatpush3.bf16.msra.mxu0 %v3209_v12  ;;  %2798 = vmatprep.subr.bf16.mxu1 %v3372_v3  ;;  %v3253_v7 = vld [vmem:[%s4038_s1 + $0x2c0] sm:$0xff]   ;;  %v3255_v9 = vld [vmem:[%s4038_s1 + $0x2c8] sm:$0xff]   ;;  %v3257_v11 = vld [vmem:[%s4038_s1 + $0x2d0] sm:$0xff]  }
  0x25   : >> { %2958 = vmatprep.subr.bf16.mxu0 %v3372_v3  ;;  %v3258_v12 = vld [vmem:[%s4038_s1 + $0xd8] sm:$0xff]   ;;  %v3261_v16 = vld [vmem:[%s4038_s1 + $0x2e0] sm:$0xff]   ;;  %v3263_v19 = vld [vmem:[%s4038_s1 + $0x2e8] sm:$0xff]  }
  0x26   : >> { %v3259_v13 = vld [vmem:[%s4038_s1 + $0x2d8] sm:$0xff]   ;;  %v3272_v36 = vld [vmem:[%s4038_s1 + $0x108] sm:$0xff]   ;;  %v3275_v39 = vld [vmem:[%s4038_s1 + $0x310] sm:$0xff]  }
  0x27   : >> { %2799 = vmatpush3.bf16.msra.mxu1 %v3210_v14  ;;  %v3260_v14 = vld [vmem:[%s4038_s1 + $0xe0] sm:$0xff]  }
  0x28   : >> { %2959 = vmatpush3.bf16.msra.mxu0 %v3211_v15  ;;  %2800 = vmatprep.subr.bf16.mxu1 %v3372_v3  ;;  %v3268_v15 = vld [vmem:[%s3487_s30] ss:$0 sps:$4 sm:$0xee]   ;;  %v3302_v62 = vld [vmem:[%s3487_s30 + $0x4] ss:$0 sps:$4 sm:$0x77]  }
  0x29   : >> { %2960 = vmatprep.subr.bf16.mxu0 %v3372_v3  ;;  %v609_v20 = vshrl.u32 %v3268_v15, 16  ;;  %v3278_v42 = vld [vmem:[%s4038_s1 + $0x120] sm:$0xff]  }
  0x2a   : >> { %v3279_v43 = vld [vmem:[%s4038_s1 + $0x320] sm:$0xff]  }
  0x2b   : >> { %2801 = vmatpush3.bf16.msra.mxu1 %v3212_v17  ;;  %v3270_v17 = vld [vmem:[%s3487_s30 + $0x8] ss:$0 sps:$4 sm:$0xee]   ;;  %v3295_v61 = vld [vmem:[%s4038_s1 + $0x360] sm:$0xff]  }
  0x2c   : >> { %2961 = vmatpush3.bf16.msra.mxu0 %v3213_v18  ;;  %2802 = vmatprep.subr.bf16.mxu1 %v3372_v3  ;;  %v3262_v18 = vld [vmem:[%s4038_s1 + $0xe8] sm:$0xff]  }
  0x2d   : >> { %2962 = vmatprep.subr.bf16.mxu0 %v3372_v3 }
  0x2f   : >> { %2803 = vmatpush3.bf16.msra.mxu1 %v3214_v21  ;;  %v612_v21 = vshll.u32 %v3268_v15, 16 }
  0x30   : >> { %2963 = vmatpush3.bf16.msra.mxu0 %v3215_v22  ;;  %2808 = vmatprep.subr.bf16.mxu1 %v3372_v3  ;;  %v1527_v22 = vshrl.u32 %v3270_v17, 16 }
  0x31   : >> { %2968 = vmatprep.subr.bf16.mxu0 %v3372_v3 }
  0x32   : >> { %2805 = vmatmul.mubr.bf16.vlgmr.msra.gmra.mrb[0].mxu1 %v297_v23  ;;  %v1530_v23 = vshll.u32 %v3270_v17, 16 }
  0x33   : >> { %2809 = vmatpush3.bf16.msra.mxu1 %v3217_v24  ;;  %2965 = vmatmul.mubr.bf16.vlgmr.msra.gmra.mrb[0].mxu0 %v2433_v25  ;;  %v3264_v24 = vld [vmem:[%s4038_s1 + $0xf0] sm:$0xff]  }
  0x34   : >> { %2969 = vmatpush3.bf16.msra.mxu0 %v3218_v26  ;;  %2810 = vmatprep.subr.bf16.mxu1 %v3372_v3  ;;  %v3265_v25 = vld [vmem:[%s4038_s1 + $0x2f0] sm:$0xff]   ;;  %v3266_v26 = vld [vmem:[%s4038_s1 + $0xf8] sm:$0xff]  }
  0x35   : >> { %2970 = vmatprep.subr.bf16.mxu0 %v3372_v3  ;;  %2824 = vmatprep.mubr.msk.bf16.mxu1 %vm3373_vm0, %v3372_v3 }
  0x36   : >> { %2984 = vmatprep.mubr.msk.bf16.mxu0 %vm3373_vm0, %v3372_v3 }
  0x37   : >> { %2811 = vmatpush3.bf16.msra.mxu1 %v3219_v27  ;;  %v611_v27 = vrot.slane %v609_v20, 1  ;;  %v3307_v20 = vld [vmem:[%s4038_s1 + $0x388] sm:$0xff]  }
  0x38   : >> { %2971 = vmatpush3.bf16.msra.mxu0 %v3220_v28  ;;  %2812 = vmatprep.subr.bf16.mxu1 %v3372_v3  ;;  %v614_v28 = vrot.slane %v612_v21, 2  ;;  %v3308_v21 = vld [vmem:[%s4038_s1 + $0x190] sm:$0xff]  }
  0x39   : >> { %2972 = vmatprep.subr.bf16.mxu0 %v3372_v3 }
  0x3b   : >> { %2813 = vmatpush3.bf16.msra.mxu1 %v3221_v29  ;;  %v1529_v29 = vrot.slane %v1527_v22, 1  ;;  %v3309_v22 = vld [vmem:[%s4038_s1 + $0x390] sm:$0xff]  }
  0x3c   : >> { %2973 = vmatpush3.bf16.msra.mxu0 %v3222_v30  ;;  %2814 = vmatprep.subr.bf16.mxu1 %v3372_v3  ;;  %v1532_v30 = vrot.slane %v1530_v23, 2  ;;  %v3310_v23 = vld [vmem:[%s4038_s1 + $0x198] sm:$0xff]  }
  0x3d   : >> { %2974 = vmatprep.subr.bf16.mxu0 %v3372_v3 }
  0x3f   : >> { %2815 = vmatpush3.bf16.msra.mxu1 %v3223_v31  ;;  %v3267_v31 = vld [vmem:[%s4038_s1 + $0x2f8] sm:$0xff]  }
  0x40   : >> { %2975 = vmatpush3.bf16.msra.mxu0 %v3224_v32  ;;  %2816 = vmatprep.subr.bf16.mxu1 %v3372_v3  ;;  %v615_v32 = vor.u32 %v614_v28, %v611_v27  ;;  %v3314_v27 = vld [vmem:[%s4038_s1 + $0x1a8] sm:$0xff]  }
  0x41   : >> { %2976 = vmatprep.subr.bf16.mxu0 %v3372_v3  ;;  %v3315_v28 = vld [vmem:[%s4038_s1 + $0x3a8] sm:$0xff]  }
  0x43   : >> { %2817 = vmatpush3.bf16.msra.mxu1 %v3225_v33  ;;  %v3269_v33 = vld [vmem:[%s4038_s1 + $0x100] sm:$0xff]  }
  0x44   : >> { %2977 = vmatpush3.bf16.msra.mxu0 %v3226_v34  ;;  %2818 = vmatprep.subr.bf16.mxu1 %v3372_v3  ;;  %v1533_v34 = vor.u32 %v1532_v30, %v1529_v29  ;;  %v3316_v29 = vld [vmem:[%s4038_s1 + $0x1b0] sm:$0xff]  }
  0x45   : >> { %2978 = vmatprep.subr.bf16.mxu0 %v3372_v3  ;;  %v3317_v30 = vld [vmem:[%s4038_s1 + $0x3b0] sm:$0xff]  }
  0x47   : >> { %2819 = vmatpush3.bf16.msra.mxu1 %v3227_v35  ;;  %v3271_v35 = vld [vmem:[%s4038_s1 + $0x300] sm:$0xff]  }
  0x48   : >> { %2979 = vmatpush3.bf16.msra.mxu0 %v3228_v37  ;;  %2820 = vmatprep.subr.bf16.mxu1 %v3372_v3  ;;  %v3273_v37 = vld [vmem:[%s4038_s1 + $0x308] sm:$0xff]  }
  0x49   : >> { %2980 = vmatprep.subr.bf16.mxu0 %v3372_v3 }
  0x4b   : >> { %2821 = vmatpush3.bf16.msra.mxu1 %v3229_v38  ;;  %v3274_v38 = vld [vmem:[%s4038_s1 + $0x110] sm:$0xff]  }
  0x4c   : >> { %2981 = vmatpush3.bf16.msra.mxu0 %v3230_v40  ;;  %2822 = vmatprep.subr.bf16.mxu1 %v3372_v3  ;;  %v3276_v40 = vld [vmem:[%s4038_s1 + $0x118] sm:$0xff]  }
  0x4d   : >> { %2982 = vmatprep.subr.bf16.mxu0 %v3372_v3 }
  0x4f   : >> { %2823 = vmatpush3.bf16.msra.mxu1 %v3231_v41  ;;  %v3277_v41 = vld [vmem:[%s4038_s1 + $0x318] sm:$0xff]  }
  0x50   : >> { %2983 = vmatpush3.bf16.msra.mxu0 %v3232_v44  ;;  %2828 = vmatprep.subr.bf16.mxu1 %v3372_v3  ;;  %v3280_v44 = vld [vmem:[%s4038_s1 + $0x128] sm:$0xff]  }
  0x51   : >> { %2988 = vmatprep.subr.bf16.mxu0 %v3372_v3 }
  0x52   : >> { %2825 = vmatmul.mubr.bf16.vlgmr.msra.gmra.mrb[0].mxu1 %v253_v45  ;;  %v3281_v45 = vld [vmem:[%s4038_s1 + $0x328] sm:$0xff]  }
  0x53   : >> { %2829 = vmatpush3.bf16.msra.mxu1 %v3233_v46  ;;  %2985 = vmatmul.mubr.bf16.vlgmr.msra.gmra.mrb[0].mxu0 %v1302_v47  ;;  %v3282_v46 = vld [vmem:[%s4038_s1 + $0x130] sm:$0xff]  }
  0x54   : >> { %2989 = vmatpush3.bf16.msra.mxu0 %v3235_v48  ;;  %2830 = vmatprep.subr.bf16.mxu1 %v3372_v3  ;;  %v3283_v47 = vld [vmem:[%s4038_s1 + $0x330] sm:$0xff]   ;;  %v3284_v48 = vld [vmem:[%s4038_s1 + $0x138] sm:$0xff]  }
  0x55   : >> { %2990 = vmatprep.subr.bf16.mxu0 %v3372_v3  ;;  %2844 = vmatprep.mubr.msk.bf16.mxu1 %vm3373_vm0, %v3372_v3 }
  0x56   : >> { %3004 = vmatprep.mubr.msk.bf16.mxu0 %vm3373_vm0, %v3372_v3 }
  0x57   : >> { %2831 = vmatpush3.bf16.msra.mxu1 %v3236_v49  ;;  %v3285_v49 = vld [vmem:[%s4038_s1 + $0x338] sm:$0xff]  }
  0x58   : >> { %2991 = vmatpush3.bf16.msra.mxu0 %v3237_v50  ;;  %2832 = vmatprep.subr.bf16.mxu1 %v3372_v3  ;;  %v2329_v50 = vld [vmem:[%s3487_s30 + $0x4] sm:$0x3] }
  0x59   : >> { %2992 = vmatprep.subr.bf16.mxu0 %v3372_v3 }
  0x5b   : >> { %2833 = vmatpush3.bf16.msra.mxu1 %v3238_v51  ;;  %v3286_v51 = vld [vmem:[%s4038_s1 + $0x140] sm:$0xff]  }
  0x5c   : >> { %2993 = vmatpush3.bf16.msra.mxu0 %v3239_v52  ;;  %2834 = vmatprep.subr.bf16.mxu1 %v3372_v3  ;;  %v2537_v52 = vld [vmem:[%s3487_s30 + $0xc] sm:$0x3] }
  0x5d   : >> { %2994 = vmatprep.subr.bf16.mxu0 %v3372_v3 }
  0x5f   : >> { %2835 = vmatpush3.bf16.msra.mxu1 %v3240_v53  ;;  %v3287_v53 = vld [vmem:[%s4038_s1 + $0x340] sm:$0xff]  }
  0x60   : >> { %2995 = vmatpush3.bf16.msra.mxu0 %v3241_v54  ;;  %2836 = vmatprep.subr.bf16.mxu1 %v3372_v3  ;;  %v3288_v54 = vld [vmem:[%s4038_s1 + $0x148] sm:$0xff]  }
  0x61   : >> { %2996 = vmatprep.subr.bf16.mxu0 %v3372_v3 }
  0x63   : >> { %2837 = vmatpush3.bf16.msra.mxu1 %v3242_v55  ;;  %v3289_v55 = vld [vmem:[%s4038_s1 + $0x348] sm:$0xff]  }
  0x64   : >> { %2997 = vmatpush3.bf16.msra.mxu0 %v3243_v56  ;;  %2838 = vmatprep.subr.bf16.mxu1 %v3372_v3  ;;  %v3290_v56 = vld [vmem:[%s4038_s1 + $0x150] sm:$0xff]  }
  0x65   : >> { %2998 = vmatprep.subr.bf16.mxu0 %v3372_v3 }
  0x67   : >> { %2839 = vmatpush3.bf16.msra.mxu1 %v3244_v57  ;;  %v3291_v57 = vld [vmem:[%s4038_s1 + $0x350] sm:$0xff]  }
  0x68   : >> { %2999 = vmatpush3.bf16.msra.mxu0 %v3245_v58  ;;  %2840 = vmatprep.subr.bf16.mxu1 %v3372_v3  ;;  %v3292_v58 = vld [vmem:[%s4038_s1 + $0x158] sm:$0xff]  }
  0x69   : >> { %3000 = vmatprep.subr.bf16.mxu0 %v3372_v3 }
  0x6b   : >> { %2841 = vmatpush3.bf16.msra.mxu1 %v3246_v59  ;;  %v3293_v59 = vld [vmem:[%s4038_s1 + $0x358] sm:$0xff]  }
  0x6c   : >> { %3001 = vmatpush3.bf16.msra.mxu0 %v3247_v60  ;;  %2842 = vmatprep.subr.bf16.mxu1 %v3372_v3  ;;  %v3294_v60 = vld [vmem:[%s4038_s1 + $0x160] sm:$0xff]  }
  0x6d   : >> { %3002 = vmatprep.subr.bf16.mxu0 %v3372_v3 }
  0x6f   : >> { %2843 = vmatpush3.bf16.msra.mxu1 %v3248_v63  ;;  %v3296_v63 = vld [vmem:[%s4038_s1 + $0x168] sm:$0xff]  }
  0x70   : >> { %3003 = vmatpush3.bf16.msra.mxu0 %v3249_v2  ;;  %2848 = vmatprep.subr.bf16.mxu1 %v3372_v3  ;;  %v3304_v2 = vld [vmem:[%s3487_s30 + $0xc] ss:$0 sps:$4 sm:$0x77]  }
  0x71   : >> { %3008 = vmatprep.subr.bf16.mxu0 %v3372_v3 }
  0x72   : >> { %2845 = vmatmul.mubr.bf16.vlgmr.msra.gmra.mrb[0].mxu1 %v496_v4  ;;  %v3297_v4 = vld [vmem:[%s4038_s1 + $0x368] sm:$0xff]  }
  0x73   : >> { %2849 = vmatpush3.bf16.msra.mxu1 %v3251_v5  ;;  %3005 = vmatmul.mubr.bf16.vlgmr.msra.gmra.mrb[0].mxu0 %v1414_v6  ;;  %v840_v5 = vshll.u32 %v3302_v62, 16  ;;  %v3298_v6 = vld [vmem:[%s4038_s1 + $0x170] sm:$0xff]  }
  0x74   : >> { %3009 = vmatpush3.bf16.msra.mxu0 %v3253_v7  ;;  %2850 = vmatprep.subr.bf16.mxu1 %v3372_v3  ;;  %v1758_v7 = vshll.u32 %v3304_v2, 16 }
  0x75   : >> { %3010 = vmatprep.subr.bf16.mxu0 %v3372_v3  ;;  %2864 = vmatprep.mubr.msk.bf16.mxu1 %vm3373_vm0, %v3372_v3 }
  0x76   : >> { %3024 = vmatprep.mubr.msk.bf16.mxu0 %vm3373_vm0, %v3372_v3 }
  0x77   : >> { %2851 = vmatpush3.bf16.msra.mxu1 %v3254_v8  ;;  %v3299_v8 = vld [vmem:[%s4038_s1 + $0x370] sm:$0xff]  }
  0x78   : >> { %3011 = vmatpush3.bf16.msra.mxu0 %v3255_v9  ;;  %2852 = vmatprep.subr.bf16.mxu1 %v3372_v3  ;;  %v838_v9 = vshrl.u32 %v3302_v62, 16  ;;  %v3337_v62 = vld [vmem:[%s4038_s1 + $0x3f8] sm:$0xff]  }
  0x79   : >> { %3012 = vmatprep.subr.bf16.mxu0 %v3372_v3 }
  0x7b   : >> { %2853 = vmatpush3.bf16.msra.mxu1 %v3256_v10  ;;  %v842_v10 = vrot.slane %v840_v5, 1 }
  0x7c   : >> { %3013 = vmatpush3.bf16.msra.mxu0 %v3257_v11  ;;  %2854 = vmatprep.subr.bf16.mxu1 %v3372_v3  ;;  %v3300_v11 = vld [vmem:[%s4038_s1 + $0x178] sm:$0xff]  }
  0x7d   : >> { %3014 = vmatprep.subr.bf16.mxu0 %v3372_v3  ;;  %v843_v15 = vor.u32 %v842_v10, %v838_v9 }
  0x7f   : >> { %2855 = vmatpush3.bf16.msra.mxu1 %v3258_v12  ;;  %v1756_v12 = vshrl.u32 %v3304_v2, 16 }
  0x80   : >> { %3015 = vmatpush3.bf16.msra.mxu0 %v3259_v13  ;;  %2856 = vmatprep.subr.bf16.mxu1 %v3372_v3  ;;  %v1760_v13 = vrot.slane %v1758_v7, 1 }
  0x81   : >> { %3016 = vmatprep.subr.bf16.mxu0 %v3372_v3 }
  0x82   : >> { %v1761_v17 = vor.u32 %v1760_v13, %v1756_v12 }
  0x83   : >> { %2857 = vmatpush3.bf16.msra.mxu1 %v3260_v14  ;;  %v3301_v14 = vld [vmem:[%s4038_s1 + $0x378] sm:$0xff]  }
  0x84   : >> { %3017 = vmatpush3.bf16.msra.mxu0 %v3261_v16  ;;  %2858 = vmatprep.subr.bf16.mxu1 %v3372_v3  ;;  %v3303_v16 = vld [vmem:[%s4038_s1 + $0x180] sm:$0xff]  }
  0x85   : >> { %3018 = vmatprep.subr.bf16.mxu0 %v3372_v3 }
  0x87   : >> { %2859 = vmatpush3.bf16.msra.mxu1 %v3262_v18  ;;  %v3305_v18 = vld [vmem:[%s4038_s1 + $0x380] sm:$0xff]  }
  0x88   : >> { %3019 = vmatpush3.bf16.msra.mxu0 %v3263_v19  ;;  %2860 = vmatprep.subr.bf16.mxu1 %v3372_v3  ;;  %v3306_v19 = vld [vmem:[%s4038_s1 + $0x188] sm:$0xff]  }
  0x89   : >> { %3020 = vmatprep.subr.bf16.mxu0 %v3372_v3 }
  0x8b   : >> { %2861 = vmatpush3.bf16.msra.mxu1 %v3264_v24  ;;  %v3311_v24 = vld [vmem:[%s4038_s1 + $0x398] sm:$0xff]  }
  0x8c   : >> { %3021 = vmatpush3.bf16.msra.mxu0 %v3265_v25  ;;  %2862 = vmatprep.subr.bf16.mxu1 %v3372_v3  ;;  %v3312_v25 = vld [vmem:[%s4038_s1 + $0x1a0] sm:$0xff]  }
  0x8d   : >> { %3022 = vmatprep.subr.bf16.mxu0 %v3372_v3 }
  0x8f   : >> { %2863 = vmatpush3.bf16.msra.mxu1 %v3266_v26  ;;  %v3313_v26 = vld [vmem:[%s4038_s1 + $0x3a0] sm:$0xff]  }
  0x90   : >> { %3023 = vmatpush3.bf16.msra.mxu0 %v3267_v31  ;;  %2868 = vmatprep.subr.bf16.mxu1 %v3372_v3  ;;  %v3320_v31 = vld [vmem:[%s3487_s30 + $0x4] ss:$0 sps:$4 sm:$0x66]  }
  0x91   : >> { %3028 = vmatprep.subr.bf16.mxu0 %v3372_v3 }
  0x92   : >> { %2865 = vmatmul.mubr.bf16.vlgmr.msra.gmra.mrb[0].mxu1 %v615_v32  ;;  %v3318_v32 = vld [vmem:[%s4038_s1 + $0x1b8] sm:$0xff]  }
  0x93   : >> { %2869 = vmatpush3.bf16.msra.mxu1 %v3269_v33  ;;  %3025 = vmatmul.mubr.bf16.vlgmr.msra.gmra.mrb[0].mxu0 %v1533_v34  ;;  %v3322_v33 = vld [vmem:[%s3487_s30 + $0xc] ss:$0 sps:$4 sm:$0x66]   ;;  %v3319_v34 = vld [vmem:[%s4038_s1 + $0x3b8] sm:$0xff]  }
  0x94   : >> { %3029 = vmatpush3.bf16.msra.mxu0 %v3271_v35  ;;  %2870 = vmatprep.subr.bf16.mxu1 %v3372_v3  ;;  %v955_v35 = vrot.slane %v3320_v31, 1 }
  0x95   : >> { %3030 = vmatprep.subr.bf16.mxu0 %v3372_v3  ;;  %2884 = vmatprep.mubr.msk.bf16.mxu1 %vm3373_vm0, %v3372_v3 }
  0x96   : >> { %3044 = vmatprep.mubr.msk.bf16.mxu0 %vm3373_vm0, %v3372_v3 }
  0x97   : >> { %2871 = vmatpush3.bf16.msra.mxu1 %v3272_v36  ;;  %v3321_v36 = vld [vmem:[%s4038_s1 + $0x1c0] sm:$0xff]  }
  0x98   : >> { %3031 = vmatpush3.bf16.msra.mxu0 %v3273_v37  ;;  %2872 = vmatprep.subr.bf16.mxu1 %v3372_v3  ;;  %v1873_v37 = vrot.slane %v3322_v33, 1 }
  0x99   : >> { %3032 = vmatprep.subr.bf16.mxu0 %v3372_v3 }
  0x9b   : >> { %2873 = vmatpush3.bf16.msra.mxu1 %v3274_v38  ;;  %v3323_v38 = vld [vmem:[%s4038_s1 + $0x3c0] sm:$0xff]  }
  0x9c   : >> { %3033 = vmatpush3.bf16.msra.mxu0 %v3275_v39  ;;  %2874 = vmatprep.subr.bf16.mxu1 %v3372_v3  ;;  %v3324_v39 = vld [vmem:[%s4038_s1 + $0x1c8] sm:$0xff]  }
  0x9d   : >> { %3034 = vmatprep.subr.bf16.mxu0 %v3372_v3 }
  0x9f   : >> { %2875 = vmatpush3.bf16.msra.mxu1 %v3276_v40  ;;  %v3325_v40 = vld [vmem:[%s4038_s1 + $0x3c8] sm:$0xff]  }
  0xa0   : >> { %3035 = vmatpush3.bf16.msra.mxu0 %v3277_v41  ;;  %2876 = vmatprep.subr.bf16.mxu1 %v3372_v3  ;;  %v3326_v41 = vld [vmem:[%s4038_s1 + $0x1d0] sm:$0xff]  }
  0xa1   : >> { %3036 = vmatprep.subr.bf16.mxu0 %v3372_v3 }
  0xa3   : >> { %2877 = vmatpush3.bf16.msra.mxu1 %v3278_v42  ;;  %v3327_v42 = vld [vmem:[%s4038_s1 + $0x3d0] sm:$0xff]  }
  0xa4   : >> { %3037 = vmatpush3.bf16.msra.mxu0 %v3279_v43  ;;  %2878 = vmatprep.subr.bf16.mxu1 %v3372_v3  ;;  %v3328_v43 = vld [vmem:[%s4038_s1 + $0x1d8] sm:$0xff]  }
  0xa5   : >> { %3038 = vmatprep.subr.bf16.mxu0 %v3372_v3 }
  0xa7   : >> { %2879 = vmatpush3.bf16.msra.mxu1 %v3280_v44  ;;  %v3329_v44 = vld [vmem:[%s4038_s1 + $0x3d8] sm:$0xff]  }
  0xa8   : >> { %3039 = vmatpush3.bf16.msra.mxu0 %v3281_v45  ;;  %2880 = vmatprep.subr.bf16.mxu1 %v3372_v3  ;;  %v3330_v45 = vld [vmem:[%s4038_s1 + $0x1e0] sm:$0xff]  }
  0xa9   : >> { %3040 = vmatprep.subr.bf16.mxu0 %v3372_v3 }
  0xab   : >> { %2881 = vmatpush3.bf16.msra.mxu1 %v3282_v46  ;;  %v3331_v46 = vld [vmem:[%s4038_s1 + $0x3e0] sm:$0xff]  }
  0xac   : >> { %3041 = vmatpush3.bf16.msra.mxu0 %v3283_v47  ;;  %2882 = vmatprep.subr.bf16.mxu1 %v3372_v3  ;;  %v3338_v47 = vld [vmem:[%s3487_s30 + $0x4] ss:$0 sps:$4 sm:$0xee]  }
  0xad   : >> { %3042 = vmatprep.subr.bf16.mxu0 %v3372_v3 }
  0xaf   : >> { %2883 = vmatpush3.bf16.msra.mxu1 %v3284_v48  ;;  %v3332_v48 = vld [vmem:[%s4038_s1 + $0x1e8] sm:$0xff]  }
  0xb0   : >> { %3043 = vmatpush3.bf16.msra.mxu0 %v3285_v49  ;;  %2888 = vmatprep.subr.bf16.mxu1 %v3372_v3  ;;  %v3339_v49 = vld [vmem:[%s3487_s30 + $0xc] ss:$0 sps:$4 sm:$0xee]  }
  0xb1   : >> { %3048 = vmatprep.subr.bf16.mxu0 %v3372_v3 }
  0xb2   : >> { %2885 = vmatmul.mubr.bf16.vlgmr.msra.gmra.mrb[0].mxu1 %v2329_v50  ;;  %v3333_v50 = vld [vmem:[%s4038_s1 + $0x3e8] sm:$0xff]  }
  0xb3   : >> { %2889 = vmatpush3.bf16.msra.mxu1 %v3286_v51  ;;  %3045 = vmatmul.mubr.bf16.vlgmr.msra.gmra.mrb[0].mxu0 %v2537_v52  ;;  %v1068_v51 = vshrl.u32 %v3338_v47, 16  ;;  %v1071_v52 = vshll.u32 %v3338_v47, 16 }
  0xb4   : >> { %3049 = vmatpush3.bf16.msra.mxu0 %v3287_v53  ;;  %2890 = vmatprep.subr.bf16.mxu1 %v3372_v3  ;;  %v3334_v53 = vld [vmem:[%s4038_s1 + $0x1f0] sm:$0xff]  }
  0xb5   : >> { %3050 = vmatprep.subr.bf16.mxu0 %v3372_v3  ;;  %2904 = vmatprep.mubr.msk.bf16.mxu1 %vm3373_vm0, %v3372_v3 }
  0xb6   : >> { %3064 = vmatprep.mubr.msk.bf16.mxu0 %vm3373_vm0, %v3372_v3 }
  0xb7   : >> { %2891 = vmatpush3.bf16.msra.mxu1 %v3288_v54  ;;  %v1986_v54 = vshrl.u32 %v3339_v49, 16 }
  0xb8   : >> { %3051 = vmatpush3.bf16.msra.mxu0 %v3289_v55  ;;  %2892 = vmatprep.subr.bf16.mxu1 %v3372_v3  ;;  %v1989_v55 = vshll.u32 %v3339_v49, 16 }
  0xb9   : >> { %3052 = vmatprep.subr.bf16.mxu0 %v3372_v3 }
  0xbb   : >> { %2893 = vmatpush3.bf16.msra.mxu1 %v3290_v56  ;;  %v3335_v56 = vld [vmem:[%s4038_s1 + $0x3f0] sm:$0xff]  }
  0xbc   : >> { %3053 = vmatpush3.bf16.msra.mxu0 %v3291_v57  ;;  %2894 = vmatprep.subr.bf16.mxu1 %v3372_v3  ;;  %v1070_v57 = vrot.slane %v1068_v51, 1 }
  0xbd   : >> { %3054 = vmatprep.subr.bf16.mxu0 %v3372_v3 }
  0xbf   : >> { %2895 = vmatpush3.bf16.msra.mxu1 %v3292_v58  ;;  %v1073_v58 = vrot.slane %v1071_v52, 2 }
  0xc0   : >> { %3055 = vmatpush3.bf16.msra.mxu0 %v3293_v59  ;;  %2896 = vmatprep.subr.bf16.mxu1 %v3372_v3  ;;  %v3336_v59 = vld [vmem:[%s4038_s1 + $0x1f8] sm:$0xff]  }
  0xc1   : >> { %3056 = vmatprep.subr.bf16.mxu0 %v3372_v3 }
  0xc3   : >> { %2897 = vmatpush3.bf16.msra.mxu1 %v3294_v60  ;;  %v1988_v60 = vrot.slane %v1986_v54, 1 }
  0xc4   : >> { %3057 = vmatpush3.bf16.msra.mxu0 %v3295_v61  ;;  %2898 = vmatprep.subr.bf16.mxu1 %v3372_v3  ;;  %v1991_v61 = vrot.slane %v1989_v55, 2 }
  0xc5   : >> { %3058 = vmatprep.subr.bf16.mxu0 %v3372_v3 }
  0xc6   : >> { %v1992_v2 = vor.u32 %v1991_v61, %v1988_v60 }
  0xc7   : >> { %2899 = vmatpush3.bf16.msra.mxu1 %v3296_v63  ;;  %v1074_v63 = vor.u32 %v1073_v58, %v1070_v57 }
  0xc8   : >> { %3059 = vmatpush3.bf16.msra.mxu0 %v3297_v4  ;;  %2900 = vmatprep.subr.bf16.mxu1 %v3372_v3 }
  0xc9   : >> { %3060 = vmatprep.subr.bf16.mxu0 %v3372_v3 }
  0xcb   : >> { %2901 = vmatpush3.bf16.msra.mxu1 %v3298_v6 }
  0xcc   : >> { %3061 = vmatpush3.bf16.msra.mxu0 %v3299_v8  ;;  %2902 = vmatprep.subr.bf16.mxu1 %v3372_v3 }
  0xcd   : >> { %3062 = vmatprep.subr.bf16.mxu0 %v3372_v3 }
  0xcf   : >> { %2903 = vmatpush3.bf16.msra.mxu1 %v3300_v11 }
  0xd0   : >> { %3063 = vmatpush3.bf16.msra.mxu0 %v3301_v14  ;;  %2908 = vmatprep.subr.bf16.mxu1 %v3372_v3 }
  0xd1   : >> { %3068 = vmatprep.subr.bf16.mxu0 %v3372_v3 }
  0xd2   : >> { %2905 = vmatmul.mubr.bf16.vlgmr.msra.gmra.mrb[0].mxu1 %v843_v15 }
  0xd3   : >> { %2909 = vmatpush3.bf16.msra.mxu1 %v3303_v16  ;;  %3065 = vmatmul.mubr.bf16.vlgmr.msra.gmra.mrb[0].mxu0 %v1761_v17 }
  0xd4   : >> { %3069 = vmatpush3.bf16.msra.mxu0 %v3305_v18  ;;  %2910 = vmatprep.subr.bf16.mxu1 %v3372_v3 }
  0xd5   : >> { %3070 = vmatprep.subr.bf16.mxu0 %v3372_v3  ;;  %2924 = vmatprep.mubr.msk.bf16.mxu1 %vm3373_vm0, %v3372_v3 }
  0xd6   : >> { %3084 = vmatprep.mubr.msk.bf16.mxu0 %vm3373_vm0, %v3372_v3 }
  0xd7   : >> { %2911 = vmatpush3.bf16.msra.mxu1 %v3306_v19 }
  0xd8   : >> { %3071 = vmatpush3.bf16.msra.mxu0 %v3307_v20  ;;  %2912 = vmatprep.subr.bf16.mxu1 %v3372_v3 }
  0xd9   : >> { %3072 = vmatprep.subr.bf16.mxu0 %v3372_v3 }
  0xdb   : >> { %2913 = vmatpush3.bf16.msra.mxu1 %v3308_v21 }
  0xdc   : >> { %3073 = vmatpush3.bf16.msra.mxu0 %v3309_v22  ;;  %2914 = vmatprep.subr.bf16.mxu1 %v3372_v3 }
  0xdd   : >> { %3074 = vmatprep.subr.bf16.mxu0 %v3372_v3 }
  0xdf   : >> { %2915 = vmatpush3.bf16.msra.mxu1 %v3310_v23 }
  0xe0   : >> { %3075 = vmatpush3.bf16.msra.mxu0 %v3311_v24  ;;  %2916 = vmatprep.subr.bf16.mxu1 %v3372_v3 }
  0xe1   : >> { %3076 = vmatprep.subr.bf16.mxu0 %v3372_v3 }
  0xe3   : >> { %2917 = vmatpush3.bf16.msra.mxu1 %v3312_v25 }
  0xe4   : >> { %3077 = vmatpush3.bf16.msra.mxu0 %v3313_v26  ;;  %2918 = vmatprep.subr.bf16.mxu1 %v3372_v3 }
  0xe5   : >> { %3078 = vmatprep.subr.bf16.mxu0 %v3372_v3 }
  0xe7   : >> { %2919 = vmatpush3.bf16.msra.mxu1 %v3314_v27 }
  0xe8   : >> { %3079 = vmatpush3.bf16.msra.mxu0 %v3315_v28  ;;  %2920 = vmatprep.subr.bf16.mxu1 %v3372_v3 }
  0xe9   : >> { %3080 = vmatprep.subr.bf16.mxu0 %v3372_v3 }
  0xeb   : >> { %2921 = vmatpush3.bf16.msra.mxu1 %v3316_v29 }
  0xec   : >> { %3081 = vmatpush3.bf16.msra.mxu0 %v3317_v30  ;;  %2922 = vmatprep.subr.bf16.mxu1 %v3372_v3 }
  0xed   : >> { %3082 = vmatprep.subr.bf16.mxu0 %v3372_v3 }
  0xef   : >> { %2923 = vmatpush3.bf16.msra.mxu1 %v3318_v32 }
  0xf0   : >> { %3083 = vmatpush3.bf16.msra.mxu0 %v3319_v34  ;;  %2928 = vmatprep.subr.bf16.mxu1 %v3372_v3 }
  0xf1   : >> { %3088 = vmatprep.subr.bf16.mxu0 %v3372_v3 }
  0xf2   : >> { %2925 = vmatmul.mubr.bf16.vlgmr.msra.gmra.mrb[0].mxu1 %v955_v35 }
  0xf3   : >> { %2929 = vmatpush3.bf16.msra.mxu1 %v3321_v36  ;;  %3085 = vmatmul.mubr.bf16.vlgmr.msra.gmra.mrb[0].mxu0 %v1873_v37 }
  0xf4   : >> { %3089 = vmatpush3.bf16.msra.mxu0 %v3323_v38  ;;  %2930 = vmatprep.subr.bf16.mxu1 %v3372_v3 }
  0xf5   : >> { %3090 = vmatprep.subr.bf16.mxu0 %v3372_v3  ;;  %2944 = vmatprep.mubr.msk.bf16.mxu1 %vm3373_vm0, %v3372_v3 }
  0xf6   : >> { %3104 = vmatprep.mubr.msk.bf16.mxu0 %vm3373_vm0, %v3372_v3 }
  0xf7   : >> { %2931 = vmatpush3.bf16.msra.mxu1 %v3324_v39 }
  0xf8   : >> { %3091 = vmatpush3.bf16.msra.mxu0 %v3325_v40  ;;  %2932 = vmatprep.subr.bf16.mxu1 %v3372_v3 }
  0xf9   : >> { %3092 = vmatprep.subr.bf16.mxu0 %v3372_v3 }
  0xfb   : >> { %2933 = vmatpush3.bf16.msra.mxu1 %v3326_v41 }
  0xfc   : >> { %3093 = vmatpush3.bf16.msra.mxu0 %v3327_v42  ;;  %2934 = vmatprep.subr.bf16.mxu1 %v3372_v3 }
  0xfd   : >> { %3094 = vmatprep.subr.bf16.mxu0 %v3372_v3 }
  0xff   : >> { %2935 = vmatpush3.bf16.msra.mxu1 %v3328_v43 }
 0x100   : >> { %3095 = vmatpush3.bf16.msra.mxu0 %v3329_v44  ;;  %2936 = vmatprep.subr.bf16.mxu1 %v3372_v3 }
 0x101   : >> { %3096 = vmatprep.subr.bf16.mxu0 %v3372_v3 }
 0x103   : >> { %2937 = vmatpush3.bf16.msra.mxu1 %v3330_v45 }
 0x104   : >> { %3097 = vmatpush3.bf16.msra.mxu0 %v3331_v46  ;;  %2938 = vmatprep.subr.bf16.mxu1 %v3372_v3 }
 0x105   : >> { %3098 = vmatprep.subr.bf16.mxu0 %v3372_v3 }
 0x107   : >> { %2939 = vmatpush3.bf16.msra.mxu1 %v3332_v48 }
 0x108   : >> { %3099 = vmatpush3.bf16.msra.mxu0 %v3333_v50  ;;  %2940 = vmatprep.subr.bf16.mxu1 %v3372_v3 }
 0x109   : >> { %3100 = vmatprep.subr.bf16.mxu0 %v3372_v3 }
 0x10b   : >> { %2941 = vmatpush3.bf16.msra.mxu1 %v3334_v53 }
 0x10c   : >> { %3101 = vmatpush3.bf16.msra.mxu0 %v3335_v56  ;;  %2942 = vmatprep.subr.bf16.mxu1 %v3372_v3 }
 0x10d   : >> { %3102 = vmatprep.subr.bf16.mxu0 %v3372_v3 }
 0x10f   : >> { %2943 = vmatpush3.bf16.msra.mxu1 %v3336_v59 }
 0x110   : >> { %3103 = vmatpush3.bf16.msra.mxu0 %v3337_v62 }
 0x112   : >> { %2945 = vmatmul.mubr.bf16.vlgmr.msra.gmra.mrb[0].mxu1 %v1074_v63 }
 0x113   : >> { %3105 = vmatmul.mubr.bf16.vlgmr.msra.gmra.mrb[0].mxu0 %v1992_v2 }
 0x1e5   : >> { %v1158_v4 = vpop.f32.mrb[0].mxu1 }
 0x1e6   : >> { %v2076_v5 = vpop.f32.mrb[0].mxu0  ;;  %v2946_v6 = vpop.f32.mrb[1].mxu1 }
 0x1e7   : >> { %v3108_v7 = vadd.f32 %v2076_v5, %v1158_v4  ;;  %v3106_v8 = vpop.f32.mrb[1].mxu0  ;;  %v1161_v9 = vpop.f32.mrb[2].mxu1 }
 0x1e8   : >> { %v2079_v10 = vpop.f32.mrb[2].mxu0  ;;  %v2947_v11 = vpop.f32.mrb[3].mxu1 }
 0x1e9   : >> { %v2084_v12 = vsel %vm2083_vm1, %v3108_v7, 0.0  ;;  %v2092_v13 = vmul.f32 %v3108_v7, %v3108_v7  ;;  %v2101_v3 = vpack.c.bf16 %v3108_v7, %v3108_v7  ;;  %v3107_v14 = vpop.f32.mrb[3].mxu0 }
 0x1ea   : >> { %v2085_v15 = vrot.slane %v2084_v12, 4 }
 0x1eb   : >> { %v2093_v16 = vsel %vm2083_vm1, %v2092_v13, 0.0  ;;  %2104 = vst [vmem:[%s2103_s14] sm:$0x3] %v2101_v3 }
 0x1ec   : >> { %v2086_v17 = vadd.f32 %v2085_v15, %v2084_v12  ;;  %v2094_v18 = vrot.slane %v2093_v16, 4 }
 0x1ee   : >> { %v2087_v19 = vrot.slane %v2086_v17, 2  ;;  %v2095_v20 = vadd.f32 %v2094_v18, %v2093_v16 }
 0x1f0   : >> { %v2088_v21 = vadd.f32 %v2087_v19, %v2086_v17  ;;  %v2096_v22 = vrot.slane %v2095_v20, 2 }
 0x1f2   : >> { %v2089_v23 = vrot.slane %v2088_v21, 1  ;;  %v2097_v24 = vadd.f32 %v2096_v22, %v2095_v20 }
 0x1f4   : >> { %v2090_v25 = vadd.f32 %v2089_v23, %v2088_v21  ;;  %v2098_v26 = vrot.slane %v2097_v24, 1  ;;  %247 = sbr.rel (!%p245_p4) target bundleno = 17 (0x11), region = 113 }
 0x1f6   : >> { %v2091_v27 = vadd.f32 %v3366_v1, %v2090_v25   ;;  %v2099_v28 = vadd.f32 %v2098_v26, %v2097_v24 }
 0x1f8   : >> { %v2100_v29 = vadd.f32 %v3362_v0, %v2099_v28   ;;  %v4044_v1 = vmov %v2091_v27  ;;  %2105 = vst [vmem:[%s238_s26] sm:$0x1] (%p245_p4), %v2091_v27 }
 0x1fa   : >> { %v4043_v0 = vmov %v2100_v29  ;;  %2106 = vst [vmem:[%s241_s7] sm:$0x1] (%p245_p4), %v2100_v29 }
 0x1fb PF: > { %s16_s18 = sadd.s32 1, %s3358_s18  }
 0x1fc   : > { %p13_p5 = scmp.ge.s32.totalorder %s16_s18, 4  }
 0x1fe   :  { %15 = sbr.rel (!%p13_p5) target bundleno = 1 (0x1), region = 124 }

// kernel: discriminator_forward.15
= control target key start
LH: loop header
LB: loop body
LE: loop exit
PB: predicated region body
PF: predicated region fallthrough
CT: control target
= control target key end

     0   :  { %11 = vsyncpa [#allocation3], 0  ;;  %s4299_s0 = inlined_call_operand.vmem [shape: bf16[2,8,1,8,128], index: 0, kind: input, shape index: {}]   ;;  %s4300_s1 = inlined_call_operand.vmem [shape: bf16[16,128,128], index: 1, kind: input, shape index: {}]   ;;  %s4301_s2 = inlined_call_operand.vmem [shape: f32[1,128], index: 2, kind: input, shape index: {}]   ;;  %s4302_s3 = inlined_call_operand.vmem [shape: bf16[2,5,5,128], index: 3, kind: output, shape index: {0}]   ;;  %s4303_s4 = inlined_call_operand.hbm [shape: f32[2,1,128], index: 4, kind: output, shape index: {1}]   ;;  %s4304_s5 = inlined_call_operand.hbm [shape: f32[2,1,128], index: 5, kind: output, shape index: {2}]  }
   0x1   :  { %13 = vsyncpa [#allocation3 + $0x1], 0 }
   0x2   :  { %14 = vsyncpa [#allocation5], 0 }
   0x3   :  { %16 = vsyncpa [#allocation5 + $0x1], 0  ;;  %s3560_s18 = smov 0   ;;  %s3562_s19 = smov 0  }
   0x4   :  { %s3564_s20 = smov 0   ;;  %s3566_s21 = smov 0  }
   0x5 LB: > { %s3581_s22 = sadd.s32 4294967295, %s3512_s21   ;;  %s2276_s23 = sadd.s32 4294967294, %s3512_s21   ;;  %s3512_s21 = sphi %s3566_s21, %s4312_s21   ;;  %s3508_s20 = sphi %s3564_s20, %s4311_s20   ;;  %s3504_s19 = sphi %s3562_s19, %s4310_s19   ;;  %s3500_s18 = sphi %s3560_s18, %s4309_s18  }
   0x6   : > { %s3585_s24 = sadd.s32 1, %s3512_s21   ;;  %s123_s25 = sadd.s32 1, %s3508_s20 }
   0x7   : > { %s120_s26 = ssub.s32 %s3512_s21, %s3585_s24  ;;  %p133_p0 = scmp.ne.s32.totalorder %s3508_s20, %s3504_s19 }
   0x8   : > { %p121_p1 = scmp.eq.s32.totalorder %s120_s26, 0  ;;  %p134_p2 = scmp.eq.s32.totalorder %s3581_s22, 1 }
   0x9   : > { %p139_p3 = scmp.ne.s32.totalorder %s3504_s19, %s3500_s18  ;;  %p140_p4 = scmp.eq.s32.totalorder %s2276_s23, 1 }
   0xa   : > { %s3596_s27 = scalar_select %p121_p1, %s3508_s20, %s123_s25  }
   0xb   : > { %p3598_p5 = por %p134_p2, %p133_p0  ;;  %p3602_p6 = por %p140_p4, %p139_p3 }
   0xc   : > { %p2279_p7 = scmp.ge.s32.totalorder %s3512_s21, 1  ;;  %p198_p8 = scmp.lt.s32.totalorder %s3512_s21, 3 }
   0xe   : > { %p199_p9 = pnand %p2279_p7, %p198_p8 }
   0xf   : > { %s3609_s30 = sand.u32 (!%p199_p9), 1, %s3504_s19   ;;  %p234_p10 = scmp.lt.s32.totalorder (!%p199_p9), %s3581_s22, 1  ;;  %v3625_v0 = vmov (!%p199_p9), 0.0   ;;  %v3627_v1 = vmov (!%p199_p9), 0.0  }
  0x10   : > { %202 = sbr.rel (%p199_p9) target bundleno = 560 (0x230), region = 32  ;;  %s227_s15 = scalar_lea.vmem (!%p199_p9), [#allocation2], %s3609_s30 }
  0x11   : > { %s233_s16 = scalar_lea.vmem (!%p199_p9), [#allocation4], %s3609_s30  ;;  %s3629_s17 = smov (!%p199_p9), 0  }
  0x17   : > { %s235_s6 = scalar_select %p234_p10, %s3581_s22, 1 }
  0x19   : > { %s2675_s7 = sshll.u32 %s235_s6, 5  ;;  %s3197_s8 = smul.u32 20, %s235_s6 }
  0x1a   : > { %s3616_s11 = scalar_lea.vmem %s4299_s0, %s2675_s7 }
  0x1b   : > { %s3621_s14 = scalar_lea.vmem %s4302_s3, %s3197_s8 }
  0x1c LB: >> { %v3268_v2 = vld [vmem:[%s4300_s1 + $0x40] sm:$0xff]   ;;  %v3526_v3 = vmov 0.0   ;;  %v3270_v5 = vld [vmem:[%s4300_s1 + $0x48] sm:$0xff]   ;;  %vm3527_vm0 = vmmov 0   ;;  %v3272_v7 = vld [vmem:[%s4300_s1 + $0x50] sm:$0xff]   ;;  %s2283_s7 = sshll.u32 %s3524_s17, 2  ;;  %s3524_s17 = sphi %s3629_s17, %s250_s17   ;;  %v3520_v1 = vphi %v3627_v1, %v4308_v1   ;;  %v3516_v0 = vphi %v3625_v0, %v4307_v0  }
  0x1d   : >> { %2820 = vmatprep.subr.bf16.mxu1 %v3526_v3  ;;  %2980 = vmatprep.subr.bf16.mxu0 %v3526_v3  ;;  %v3269_v4 = vld [vmem:[%s4300_s1 + $0x200] sm:$0xff]   ;;  %v3271_v6 = vld [vmem:[%s4300_s1 + $0x208] sm:$0xff]   ;;  %v3273_v8 = vld [vmem:[%s4300_s1 + $0x210] sm:$0xff]   ;;  %s3680_s10 = scalar_lea.vmem %s3616_s11, %s2283_s7  ;;  %vm2065_vm1 = vcmask 1044480   ;;  %s2097_s8 = scalar_lea.vmem %s3621_s14, %s2283_s7  ;;  %vm2098_vm2 = vcmask 1042432  }
  0x1e   : >> { %2821 = vmatpush3.bf16.msra.mxu1 %v3268_v2  ;;  %2836 = vmatprep.mubr.msk.bf16.mxu1 %vm3527_vm0, %v3526_v3  ;;  %v3274_v9 = vld [vmem:[%s4300_s1 + $0x58] sm:$0xff]   ;;  %v3276_v11 = vld [vmem:[%s4300_s1 + $0x60] sm:$0xff]   ;;  %v3278_v15 = vld [vmem:[%s4300_s1 + $0x68] sm:$0xff]   ;;  %vm2099_vm3 = vsmask.f32 2304  ;;  %s250_s17 = sadd.s32 1, %s3524_s17  }
  0x1f   : >> { %2981 = vmatpush3.bf16.msra.mxu0 %v3269_v4  ;;  %2822 = vmatprep.subr.bf16.mxu1 %v3526_v3  ;;  %v3275_v10 = vld [vmem:[%s4300_s1 + $0x218] sm:$0xff]   ;;  %v3277_v12 = vld [vmem:[%s4300_s1 + $0x220] sm:$0xff]   ;;  %v3279_v16 = vld [vmem:[%s4300_s1 + $0x228] sm:$0xff]   ;;  %p247_p11 = scmp.ge.s32.totalorder %s250_s17, 5  }
  0x20   : >> { %2982 = vmatprep.subr.bf16.mxu0 %v3526_v3  ;;  %2996 = vmatprep.mubr.msk.bf16.mxu0 %vm3527_vm0, %v3526_v3  ;;  %v3691_v13 = vld [vmem:[%s3680_s10] sm:$0x7]  ;;  %v3280_v18 = vld [vmem:[%s4300_s1 + $0x70] sm:$0xff]   ;;  %v3282_v22 = vld [vmem:[%s4300_s1 + $0x78] sm:$0xff]   ;;  %s2671_s7 = sshll.u32 (%p247_p11), %s3581_s22, 4  ;;  %s2131_s17 = sshll.u32 (%p247_p11), %s227_s15, 4  ;;  %s2132_s17 = int_to_ptr.vmem [resolvable:$true] %s2131_s17 }
  0x21   : >> { %v2300_v14 = vcombine.low %v3691_v13, %v3691_v13  ;;  %v3281_v19 = vld [vmem:[%s4300_s1 + $0x230] sm:$0xff]   ;;  %v3283_v23 = vld [vmem:[%s4300_s1 + $0x238] sm:$0xff]   ;;  %v3285_v25 = vld [vmem:[%s4300_s1] sm:$0xff]   ;;  %s4233_s13 = scalar_lea.hbm (%p247_p11), %s4303_s4, %s2671_s7  ;;  %s2112_s11 = scalar_lea.sflag (%p247_p11), [#allocation3], %s3609_s30 }
  0x22   : >> { %2823 = vmatpush3.bf16.msra.mxu1 %v3270_v5  ;;  %v2468_v26 = vld [vmem:[%s3680_s10 + $0x8] sm:$0x7]  ;;  %v3287_v27 = vld [vmem:[%s4300_s1 + $0x240] sm:$0xff]   ;;  %v3290_v30 = vld [vmem:[%s4300_s1 + $0x10] sm:$0xff]   ;;  %s3406_s14 = scalar_lea.vmem (%p247_p11), %s2132_s17, 16 }
  0x23   : >> { %2983 = vmatpush3.bf16.msra.mxu0 %v3271_v6  ;;  %2824 = vmatprep.subr.bf16.mxu1 %v3526_v3  ;;  %v295_v17 = vshll.u32 %v2300_v14, 16  ;;  %v293_v20 = vshrl.u32 %v2300_v14, 16  ;;  %v3288_v28 = vld [vmem:[%s4300_s1 + $0x8] sm:$0xff]   ;;  %v3291_v31 = vld [vmem:[%s4300_s1 + $0x250] sm:$0xff]   ;;  %v3292_v32 = vld [vmem:[%s4300_s1 + $0x18] sm:$0xff]   ;;  %v2509_v37 = vcombine.low %v2468_v26, %v2468_v26  ;;  %p3407_p12 = scmp.ne.s32.totalorder (%p247_p11), %s2132_s17, %s3406_s14 }
  0x24   : >> { %2984 = vmatprep.subr.bf16.mxu0 %v3526_v3  ;;  %v3289_v29 = vld [vmem:[%s4300_s1 + $0x248] sm:$0xff]   ;;  %v3293_v33 = vld [vmem:[%s4300_s1 + $0x258] sm:$0xff]   ;;  %v3294_v34 = vld [vmem:[%s4300_s1 + $0x20] sm:$0xff]  }
  0x25   : >> { %v297_v21 = vrot.slane %v295_v17, 1  ;;  %v3295_v35 = vld [vmem:[%s4300_s1 + $0x260] sm:$0xff]   ;;  %v3296_v36 = vld [vmem:[%s4300_s1 + $0x28] sm:$0xff]   ;;  %v1290_v39 = vshll.u32 %v2509_v37, 16  ;;  %v3298_v40 = vld [vmem:[%s4300_s1 + $0x30] sm:$0xff]   ;;  %v1288_v42 = vshrl.u32 %v2509_v37, 16  ;;  %p3408_p13 = pnand (%p247_p11), %p3407_p12, %p3598_p5 }
  0x26   : >> { %2825 = vmatpush3.bf16.msra.mxu1 %v3272_v7  ;;  %v3297_v38 = vld [vmem:[%s4300_s1 + $0x268] sm:$0xff]   ;;  %v3299_v41 = vld [vmem:[%s4300_s1 + $0x270] sm:$0xff]   ;;  %v3300_v44 = vld [vmem:[%s4300_s1 + $0x38] sm:$0xff]  }
  0x27   : >> { %2985 = vmatpush3.bf16.msra.mxu0 %v3273_v8  ;;  %2826 = vmatprep.subr.bf16.mxu1 %v3526_v3  ;;  %v298_v24 = vor.u32 %v297_v21, %v293_v20  ;;  %v1292_v43 = vrot.slane %v1290_v39, 1  ;;  %v3301_v45 = vld [vmem:[%s4300_s1 + $0x278] sm:$0xff]   ;;  %v3302_v47 = vld [vmem:[%s4300_s1 + $0x80] sm:$0xff]   ;;  %v3304_v49 = vld [vmem:[%s4300_s1 + $0x88] sm:$0xff]   ;;  %p3409_p0 = pneg (%p247_p11), %p3408_p13 }
  0x28   : >> { %2986 = vmatprep.subr.bf16.mxu0 %v3526_v3  ;;  %v3303_v48 = vld [vmem:[%s4300_s1 + $0x280] sm:$0xff]   ;;  %v3305_v50 = vld [vmem:[%s4300_s1 + $0x288] sm:$0xff]   ;;  %v3306_v51 = vld [vmem:[%s4300_s1 + $0x90] sm:$0xff]  }
  0x29   : >> { %v1293_v46 = vor.u32 %v1292_v43, %v1288_v42  ;;  %v3307_v52 = vld [vmem:[%s4300_s1 + $0x290] sm:$0xff]   ;;  %v3308_v53 = vld [vmem:[%s4300_s1 + $0x98] sm:$0xff]   ;;  %v3310_v55 = vld [vmem:[%s4300_s1 + $0xa0] sm:$0xff]  }
  0x2a   : >> { %2827 = vmatpush3.bf16.msra.mxu1 %v3274_v9  ;;  %v3309_v54 = vld [vmem:[%s4300_s1 + $0x298] sm:$0xff]   ;;  %v3311_v56 = vld [vmem:[%s4300_s1 + $0x2a0] sm:$0xff]   ;;  %v3312_v57 = vld [vmem:[%s4300_s1 + $0xa8] sm:$0xff]  }
  0x2b   : >> { %2987 = vmatpush3.bf16.msra.mxu0 %v3275_v10  ;;  %2828 = vmatprep.subr.bf16.mxu1 %v3526_v3  ;;  %v3313_v58 = vld [vmem:[%s4300_s1 + $0x2a8] sm:$0xff]   ;;  %v3314_v59 = vld [vmem:[%s4300_s1 + $0xb0] sm:$0xff]   ;;  %v3318_v61 = vld [vmem:[%s3680_s10] ss:$0 sps:$4 sm:$0xee]  }
  0x2c   : >> { %2988 = vmatprep.subr.bf16.mxu0 %v3526_v3  ;;  %v3315_v60 = vld [vmem:[%s4300_s1 + $0x2b0] sm:$0xff]   ;;  %v3851_v62 = vld [vmem:[%s3680_s10 + $0x8] ss:$0 sps:$4 sm:$0xee]   ;;  %v3316_v63 = vld [vmem:[%s4300_s1 + $0xb8] sm:$0xff]   ;;  %v497_v4 = vrot.slane %v3318_v61, 1 }
  0x2d   : >> { %v3317_v2 = vld [vmem:[%s4300_s1 + $0x2b8] sm:$0xff]   ;;  %v3319_v5 = vld [vmem:[%s4300_s1 + $0xc0] sm:$0xff]   ;;  %v1405_v6 = vrot.slane %v3851_v62, 1  ;;  %v3322_v8 = vld [vmem:[%s4300_s1 + $0xc8] sm:$0xff]   ;;  %v1514_v20 = vshrl.u32 %v3851_v62, 16 }
  0x2e   : >> { %2829 = vmatpush3.bf16.msra.mxu1 %v3276_v11  ;;  %v3321_v7 = vld [vmem:[%s4300_s1 + $0x2c0] sm:$0xff]   ;;  %v3323_v9 = vld [vmem:[%s4300_s1 + $0x2c8] sm:$0xff]   ;;  %v3324_v10 = vld [vmem:[%s4300_s1 + $0xd0] sm:$0xff]  }
  0x2f   : >> { %2989 = vmatpush3.bf16.msra.mxu0 %v3277_v12  ;;  %2830 = vmatprep.subr.bf16.mxu1 %v3526_v3  ;;  %v3325_v11 = vld [vmem:[%s4300_s1 + $0x2d0] sm:$0xff]   ;;  %v3326_v12 = vld [vmem:[%s4300_s1 + $0xd8] sm:$0xff]   ;;  %v3328_v14 = vld [vmem:[%s4300_s1 + $0xe0] sm:$0xff]  }
  0x30   : >> { %2990 = vmatprep.subr.bf16.mxu0 %v3526_v3  ;;  %v3331_v17 = vld [vmem:[%s4300_s1 + $0x2e8] sm:$0xff]   ;;  %v3332_v21 = vld [vmem:[%s4300_s1 + $0xf0] sm:$0xff]   ;;  %v3343_v39 = vld [vmem:[%s4300_s1 + $0x318] sm:$0xff]  }
  0x31   : >> { %v3341_v37 = vld [vmem:[%s4300_s1 + $0x310] sm:$0xff]   ;;  %v3346_v42 = vld [vmem:[%s4300_s1 + $0x128] sm:$0xff]   ;;  %vm2100_vm4 = vmand %vm2098_vm2, %vm2099_vm3 }
  0x32   : >> { %2831 = vmatpush3.bf16.msra.mxu1 %v3278_v15  ;;  %v3329_v15 = vld [vmem:[%s4300_s1 + $0x2e0] sm:$0xff]   ;;  %v3347_v43 = vld [vmem:[%s4300_s1 + $0x328] sm:$0xff]  }
  0x33   : >> { %2991 = vmatpush3.bf16.msra.mxu0 %v3279_v16  ;;  %2832 = vmatprep.subr.bf16.mxu1 %v3526_v3  ;;  %v3330_v16 = vld [vmem:[%s4300_s1 + $0xe8] sm:$0xff]  }
  0x34   : >> { %2992 = vmatprep.subr.bf16.mxu0 %v3526_v3 }
  0x36   : >> { %2833 = vmatpush3.bf16.msra.mxu1 %v3280_v18  ;;  %v606_v18 = vshrl.u32 %v3318_v61, 16 }
  0x37   : >> { %2993 = vmatpush3.bf16.msra.mxu0 %v3281_v19  ;;  %2834 = vmatprep.subr.bf16.mxu1 %v3526_v3  ;;  %v609_v19 = vshll.u32 %v3318_v61, 16 }
  0x38   : >> { %2994 = vmatprep.subr.bf16.mxu0 %v3526_v3 }
  0x3a   : >> { %2835 = vmatpush3.bf16.msra.mxu1 %v3282_v22  ;;  %v1517_v22 = vshll.u32 %v3851_v62, 16  ;;  %v3364_v62 = vld [vmem:[%s4300_s1 + $0x168] sm:$0xff]  }
  0x3b   : >> { %2995 = vmatpush3.bf16.msra.mxu0 %v3283_v23  ;;  %2840 = vmatprep.subr.bf16.mxu1 %v3526_v3  ;;  %v3333_v23 = vld [vmem:[%s4300_s1 + $0x2f0] sm:$0xff]  }
  0x3c   : >> { %3000 = vmatprep.subr.bf16.mxu0 %v3526_v3 }
  0x3d   : >> { %2837 = vmatmul.mubr.bf16.vlgmr.msra.gmra.mrb[0].mxu1 %v298_v24  ;;  %v608_v24 = vrot.slane %v606_v18, 1  ;;  %v3373_v18 = vld [vmem:[%s4300_s1 + $0x388] sm:$0xff]  }
  0x3e   : >> { %2841 = vmatpush3.bf16.msra.mxu1 %v3285_v25  ;;  %2997 = vmatmul.mubr.bf16.vlgmr.msra.gmra.mrb[0].mxu0 %v2468_v26  ;;  %v611_v25 = vrot.slane %v609_v19, 2  ;;  %v1516_v26 = vrot.slane %v1514_v20, 1  ;;  %v3374_v19 = vld [vmem:[%s4300_s1 + $0x190] sm:$0xff]  }
  0x3f   : >> { %3001 = vmatpush3.bf16.msra.mxu0 %v3287_v27  ;;  %2842 = vmatprep.subr.bf16.mxu1 %v3526_v3  ;;  %v3334_v27 = vld [vmem:[%s4300_s1 + $0xf8] sm:$0xff]   ;;  %v3375_v20 = vld [vmem:[%s4300_s1 + $0x390] sm:$0xff]  }
  0x40   : >> { %3002 = vmatprep.subr.bf16.mxu0 %v3526_v3  ;;  %2856 = vmatprep.mubr.msk.bf16.mxu1 %vm3527_vm0, %v3526_v3 }
  0x41   : >> { %3016 = vmatprep.mubr.msk.bf16.mxu0 %vm3527_vm0, %v3526_v3 }
  0x42   : >> { %2843 = vmatpush3.bf16.msra.mxu1 %v3288_v28  ;;  %v1519_v28 = vrot.slane %v1517_v22, 2  ;;  %v3377_v22 = vld [vmem:[%s4300_s1 + $0x398] sm:$0xff]  }
  0x43   : >> { %3003 = vmatpush3.bf16.msra.mxu0 %v3289_v29  ;;  %2844 = vmatprep.subr.bf16.mxu1 %v3526_v3  ;;  %v3335_v29 = vld [vmem:[%s4300_s1 + $0x2f8] sm:$0xff]  }
  0x44   : >> { %3004 = vmatprep.subr.bf16.mxu0 %v3526_v3 }
  0x46   : >> { %2845 = vmatpush3.bf16.msra.mxu1 %v3290_v30  ;;  %v612_v30 = vor.u32 %v611_v25, %v608_v24  ;;  %v3379_v24 = vld [vmem:[%s4300_s1 + $0x3a0] sm:$0xff]   ;;  %v3380_v25 = vld [vmem:[%s4300_s1 + $0x1a8] sm:$0xff]  }
  0x47   : >> { %3005 = vmatpush3.bf16.msra.mxu0 %v3291_v31  ;;  %2846 = vmatprep.subr.bf16.mxu1 %v3526_v3  ;;  %v3336_v31 = vld [vmem:[%s4300_s1 + $0x100] sm:$0xff]  }
  0x48   : >> { %3006 = vmatprep.subr.bf16.mxu0 %v3526_v3 }
  0x4a   : >> { %2847 = vmatpush3.bf16.msra.mxu1 %v3292_v32  ;;  %v1520_v32 = vor.u32 %v1519_v28, %v1516_v26  ;;  %v3381_v26 = vld [vmem:[%s4300_s1 + $0x3a8] sm:$0xff]   ;;  %v3383_v28 = vld [vmem:[%s4300_s1 + $0x3b0] sm:$0xff]  }
  0x4b   : >> { %3007 = vmatpush3.bf16.msra.mxu0 %v3293_v33  ;;  %2848 = vmatprep.subr.bf16.mxu1 %v3526_v3  ;;  %v3337_v33 = vld [vmem:[%s4300_s1 + $0x300] sm:$0xff]  }
  0x4c   : >> { %3008 = vmatprep.subr.bf16.mxu0 %v3526_v3 }
  0x4e   : >> { %2849 = vmatpush3.bf16.msra.mxu1 %v3294_v34  ;;  %v3338_v34 = vld [vmem:[%s4300_s1 + $0x108] sm:$0xff]  }
  0x4f   : >> { %3009 = vmatpush3.bf16.msra.mxu0 %v3295_v35  ;;  %2850 = vmatprep.subr.bf16.mxu1 %v3526_v3  ;;  %v3339_v35 = vld [vmem:[%s4300_s1 + $0x308] sm:$0xff]  }
  0x50   : >> { %3010 = vmatprep.subr.bf16.mxu0 %v3526_v3 }
  0x52   : >> { %2851 = vmatpush3.bf16.msra.mxu1 %v3296_v36  ;;  %v3340_v36 = vld [vmem:[%s4300_s1 + $0x110] sm:$0xff]  }
  0x53   : >> { %3011 = vmatpush3.bf16.msra.mxu0 %v3297_v38  ;;  %2852 = vmatprep.subr.bf16.mxu1 %v3526_v3  ;;  %v3342_v38 = vld [vmem:[%s4300_s1 + $0x118] sm:$0xff]  }
  0x54   : >> { %3012 = vmatprep.subr.bf16.mxu0 %v3526_v3 }
  0x56   : >> { %2853 = vmatpush3.bf16.msra.mxu1 %v3298_v40  ;;  %v3344_v40 = vld [vmem:[%s4300_s1 + $0x120] sm:$0xff]  }
  0x57   : >> { %3013 = vmatpush3.bf16.msra.mxu0 %v3299_v41  ;;  %2854 = vmatprep.subr.bf16.mxu1 %v3526_v3  ;;  %v3345_v41 = vld [vmem:[%s4300_s1 + $0x320] sm:$0xff]  }
  0x58   : >> { %3014 = vmatprep.subr.bf16.mxu0 %v3526_v3 }
  0x5a   : >> { %2855 = vmatpush3.bf16.msra.mxu1 %v3300_v44  ;;  %v3348_v44 = vld [vmem:[%s4300_s1 + $0x130] sm:$0xff]  }
  0x5b   : >> { %3015 = vmatpush3.bf16.msra.mxu0 %v3301_v45  ;;  %2860 = vmatprep.subr.bf16.mxu1 %v3526_v3  ;;  %v3349_v45 = vld [vmem:[%s4300_s1 + $0x330] sm:$0xff]  }
  0x5c   : >> { %3020 = vmatprep.subr.bf16.mxu0 %v3526_v3 }
  0x5d   : >> { %2857 = vmatmul.mubr.bf16.vlgmr.msra.gmra.mrb[0].mxu1 %v3691_v13  ;;  %v3327_v13 = vld [vmem:[%s4300_s1 + $0x2d8] sm:$0xff]  }
  0x5e   : >> { %2861 = vmatpush3.bf16.msra.mxu1 %v3302_v47  ;;  %3017 = vmatmul.mubr.bf16.vlgmr.msra.gmra.mrb[0].mxu0 %v1293_v46  ;;  %v3350_v46 = vld [vmem:[%s4300_s1 + $0x138] sm:$0xff]  }
  0x5f   : >> { %3021 = vmatpush3.bf16.msra.mxu0 %v3303_v48  ;;  %2862 = vmatprep.subr.bf16.mxu1 %v3526_v3  ;;  %v3351_v47 = vld [vmem:[%s4300_s1 + $0x338] sm:$0xff]   ;;  %v2367_v48 = vld [vmem:[%s3680_s10 + $0x4] sm:$0x7] }
  0x60   : >> { %3022 = vmatprep.subr.bf16.mxu0 %v3526_v3  ;;  %2876 = vmatprep.mubr.msk.bf16.mxu1 %vm3527_vm0, %v3526_v3 }
  0x61   : >> { %3036 = vmatprep.mubr.msk.bf16.mxu0 %vm3527_vm0, %v3526_v3 }
  0x62   : >> { %2863 = vmatpush3.bf16.msra.mxu1 %v3304_v49  ;;  %v3353_v49 = vld [vmem:[%s4300_s1 + $0x140] sm:$0xff]  }
  0x63   : >> { %3023 = vmatpush3.bf16.msra.mxu0 %v3305_v50  ;;  %2864 = vmatprep.subr.bf16.mxu1 %v3526_v3  ;;  %v2569_v50 = vld [vmem:[%s3680_s10 + $0xc] sm:$0x7] }
  0x64   : >> { %3024 = vmatprep.subr.bf16.mxu0 %v3526_v3  ;;  %v2610_v61 = vcombine.low %v2569_v50, %v2569_v50 }
  0x66   : >> { %2865 = vmatpush3.bf16.msra.mxu1 %v3306_v51  ;;  %v3355_v51 = vld [vmem:[%s4300_s1 + $0x340] sm:$0xff]  }
  0x67   : >> { %3025 = vmatpush3.bf16.msra.mxu0 %v3307_v52  ;;  %2866 = vmatprep.subr.bf16.mxu1 %v3526_v3  ;;  %v3356_v52 = vld [vmem:[%s4300_s1 + $0x148] sm:$0xff]  }
  0x68   : >> { %3026 = vmatprep.subr.bf16.mxu0 %v3526_v3 }
  0x6a   : >> { %2867 = vmatpush3.bf16.msra.mxu1 %v3308_v53  ;;  %v3357_v53 = vld [vmem:[%s4300_s1 + $0x348] sm:$0xff]  }
  0x6b   : >> { %3027 = vmatpush3.bf16.msra.mxu0 %v3309_v54  ;;  %2868 = vmatprep.subr.bf16.mxu1 %v3526_v3  ;;  %v3358_v54 = vld [vmem:[%s4300_s1 + $0x150] sm:$0xff]  }
  0x6c   : >> { %3028 = vmatprep.subr.bf16.mxu0 %v3526_v3 }
  0x6e   : >> { %2869 = vmatpush3.bf16.msra.mxu1 %v3310_v55  ;;  %v3359_v55 = vld [vmem:[%s4300_s1 + $0x350] sm:$0xff]  }
  0x6f   : >> { %3029 = vmatpush3.bf16.msra.mxu0 %v3311_v56  ;;  %2870 = vmatprep.subr.bf16.mxu1 %v3526_v3  ;;  %v3360_v56 = vld [vmem:[%s4300_s1 + $0x158] sm:$0xff]  }
  0x70   : >> { %3030 = vmatprep.subr.bf16.mxu0 %v3526_v3 }
  0x72   : >> { %2871 = vmatpush3.bf16.msra.mxu1 %v3312_v57  ;;  %v3361_v57 = vld [vmem:[%s4300_s1 + $0x358] sm:$0xff]  }
  0x73   : >> { %3031 = vmatpush3.bf16.msra.mxu0 %v3313_v58  ;;  %2872 = vmatprep.subr.bf16.mxu1 %v3526_v3  ;;  %v3362_v58 = vld [vmem:[%s4300_s1 + $0x160] sm:$0xff]  }
  0x74   : >> { %3032 = vmatprep.subr.bf16.mxu0 %v3526_v3 }
  0x76   : >> { %2873 = vmatpush3.bf16.msra.mxu1 %v3314_v59  ;;  %v3363_v59 = vld [vmem:[%s4300_s1 + $0x360] sm:$0xff]  }
  0x77   : >> { %3033 = vmatpush3.bf16.msra.mxu0 %v3315_v60  ;;  %2874 = vmatprep.subr.bf16.mxu1 %v3526_v3  ;;  %v2408_v60 = vcombine.low %v2367_v48, %v2367_v48 }
  0x78   : >> { %3034 = vmatprep.subr.bf16.mxu0 %v3526_v3 }
  0x7a   : >> { %2875 = vmatpush3.bf16.msra.mxu1 %v3316_v63  ;;  %v3365_v63 = vld [vmem:[%s4300_s1 + $0x368] sm:$0xff]  }
  0x7b   : >> { %3035 = vmatpush3.bf16.msra.mxu0 %v3317_v2  ;;  %2880 = vmatprep.subr.bf16.mxu1 %v3526_v3  ;;  %v836_v2 = vshll.u32 %v2408_v60, 16 }
  0x7c   : >> { %3040 = vmatprep.subr.bf16.mxu0 %v3526_v3 }
  0x7d   : >> { %2877 = vmatmul.mubr.bf16.vlgmr.msra.gmra.mrb[0].mxu1 %v497_v4  ;;  %v1744_v4 = vshll.u32 %v2610_v61, 16 }
  0x7e   : >> { %2881 = vmatpush3.bf16.msra.mxu1 %v3319_v5  ;;  %3037 = vmatmul.mubr.bf16.vlgmr.msra.gmra.mrb[0].mxu0 %v1405_v6  ;;  %v3366_v5 = vld [vmem:[%s4300_s1 + $0x170] sm:$0xff]  }
  0x7f   : >> { %3041 = vmatpush3.bf16.msra.mxu0 %v3321_v7  ;;  %2882 = vmatprep.subr.bf16.mxu1 %v3526_v3  ;;  %v3367_v6 = vld [vmem:[%s4300_s1 + $0x370] sm:$0xff]   ;;  %v834_v7 = vshrl.u32 %v2408_v60, 16 }
  0x80   : >> { %3042 = vmatprep.subr.bf16.mxu0 %v3526_v3  ;;  %2896 = vmatprep.mubr.msk.bf16.mxu1 %vm3527_vm0, %v3526_v3 }
  0x81   : >> { %3056 = vmatprep.mubr.msk.bf16.mxu0 %vm3527_vm0, %v3526_v3 }
  0x82   : >> { %2883 = vmatpush3.bf16.msra.mxu1 %v3322_v8  ;;  %v838_v8 = vrot.slane %v836_v2, 1 }
  0x83   : >> { %3043 = vmatpush3.bf16.msra.mxu0 %v3323_v9  ;;  %2884 = vmatprep.subr.bf16.mxu1 %v3526_v3  ;;  %v1742_v9 = vshrl.u32 %v2610_v61, 16 }
  0x84   : >> { %3044 = vmatprep.subr.bf16.mxu0 %v3526_v3 }
  0x86   : >> { %2885 = vmatpush3.bf16.msra.mxu1 %v3324_v10  ;;  %v1746_v10 = vrot.slane %v1744_v4, 1 }
  0x87   : >> { %3045 = vmatpush3.bf16.msra.mxu0 %v3325_v11  ;;  %2886 = vmatprep.subr.bf16.mxu1 %v3526_v3  ;;  %v3368_v11 = vld [vmem:[%s4300_s1 + $0x178] sm:$0xff]  }
  0x88   : >> { %3046 = vmatprep.subr.bf16.mxu0 %v3526_v3 }
  0x8a   : >> { %2887 = vmatpush3.bf16.msra.mxu1 %v3326_v12  ;;  %v3369_v12 = vld [vmem:[%s4300_s1 + $0x378] sm:$0xff]  }
  0x8b   : >> { %3047 = vmatpush3.bf16.msra.mxu0 %v3327_v13  ;;  %2888 = vmatprep.subr.bf16.mxu1 %v3526_v3  ;;  %v839_v13 = vor.u32 %v838_v8, %v834_v7 }
  0x8c   : >> { %3048 = vmatprep.subr.bf16.mxu0 %v3526_v3 }
  0x8e   : >> { %2889 = vmatpush3.bf16.msra.mxu1 %v3328_v14  ;;  %v3370_v14 = vld [vmem:[%s4300_s1 + $0x180] sm:$0xff]  }
  0x8f   : >> { %3049 = vmatpush3.bf16.msra.mxu0 %v3329_v15  ;;  %2890 = vmatprep.subr.bf16.mxu1 %v3526_v3  ;;  %v1747_v15 = vor.u32 %v1746_v10, %v1742_v9 }
  0x90   : >> { %3050 = vmatprep.subr.bf16.mxu0 %v3526_v3 }
  0x92   : >> { %2891 = vmatpush3.bf16.msra.mxu1 %v3330_v16  ;;  %v3371_v16 = vld [vmem:[%s4300_s1 + $0x380] sm:$0xff]  }
  0x93   : >> { %3051 = vmatpush3.bf16.msra.mxu0 %v3331_v17  ;;  %2892 = vmatprep.subr.bf16.mxu1 %v3526_v3  ;;  %v3372_v17 = vld [vmem:[%s4300_s1 + $0x188] sm:$0xff]  }
  0x94   : >> { %3052 = vmatprep.subr.bf16.mxu0 %v3526_v3 }
  0x96   : >> { %2893 = vmatpush3.bf16.msra.mxu1 %v3332_v21  ;;  %v3376_v21 = vld [vmem:[%s4300_s1 + $0x198] sm:$0xff]  }
  0x97   : >> { %3053 = vmatpush3.bf16.msra.mxu0 %v3333_v23  ;;  %2894 = vmatprep.subr.bf16.mxu1 %v3526_v3  ;;  %v3378_v23 = vld [vmem:[%s4300_s1 + $0x1a0] sm:$0xff]  }
  0x98   : >> { %3054 = vmatprep.subr.bf16.mxu0 %v3526_v3 }
  0x9a   : >> { %2895 = vmatpush3.bf16.msra.mxu1 %v3334_v27  ;;  %v3382_v27 = vld [vmem:[%s4300_s1 + $0x1b0] sm:$0xff]  }
  0x9b   : >> { %3055 = vmatpush3.bf16.msra.mxu0 %v3335_v29  ;;  %2900 = vmatprep.subr.bf16.mxu1 %v3526_v3  ;;  %v3386_v29 = vld [vmem:[%s3680_s10 + $0x4] ss:$0 sps:$4 sm:$0xee]  }
  0x9c   : >> { %3060 = vmatprep.subr.bf16.mxu0 %v3526_v3 }
  0x9d   : >> { %2897 = vmatmul.mubr.bf16.vlgmr.msra.gmra.mrb[0].mxu1 %v612_v30  ;;  %v3384_v30 = vld [vmem:[%s4300_s1 + $0x1b8] sm:$0xff]  }
  0x9e   : >> { %2901 = vmatpush3.bf16.msra.mxu1 %v3336_v31  ;;  %3057 = vmatmul.mubr.bf16.vlgmr.msra.gmra.mrb[0].mxu0 %v1520_v32  ;;  %v3388_v31 = vld [vmem:[%s3680_s10 + $0xc] ss:$0 sps:$4 sm:$0xee]   ;;  %v3385_v32 = vld [vmem:[%s4300_s1 + $0x3b8] sm:$0xff]   ;;  %s3528_s10 = smov (%p247_p11), [#allocation2]  }
  0x9f   : >> { %3061 = vmatpush3.bf16.msra.mxu0 %v3337_v33  ;;  %2902 = vmatprep.subr.bf16.mxu1 %v3526_v3  ;;  %v951_v33 = vrot.slane %v3386_v29, 1  ;;  %s3410_s23 = sshll.u32 (%p247_p11), %s3528_s10, 4  ;;  %s3411_s23 = int_to_ptr.vmem [resolvable:$false] %s3410_s23 }
  0xa0   : >> { %3062 = vmatprep.subr.bf16.mxu0 %v3526_v3  ;;  %2916 = vmatprep.mubr.msk.bf16.mxu1 %vm3527_vm0, %v3526_v3  ;;  %s3412_s25 = scalar_lea.vmem (%p247_p11), %s3411_s23, 32  ;;  %p3413_p1 = scmp.lt.s32.totalorder (%p247_p11), %s2132_s17, %s3411_s23 }
  0xa1   : >> { %3076 = vmatprep.mubr.msk.bf16.mxu0 %vm3527_vm0, %v3526_v3  ;;  %p3414_p2 = scmp.lt.s32.totalorder (%p247_p11), %s3412_s25, %s3406_s14 }
  0xa2   : >> { %2903 = vmatpush3.bf16.msra.mxu1 %v3338_v34  ;;  %v3387_v34 = vld [vmem:[%s4300_s1 + $0x1c0] sm:$0xff]  }
  0xa3   : >> { %3063 = vmatpush3.bf16.msra.mxu0 %v3339_v35  ;;  %2904 = vmatprep.subr.bf16.mxu1 %v3526_v3  ;;  %v1859_v35 = vrot.slane %v3388_v31, 1  ;;  %p3415_p3 = por (%p247_p11), %p3414_p2, %p3413_p1 }
  0xa4   : >> { %3064 = vmatprep.subr.bf16.mxu0 %v3526_v3 }
  0xa5   : > { %p3416_p4 = pnand (%p247_p11), %p3415_p3, %p3409_p0 }
  0xa6   : >> { %2905 = vmatpush3.bf16.msra.mxu1 %v3340_v36  ;;  %v3389_v36 = vld [vmem:[%s4300_s1 + $0x3c0] sm:$0xff]  }
  0xa7   : >> { %3065 = vmatpush3.bf16.msra.mxu0 %v3341_v37  ;;  %2906 = vmatprep.subr.bf16.mxu1 %v3526_v3  ;;  %v3390_v37 = vld [vmem:[%s4300_s1 + $0x1c8] sm:$0xff]  }
  0xa8   : >> { %3066 = vmatprep.subr.bf16.mxu0 %v3526_v3 }
  0xaa   : >> { %2907 = vmatpush3.bf16.msra.mxu1 %v3342_v38  ;;  %v3391_v38 = vld [vmem:[%s4300_s1 + $0x3c8] sm:$0xff]  }
  0xab   : >> { %3067 = vmatpush3.bf16.msra.mxu0 %v3343_v39  ;;  %2908 = vmatprep.subr.bf16.mxu1 %v3526_v3  ;;  %v3392_v39 = vld [vmem:[%s4300_s1 + $0x1d0] sm:$0xff]  }
  0xac   : >> { %3068 = vmatprep.subr.bf16.mxu0 %v3526_v3 }
  0xae   : >> { %2909 = vmatpush3.bf16.msra.mxu1 %v3344_v40  ;;  %v3393_v40 = vld [vmem:[%s4300_s1 + $0x3d0] sm:$0xff]  }
  0xaf   : >> { %3069 = vmatpush3.bf16.msra.mxu0 %v3345_v41  ;;  %2910 = vmatprep.subr.bf16.mxu1 %v3526_v3  ;;  %v3394_v41 = vld [vmem:[%s4300_s1 + $0x1d8] sm:$0xff]  }
  0xb0   : >> { %3070 = vmatprep.subr.bf16.mxu0 %v3526_v3 }
  0xb2   : >> { %2911 = vmatpush3.bf16.msra.mxu1 %v3346_v42  ;;  %v3395_v42 = vld [vmem:[%s4300_s1 + $0x3d8] sm:$0xff]  }
  0xb3   : >> { %3071 = vmatpush3.bf16.msra.mxu0 %v3347_v43  ;;  %2912 = vmatprep.subr.bf16.mxu1 %v3526_v3  ;;  %v3396_v43 = vld [vmem:[%s4300_s1 + $0x1e0] sm:$0xff]  }
  0xb4   : >> { %3072 = vmatprep.subr.bf16.mxu0 %v3526_v3 }
  0xb6   : >> { %2913 = vmatpush3.bf16.msra.mxu1 %v3348_v44  ;;  %v3397_v44 = vld [vmem:[%s4300_s1 + $0x3e0] sm:$0xff]  }
  0xb7   : >> { %3073 = vmatpush3.bf16.msra.mxu0 %v3349_v45  ;;  %2914 = vmatprep.subr.bf16.mxu1 %v3526_v3  ;;  %v3398_v45 = vld [vmem:[%s4300_s1 + $0x1e8] sm:$0xff]  }
  0xb8   : >> { %3074 = vmatprep.subr.bf16.mxu0 %v3526_v3 }
  0xba   : >> { %2915 = vmatpush3.bf16.msra.mxu1 %v3350_v46  ;;  %v3399_v46 = vld [vmem:[%s4300_s1 + $0x3e8] sm:$0xff]  }
  0xbb   : >> { %3075 = vmatpush3.bf16.msra.mxu0 %v3351_v47  ;;  %2920 = vmatprep.subr.bf16.mxu1 %v3526_v3  ;;  %v1060_v47 = vshrl.u32 %v3386_v29, 16 }
  0xbc   : >> { %3080 = vmatprep.subr.bf16.mxu0 %v3526_v3 }
  0xbd   : >> { %2917 = vmatmul.mubr.bf16.vlgmr.msra.gmra.mrb[0].mxu1 %v2367_v48  ;;  %v1063_v48 = vshll.u32 %v3386_v29, 16 }
  0xbe   : >> { %2921 = vmatpush3.bf16.msra.mxu1 %v3353_v49  ;;  %3077 = vmatmul.mubr.bf16.vlgmr.msra.gmra.mrb[0].mxu0 %v2569_v50  ;;  %v3400_v49 = vld [vmem:[%s4300_s1 + $0x1f0] sm:$0xff]   ;;  %v1968_v50 = vshrl.u32 %v3388_v31, 16 }
  0xbf   : >> { %3081 = vmatpush3.bf16.msra.mxu0 %v3355_v51  ;;  %2922 = vmatprep.subr.bf16.mxu1 %v3526_v3  ;;  %v1971_v51 = vshll.u32 %v3388_v31, 16  ;;  %v2101_v31 = vld [vmem:[%s2097_s8] sm:$0x7] }
  0xc0   : >> { %3082 = vmatprep.subr.bf16.mxu0 %v3526_v3  ;;  %2936 = vmatprep.mubr.msk.bf16.mxu1 %vm3527_vm0, %v3526_v3 }
  0xc1   : >> { %3096 = vmatprep.mubr.msk.bf16.mxu0 %vm3527_vm0, %v3526_v3 }
  0xc2   : >> { %2923 = vmatpush3.bf16.msra.mxu1 %v3356_v52  ;;  %v3401_v52 = vld [vmem:[%s4300_s1 + $0x3f0] sm:$0xff]  }
  0xc3   : >> { %3083 = vmatpush3.bf16.msra.mxu0 %v3357_v53  ;;  %2924 = vmatprep.subr.bf16.mxu1 %v3526_v3  ;;  %v1062_v53 = vrot.slane %v1060_v47, 1 }
  0xc4   : >> { %3084 = vmatprep.subr.bf16.mxu0 %v3526_v3 }
  0xc6   : >> { %2925 = vmatpush3.bf16.msra.mxu1 %v3358_v54  ;;  %v1065_v54 = vrot.slane %v1063_v48, 2 }
  0xc7   : >> { %3085 = vmatpush3.bf16.msra.mxu0 %v3359_v55  ;;  %2926 = vmatprep.subr.bf16.mxu1 %v3526_v3  ;;  %v3402_v55 = vld [vmem:[%s4300_s1 + $0x1f8] sm:$0xff]  }
  0xc8   : >> { %3086 = vmatprep.subr.bf16.mxu0 %v3526_v3 }
  0xca   : >> { %2927 = vmatpush3.bf16.msra.mxu1 %v3360_v56  ;;  %v1970_v56 = vrot.slane %v1968_v50, 1 }
  0xcb   : >> { %3087 = vmatpush3.bf16.msra.mxu0 %v3361_v57  ;;  %2928 = vmatprep.subr.bf16.mxu1 %v3526_v3  ;;  %v1973_v57 = vrot.slane %v1971_v51, 2 }
  0xcc   : >> { %3088 = vmatprep.subr.bf16.mxu0 %v3526_v3 }
  0xcd   : >> { %v1974_v60 = vor.u32 %v1973_v57, %v1970_v56 }
  0xce   : >> { %2929 = vmatpush3.bf16.msra.mxu1 %v3362_v58  ;;  %v3403_v58 = vld [vmem:[%s4300_s1 + $0x3f8] sm:$0xff]  }
  0xcf   : >> { %3089 = vmatpush3.bf16.msra.mxu0 %v3363_v59  ;;  %2930 = vmatprep.subr.bf16.mxu1 %v3526_v3  ;;  %v1066_v59 = vor.u32 %v1065_v54, %v1062_v53 }
  0xd0   : >> { %3090 = vmatprep.subr.bf16.mxu0 %v3526_v3 }
  0xd2   : >> { %2931 = vmatpush3.bf16.msra.mxu1 %v3364_v62 }
  0xd3   : >> { %3091 = vmatpush3.bf16.msra.mxu0 %v3365_v63  ;;  %2932 = vmatprep.subr.bf16.mxu1 %v3526_v3  ;;  %v2669_v63 = vld [vmem:[%s4301_s2] ss:$0 sm:$0xff] }
  0xd4   : >> { %3092 = vmatprep.subr.bf16.mxu0 %v3526_v3 }
  0xd6   : >> { %2933 = vmatpush3.bf16.msra.mxu1 %v3366_v5 }
  0xd7   : >> { %3093 = vmatpush3.bf16.msra.mxu0 %v3367_v6  ;;  %2934 = vmatprep.subr.bf16.mxu1 %v3526_v3 }
  0xd8   : >> { %3094 = vmatprep.subr.bf16.mxu0 %v3526_v3 }
  0xda   : >> { %2935 = vmatpush3.bf16.msra.mxu1 %v3368_v11 }
  0xdb   : >> { %3095 = vmatpush3.bf16.msra.mxu0 %v3369_v12  ;;  %2940 = vmatprep.subr.bf16.mxu1 %v3526_v3 }
  0xdc   : >> { %3100 = vmatprep.subr.bf16.mxu0 %v3526_v3 }
  0xdd   : >> { %2937 = vmatmul.mubr.bf16.vlgmr.msra.gmra.mrb[0].mxu1 %v839_v13 }
  0xde   : >> { %2941 = vmatpush3.bf16.msra.mxu1 %v3370_v14  ;;  %3097 = vmatmul.mubr.bf16.vlgmr.msra.gmra.mrb[0].mxu0 %v1747_v15 }
  0xdf   : >> { %3101 = vmatpush3.bf16.msra.mxu0 %v3371_v16  ;;  %2942 = vmatprep.subr.bf16.mxu1 %v3526_v3 }
  0xe0   : >> { %3102 = vmatprep.subr.bf16.mxu0 %v3526_v3  ;;  %2956 = vmatprep.mubr.msk.bf16.mxu1 %vm3527_vm0, %v3526_v3 }
  0xe1   : >> { %3116 = vmatprep.mubr.msk.bf16.mxu0 %vm3527_vm0, %v3526_v3 }
  0xe2   : >> { %2943 = vmatpush3.bf16.msra.mxu1 %v3372_v17 }
  0xe3   : >> { %3103 = vmatpush3.bf16.msra.mxu0 %v3373_v18  ;;  %2944 = vmatprep.subr.bf16.mxu1 %v3526_v3 }
  0xe4   : >> { %3104 = vmatprep.subr.bf16.mxu0 %v3526_v3 }
  0xe6   : >> { %2945 = vmatpush3.bf16.msra.mxu1 %v3374_v19 }
  0xe7   : >> { %3105 = vmatpush3.bf16.msra.mxu0 %v3375_v20  ;;  %2946 = vmatprep.subr.bf16.mxu1 %v3526_v3 }
  0xe8   : >> { %3106 = vmatprep.subr.bf16.mxu0 %v3526_v3 }
  0xea   : >> { %2947 = vmatpush3.bf16.msra.mxu1 %v3376_v21 }
  0xeb   : >> { %3107 = vmatpush3.bf16.msra.mxu0 %v3377_v22  ;;  %2948 = vmatprep.subr.bf16.mxu1 %v3526_v3 }
  0xec   : >> { %3108 = vmatprep.subr.bf16.mxu0 %v3526_v3 }
  0xee   : >> { %2949 = vmatpush3.bf16.msra.mxu1 %v3378_v23 }
  0xef   : >> { %3109 = vmatpush3.bf16.msra.mxu0 %v3379_v24  ;;  %2950 = vmatprep.subr.bf16.mxu1 %v3526_v3 }
  0xf0   : >> { %3110 = vmatprep.subr.bf16.mxu0 %v3526_v3 }
  0xf2   : >> { %2951 = vmatpush3.bf16.msra.mxu1 %v3380_v25 }
  0xf3   : >> { %3111 = vmatpush3.bf16.msra.mxu0 %v3381_v26  ;;  %2952 = vmatprep.subr.bf16.mxu1 %v3526_v3 }
  0xf4   : >> { %3112 = vmatprep.subr.bf16.mxu0 %v3526_v3 }
  0xf6   : >> { %2953 = vmatpush3.bf16.msra.mxu1 %v3382_v27 }
  0xf7   : >> { %3113 = vmatpush3.bf16.msra.mxu0 %v3383_v28  ;;  %2954 = vmatprep.subr.bf16.mxu1 %v3526_v3 }
  0xf8   : >> { %3114 = vmatprep.subr.bf16.mxu0 %v3526_v3 }
  0xfa   : >> { %2955 = vmatpush3.bf16.msra.mxu1 %v3384_v30 }
  0xfb   : >> { %3115 = vmatpush3.bf16.msra.mxu0 %v3385_v32  ;;  %2960 = vmatprep.subr.bf16.mxu1 %v3526_v3 }
  0xfc   : >> { %3120 = vmatprep.subr.bf16.mxu0 %v3526_v3 }
  0xfd   : >> { %2957 = vmatmul.mubr.bf16.vlgmr.msra.gmra.mrb[0].mxu1 %v951_v33 }
  0xfe   : >> { %2961 = vmatpush3.bf16.msra.mxu1 %v3387_v34  ;;  %3117 = vmatmul.mubr.bf16.vlgmr.msra.gmra.mrb[0].mxu0 %v1859_v35 }
  0xff   : >> { %3121 = vmatpush3.bf16.msra.mxu0 %v3389_v36  ;;  %2962 = vmatprep.subr.bf16.mxu1 %v3526_v3 }
 0x100   : >> { %3122 = vmatprep.subr.bf16.mxu0 %v3526_v3  ;;  %2976 = vmatprep.mubr.msk.bf16.mxu1 %vm3527_vm0, %v3526_v3 }
 0x101   : >> { %3136 = vmatprep.mubr.msk.bf16.mxu0 %vm3527_vm0, %v3526_v3 }
 0x102   : >> { %2963 = vmatpush3.bf16.msra.mxu1 %v3390_v37 }
 0x103   : >> { %3123 = vmatpush3.bf16.msra.mxu0 %v3391_v38  ;;  %2964 = vmatprep.subr.bf16.mxu1 %v3526_v3 }
 0x104   : >> { %3124 = vmatprep.subr.bf16.mxu0 %v3526_v3 }
 0x106   : >> { %2965 = vmatpush3.bf16.msra.mxu1 %v3392_v39 }
 0x107   : >> { %3125 = vmatpush3.bf16.msra.mxu0 %v3393_v40  ;;  %2966 = vmatprep.subr.bf16.mxu1 %v3526_v3 }
 0x108   : >> { %3126 = vmatprep.subr.bf16.mxu0 %v3526_v3 }
 0x10a   : >> { %2967 = vmatpush3.bf16.msra.mxu1 %v3394_v41 }
 0x10b   : >> { %3127 = vmatpush3.bf16.msra.mxu0 %v3395_v42  ;;  %2968 = vmatprep.subr.bf16.mxu1 %v3526_v3 }
 0x10c   : >> { %3128 = vmatprep.subr.bf16.mxu0 %v3526_v3 }
 0x10e   : >> { %2969 = vmatpush3.bf16.msra.mxu1 %v3396_v43 }
 0x10f   : >> { %3129 = vmatpush3.bf16.msra.mxu0 %v3397_v44  ;;  %2970 = vmatprep.subr.bf16.mxu1 %v3526_v3 }
 0x110   : >> { %3130 = vmatprep.subr.bf16.mxu0 %v3526_v3 }
 0x112   : >> { %2971 = vmatpush3.bf16.msra.mxu1 %v3398_v45 }
 0x113   : >> { %3131 = vmatpush3.bf16.msra.mxu0 %v3399_v46  ;;  %2972 = vmatprep.subr.bf16.mxu1 %v3526_v3 }
 0x114   : >> { %3132 = vmatprep.subr.bf16.mxu0 %v3526_v3 }
 0x116   : >> { %2973 = vmatpush3.bf16.msra.mxu1 %v3400_v49 }
 0x117   : >> { %3133 = vmatpush3.bf16.msra.mxu0 %v3401_v52  ;;  %2974 = vmatprep.subr.bf16.mxu1 %v3526_v3 }
 0x118   : >> { %3134 = vmatprep.subr.bf16.mxu0 %v3526_v3 }
 0x11a   : >> { %2975 = vmatpush3.bf16.msra.mxu1 %v3402_v55 }
 0x11b   : >> { %3135 = vmatpush3.bf16.msra.mxu0 %v3403_v58 }
 0x11d   : >> { %2977 = vmatmul.mubr.bf16.vlgmr.msra.gmra.mrb[0].mxu1 %v1066_v59 }
 0x11e   : >> { %3137 = vmatmul.mubr.bf16.vlgmr.msra.gmra.mrb[0].mxu0 %v1974_v60 }
 0x1f0   : >> { %v1150_v61 = vpop.f32.mrb[0].mxu1 }
 0x1f1   : >> { %v2058_v62 = vpop.f32.mrb[0].mxu0  ;;  %v2978_v2 = vpop.f32.mrb[1].mxu1 }
 0x1f2   : >> { %v3140_v4 = vadd.f32 %v2058_v62, %v1150_v61  ;;  %v3138_v5 = vpop.f32.mrb[1].mxu0  ;;  %v1153_v6 = vpop.f32.mrb[2].mxu1 }
 0x1f3   : >> { %v2061_v7 = vpop.f32.mrb[2].mxu0  ;;  %v2979_v8 = vpop.f32.mrb[3].mxu1 }
 0x1f4   : >> { %v2066_v3 = vsel %vm2065_vm1, %v3140_v4, 0.0  ;;  %v2074_v9 = vmul.f32 %v3140_v4, %v3140_v4  ;;  %v2090_v10 = vadd.f32 %v3140_v4, %v2669_v63  ;;  %v3139_v11 = vpop.f32.mrb[3].mxu0 }
 0x1f5   : >> { %v2067_v12 = vrot.slane %v2066_v3, 4 }
 0x1f6   : >> { %v2075_v13 = vsel %vm2065_vm1, %v2074_v9, 0.0  ;;  %v2091_v14 = vmul.f32 0.5, %v2090_v10 }
 0x1f7   : >> { %v2068_v15 = vadd.f32 %v2067_v12, %v2066_v3  ;;  %v2076_v16 = vrot.slane %v2075_v13, 4 }
 0x1f8   : >> { %3404 = vtanh.f32 %v2091_v14 }
 0x1f9   : >> { %v2069_v17 = vrot.slane %v2068_v15, 2  ;;  %v2077_v18 = vadd.f32 %v2076_v16, %v2075_v13 }
 0x1fb   : >> { %v2070_v19 = vadd.f32 %v2069_v17, %v2068_v15  ;;  %v2078_v20 = vrot.slane %v2077_v18, 2 }
 0x1fd   : >> { %v2071_v21 = vrot.slane %v2070_v19, 1  ;;  %v2079_v22 = vadd.f32 %v2078_v20, %v2077_v18 }
 0x1ff   : >> { %v2072_v23 = vadd.f32 %v2071_v21, %v2070_v19  ;;  %v2080_v24 = vrot.slane %v2079_v22, 1 }
 0x201   : >> { %v2073_v25 = vadd.f32 %v3520_v1, %v2072_v23   ;;  %v2081_v26 = vadd.f32 %v2080_v24, %v2079_v22 }
 0x202   : >> { %v3405_v27 = vpop.eup %3404 }
 0x203   : >> { %v2082_v28 = vadd.f32 %v3516_v0, %v2081_v26   ;;  %v2093_v29 = vadd.f32 1.0, %v3405_v27  ;;  %v4308_v1 = vmov %v2073_v25  ;;  %2104 = vst [vmem:[%s227_s15] sm:$0x1] (%p247_p11), %v2073_v25 }
 0x204   : > { %249 = sbr.rel (!%p247_p11) target bundleno = 28 (0x1c), region = 123 }
 0x205   : >> { %v2094_v30 = vmul.f32 0.5, %v2093_v29  ;;  %v4307_v0 = vmov %v2082_v28  ;;  %2105 = vst [vmem:[%s233_s16] sm:$0x1] (%p247_p11), %v2082_v28 }
 0x207   : >> { %v2095_v32 = vpack.c.bf16 %v2094_v30, %v2094_v30 }
 0x209   : >> { %v2102_v33 = vsel %vm2100_vm4, %v2095_v32, %v2101_v31 }
 0x20a   : >> { %2103 = vst [vmem:[%s2097_s8] sm:$0x7] %v2102_v33 }
 0x20b   : > { %3419 = shalt.err (!%p3416_p4)
}
 0x20c   : > { %s3420_s15 = scalar_lea.hbm %s4233_s13, 16  ;;  %s3424_s8 = scalar_lea.hbm %s4303_s4, 32 }
 0x20d   : > { %p3421_p7 = scmp.ne.s32.totalorder %s4233_s13, %s3420_s15  ;;  %p3425_p10 = scmp.lt.u32.totalorder %s4233_s13, %s4303_s4 }
 0x20e   : > { %p3426_p11 = scmp.lt.u32.totalorder %s3424_s8, %s3420_s15  ;;  %p3428_p13 = scmp.lt.u32.totalorder %s3420_s15, %s4233_s13 }
 0x20f   : > { %p3422_p8 = pnand %p3421_p7, %p3598_p5 }
 0x210   : > { %p3427_p12 = por %p3426_p11, %p3425_p10 }
 0x211   : > { %p3423_p9 = pneg %p3422_p8 }
 0x212   : > { %p3429_p0 = por %p3428_p13, %p3427_p12 }
 0x214   : > { %p3430_p1 = pnand %p3429_p0, %p3423_p9 }
 0x216   : > { %3433 = shalt.err (!%p3430_p1)
}
 0x217   : > { %3198 = dma.vmem_to_hbm [thread:$0]  (%p3598_p5), %s2132_s17, 16, %s4233_s13, %s2112_s11  }
 0x218   : > { %s4260_s23 = scalar_lea.hbm %s4304_s5, %s2671_s7  ;;  %s2144_s25 = sshll.u32 %s233_s16, 4  ;;  %s2145_s25 = int_to_ptr.vmem [resolvable:$true] %s2144_s25 }
 0x219   : > { %s2116_s15 = scalar_lea.sflag [#allocation5], %s3609_s30  ;;  %s3434_s26 = scalar_lea.vmem %s2145_s25, 16 }
 0x21a   : > { %p3435_p2 = scmp.ne.s32.totalorder %s2145_s25, %s3434_s26  ;;  %s3529_s6 = smov [#allocation4]  }
 0x21b   : > { %s3438_s8 = sshll.u32 %s3529_s6, 4  ;;  %s3439_s8 = int_to_ptr.vmem [resolvable:$false] %s3438_s8 }
 0x21c   : > { %p3436_p3 = pnand %p3435_p2, %p3598_p5  ;;  %s3440_s9 = scalar_lea.vmem %s3439_s8, 32 }
 0x21d   : > { %p3441_p7 = scmp.lt.s32.totalorder %s2145_s25, %s3439_s8  ;;  %p3442_p8 = scmp.lt.s32.totalorder %s3440_s9, %s3434_s26 }
 0x21e   : > { %p3437_p4 = pneg %p3436_p3 }
 0x21f   : > { %p3443_p9 = por %p3442_p8, %p3441_p7 }
 0x221   : > { %p3444_p10 = pnand %p3443_p9, %p3437_p4 }
 0x223   : > { %3447 = shalt.err (!%p3444_p10)
}
 0x224   : > { %s3448_s22 = scalar_lea.hbm %s4260_s23, 16  ;;  %s3452_s7 = scalar_lea.hbm %s4304_s5, 32 }
 0x225   : > { %p3449_p11 = scmp.ne.s32.totalorder %s4260_s23, %s3448_s22  ;;  %p3453_p0 = scmp.lt.u32.totalorder %s4260_s23, %s4304_s5 }
 0x226   : > { %p3454_p1 = scmp.lt.u32.totalorder %s3452_s7, %s3448_s22  ;;  %p3456_p3 = scmp.lt.u32.totalorder %s3448_s22, %s4260_s23 }
 0x227   : > { %p3450_p12 = pnand %p3449_p11, %p3598_p5 }
 0x228   : > { %p3455_p2 = por %p3454_p1, %p3453_p0 }
 0x229   : > { %p3451_p13 = pneg %p3450_p12 }
 0x22a   : > { %p3457_p4 = por %p3456_p3, %p3455_p2 }
 0x22c   : > { %p3458_p7 = pnand %p3457_p4, %p3451_p13 }
 0x22e   : > { %3461 = shalt.err (!%p3458_p7)
}
 0x22f   : > { %3199 = dma.vmem_to_hbm [thread:$0]  (%p3598_p5), %s2145_s25, 16, %s4260_s23, %s2116_s15  }
 0x230 PF: > { %p3209_p8 = scmp.ge.s32.totalorder %s3512_s21, 2  ;;  %s2164_s11 = sand.u32 1, %s3500_s18  }
 0x231   : > { %s2165_s12 = scalar_lea.sflag [#allocation3], %s2164_s11 }
 0x232   : > { %p3203_p9 = pnand %p3209_p8, %p3602_p6 }
 0x234   : > { %3491 = dma.done.wait (!%p3203_p9), %s2165_s12, 16  }
 0x235   : > { %3493 = vsyncadd (!%p3203_p9), %s2165_s12, 4294967280  ;;  %s2173_s14 = scalar_lea.sflag [#allocation5], %s2164_s11 }
 0x236   : > { %3495 = dma.done.wait (!%p3203_p9), %s2173_s14, 16  }
 0x237   : > { %3497 = vsyncadd (!%p3203_p9), %s2173_s14, 4294967280  ;;  %p19_p5 = scmp.ge.s32.totalorder %s3585_s24, 4   ;;  %s4309_s18 = smov %s3504_s19 }
 0x238   : > { %s4310_s19 = smov %s3508_s20  ;;  %s4311_s20 = smov %s3596_s27 }
 0x239   : > { %s4312_s21 = smov %s3585_s24  ;;  %21 = sbr.rel (!%p19_p5) target bundleno = 5 (0x5), region = 134 }
 0x240   :  { %2177 = vsyncpa [#allocation3], 1 }
 0x241   :  { %2179 = vsyncpa [#allocation3 + $0x1], 1 }
 0x242   :  { %2180 = vsyncpa [#allocation5], 1 }
 0x243   :  { %2182 = vsyncpa [#allocation5 + $0x1], 1 }

</bundles_post_ra>
